<compile_context>
chip_gen: v7x
topology: tpu7x:2x2x1
jax: 0.10.0
libtpu: 0.0.40
codegen_flags: <defaults>
</compile_context>

<pallas_src>
import functools

import jax
import jax.numpy as jnp
import numpy as np
from jax.experimental import pallas as pl
from jax.experimental.pallas import tpu as pltpu

EPS = 1e-5  # nn.InstanceNorm2d default (affine=False, biased variance)


def _residual_block_kernel(w1_ref, b1_ref, w2_ref, b2_ref, xp_ref,
                           o_ref, h1p_ref, *, H, W, C):
    """One batch sample per grid step.

    xp_ref : ((H+2)*(W+2)+2, C) bf16 reflect-padded input, channels-last,
             spatially flattened row-major with one zero row prepended and
             appended ("ext" layout), so every 3x3 tap is a *contiguous* row
             slice of the slab.
    o_ref  : (H*(W+2), C) bf16 output slab (padded rows 1..H, all columns);
             the wrapper drops the two pad columns.
    h1p_ref: f32 VMEM scratch holding the reflect-padded intermediate in the
             same ext layout (VMEM-only, never hits HBM).
    """
    P = W + 2                    # padded width
    S = H * P                    # slab rows (padded rows 1..H, every column)
    Np = (H + 2) * P             # flattened padded size
    inv_n = 1.0 / float(H * W)   # InstanceNorm statistics over valid pixels

    # Pad-column masks derived in-kernel (a few one-time VPU ops, no mask
    # inputs / extra DMA streams).
    col = jax.lax.broadcasted_iota(jnp.int32, (S, 1), 0) % P
    m_left = col == 0                     # pad column 0
    m_right = col == (P - 1)              # pad column P-1
    valid = jnp.logical_and(col != 0, col != (P - 1))

    def conv3x3(src_ref, w_ref, b_ref):
        """3x3 'valid' conv over the ext slab -> (S, C) f32 (+ bias)."""
        if C % 128 == 0:
            # im2col: one (S, 9C) @ (9C, C) bf16 matmul -> full systolic fill
            # on v6e/v7x; lane-concat offsets are 128-aligned (pure tile
            # copies).  Costs ~9x slab VMEM transiently — at very large H*W
            # on v7x pair this with the row-strip grid (see TODO above).
            taps = [src_ref[pl.ds(kh * P + kw, S), :].astype(jnp.bfloat16)
                    for kh in range(3) for kw in range(3)]
            patches = jnp.concatenate(taps, axis=-1)              # (S, 9C)
            acc = jnp.dot(patches, w_ref[...].reshape(9 * C, C),
                          preferred_element_type=jnp.float32)
        else:
            # Small / unaligned C: 9 accumulating bf16 MXU matmuls, one per
            # (kh, kw) tap; avoids unaligned lane-concat relayouts.
            acc = jnp.zeros((S, C), jnp.float32)
            for kh in range(3):
                for kw in range(3):
                    tap = src_ref[pl.ds(kh * P + kw, S), :].astype(jnp.bfloat16)
                    acc = acc + jnp.dot(tap, w_ref[kh * 3 + kw],
                                        preferred_element_type=jnp.float32)
        return acc + b_ref[...]           # single (1, C) f32 bias broadcast

    def inst_norm(acc):
        # Single masked pass: sum and sum-of-squares together; biased var.
        av = jnp.where(valid, acc, 0.0)
        s1 = jnp.sum(av, axis=0, keepdims=True)          # (1, C)
        s2 = jnp.sum(av * av, axis=0, keepdims=True)     # (1, C)
        mean = s1 * inv_n
        var = s2 * inv_n - mean * mean
        return (acc - mean) * jax.lax.rsqrt(var + EPS)

    # ---- conv1 -> InstanceNorm -> ReLU (f32 values) ----
    h1 = jnp.maximum(inst_norm(conv3x3(xp_ref, w1_ref, b1_ref)), 0.0)

    # ---- reflect the two pad columns directly from the value (XLU rolls),
    #      then assemble the reflect-padded intermediate with slab writes ----
    # np.roll semantics: roll(x, k)[s] = x[s - k]; wrapped rows are never
    # selected by the masks.
    fwd = pltpu.roll(h1, S - 2, 0)        # fwd[s] = h1[s + 2]  (col 0   <- col 2)
    bwd = pltpu.roll(h1, 2, 0)            # bwd[s] = h1[s - 2]  (col P-1 <- col P-3)
    h1c = jnp.where(m_left, fwd, jnp.where(m_right, bwd, h1))

    zero_row = jnp.zeros((1, C), h1p_ref.dtype)
    h1p_ref[pl.ds(0, 1), :] = zero_row
    h1p_ref[pl.ds(Np + 1, 1), :] = zero_row
    # Interior (padded rows 1..H), pad columns already corrected: ONE store.
    h1p_ref[pl.ds(1 + P, S), :] = h1c.astype(h1p_ref.dtype)
    # Reflect rows: padded row 0 <- padded row 2, padded row H+1 <- row H-1
    # (corners come for free since the columns are already fixed).
    top = h1p_ref[pl.ds(1 + 2 * P, P), :]
    h1p_ref[pl.ds(1, P), :] = top
    bot = h1p_ref[pl.ds(1 + (H - 1) * P, P), :]
    h1p_ref[pl.ds(1 + (H + 1) * P, P), :] = bot

    # ---- conv2 -> InstanceNorm, residual add, single slab store ----
    h2 = inst_norm(conv3x3(h1p_ref, w2_ref, b2_ref))
    res = xp_ref[pl.ds(1 + P, S), :].astype(jnp.float32)
    o_ref[...] = (res + h2).astype(o_ref.dtype)


def residual_block(x, w1, b1, w2, b2):
    """x: (B, C, H, W); w*: (C, C, 3, 3) OIHW; b*: (C,).  Returns NCHW."""
    B, C, H, W = x.shape
    P, Hp = W + 2, H + 2
    S = H * P
    Np = Hp * P

    # Channels-last, reflect-pad, flatten spatially, add one zero row on each
    # end so every 3x3 tap is a contiguous row slice inside the kernel.
    # bf16 slab: halves HBM traffic and input VMEM (f32 accumulation inside).
    xl = jnp.transpose(x, (0, 2, 3, 1))                            # (B,H,W,C)
    xp = jnp.pad(xl, ((0, 0), (1, 1), (1, 1), (0, 0)), mode="reflect")
    xp = xp.reshape(B, Np, C)
    xp = jnp.pad(xp, ((0, 0), (1, 1), (0, 0))).astype(jnp.bfloat16)

    # Per-tap (C_in, C_out) weight matrices (taps ordered kh*3+kw), bf16.
    w1t = jnp.transpose(w1, (2, 3, 1, 0)).reshape(9, C, C).astype(jnp.bfloat16)
    w2t = jnp.transpose(w2, (2, 3, 1, 0)).reshape(9, C, C).astype(jnp.bfloat16)
    b1r = b1.reshape(1, C).astype(jnp.float32)
    b2r = b2.reshape(1, C).astype(jnp.float32)

    kernel = functools.partial(_residual_block_kernel, H=H, W=W, C=C)
    rep2 = lambda b: (0, 0)
    rep3 = lambda b: (0, 0, 0)

    out = pl.pallas_call(
        kernel,
        out_shape=jax.ShapeDtypeStruct((B, S, C), jnp.bfloat16),
        grid=(B,),
        in_specs=[
            pl.BlockSpec((9, C, C), rep3),                         # w1 taps
            pl.BlockSpec((1, C), rep2),                            # b1
            pl.BlockSpec((9, C, C), rep3),                         # w2 taps
            pl.BlockSpec((1, C), rep2),                            # b2
            pl.BlockSpec((None, Np + 2, C), lambda b: (b, 0, 0)),  # xp (ext)
        ],
        out_specs=pl.BlockSpec((None, S, C), lambda b: (b, 0, 0)),
        scratch_shapes=[pltpu.VMEM((Np + 2, C), jnp.float32)],
        compiler_params=pltpu.CompilerParams(
            dimension_semantics=("parallel",),      # batch across TCs
            vmem_limit_bytes=32 * 1024 * 1024),
    )(w1t, b1r, w2t, b2r, xp)

    # Drop the 2 pad columns, back to NCHW.
    out = out.reshape(B, H, P, C)[:, :, 1:W + 1, :]
    return jnp.transpose(out, (0, 3, 1, 2)).astype(x.dtype)


# ---------------- pure-JAX reference (for correctness check) ----------------
def ref_residual_block(x, w1, b1, w2, b2):
    def conv(x, w, b):
        xp = jnp.pad(x, ((0, 0), (0, 0), (1, 1), (1, 1)), mode="reflect")
        y = jax.lax.conv_general_dilated(
            xp, w, window_strides=(1, 1), padding="VALID",
            dimension_numbers=("NCHW", "OIHW", "NCHW"),
            precision=jax.lax.Precision.HIGHEST)
        return y + b[None, :, None, None]

    def inorm(y):
        mu = jnp.mean(y, axis=(2, 3), keepdims=True)
        var = jnp.mean((y - mu) ** 2, axis=(2, 3), keepdims=True)
        return (y - mu) * jax.lax.rsqrt(var + EPS)

    h = jax.nn.relu(inorm(conv(x, w1, b1)))
    return x + inorm(conv(h, w2, b2))


if __name__ == "__main__":
    B, C, H, W = 2, 4, 16, 16
    key = jax.random.PRNGKey(0)
    kx, k1, kb1, k2, kb2 = jax.random.split(key, 5)

    x = jax.random.normal(kx, (B, C, H, W), jnp.float32)
    # Deterministic Conv2d-style init: U(-1/sqrt(fan_in), 1/sqrt(fan_in))
    fan_in = C * 3 * 3
    bound = 1.0 / (fan_in ** 0.5)
    w1 = jax.random.uniform(k1, (C, C, 3, 3), jnp.float32, -bound, bound)
    b1 = jax.random.uniform(kb1, (C,), jnp.float32, -bound, bound)
    w2 = jax.random.uniform(k2, (C, C, 3, 3), jnp.float32, -bound, bound)
    b2 = jax.random.uniform(kb2, (C,), jnp.float32, -bound, bound)

    out = residual_block(x, w1, b1, w2, b2)
    out = jax.block_until_ready(out)
    assert out.shape == (B, C, H, W)

    # f32 reference; the kernel runs its data path in bf16 (f32 accumulation),
    # so the comparison tolerance is bf16-level.
    ref = ref_residual_block(x, w1, b1, w2, b2)
    np.testing.assert_allclose(np.asarray(out), np.asarray(ref),
                               atol=5e-2, rtol=5e-2)
    print("KERNEL_OK")
</pallas_src>

<mosaic_0001>
module attributes {stable_mosaic.version = 11 : i64} {
  func.func @_residual_block_kernel(%arg0: i32, %arg1: memref<9x4x4xbf16, #tpu.memory_space<vmem>>, %arg2: memref<1x4xf32, #tpu.memory_space<vmem>>, %arg3: memref<9x4x4xbf16, #tpu.memory_space<vmem>>, %arg4: memref<1x4xf32, #tpu.memory_space<vmem>>, %arg5: memref<1x326x4xbf16, #tpu.memory_space<vmem>>, %arg6: memref<1x288x4xbf16, #tpu.memory_space<vmem>>, %arg7: memref<326x4xf32, #tpu.memory_space<vmem>>) attributes {dimension_semantics = [#tpu.dimension_semantics<parallel>], iteration_bounds = array<i64: 2>, scalar_prefetch = 0 : i64, scratch_operands = 1 : i64, tpu.core_type = #tpu.core_type<tc>, window_params = [{pipeline_mode = #tpu.pipeline_mode<synchronous>, transform_indices = @transform_0, window_bounds = array<i64: 9, 4, 4>}, {pipeline_mode = #tpu.pipeline_mode<synchronous>, transform_indices = @transform_1, window_bounds = array<i64: 1, 4>}, {pipeline_mode = #tpu.pipeline_mode<synchronous>, transform_indices = @transform_2, window_bounds = array<i64: 9, 4, 4>}, {pipeline_mode = #tpu.pipeline_mode<synchronous>, transform_indices = @transform_3, window_bounds = array<i64: 1, 4>}, {transform_indices = @transform_4, window_bounds = array<i64: 1, 326, 4>}, {transform_indices = @transform_5, window_bounds = array<i64: 1, 288, 4>}]} {
    %0 = tpu.iota {dimensions = array<i32: 0>} : vector<288x1xi32>
    %c18_i32 = arith.constant 18 : i32
    %c0_i32 = arith.constant 0 : i32
    %1 = arith.cmpi eq, %c18_i32, %c0_i32 : i32
    %c1_i32 = arith.constant 1 : i32
    %2 = arith.select %1, %c1_i32, %c18_i32 : i32
    %3 = vector.broadcast %2 : i32 to vector<288x1xi32>
    %4 = arith.remsi %0, %3 : vector<288x1xi32>
    %c0_i32_0 = arith.constant 0 : i32
    %5 = vector.broadcast %c0_i32_0 : i32 to vector<288x1xi32>
    %6 = arith.cmpi ne, %4, %5 : vector<288x1xi32>
    %c0_i32_1 = arith.constant 0 : i32
    %7 = vector.broadcast %c0_i32_1 : i32 to vector<288x1xi32>
    %8 = arith.cmpi slt, %4, %7 : vector<288x1xi32>
    %c0_i32_2 = arith.constant 0 : i32
    %9 = arith.cmpi slt, %2, %c0_i32_2 : i32
    %10 = vector.broadcast %9 : i1 to vector<288x1xi1>
    %11 = vector.broadcast %10 : vector<288x1xi1> to vector<288x1xi1>
    %12 = arith.xori %8, %11 : vector<288x1xi1>
    %13 = arith.andi %12, %6 : vector<288x1xi1>
    %14 = vector.broadcast %2 : i32 to vector<288x1xi32>
    %15 = arith.addi %4, %14 : vector<288x1xi32>
    %16 = arith.select %13, %15, %4 : vector<288x1xi1>, vector<288x1xi32>
    %c0_i32_3 = arith.constant 0 : i32
    %17 = vector.broadcast %c0_i32_3 : i32 to vector<288x1xi32>
    %18 = arith.cmpi eq, %16, %17 : vector<288x1xi32>
    %c17_i32 = arith.constant 17 : i32
    %19 = vector.broadcast %c17_i32 : i32 to vector<288x1xi32>
    %20 = arith.cmpi eq, %16, %19 : vector<288x1xi32>
    %c0_i32_4 = arith.constant 0 : i32
    %21 = vector.broadcast %c0_i32_4 : i32 to vector<288x1xi32>
    %22 = arith.cmpi ne, %16, %21 : vector<288x1xi32>
    %c17_i32_5 = arith.constant 17 : i32
    %23 = vector.broadcast %c17_i32_5 : i32 to vector<288x1xi32>
    %24 = arith.cmpi ne, %16, %23 : vector<288x1xi32>
    %25 = arith.andi %22, %24 : vector<288x1xi1>
    %cst = arith.constant 0.000000e+00 : f32
    %26 = vector.broadcast %cst : f32 to vector<288x4xf32>
    %c0 = arith.constant 0 : index
    %c0_6 = arith.constant 0 : index
    %c0_7 = arith.constant 0 : index
    %27 = vector.load %arg5[%c0, %c0_6, %c0_7] : memref<1x326x4xbf16, #tpu.memory_space<vmem>>, vector<1x288x4xbf16>
    %28 = vector.shape_cast %27 : vector<1x288x4xbf16> to vector<288x4xbf16>
    %c0_8 = arith.constant 0 : index
    %c0_9 = arith.constant 0 : index
    %c0_10 = arith.constant 0 : index
    %29 = vector.load %arg1[%c0_8, %c0_9, %c0_10] : memref<9x4x4xbf16, #tpu.memory_space<vmem>>, vector<1x4x4xbf16>
    %30 = vector.shape_cast %29 : vector<1x4x4xbf16> to vector<4x4xbf16>
    %cst_11 = arith.constant dense<0.000000e+00> : vector<288x4xf32>
    %31 = tpu.matmul %28, %30, %cst_11 {dimension_numbers = #tpu.dot_dimension_numbers<[1], [0], [0], [1], [0, 0, 1, 1], [], []>} : vector<288x4xbf16>, vector<4x4xbf16>, vector<288x4xf32> -> vector<288x4xf32>
    %32 = arith.addf %26, %31 : vector<288x4xf32>
    %c0_12 = arith.constant 0 : index
    %c1 = arith.constant 1 : index
    %c0_13 = arith.constant 0 : index
    %33 = vector.load %arg5[%c0_12, %c1, %c0_13] : memref<1x326x4xbf16, #tpu.memory_space<vmem>>, vector<1x288x4xbf16>
    %34 = vector.shape_cast %33 : vector<1x288x4xbf16> to vector<288x4xbf16>
    %c1_14 = arith.constant 1 : index
    %c0_15 = arith.constant 0 : index
    %c0_16 = arith.constant 0 : index
    %35 = vector.load %arg1[%c1_14, %c0_15, %c0_16] : memref<9x4x4xbf16, #tpu.memory_space<vmem>>, vector<1x4x4xbf16>
    %36 = vector.shape_cast %35 : vector<1x4x4xbf16> to vector<4x4xbf16>
    %cst_17 = arith.constant dense<0.000000e+00> : vector<288x4xf32>
    %37 = tpu.matmul %34, %36, %cst_17 {dimension_numbers = #tpu.dot_dimension_numbers<[1], [0], [0], [1], [0, 0, 1, 1], [], []>} : vector<288x4xbf16>, vector<4x4xbf16>, vector<288x4xf32> -> vector<288x4xf32>
    %38 = arith.addf %32, %37 : vector<288x4xf32>
    %c0_18 = arith.constant 0 : index
    %c2 = arith.constant 2 : index
    %c0_19 = arith.constant 0 : index
    %39 = vector.load %arg5[%c0_18, %c2, %c0_19] : memref<1x326x4xbf16, #tpu.memory_space<vmem>>, vector<1x288x4xbf16>
    %40 = vector.shape_cast %39 : vector<1x288x4xbf16> to vector<288x4xbf16>
    %c2_20 = arith.constant 2 : index
    %c0_21 = arith.constant 0 : index
    %c0_22 = arith.constant 0 : index
    %41 = vector.load %arg1[%c2_20, %c0_21, %c0_22] : memref<9x4x4xbf16, #tpu.memory_space<vmem>>, vector<1x4x4xbf16>
    %42 = vector.shape_cast %41 : vector<1x4x4xbf16> to vector<4x4xbf16>
    %cst_23 = arith.constant dense<0.000000e+00> : vector<288x4xf32>
    %43 = tpu.matmul %40, %42, %cst_23 {dimension_numbers = #tpu.dot_dimension_numbers<[1], [0], [0], [1], [0, 0, 1, 1], [], []>} : vector<288x4xbf16>, vector<4x4xbf16>, vector<288x4xf32> -> vector<288x4xf32>
    %44 = arith.addf %38, %43 : vector<288x4xf32>
    %c0_24 = arith.constant 0 : index
    %c18 = arith.constant 18 : index
    %c0_25 = arith.constant 0 : index
    %45 = vector.load %arg5[%c0_24, %c18, %c0_25] : memref<1x326x4xbf16, #tpu.memory_space<vmem>>, vector<1x288x4xbf16>
    %46 = vector.shape_cast %45 : vector<1x288x4xbf16> to vector<288x4xbf16>
    %c3 = arith.constant 3 : index
    %c0_26 = arith.constant 0 : index
    %c0_27 = arith.constant 0 : index
    %47 = vector.load %arg1[%c3, %c0_26, %c0_27] : memref<9x4x4xbf16, #tpu.memory_space<vmem>>, vector<1x4x4xbf16>
    %48 = vector.shape_cast %47 : vector<1x4x4xbf16> to vector<4x4xbf16>
    %cst_28 = arith.constant dense<0.000000e+00> : vector<288x4xf32>
    %49 = tpu.matmul %46, %48, %cst_28 {dimension_numbers = #tpu.dot_dimension_numbers<[1], [0], [0], [1], [0, 0, 1, 1], [], []>} : vector<288x4xbf16>, vector<4x4xbf16>, vector<288x4xf32> -> vector<288x4xf32>
    %50 = arith.addf %44, %49 : vector<288x4xf32>
    %c0_29 = arith.constant 0 : index
    %c19 = arith.constant 19 : index
    %c0_30 = arith.constant 0 : index
    %51 = vector.load %arg5[%c0_29, %c19, %c0_30] : memref<1x326x4xbf16, #tpu.memory_space<vmem>>, vector<1x288x4xbf16>
    %52 = vector.shape_cast %51 : vector<1x288x4xbf16> to vector<288x4xbf16>
    %c4 = arith.constant 4 : index
    %c0_31 = arith.constant 0 : index
    %c0_32 = arith.constant 0 : index
    %53 = vector.load %arg1[%c4, %c0_31, %c0_32] : memref<9x4x4xbf16, #tpu.memory_space<vmem>>, vector<1x4x4xbf16>
    %54 = vector.shape_cast %53 : vector<1x4x4xbf16> to vector<4x4xbf16>
    %cst_33 = arith.constant dense<0.000000e+00> : vector<288x4xf32>
    %55 = tpu.matmul %52, %54, %cst_33 {dimension_numbers = #tpu.dot_dimension_numbers<[1], [0], [0], [1], [0, 0, 1, 1], [], []>} : vector<288x4xbf16>, vector<4x4xbf16>, vector<288x4xf32> -> vector<288x4xf32>
    %56 = arith.addf %50, %55 : vector<288x4xf32>
    %c0_34 = arith.constant 0 : index
    %c20 = arith.constant 20 : index
    %c0_35 = arith.constant 0 : index
    %57 = vector.load %arg5[%c0_34, %c20, %c0_35] : memref<1x326x4xbf16, #tpu.memory_space<vmem>>, vector<1x288x4xbf16>
    %58 = vector.shape_cast %57 : vector<1x288x4xbf16> to vector<288x4xbf16>
    %c5 = arith.constant 5 : index
    %c0_36 = arith.constant 0 : index
    %c0_37 = arith.constant 0 : index
    %59 = vector.load %arg1[%c5, %c0_36, %c0_37] : memref<9x4x4xbf16, #tpu.memory_space<vmem>>, vector<1x4x4xbf16>
    %60 = vector.shape_cast %59 : vector<1x4x4xbf16> to vector<4x4xbf16>
    %cst_38 = arith.constant dense<0.000000e+00> : vector<288x4xf32>
    %61 = tpu.matmul %58, %60, %cst_38 {dimension_numbers = #tpu.dot_dimension_numbers<[1], [0], [0], [1], [0, 0, 1, 1], [], []>} : vector<288x4xbf16>, vector<4x4xbf16>, vector<288x4xf32> -> vector<288x4xf32>
    %62 = arith.addf %56, %61 : vector<288x4xf32>
    %c0_39 = arith.constant 0 : index
    %c36 = arith.constant 36 : index
    %c0_40 = arith.constant 0 : index
    %63 = vector.load %arg5[%c0_39, %c36, %c0_40] : memref<1x326x4xbf16, #tpu.memory_space<vmem>>, vector<1x288x4xbf16>
    %64 = vector.shape_cast %63 : vector<1x288x4xbf16> to vector<288x4xbf16>
    %c6 = arith.constant 6 : index
    %c0_41 = arith.constant 0 : index
    %c0_42 = arith.constant 0 : index
    %65 = vector.load %arg1[%c6, %c0_41, %c0_42] : memref<9x4x4xbf16, #tpu.memory_space<vmem>>, vector<1x4x4xbf16>
    %66 = vector.shape_cast %65 : vector<1x4x4xbf16> to vector<4x4xbf16>
    %cst_43 = arith.constant dense<0.000000e+00> : vector<288x4xf32>
    %67 = tpu.matmul %64, %66, %cst_43 {dimension_numbers = #tpu.dot_dimension_numbers<[1], [0], [0], [1], [0, 0, 1, 1], [], []>} : vector<288x4xbf16>, vector<4x4xbf16>, vector<288x4xf32> -> vector<288x4xf32>
    %68 = arith.addf %62, %67 : vector<288x4xf32>
    %c0_44 = arith.constant 0 : index
    %c37 = arith.constant 37 : index
    %c0_45 = arith.constant 0 : index
    %69 = vector.load %arg5[%c0_44, %c37, %c0_45] : memref<1x326x4xbf16, #tpu.memory_space<vmem>>, vector<1x288x4xbf16>
    %70 = vector.shape_cast %69 : vector<1x288x4xbf16> to vector<288x4xbf16>
    %c7 = arith.constant 7 : index
    %c0_46 = arith.constant 0 : index
    %c0_47 = arith.constant 0 : index
    %71 = vector.load %arg1[%c7, %c0_46, %c0_47] : memref<9x4x4xbf16, #tpu.memory_space<vmem>>, vector<1x4x4xbf16>
    %72 = vector.shape_cast %71 : vector<1x4x4xbf16> to vector<4x4xbf16>
    %cst_48 = arith.constant dense<0.000000e+00> : vector<288x4xf32>
    %73 = tpu.matmul %70, %72, %cst_48 {dimension_numbers = #tpu.dot_dimension_numbers<[1], [0], [0], [1], [0, 0, 1, 1], [], []>} : vector<288x4xbf16>, vector<4x4xbf16>, vector<288x4xf32> -> vector<288x4xf32>
    %74 = arith.addf %68, %73 : vector<288x4xf32>
    %c0_49 = arith.constant 0 : index
    %c38 = arith.constant 38 : index
    %c0_50 = arith.constant 0 : index
    %75 = vector.load %arg5[%c0_49, %c38, %c0_50] : memref<1x326x4xbf16, #tpu.memory_space<vmem>>, vector<1x288x4xbf16>
    %76 = vector.shape_cast %75 : vector<1x288x4xbf16> to vector<288x4xbf16>
    %c8 = arith.constant 8 : index
    %c0_51 = arith.constant 0 : index
    %c0_52 = arith.constant 0 : index
    %77 = vector.load %arg1[%c8, %c0_51, %c0_52] : memref<9x4x4xbf16, #tpu.memory_space<vmem>>, vector<1x4x4xbf16>
    %78 = vector.shape_cast %77 : vector<1x4x4xbf16> to vector<4x4xbf16>
    %cst_53 = arith.constant dense<0.000000e+00> : vector<288x4xf32>
    %79 = tpu.matmul %76, %78, %cst_53 {dimension_numbers = #tpu.dot_dimension_numbers<[1], [0], [0], [1], [0, 0, 1, 1], [], []>} : vector<288x4xbf16>, vector<4x4xbf16>, vector<288x4xf32> -> vector<288x4xf32>
    %80 = arith.addf %74, %79 : vector<288x4xf32>
    %c0_54 = arith.constant 0 : index
    %c0_55 = arith.constant 0 : index
    %81 = vector.load %arg2[%c0_54, %c0_55] : memref<1x4xf32, #tpu.memory_space<vmem>>, vector<1x4xf32>
    %82 = vector.broadcast %81 : vector<1x4xf32> to vector<288x4xf32>
    %83 = arith.addf %80, %82 : vector<288x4xf32>
    %cst_56 = arith.constant 0.000000e+00 : f32
    %84 = vector.shape_cast %25 : vector<288x1xi1> to vector<288x1xi1>
    %85 = vector.broadcast %84 : vector<288x1xi1> to vector<288x4xi1>
    %86 = vector.broadcast %cst_56 : f32 to vector<288x4xf32>
    %87 = arith.select %85, %83, %86 : vector<288x4xi1>, vector<288x4xf32>
    %cst_57 = arith.constant dense<0.000000e+00> : vector<4xf32>
    %88 = vector.multi_reduction <add>, %87, %cst_57 [0] : vector<288x4xf32> to vector<4xf32>
    %89 = vector.shape_cast %88 : vector<4xf32> to vector<1x4xf32>
    %90 = arith.mulf %87, %87 : vector<288x4xf32>
    %cst_58 = arith.constant dense<0.000000e+00> : vector<4xf32>
    %91 = vector.multi_reduction <add>, %90, %cst_58 [0] : vector<288x4xf32> to vector<4xf32>
    %92 = vector.shape_cast %91 : vector<4xf32> to vector<1x4xf32>
    %cst_59 = arith.constant 3.906250e-03 : f32
    %93 = vector.broadcast %cst_59 : f32 to vector<1x4xf32>
    %94 = arith.mulf %89, %93 : vector<1x4xf32>
    %cst_60 = arith.constant 3.906250e-03 : f32
    %95 = vector.broadcast %cst_60 : f32 to vector<1x4xf32>
    %96 = arith.mulf %92, %95 : vector<1x4xf32>
    %97 = arith.mulf %94, %94 : vector<1x4xf32>
    %98 = arith.subf %96, %97 : vector<1x4xf32>
    %99 = vector.broadcast %94 : vector<1x4xf32> to vector<288x4xf32>
    %100 = arith.subf %83, %99 : vector<288x4xf32>
    %cst_61 = arith.constant 9.99999974E-6 : f32
    %101 = vector.broadcast %cst_61 : f32 to vector<1x4xf32>
    %102 = arith.addf %98, %101 : vector<1x4xf32>
    %103 = math.rsqrt %102 : vector<1x4xf32>
    %104 = vector.broadcast %103 : vector<1x4xf32> to vector<288x4xf32>
    %105 = arith.mulf %100, %104 : vector<288x4xf32>
    %cst_62 = arith.constant 0.000000e+00 : f32
    %106 = vector.broadcast %cst_62 : f32 to vector<288x4xf32>
    %107 = arith.maximumf %105, %106 : vector<288x4xf32>
    %c286_i32 = arith.constant 286 : i32
    %108 = tpu.dynamic_rotate %107 by %c286_i32 dim 0 : vector<288x4xf32>, i32 -> vector<288x4xf32>
    %c2_i32 = arith.constant 2 : i32
    %109 = tpu.dynamic_rotate %107 by %c2_i32 dim 0 : vector<288x4xf32>, i32 -> vector<288x4xf32>
    %110 = vector.shape_cast %20 : vector<288x1xi1> to vector<288x1xi1>
    %111 = vector.broadcast %110 : vector<288x1xi1> to vector<288x4xi1>
    %112 = arith.select %111, %109, %107 : vector<288x4xi1>, vector<288x4xf32>
    %113 = vector.shape_cast %18 : vector<288x1xi1> to vector<288x1xi1>
    %114 = vector.broadcast %113 : vector<288x1xi1> to vector<288x4xi1>
    %115 = arith.select %114, %108, %112 : vector<288x4xi1>, vector<288x4xf32>
    %cst_63 = arith.constant 0.000000e+00 : f32
    %116 = vector.broadcast %cst_63 : f32 to vector<1x4xf32>
    %c0_64 = arith.constant 0 : index
    %c0_65 = arith.constant 0 : index
    %117 = vector.load %arg7[%c0_64, %c0_65] : memref<326x4xf32, #tpu.memory_space<vmem>>, vector<1x4xf32>
    tpu.vector_store %arg7[%c0_64, %c0_65], %116 {strides = array<i32>} : memref<326x4xf32, #tpu.memory_space<vmem>>, vector<1x4xf32>,
    %c325 = arith.constant 325 : index
    %c0_66 = arith.constant 0 : index
    %118 = vector.load %arg7[%c325, %c0_66] : memref<326x4xf32, #tpu.memory_space<vmem>>, vector<1x4xf32>
    tpu.vector_store %arg7[%c325, %c0_66], %116 {strides = array<i32>} : memref<326x4xf32, #tpu.memory_space<vmem>>, vector<1x4xf32>,
    %c19_67 = arith.constant 19 : index
    %c0_68 = arith.constant 0 : index
    %119 = vector.load %arg7[%c19_67, %c0_68] : memref<326x4xf32, #tpu.memory_space<vmem>>, vector<288x4xf32>
    tpu.vector_store %arg7[%c19_67, %c0_68], %115 {strides = array<i32>} : memref<326x4xf32, #tpu.memory_space<vmem>>, vector<288x4xf32>,
    %c37_69 = arith.constant 37 : index
    %c0_70 = arith.constant 0 : index
    %120 = vector.load %arg7[%c37_69, %c0_70] : memref<326x4xf32, #tpu.memory_space<vmem>>, vector<18x4xf32>
    %c1_71 = arith.constant 1 : index
    %c0_72 = arith.constant 0 : index
    %121 = vector.load %arg7[%c1_71, %c0_72] : memref<326x4xf32, #tpu.memory_space<vmem>>, vector<18x4xf32>
    tpu.vector_store %arg7[%c1_71, %c0_72], %120 {strides = array<i32>} : memref<326x4xf32, #tpu.memory_space<vmem>>, vector<18x4xf32>,
    %c271 = arith.constant 271 : index
    %c0_73 = arith.constant 0 : index
    %122 = vector.load %arg7[%c271, %c0_73] : memref<326x4xf32, #tpu.memory_space<vmem>>, vector<18x4xf32>
    %c307 = arith.constant 307 : index
    %c0_74 = arith.constant 0 : index
    %123 = vector.load %arg7[%c307, %c0_74] : memref<326x4xf32, #tpu.memory_space<vmem>>, vector<18x4xf32>
    tpu.vector_store %arg7[%c307, %c0_74], %122 {strides = array<i32>} : memref<326x4xf32, #tpu.memory_space<vmem>>, vector<18x4xf32>,
    %cst_75 = arith.constant 0.000000e+00 : f32
    %124 = vector.broadcast %cst_75 : f32 to vector<288x4xf32>
    %c0_76 = arith.constant 0 : index
    %c0_77 = arith.constant 0 : index
    %125 = vector.load %arg7[%c0_76, %c0_77] : memref<326x4xf32, #tpu.memory_space<vmem>>, vector<288x4xf32>
    %126 = arith.truncf %125 : vector<288x4xf32> to vector<288x4xbf16>
    %c0_78 = arith.constant 0 : index
    %c0_79 = arith.constant 0 : index
    %c0_80 = arith.constant 0 : index
    %127 = vector.load %arg3[%c0_78, %c0_79, %c0_80] : memref<9x4x4xbf16, #tpu.memory_space<vmem>>, vector<1x4x4xbf16>
    %128 = vector.shape_cast %127 : vector<1x4x4xbf16> to vector<4x4xbf16>
    %cst_81 = arith.constant dense<0.000000e+00> : vector<288x4xf32>
    %129 = tpu.matmul %126, %128, %cst_81 {dimension_numbers = #tpu.dot_dimension_numbers<[1], [0], [0], [1], [0, 0, 1, 1], [], []>} : vector<288x4xbf16>, vector<4x4xbf16>, vector<288x4xf32> -> vector<288x4xf32>
    %130 = arith.addf %124, %129 : vector<288x4xf32>
    %c1_82 = arith.constant 1 : index
    %c0_83 = arith.constant 0 : index
    %131 = vector.load %arg7[%c1_82, %c0_83] : memref<326x4xf32, #tpu.memory_space<vmem>>, vector<288x4xf32>
    %132 = arith.truncf %131 : vector<288x4xf32> to vector<288x4xbf16>
    %c1_84 = arith.constant 1 : index
    %c0_85 = arith.constant 0 : index
    %c0_86 = arith.constant 0 : index
    %133 = vector.load %arg3[%c1_84, %c0_85, %c0_86] : memref<9x4x4xbf16, #tpu.memory_space<vmem>>, vector<1x4x4xbf16>
    %134 = vector.shape_cast %133 : vector<1x4x4xbf16> to vector<4x4xbf16>
    %cst_87 = arith.constant dense<0.000000e+00> : vector<288x4xf32>
    %135 = tpu.matmul %132, %134, %cst_87 {dimension_numbers = #tpu.dot_dimension_numbers<[1], [0], [0], [1], [0, 0, 1, 1], [], []>} : vector<288x4xbf16>, vector<4x4xbf16>, vector<288x4xf32> -> vector<288x4xf32>
    %136 = arith.addf %130, %135 : vector<288x4xf32>
    %c2_88 = arith.constant 2 : index
    %c0_89 = arith.constant 0 : index
    %137 = vector.load %arg7[%c2_88, %c0_89] : memref<326x4xf32, #tpu.memory_space<vmem>>, vector<288x4xf32>
    %138 = arith.truncf %137 : vector<288x4xf32> to vector<288x4xbf16>
    %c2_90 = arith.constant 2 : index
    %c0_91 = arith.constant 0 : index
    %c0_92 = arith.constant 0 : index
    %139 = vector.load %arg3[%c2_90, %c0_91, %c0_92] : memref<9x4x4xbf16, #tpu.memory_space<vmem>>, vector<1x4x4xbf16>
    %140 = vector.shape_cast %139 : vector<1x4x4xbf16> to vector<4x4xbf16>
    %cst_93 = arith.constant dense<0.000000e+00> : vector<288x4xf32>
    %141 = tpu.matmul %138, %140, %cst_93 {dimension_numbers = #tpu.dot_dimension_numbers<[1], [0], [0], [1], [0, 0, 1, 1], [], []>} : vector<288x4xbf16>, vector<4x4xbf16>, vector<288x4xf32> -> vector<288x4xf32>
    %142 = arith.addf %136, %141 : vector<288x4xf32>
    %c18_94 = arith.constant 18 : index
    %c0_95 = arith.constant 0 : index
    %143 = vector.load %arg7[%c18_94, %c0_95] : memref<326x4xf32, #tpu.memory_space<vmem>>, vector<288x4xf32>
    %144 = arith.truncf %143 : vector<288x4xf32> to vector<288x4xbf16>
    %c3_96 = arith.constant 3 : index
    %c0_97 = arith.constant 0 : index
    %c0_98 = arith.constant 0 : index
    %145 = vector.load %arg3[%c3_96, %c0_97, %c0_98] : memref<9x4x4xbf16, #tpu.memory_space<vmem>>, vector<1x4x4xbf16>
    %146 = vector.shape_cast %145 : vector<1x4x4xbf16> to vector<4x4xbf16>
    %cst_99 = arith.constant dense<0.000000e+00> : vector<288x4xf32>
    %147 = tpu.matmul %144, %146, %cst_99 {dimension_numbers = #tpu.dot_dimension_numbers<[1], [0], [0], [1], [0, 0, 1, 1], [], []>} : vector<288x4xbf16>, vector<4x4xbf16>, vector<288x4xf32> -> vector<288x4xf32>
    %148 = arith.addf %142, %147 : vector<288x4xf32>
    %c19_100 = arith.constant 19 : index
    %c0_101 = arith.constant 0 : index
    %149 = vector.load %arg7[%c19_100, %c0_101] : memref<326x4xf32, #tpu.memory_space<vmem>>, vector<288x4xf32>
    %150 = arith.truncf %149 : vector<288x4xf32> to vector<288x4xbf16>
    %c4_102 = arith.constant 4 : index
    %c0_103 = arith.constant 0 : index
    %c0_104 = arith.constant 0 : index
    %151 = vector.load %arg3[%c4_102, %c0_103, %c0_104] : memref<9x4x4xbf16, #tpu.memory_space<vmem>>, vector<1x4x4xbf16>
    %152 = vector.shape_cast %151 : vector<1x4x4xbf16> to vector<4x4xbf16>
    %cst_105 = arith.constant dense<0.000000e+00> : vector<288x4xf32>
    %153 = tpu.matmul %150, %152, %cst_105 {dimension_numbers = #tpu.dot_dimension_numbers<[1], [0], [0], [1], [0, 0, 1, 1], [], []>} : vector<288x4xbf16>, vector<4x4xbf16>, vector<288x4xf32> -> vector<288x4xf32>
    %154 = arith.addf %148, %153 : vector<288x4xf32>
    %c20_106 = arith.constant 20 : index
    %c0_107 = arith.constant 0 : index
    %155 = vector.load %arg7[%c20_106, %c0_107] : memref<326x4xf32, #tpu.memory_space<vmem>>, vector<288x4xf32>
    %156 = arith.truncf %155 : vector<288x4xf32> to vector<288x4xbf16>
    %c5_108 = arith.constant 5 : index
    %c0_109 = arith.constant 0 : index
    %c0_110 = arith.constant 0 : index
    %157 = vector.load %arg3[%c5_108, %c0_109, %c0_110] : memref<9x4x4xbf16, #tpu.memory_space<vmem>>, vector<1x4x4xbf16>
    %158 = vector.shape_cast %157 : vector<1x4x4xbf16> to vector<4x4xbf16>
    %cst_111 = arith.constant dense<0.000000e+00> : vector<288x4xf32>
    %159 = tpu.matmul %156, %158, %cst_111 {dimension_numbers = #tpu.dot_dimension_numbers<[1], [0], [0], [1], [0, 0, 1, 1], [], []>} : vector<288x4xbf16>, vector<4x4xbf16>, vector<288x4xf32> -> vector<288x4xf32>
    %160 = arith.addf %154, %159 : vector<288x4xf32>
    %c36_112 = arith.constant 36 : index
    %c0_113 = arith.constant 0 : index
    %161 = vector.load %arg7[%c36_112, %c0_113] : memref<326x4xf32, #tpu.memory_space<vmem>>, vector<288x4xf32>
    %162 = arith.truncf %161 : vector<288x4xf32> to vector<288x4xbf16>
    %c6_114 = arith.constant 6 : index
    %c0_115 = arith.constant 0 : index
    %c0_116 = arith.constant 0 : index
    %163 = vector.load %arg3[%c6_114, %c0_115, %c0_116] : memref<9x4x4xbf16, #tpu.memory_space<vmem>>, vector<1x4x4xbf16>
    %164 = vector.shape_cast %163 : vector<1x4x4xbf16> to vector<4x4xbf16>
    %cst_117 = arith.constant dense<0.000000e+00> : vector<288x4xf32>
    %165 = tpu.matmul %162, %164, %cst_117 {dimension_numbers = #tpu.dot_dimension_numbers<[1], [0], [0], [1], [0, 0, 1, 1], [], []>} : vector<288x4xbf16>, vector<4x4xbf16>, vector<288x4xf32> -> vector<288x4xf32>
    %166 = arith.addf %160, %165 : vector<288x4xf32>
    %c37_118 = arith.constant 37 : index
    %c0_119 = arith.constant 0 : index
    %167 = vector.load %arg7[%c37_118, %c0_119] : memref<326x4xf32, #tpu.memory_space<vmem>>, vector<288x4xf32>
    %168 = arith.truncf %167 : vector<288x4xf32> to vector<288x4xbf16>
    %c7_120 = arith.constant 7 : index
    %c0_121 = arith.constant 0 : index
    %c0_122 = arith.constant 0 : index
    %169 = vector.load %arg3[%c7_120, %c0_121, %c0_122] : memref<9x4x4xbf16, #tpu.memory_space<vmem>>, vector<1x4x4xbf16>
    %170 = vector.shape_cast %169 : vector<1x4x4xbf16> to vector<4x4xbf16>
    %cst_123 = arith.constant dense<0.000000e+00> : vector<288x4xf32>
    %171 = tpu.matmul %168, %170, %cst_123 {dimension_numbers = #tpu.dot_dimension_numbers<[1], [0], [0], [1], [0, 0, 1, 1], [], []>} : vector<288x4xbf16>, vector<4x4xbf16>, vector<288x4xf32> -> vector<288x4xf32>
    %172 = arith.addf %166, %171 : vector<288x4xf32>
    %c38_124 = arith.constant 38 : index
    %c0_125 = arith.constant 0 : index
    %173 = vector.load %arg7[%c38_124, %c0_125] : memref<326x4xf32, #tpu.memory_space<vmem>>, vector<288x4xf32>
    %174 = arith.truncf %173 : vector<288x4xf32> to vector<288x4xbf16>
    %c8_126 = arith.constant 8 : index
    %c0_127 = arith.constant 0 : index
    %c0_128 = arith.constant 0 : index
    %175 = vector.load %arg3[%c8_126, %c0_127, %c0_128] : memref<9x4x4xbf16, #tpu.memory_space<vmem>>, vector<1x4x4xbf16>
    %176 = vector.shape_cast %175 : vector<1x4x4xbf16> to vector<4x4xbf16>
    %cst_129 = arith.constant dense<0.000000e+00> : vector<288x4xf32>
    %177 = tpu.matmul %174, %176, %cst_129 {dimension_numbers = #tpu.dot_dimension_numbers<[1], [0], [0], [1], [0, 0, 1, 1], [], []>} : vector<288x4xbf16>, vector<4x4xbf16>, vector<288x4xf32> -> vector<288x4xf32>
    %178 = arith.addf %172, %177 : vector<288x4xf32>
    %c0_130 = arith.constant 0 : index
    %c0_131 = arith.constant 0 : index
    %179 = vector.load %arg4[%c0_130, %c0_131] : memref<1x4xf32, #tpu.memory_space<vmem>>, vector<1x4xf32>
    %180 = vector.broadcast %179 : vector<1x4xf32> to vector<288x4xf32>
    %181 = arith.addf %178, %180 : vector<288x4xf32>
    %cst_132 = arith.constant 0.000000e+00 : f32
    %182 = vector.shape_cast %25 : vector<288x1xi1> to vector<288x1xi1>
    %183 = vector.broadcast %182 : vector<288x1xi1> to vector<288x4xi1>
    %184 = vector.broadcast %cst_132 : f32 to vector<288x4xf32>
    %185 = arith.select %183, %181, %184 : vector<288x4xi1>, vector<288x4xf32>
    %cst_133 = arith.constant dense<0.000000e+00> : vector<4xf32>
    %186 = vector.multi_reduction <add>, %185, %cst_133 [0] : vector<288x4xf32> to vector<4xf32>
    %187 = vector.shape_cast %186 : vector<4xf32> to vector<1x4xf32>
    %188 = arith.mulf %185, %185 : vector<288x4xf32>
    %cst_134 = arith.constant dense<0.000000e+00> : vector<4xf32>
    %189 = vector.multi_reduction <add>, %188, %cst_134 [0] : vector<288x4xf32> to vector<4xf32>
    %190 = vector.shape_cast %189 : vector<4xf32> to vector<1x4xf32>
    %cst_135 = arith.constant 3.906250e-03 : f32
    %191 = vector.broadcast %cst_135 : f32 to vector<1x4xf32>
    %192 = arith.mulf %187, %191 : vector<1x4xf32>
    %cst_136 = arith.constant 3.906250e-03 : f32
    %193 = vector.broadcast %cst_136 : f32 to vector<1x4xf32>
    %194 = arith.mulf %190, %193 : vector<1x4xf32>
    %195 = arith.mulf %192, %192 : vector<1x4xf32>
    %196 = arith.subf %194, %195 : vector<1x4xf32>
    %197 = vector.broadcast %192 : vector<1x4xf32> to vector<288x4xf32>
    %198 = arith.subf %181, %197 : vector<288x4xf32>
    %cst_137 = arith.constant 9.99999974E-6 : f32
    %199 = vector.broadcast %cst_137 : f32 to vector<1x4xf32>
    %200 = arith.addf %196, %199 : vector<1x4xf32>
    %201 = math.rsqrt %200 : vector<1x4xf32>
    %202 = vector.broadcast %201 : vector<1x4xf32> to vector<288x4xf32>
    %203 = arith.mulf %198, %202 : vector<288x4xf32>
    %c0_138 = arith.constant 0 : index
    %c19_139 = arith.constant 19 : index
    %c0_140 = arith.constant 0 : index
    %204 = vector.load %arg5[%c0_138, %c19_139, %c0_140] : memref<1x326x4xbf16, #tpu.memory_space<vmem>>, vector<1x288x4xbf16>
    %205 = vector.shape_cast %204 : vector<1x288x4xbf16> to vector<288x4xbf16>
    %206 = arith.extf %205 : vector<288x4xbf16> to vector<288x4xf32>
    %207 = arith.addf %206, %203 : vector<288x4xf32>
    %208 = arith.truncf %207 : vector<288x4xf32> to vector<288x4xbf16>
    %c0_141 = arith.constant 0 : index
    %c0_142 = arith.constant 0 : index
    %c0_143 = arith.constant 0 : index
    %209 = vector.load %arg6[%c0_141, %c0_142, %c0_143] : memref<1x288x4xbf16, #tpu.memory_space<vmem>>, vector<1x288x4xbf16>
    %210 = vector.shape_cast %209 : vector<1x288x4xbf16> to vector<288x4xbf16>
    %211 = vector.shape_cast %208 : vector<288x4xbf16> to vector<1x288x4xbf16>
    tpu.vector_store %arg6[%c0_141, %c0_142, %c0_143], %211 {strides = array<i32>} : memref<1x288x4xbf16, #tpu.memory_space<vmem>>, vector<1x288x4xbf16>,
    return
  }
  func.func @transform_0(%arg0: i32) -> (i32, i32, i32) {
    %c0_i32 = arith.constant 0 : i32
    %c0_i32_0 = arith.constant 0 : i32
    %c0_i32_1 = arith.constant 0 : i32
    %c0_i32_2 = arith.constant 0 : i32
    return %c0_i32, %c0_i32_0, %c0_i32_1 : i32, i32, i32
  }
  func.func @transform_1(%arg0: i32) -> (i32, i32) {
    %c0_i32 = arith.constant 0 : i32
    %c0_i32_0 = arith.constant 0 : i32
    %c0_i32_1 = arith.constant 0 : i32
    return %c0_i32, %c0_i32_0 : i32, i32
  }
  func.func @transform_2(%arg0: i32) -> (i32, i32, i32) {
    %c0_i32 = arith.constant 0 : i32
    %c0_i32_0 = arith.constant 0 : i32
    %c0_i32_1 = arith.constant 0 : i32
    %c0_i32_2 = arith.constant 0 : i32
    return %c0_i32, %c0_i32_0, %c0_i32_1 : i32, i32, i32
  }
  func.func @transform_3(%arg0: i32) -> (i32, i32) {
    %c0_i32 = arith.constant 0 : i32
    %c0_i32_0 = arith.constant 0 : i32
    %c0_i32_1 = arith.constant 0 : i32
    return %c0_i32, %c0_i32_0 : i32, i32
  }
  func.func @transform_4(%arg0: i32) -> (i32, i32, i32) {
    %c0_i32 = arith.constant 0 : i32
    %c0_i32_0 = arith.constant 0 : i32
    %c0_i32_1 = arith.constant 0 : i32
    return %arg0, %c0_i32, %c0_i32_0 : i32, i32, i32
  }
  func.func @transform_5(%arg0: i32) -> (i32, i32, i32) {
    %c0_i32 = arith.constant 0 : i32
    %c0_i32_0 = arith.constant 0 : i32
    %c0_i32_1 = arith.constant 0 : i32
    return %arg0, %c0_i32, %c0_i32_0 : i32, i32, i32
  }
}

</mosaic_0001>

<bundles_post_ra>
// kernel: tpu_custom_call.1
= control target key start
LH: loop header
LB: loop body
LE: loop exit
PB: predicated region body
PF: predicated region fallthrough
CT: control target
= control target key end

     0   :  { %s11792_s18 = smov 0   ;;  %s16328_s0 = inlined_call_operand.vmem [shape: bf16[9,4,4], index: 0, kind: input, shape index: {}]   ;;  %s16329_s1 = inlined_call_operand.vmem [shape: f32[1,4], index: 1, kind: input, shape index: {}]   ;;  %s16330_s2 = inlined_call_operand.vmem [shape: bf16[9,4,4], index: 2, kind: input, shape index: {}]   ;;  %s16331_s3 = inlined_call_operand.vmem [shape: f32[1,4], index: 3, kind: input, shape index: {}]   ;;  %s16332_s4 = inlined_call_operand.vmem [shape: bf16[2,326,4], index: 4, kind: input, shape index: {}]   ;;  %s16333_s5 = inlined_call_operand.vmem [shape: bf16[2,288,4], index: 5, kind: output, shape index: {}]  }
   0x1 LB: > { %s9411_s19 = sadd.s32 4294967295, %s11759_s18   ;;  %p9415_p0 = scmp.ge.s32.totalorder %s11759_s18, 1  ;;  %s11759_s18 = sphi %s11792_s18, %s15_s18  }
   0x2   : > { %p187_p1 = scmp.lt.s32.totalorder %s11759_s18, 3 }
   0x4   : > { %p188_p2 = pnand %p9415_p0, %p187_p1 }
   0x6   : > { %191 = sbr.rel (%p188_p2) target bundleno = 2139 (0x85b), region = 40 }
   0xd   : > { %v9418_v0 = vld [vmem:[%s16328_s0 + $0x2] sm:$0x3]  ;;  %vm16334_vm0 = vcmask 1041408   ;;  %p215_p3 = scmp.lt.s32.totalorder %s9411_s19, 1  ;;  %v1055_v2 = vld [vmem:[%s16328_s0] sm:$0x3] }
   0xe   : > { %11585 = vmatprep.subr.msk.bf16.mxu0 %vm16334_vm0, %v9418_v0  ;;  %v1358_v1 = vsel %vm16334_vm0, %v9418_v0, 0  ;;  %vm1152_vm1 = vsmask.f32 7424  ;;  %vm16335_vm2 = vcmask 31744   ;;  %v1574_v24 = vsel %vm16334_vm0, %v1055_v2, 0 }
   0xf   : > { %10326 = vmatpush3.bf16.msra.mxu0 %v1358_v1  ;;  %s17672_s19 = smov (!%p215_p3, %s9411_s19), 1  ;;  %v11858_v33 = vld [vmem:[%s16328_s0 + $0x4] sm:$0x3]  ;;  %vm1759_vm3 = vcmask 1046528   ;;  %vm2512_vm4 = vsmask.f32 6400 }
  0x10   : > { %11586 = vmatprep.subr.msk.bf16.mxu0 %vm16334_vm0, %v1055_v2  ;;  %s11603_s24 = smul.u32 164, %s17672_s19  ;;  %vm2959_vm5 = vcmask 1045504   ;;  %vm3712_vm6 = vsmask.f32 5376  ;;  %vm4159_vm7 = vcmask 1044480  }
  0x12   : > { %s11815_s27 = scalar_lea.vmem %s16332_s4, %s11603_s24 }
  0x13   : > { %v1019_v3 = vld [vmem:[%s11815_s27] sm:$0xf]  ;;  %v11819_v4 = vld [vmem:[%s11815_s27 + $0x4] sm:$0xf]  ;;  %v11825_v6 = vld [vmem:[%s11815_s27 + $0x8] sm:$0xff]  }
  0x14   : > { %v11822_v5 = vcombine.low %v1019_v3, %v11819_v4  ;;  %v11828_v7 = vld [vmem:[%s11815_s27 + $0x10] sm:$0xff]   ;;  %v1161_v10 = vshll.u32 %v11825_v6, 16  ;;  %v1165_v11 = vshrl.u32 %v11825_v6, 16  ;;  %v11836_v13 = vld [vmem:[%s11815_s27 + $0x18] sm:$0xff]   ;;  %v11840_v15 = vld [vmem:[%s11815_s27 + $0x20] sm:$0xff]  }
  0x15   : > { %v1169_v12 = vshll.u32 %v11828_v7, 16  ;;  %v1173_v14 = vshrl.u32 %v11828_v7, 16  ;;  %v1177_v19 = vshll.u32 %v11836_v13, 16  ;;  %v1185_v22 = vshll.u32 %v11840_v15, 16  ;;  %v11845_v23 = vld [vmem:[%s11815_s27 + $0x28] sm:$0xff]   ;;  %v11862_v35 = vld [vmem:[%s11815_s27 + $0x30] sm:$0xff]  }
  0x16   : > { %v1154_v8 = vshrl.u32 %v11822_v5, 16  ;;  %v1156_v9 = vshll.u32 %v11822_v5, 16  ;;  %v1163_v17 = vrot.slane %v1161_v10, 1  ;;  %v1181_v27 = vshrl.u32 %v11836_v13, 16  ;;  %v11866_v39 = vld [vmem:[%s11815_s27 + $0x38] sm:$0xff]   ;;  %v11878_v47 = vld [vmem:[%s11815_s27 + $0x40] sm:$0xff]  }
  0x17   : > { %v1171_v18 = vrot.slane %v1169_v12, 1  ;;  %v1179_v26 = vrot.slane %v1177_v19, 1  ;;  %v1189_v30 = vshrl.u32 %v11840_v15, 16  ;;  %v1193_v31 = vshll.u32 %v11845_v23, 16  ;;  %v11881_v48 = vld [vmem:[%s11815_s27 + $0x48] sm:$0xff]   ;;  %v11885_v50 = vld [vmem:[%s11815_s27 + $0x50] sm:$0xff]  }
  0x18   : > { %v1158_v16 = vrot.slane %v1156_v9, 1  ;;  %v1167_v21 = vor.u32 %v1165_v11, %v1163_v17  ;;  %v1187_v34 = vrot.slane %v1185_v22, 1  ;;  %v1201_v40 = vshll.u32 %v11862_v35, 16  ;;  %v11888_v53 = vld [vmem:[%s11815_s27 + $0x58] sm:$0xff]   ;;  %v11899_v62 = vld [vmem:[%s11815_s27 + $0x60] sm:$0xff]  }
  0x19   : > { %v1175_v25 = vor.u32 %v1173_v14, %v1171_v18  ;;  %v1183_v36 = vor.u32 %v1181_v27, %v1179_v26  ;;  %v1195_v38 = vrot.slane %v1193_v31, 1  ;;  %v1197_v42 = vshrl.u32 %v11845_v23, 16  ;;  %v11908_v14 = vld [vmem:[%s11815_s27 + $0x68] sm:$0xff]  }
  0x1a   : > { %v1159_v20 = vor.u32 %v1158_v16, %v1154_v8  ;;  %v1172_v29 = vsel %vm1152_vm1, %v1167_v21, %v1171_v18  ;;  %v1191_v37 = vor.u32 %v1189_v30, %v1187_v34  ;;  %v1205_v44 = vshrl.u32 %v11862_v35, 16 }
  0x1b   : > { %v1180_v32 = vsel %vm1152_vm1, %v1175_v25, %v1179_v26  ;;  %v1188_v41 = vsel %vm1152_vm1, %v1183_v36, %v1187_v34  ;;  %v1209_v45 = vshll.u32 %v11866_v39, 16  ;;  %v1203_v46 = vrot.slane %v1201_v40, 1  ;;  %v11918_v25 = vld [vmem:[%s11815_s27 + $0x70] sm:$0xff]   ;;  %v11921_v26 = vld [vmem:[%s11815_s27 + $0x78] sm:$0xff]  }
  0x1c   : > { %v1164_v28 = vsel %vm1152_vm1, %v1159_v20, %v1163_v17  ;;  %v1196_v43 = vsel %vm1152_vm1, %v1191_v37, %v1195_v38  ;;  %v1199_v49 = vor.u32 %v1197_v42, %v1195_v38  ;;  %v1213_v54 = vshrl.u32 %v11866_v39, 16 }
  0x1d   : > { %10327 = vmatprep.mubr.msk.bf16.mxu0 %vm16335_vm2, %v1164_v28  ;;  %v1207_v51 = vor.u32 %v1205_v44, %v1203_v46  ;;  %v1211_v52 = vrot.slane %v1209_v45, 1  ;;  %v1217_v55 = vshll.u32 %v11878_v47, 16  ;;  %v1225_v57 = vshll.u32 %v11881_v48, 16  ;;  %v11938_v45 = vld [vmem:[%s11815_s27 + $0x88] sm:$0xff]  }
  0x1e   : > { %10328 = vmatmul.mubr.msk.bf16.vlgmr.msra.gmra.mrb[0].mxu0 %vm16335_vm2, %v1172_v29  ;;  %v1204_v56 = vsel %vm1152_vm1, %v1199_v49, %v1203_v46  ;;  %v1233_v58 = vshll.u32 %v11885_v50, 16  ;;  %v1221_v60 = vshrl.u32 %v11878_v47, 16  ;;  %v1241_v61 = vshll.u32 %v11888_v53, 16 }
  0x1f   : > { %10364 = vmatpush3.bf16.msra.mxu0 %v1574_v24  ;;  %10331 = vmatprep.mubr.msk.bf16.mxu0 %vm16335_vm2, %v1180_v32  ;;  %v1212_v59 = vsel %vm1152_vm1, %v1207_v51, %v1211_v52  ;;  %v1215_v63 = vor.u32 %v1213_v54, %v1211_v52  ;;  %v1219_v0 = vrot.slane %v1217_v55, 1  ;;  %v1229_v1 = vshrl.u32 %v11881_v48, 16 }
  0x20   : > { %11587 = vmatprep.subr.msk.bf16.mxu0 %vm16334_vm0, %v11858_v33  ;;  %v1227_v2 = vrot.slane %v1225_v57, 1  ;;  %v1235_v3 = vrot.slane %v1233_v58, 1  ;;  %v1237_v8 = vshrl.u32 %v11885_v50, 16  ;;  %v1245_v9 = vshrl.u32 %v11888_v53, 16 }
  0x21   : > { %v1223_v10 = vor.u32 %v1221_v60, %v1219_v0  ;;  %v1243_v11 = vrot.slane %v1241_v61, 1  ;;  %v1249_v12 = vshll.u32 %v11899_v62, 16  ;;  %v1220_v16 = vsel %vm1152_vm1, %v1215_v63, %v1219_v0  ;;  %v11949_v58 = vld [vmem:[%s11815_s27 + $0x90] ss:$0 sps:$4 sm:$0x11]  }
  0x22   : > { %v1253_v18 = vshrl.u32 %v11899_v62, 16  ;;  %v1257_v19 = vshll.u32 %v11908_v14, 16  ;;  %v1231_v20 = vor.u32 %v1229_v1, %v1227_v2  ;;  %v1261_v22 = vshrl.u32 %v11908_v14, 16 }
  0x23   : > { %v1228_v17 = vsel %vm1152_vm1, %v1223_v10, %v1227_v2  ;;  %v1251_v21 = vrot.slane %v1249_v12, 1  ;;  %v1239_v24 = vor.u32 %v1237_v8, %v1235_v3  ;;  %v1265_v30 = vshll.u32 %v11918_v25, 16  ;;  %v9494_v10 = vld [vmem:[%s16328_s0 + $0x6] sm:$0x3] }
  0x24   : > { %v1236_v27 = vsel %vm1152_vm1, %v1231_v20, %v1235_v3  ;;  %v1259_v29 = vrot.slane %v1257_v19, 1  ;;  %v1247_v31 = vor.u32 %v1245_v9, %v1243_v11  ;;  %v1269_v32 = vshrl.u32 %v11918_v25, 16 }
  0x25   : > { %v1244_v28 = vsel %vm1152_vm1, %v1239_v24, %v1243_v11  ;;  %v1273_v34 = vshll.u32 %v11921_v26, 16  ;;  %v1255_v36 = vor.u32 %v1253_v18, %v1251_v21  ;;  %v1267_v40 = vrot.slane %v1265_v30, 1 }
  0x26   : > { %10332 = vmatmul.mubr.msk.bf16.gmra.mrb[4].mxu0 %vm16335_vm2, %v1188_v41  ;;  %v1252_v37 = vsel %vm1152_vm1, %v1247_v31, %v1251_v21  ;;  %v11934_v41 = vld [vmem:[%s11815_s27 + $0x80] sm:$0xff]   ;;  %v1263_v42 = vor.u32 %v1261_v22, %v1259_v29  ;;  %v1277_v51 = vshrl.u32 %v11921_v26, 16  ;;  %v1289_v55 = vshll.u32 %v11938_v45, 16 }
  0x27   : > { %10335 = vmatprep.mubr.msk.bf16.mxu0 %vm16335_vm2, %v1196_v43  ;;  %v1260_v38 = vsel %vm1152_vm1, %v1255_v36, %v1259_v29  ;;  %v1271_v43 = vor.u32 %v1269_v32, %v1267_v40  ;;  %v1275_v44 = vrot.slane %v1273_v34, 1  ;;  %v1281_v46 = vshll.u32 %v11934_v41, 16 }
  0x28   : > { %v1268_v49 = vsel %vm1152_vm1, %v1263_v42, %v1267_v40  ;;  %v1285_v54 = vshrl.u32 %v11934_v41, 16  ;;  %v1291_v60 = vrot.slane %v1289_v55, 1  ;;  %v1293_v63 = vshrl.u32 %v11938_v45, 16  ;;  %v2067_v42 = vld [vmem:[%s11815_s27 + $0x8] sm:$0xe]  ;;  %v12081_v55 = vld [vmem:[%s11815_s27 + $0x20] sm:$0xff]  }
  0x29   : > { %v1276_v52 = vsel %vm1152_vm1, %v1271_v43, %v1275_v44  ;;  %v1279_v57 = vor.u32 %v1277_v51, %v1275_v44  ;;  %v1297_v0 = vshll.u32 %v11949_v58, 16  ;;  %v1852_v9 = vsel %vm16334_vm0, %v11858_v33, 0  ;;  %v12060_v43 = vld [vmem:[%s11815_s27 + $0xc] sm:$0xf] }
  0x2a   : > { %v1295_v2 = vor.u32 %v1293_v63, %v1291_v60  ;;  %v1761_v12 = vrot.slane %v11825_v6, 1  ;;  %v2291_v19 = vsel %vm16334_vm0, %v9494_v10, 0  ;;  %v1771_v24 = vrot.slane %v11862_v35, 1  ;;  %v12095_v63 = vld [vmem:[%s11815_s27 + $0x30] sm:$0xff]  }
  0x2b   : > { %v1299_v3 = vrot.slane %v1297_v0, 1  ;;  %v1777_v29 = vrot.slane %v11881_v48, 1  ;;  %v12065_v44 = vcombine.low %v2067_v42, %v12060_v43  ;;  %v12100_v0 = vld [vmem:[%s16328_s0 + $0xa] sm:$0x3] }
  0x2d   : > { %v1300_v8 = vsel %vm1152_vm1, %v1295_v2, %v1299_v3  ;;  %v2208_v2 = vrot.slane %v12095_v63, 1 }
  0x2e   : > { %10336 = vmatmul.mubr.msk.bf16.gmra.mrb[8].mxu0 %vm16335_vm2, %v1204_v56  ;;  %v1283_v56 = vrot.slane %v1281_v46, 1  ;;  %v12068_v46 = vld [vmem:[%s11815_s27 + $0x10] sm:$0xff]  }
  0x2f   : > { %10339 = vmatprep.mubr.msk.bf16.mxu0 %vm16335_vm2, %v1212_v59 }
  0x30   : > { %v1287_v59 = vor.u32 %v1285_v54, %v1283_v56  ;;  %v1284_v61 = vsel %vm1152_vm1, %v1279_v57, %v1283_v56  ;;  %v2204_v57 = vrot.slane %v12081_v55, 1 }
  0x32   : > { %v1292_v1 = vsel %vm1152_vm1, %v1287_v59, %v1291_v60  ;;  %v12089_v59 = vld [vmem:[%s11815_s27 + $0x28] sm:$0xff]  }
  0x36   : > { %10340 = vmatmul.mubr.msk.bf16.gmra.mrb[12].mxu0 %vm16335_vm2, %v1220_v16 }
  0x37   : > { %10343 = vmatprep.mubr.msk.bf16.mxu0 %vm16335_vm2, %v1228_v17  ;;  %v1763_v17 = vrot.slane %v11828_v7, 1 }
  0x39   : > { %v1764_v18 = vsel %vm1759_vm3, %v1761_v12, %v1763_v17 }
  0x3e   : > { %10344 = vmatmul.mubr.msk.bf16.gmra.mrb[16].mxu0 %vm16335_vm2, %v1236_v27  ;;  %v1773_v27 = vrot.slane %v11866_v39, 1 }
  0x3f   : > { %10347 = vmatprep.mubr.msk.bf16.mxu0 %vm16335_vm2, %v1244_v28 }
  0x46   : > { %10348 = vmatmul.mubr.msk.bf16.gmra.mrb[20].mxu0 %vm16335_vm2, %v1252_v37  ;;  %v1789_v37 = vrot.slane %v11921_v26, 1 }
  0x47   : > { %10351 = vmatprep.mubr.msk.bf16.mxu0 %vm16335_vm2, %v1260_v38 }
  0x4e   : > { %10352 = vmatmul.mubr.msk.bf16.gmra.mrb[24].mxu0 %vm16335_vm2, %v1268_v49  ;;  %v2200_v49 = vrot.slane %v12068_v46, 1 }
  0x4f   : > { %10355 = vmatprep.mubr.msk.bf16.mxu0 %vm16335_vm2, %v1276_v52  ;;  %v12077_v52 = vld [vmem:[%s11815_s27 + $0x18] sm:$0xff]  }
  0x50   : > { %v2202_v56 = vrot.slane %v12077_v52, 1 }
  0x56   : > { %10356 = vmatmul.mubr.msk.bf16.gmra.mrb[28].mxu0 %vm16335_vm2, %v1284_v61  ;;  %v2205_v61 = vsel %vm1759_vm3, %v2202_v56, %v2204_v57 }
  0x57   : > { %10359 = vmatprep.mubr.msk.bf16.mxu0 %vm16335_vm2, %v1292_v1  ;;  %v2206_v1 = vrot.slane %v12089_v59, 1 }
  0x59   : > { %v2207_v3 = vsel %vm1759_vm3, %v2204_v57, %v2206_v1 }
  0x5e   : > { %10360 = vmatmul.mubr.msk.bf16.gmra.mrb[32].mxu0 %vm16335_vm2, %v1300_v8  ;;  %v12110_v8 = vld [vmem:[%s11815_s27 + $0x38] sm:$0xff]  }
  0x5f   : > { %10365 = vmatprep.mubr.msk.bf16.mxu0 %vm16335_vm2, %v11822_v5  ;;  %v1753_v5 = vld [vmem:[%s11815_s27] sm:$0xe] }
  0x60   : > { %v9475_v33 = vcombine.low %v1753_v5, %v11819_v4  ;;  %v1765_v4 = vrot.slane %v11836_v13, 1  ;;  %v2210_v5 = vrot.slane %v12110_v8, 1 }
  0x62   : > { %v1760_v11 = vrot.slane %v9475_v33, 1  ;;  %v1766_v20 = vsel %vm1759_vm3, %v1763_v17, %v1765_v4  ;;  %v12126_v17 = vld [vmem:[%s11815_s27 + $0x50] sm:$0xff]  }
  0x64   : > { %v1762_v16 = vsel %vm1759_vm3, %v1760_v11, %v1761_v12  ;;  %v2211_v11 = vsel %vm1759_vm3, %v2208_v2, %v2210_v5  ;;  %v12122_v12 = vld [vmem:[%s11815_s27 + $0x48] sm:$0xff]  }
  0x66   : > { %10366 = vmatmul.mubr.msk.bf16.vlgmr.msra.gmra.mrb[0].mxu0 %vm16335_vm2, %v11825_v6  ;;  %v12014_v6 = vld [vmem:[%s16328_s0 + $0x8] sm:$0x3] }
  0x67   : > { %10402 = vmatpush3.bf16.msra.mxu0 %v1852_v9  ;;  %10369 = vmatprep.mubr.msk.bf16.mxu0 %vm16335_vm2, %v11828_v7  ;;  %v1767_v7 = vrot.slane %v11840_v15, 1  ;;  %v2738_v60 = vsel %vm16334_vm0, %v12014_v6, 0  ;;  %v2209_v9 = vsel %vm1759_vm3, %v2206_v1, %v2208_v2 }
  0x68   : > { %11588 = vmatprep.subr.msk.bf16.mxu0 %vm16334_vm0, %v9494_v10  ;;  %v12114_v10 = vld [vmem:[%s11815_s27 + $0x40] sm:$0xff]  }
  0x69   : > { %v1768_v21 = vsel %vm1759_vm3, %v1765_v4, %v1767_v7  ;;  %v2212_v33 = vrot.slane %v12114_v10, 1  ;;  %v2214_v4 = vrot.slane %v12122_v12, 1 }
  0x6e   : > { %10370 = vmatmul.mubr.msk.bf16.gmra.mrb[4].mxu0 %vm16335_vm2, %v11836_v13  ;;  %v1769_v13 = vrot.slane %v11845_v23, 1 }
  0x6f   : > { %10373 = vmatprep.mubr.msk.bf16.mxu0 %vm16335_vm2, %v11840_v15  ;;  %v1774_v15 = vsel %vm1759_vm3, %v1771_v24, %v1773_v27 }
  0x70   : > { %v1770_v22 = vsel %vm1759_vm3, %v1767_v7, %v1769_v13  ;;  %v1772_v28 = vsel %vm1759_vm3, %v1769_v13, %v1771_v24  ;;  %v12138_v7 = vld [vmem:[%s11815_s27 + $0x60] sm:$0xff]   ;;  %v12146_v24 = vld [vmem:[%s11815_s27 + $0x68] sm:$0xff]  }
  0x76   : > { %10374 = vmatmul.mubr.msk.bf16.gmra.mrb[8].mxu0 %vm16335_vm2, %v11845_v23  ;;  %v1775_v23 = vrot.slane %v11878_v47, 1 }
  0x77   : > { %10377 = vmatprep.mubr.msk.bf16.mxu0 %vm16335_vm2, %v11862_v35  ;;  %v1779_v35 = vrot.slane %v11885_v50, 1 }
  0x78   : > { %v1776_v30 = vsel %vm1759_vm3, %v1773_v27, %v1775_v23  ;;  %v1778_v31 = vsel %vm1759_vm3, %v1775_v23, %v1777_v29 }
  0x79   : > { %v1780_v32 = vsel %vm1759_vm3, %v1777_v29, %v1779_v35 }
  0x7e   : > { %10378 = vmatmul.mubr.msk.bf16.gmra.mrb[12].mxu0 %vm16335_vm2, %v11866_v39  ;;  %v1781_v39 = vrot.slane %v11888_v53, 1 }
  0x7f   : > { %10381 = vmatprep.mubr.msk.bf16.mxu0 %vm16335_vm2, %v11878_v47  ;;  %v1783_v47 = vrot.slane %v11899_v62, 1 }
  0x80   : > { %v1782_v34 = vsel %vm1759_vm3, %v1779_v35, %v1781_v39  ;;  %v12162_v35 = vld [vmem:[%s11815_s27 + $0x80] sm:$0xff]  }
  0x81   : > { %v1784_v36 = vsel %vm1759_vm3, %v1781_v39, %v1783_v47 }
  0x86   : > { %10382 = vmatmul.mubr.msk.bf16.gmra.mrb[16].mxu0 %vm16335_vm2, %v11881_v48  ;;  %v1785_v48 = vrot.slane %v11908_v14, 1 }
  0x87   : > { %10385 = vmatprep.mubr.msk.bf16.mxu0 %vm16335_vm2, %v11885_v50 }
  0x88   : > { %v1786_v50 = vsel %vm1759_vm3, %v1783_v47, %v1785_v48  ;;  %v12170_v47 = vld [vmem:[%s11815_s27 + $0x88] sm:$0xff]  }
  0x8e   : > { %10386 = vmatmul.mubr.msk.bf16.gmra.mrb[20].mxu0 %vm16335_vm2, %v11888_v53  ;;  %v1787_v53 = vrot.slane %v11918_v25, 1 }
  0x8f   : > { %10389 = vmatprep.mubr.msk.bf16.mxu0 %vm16335_vm2, %v11899_v62  ;;  %v1791_v62 = vrot.slane %v11934_v41, 1 }
  0x90   : > { %v1788_v38 = vsel %vm1759_vm3, %v1785_v48, %v1787_v53  ;;  %v1790_v40 = vsel %vm1759_vm3, %v1787_v53, %v1789_v37  ;;  %v12173_v48 = vld [vmem:[%s11815_s27 + $0x90] sm:$0xff]  }
  0x91   : > { %v2232_v53 = vrot.slane %v12173_v48, 1 }
  0x96   : > { %10390 = vmatmul.mubr.msk.bf16.gmra.mrb[24].mxu0 %vm16335_vm2, %v11908_v14  ;;  %v1793_v14 = vrot.slane %v11938_v45, 1 }
  0x97   : > { %10393 = vmatprep.mubr.msk.bf16.mxu0 %vm16335_vm2, %v11918_v25  ;;  %v1792_v25 = vsel %vm1759_vm3, %v1789_v37, %v1791_v62  ;;  %v2514_v37 = vshrl.u32 %v12065_v44, 16 }
  0x9e   : > { %10394 = vmatmul.mubr.msk.bf16.gmra.mrb[28].mxu0 %vm16335_vm2, %v11921_v26  ;;  %v1794_v26 = vsel %vm1759_vm3, %v1791_v62, %v1793_v14  ;;  %v2525_v62 = vshll.u32 %v12068_v46, 16 }
  0x9f   : > { %10397 = vmatprep.mubr.msk.bf16.mxu0 %vm16335_vm2, %v11934_v41  ;;  %v1795_v41 = vrot.slane %v11949_v58, 1  ;;  %v2203_v58 = vsel %vm1759_vm3, %v2200_v49, %v2202_v56 }
  0xa1   : > { %v1796_v51 = vsel %vm1759_vm3, %v1793_v14, %v1795_v41 }
  0xa6   : > { %10398 = vmatmul.mubr.msk.bf16.gmra.mrb[32].mxu0 %vm16335_vm2, %v11938_v45  ;;  %v2199_v45 = vrot.slane %v12065_v44, 1 }
  0xa7   : > { %10403 = vmatprep.mubr.msk.bf16.mxu0 %vm16335_vm2, %v1762_v16  ;;  %v2213_v16 = vsel %vm1759_vm3, %v2210_v5, %v2212_v33 }
  0xa8   : > { %v2201_v54 = vsel %vm1759_vm3, %v2199_v45, %v2200_v49  ;;  %v2527_v49 = vrot.slane %v2525_v62, 2 }
  0xae   : > { %10404 = vmatmul.mubr.msk.bf16.vlgmr.msra.gmra.mrb[0].mxu0 %vm16335_vm2, %v1764_v18  ;;  %v2216_v18 = vrot.slane %v12126_v17, 1 }
  0xaf   : > { %10440 = vmatpush3.bf16.msra.mxu0 %v2291_v19  ;;  %10407 = vmatprep.mubr.msk.bf16.mxu0 %vm16335_vm2, %v1766_v20  ;;  %v2215_v19 = vsel %vm1759_vm3, %v2212_v33, %v2214_v4  ;;  %v12134_v20 = vld [vmem:[%s11815_s27 + $0x58] sm:$0xff]  }
  0xb0   : > { %11589 = vmatprep.subr.msk.bf16.mxu0 %vm16334_vm0, %v12014_v6  ;;  %v2217_v6 = vsel %vm1759_vm3, %v2214_v4, %v2216_v18  ;;  %v2218_v13 = vrot.slane %v12134_v20, 1 }
  0xb6   : > { %10408 = vmatmul.mubr.msk.bf16.gmra.mrb[4].mxu0 %vm16335_vm2, %v1768_v21  ;;  %v2220_v21 = vrot.slane %v12138_v7, 1 }
  0xb7   : > { %10411 = vmatprep.mubr.msk.bf16.mxu0 %vm16335_vm2, %v1770_v22  ;;  %v2219_v22 = vsel %vm1759_vm3, %v2216_v18, %v2218_v13  ;;  %v2558_v18 = vshrl.u32 %v12095_v63, 16 }
  0xb8   : > { %v2221_v27 = vsel %vm1759_vm3, %v2218_v13, %v2220_v21 }
  0xbe   : > { %10412 = vmatmul.mubr.msk.bf16.gmra.mrb[8].mxu0 %vm16335_vm2, %v1772_v28  ;;  %v12150_v28 = vld [vmem:[%s11815_s27 + $0x70] sm:$0xff]  }
  0xbf   : > { %10415 = vmatprep.mubr.msk.bf16.mxu0 %vm16335_vm2, %v1774_v15  ;;  %v2222_v15 = vrot.slane %v12146_v24, 1  ;;  %v2224_v23 = vrot.slane %v12150_v28, 1 }
  0xc1   : > { %v2223_v29 = vsel %vm1759_vm3, %v2220_v21, %v2222_v15 }
  0xc6   : > { %10416 = vmatmul.mubr.msk.bf16.gmra.mrb[12].mxu0 %vm16335_vm2, %v1776_v30  ;;  %v12158_v30 = vld [vmem:[%s11815_s27 + $0x78] sm:$0xff]  }
  0xc7   : > { %10419 = vmatprep.mubr.msk.bf16.mxu0 %vm16335_vm2, %v1778_v31  ;;  %v2225_v31 = vsel %vm1759_vm3, %v2222_v15, %v2224_v23  ;;  %v2226_v39 = vrot.slane %v12158_v30, 1  ;;  %v2560_v15 = vrot.slane %v2558_v18, 1 }
  0xce   : > { %10420 = vmatmul.mubr.msk.bf16.gmra.mrb[16].mxu0 %vm16335_vm2, %v1780_v32  ;;  %v2228_v32 = vrot.slane %v12162_v35, 1 }
  0xcf   : > { %10423 = vmatprep.mubr.msk.bf16.mxu0 %vm16335_vm2, %v1782_v34  ;;  %v2227_v34 = vsel %vm1759_vm3, %v2224_v23, %v2226_v39 }
  0xd6   : > { %10424 = vmatmul.mubr.msk.bf16.gmra.mrb[20].mxu0 %vm16335_vm2, %v1784_v36  ;;  %v2229_v36 = vsel %vm1759_vm3, %v2226_v39, %v2228_v32  ;;  %v2567_v39 = vshrl.u32 %v12110_v8, 16 }
  0xd7   : > { %10427 = vmatprep.mubr.msk.bf16.mxu0 %vm16335_vm2, %v1786_v50  ;;  %v2230_v50 = vrot.slane %v12170_v47, 1 }
  0xd9   : > { %v2231_v14 = vsel %vm1759_vm3, %v2228_v32, %v2230_v50  ;;  %v2233_v42 = vsel %vm1759_vm3, %v2230_v50, %v2232_v53  ;;  %v2570_v32 = vshll.u32 %v12110_v8, 16 }
  0xde   : > { %10428 = vmatmul.mubr.msk.bf16.gmra.mrb[24].mxu0 %vm16335_vm2, %v1788_v38  ;;  %v2517_v38 = vshll.u32 %v12065_v44, 16  ;;  %v2531_v44 = vshrl.u32 %v12077_v52, 16 }
  0xdf   : > { %10431 = vmatprep.mubr.msk.bf16.mxu0 %vm16335_vm2, %v1790_v40  ;;  %v2522_v40 = vshrl.u32 %v12068_v46, 16 }
  0xe0   : > { %v2519_v41 = vrot.slane %v2517_v38, 2  ;;  %v2533_v1 = vrot.slane %v2531_v44, 1 }
  0xe1   : > { %v2524_v45 = vrot.slane %v2522_v40, 1 }
  0xe3   : > { %v2528_v57 = vor.u32 %v2527_v49, %v2524_v45  ;;  %v2597_v45 = vshll.u32 %v12126_v17, 16 }
  0xe6   : > { %10432 = vmatmul.mubr.msk.bf16.gmra.mrb[28].mxu0 %vm16335_vm2, %v1792_v25  ;;  %v11724_v25 = vld [vmem:[%s11815_s27 + $0x98] ss:$0 sps:$4 sm:$0x11]  }
  0xe7   : > { %10435 = vmatprep.mubr.msk.bf16.mxu0 %vm16335_vm2, %v1794_v26  ;;  %v2516_v26 = vrot.slane %v2514_v37, 1  ;;  %v2572_v37 = vrot.slane %v2570_v32, 2 }
  0xe9   : > { %v2520_v56 = vor.u32 %v2519_v41, %v2516_v26  ;;  %v2594_v41 = vshrl.u32 %v12126_v17, 16 }
  0xee   : > { %10436 = vmatmul.mubr.msk.bf16.gmra.mrb[32].mxu0 %vm16335_vm2, %v1796_v51  ;;  %v2234_v51 = vrot.slane %v11724_v25, 1  ;;  %v2588_v25 = vshll.u32 %v12122_v12, 16 }
  0xef   : > { %10441 = vmatprep.mubr.msk.bf16.mxu0 %vm16335_vm2, %v2201_v54  ;;  %v2534_v54 = vshll.u32 %v12077_v52, 16 }
  0xf0   : > { %v2590_v44 = vrot.slane %v2588_v25, 2 }
  0xf1   : > { %v2536_v2 = vrot.slane %v2534_v54, 2 }
  0xf3   : > { %v2537_v33 = vor.u32 %v2536_v2, %v2533_v1  ;;  %v2612_v2 = vshrl.u32 %v12138_v7, 16 }
  0xf6   : > { %10442 = vmatmul.mubr.msk.bf16.vlgmr.msra.gmra.mrb[0].mxu0 %vm16335_vm2, %v2203_v58  ;;  %v2540_v58 = vshrl.u32 %v12081_v55, 16 }
  0xf7   : > { %10478 = vmatpush3.bf16.msra.mxu0 %v2738_v60  ;;  %10445 = vmatprep.mubr.msk.bf16.mxu0 %vm16335_vm2, %v2205_v61  ;;  %v2543_v60 = vshll.u32 %v12081_v55, 16  ;;  %v2235_v61 = vsel %vm1759_vm3, %v2232_v53, %v2234_v51  ;;  %v2569_v53 = vrot.slane %v2567_v39, 1 }
  0xf8   : > { %11590 = vmatprep.subr.msk.bf16.mxu0 %vm16334_vm0, %v12100_v0 }
  0xf9   : > { %v2545_v5 = vrot.slane %v2543_v60, 2  ;;  %v2603_v60 = vshrl.u32 %v12134_v20, 16 }
  0xfe   : > { %10446 = vmatmul.mubr.msk.bf16.gmra.mrb[4].mxu0 %vm16335_vm2, %v2207_v3  ;;  %v2529_v3 = vsel %vm2512_vm4, %v2520_v56, %v2528_v57  ;;  %v2596_v56 = vrot.slane %v2594_v41, 1  ;;  %v2657_v41 = vshrl.u32 %v12170_v47, 16 }
  0xff   : > { %10449 = vmatprep.mubr.msk.bf16.mxu0 %vm16335_vm2, %v2209_v9  ;;  %v2542_v9 = vrot.slane %v2540_v58, 1 }
 0x101   : > { %v2546_v4 = vor.u32 %v2545_v5, %v2542_v9  ;;  %v2605_v5 = vrot.slane %v2603_v60, 1 }
 0x106   : > { %10450 = vmatmul.mubr.msk.bf16.gmra.mrb[8].mxu0 %vm16335_vm2, %v2211_v11  ;;  %v2549_v11 = vshrl.u32 %v12089_v59, 16 }
 0x107   : > { %10453 = vmatprep.mubr.msk.bf16.mxu0 %vm16335_vm2, %v2213_v16  ;;  %v2552_v16 = vshll.u32 %v12089_v59, 16 }
 0x108   : > { %v2551_v13 = vrot.slane %v2549_v11, 1 }
 0x109   : > { %v2554_v21 = vrot.slane %v2552_v16, 2  ;;  %v2614_v16 = vrot.slane %v2612_v2, 1 }
 0x10e   : > { %10454 = vmatmul.mubr.msk.bf16.gmra.mrb[12].mxu0 %vm16335_vm2, %v2215_v19  ;;  %v2561_v19 = vshll.u32 %v12095_v63, 16 }
 0x10f   : > { %10457 = vmatprep.mubr.msk.bf16.mxu0 %vm16335_vm2, %v2217_v6  ;;  %v2538_v6 = vsel %vm2512_vm4, %v2528_v57, %v2537_v33  ;;  %v2599_v57 = vrot.slane %v2597_v45, 2  ;;  %v2660_v45 = vshll.u32 %v12170_v47, 16 }
 0x110   : > { %v2563_v23 = vrot.slane %v2561_v19, 2  ;;  %v2621_v19 = vshrl.u32 %v12146_v24, 16 }
 0x111   : > { %v2600_v1 = vor.u32 %v2599_v57, %v2596_v56  ;;  %v2659_v56 = vrot.slane %v2657_v41, 1  ;;  %v2662_v57 = vrot.slane %v2660_v45, 2  ;;  %v12333_v41 = vld [vmem:[%s11815_s27 + $0x14] sm:$0xf] }
 0x113   : > { %v2663_v2 = vor.u32 %v2662_v57, %v2659_v56  ;;  %v12354_v57 = vld [vmem:[%s11815_s27 + $0x28] sm:$0xff]  }
 0x116   : > { %10458 = vmatmul.mubr.msk.bf16.gmra.mrb[16].mxu0 %vm16335_vm2, %v2219_v22  ;;  %v3052_v22 = vsel %vm16334_vm0, %v12100_v0, 0  ;;  %v2564_v0 = vor.u32 %v2563_v23, %v2560_v15  ;;  %v2623_v15 = vrot.slane %v2621_v19, 1 }
 0x117   : > { %10461 = vmatprep.mubr.msk.bf16.mxu0 %vm16335_vm2, %v2221_v27  ;;  %v2547_v27 = vsel %vm2512_vm4, %v2537_v33, %v2546_v4 }
 0x11e   : > { %10462 = vmatmul.mubr.msk.bf16.gmra.mrb[20].mxu0 %vm16335_vm2, %v2223_v29  ;;  %v12208_v29 = vld [vmem:[%s16328_s0 + $0xc] sm:$0x3] }
 0x11f   : > { %10465 = vmatprep.mubr.msk.bf16.mxu0 %vm16335_vm2, %v2225_v31  ;;  %v2555_v31 = vor.u32 %v2554_v21, %v2551_v13  ;;  %v2630_v21 = vshrl.u32 %v12150_v28, 16 }
 0x121   : > { %v2556_v50 = vsel %vm2512_vm4, %v2546_v4, %v2555_v31  ;;  %v2565_v38 = vsel %vm2512_vm4, %v2555_v31, %v2564_v0  ;;  %v2632_v39 = vrot.slane %v2630_v21, 1  ;;  %v2961_v21 = vrot.slane %v12068_v46, 2 }
 0x126   : > { %10466 = vmatmul.mubr.msk.bf16.gmra.mrb[24].mxu0 %vm16335_vm2, %v2227_v34  ;;  %v2576_v34 = vshrl.u32 %v12114_v10, 16 }
 0x127   : > { %10469 = vmatprep.mubr.msk.bf16.mxu0 %vm16335_vm2, %v2229_v36  ;;  %v2579_v36 = vshll.u32 %v12114_v10, 16 }
 0x128   : > { %v2578_v40 = vrot.slane %v2576_v34, 1  ;;  %v2639_v34 = vshrl.u32 %v12158_v30, 16 }
 0x129   : > { %v2581_v62 = vrot.slane %v2579_v36, 2  ;;  %v2642_v36 = vshll.u32 %v12158_v30, 16 }
 0x12b   : > { %v2582_v26 = vor.u32 %v2581_v62, %v2578_v40  ;;  %v2641_v40 = vrot.slane %v2639_v34, 1  ;;  %v2644_v62 = vrot.slane %v2642_v36, 2  ;;  %v2973_v34 = vrot.slane %v12114_v10, 2 }
 0x12c   : > { %v2981_v10 = vrot.slane %v12138_v7, 2 }
 0x12e   : > { %10470 = vmatmul.mubr.msk.bf16.gmra.mrb[28].mxu0 %vm16335_vm2, %v2231_v14  ;;  %v2573_v14 = vor.u32 %v2572_v37, %v2569_v53  ;;  %v2648_v53 = vshrl.u32 %v12162_v35, 16  ;;  %v2651_v37 = vshll.u32 %v12162_v35, 16 }
 0x12f   : > { %10473 = vmatprep.mubr.msk.bf16.mxu0 %vm16335_vm2, %v2233_v42  ;;  %v2585_v42 = vshrl.u32 %v12122_v12, 16 }
 0x130   : > { %v2574_v49 = vsel %vm2512_vm4, %v2564_v0, %v2573_v14  ;;  %v2583_v54 = vsel %vm2512_vm4, %v2573_v14, %v2582_v26  ;;  %v2653_v25 = vrot.slane %v2651_v37, 2 }
 0x131   : > { %v2587_v51 = vrot.slane %v2585_v42, 1  ;;  %v2650_v42 = vrot.slane %v2648_v53, 1 }
 0x133   : > { %v2591_v58 = vor.u32 %v2590_v44, %v2587_v51  ;;  %v2666_v51 = vshrl.u32 %v12173_v48, 16  ;;  %v2669_v44 = vshll.u32 %v12173_v48, 16 }
 0x135   : > { %v2592_v9 = vsel %vm2512_vm4, %v2582_v26, %v2591_v58  ;;  %v2601_v11 = vsel %vm2512_vm4, %v2591_v58, %v2600_v1  ;;  %v2645_v26 = vor.u32 %v2644_v62, %v2641_v40  ;;  %v12260_v58 = vld [vmem:[%s11815_s27 + $0x98] ss:$0 sps:$4 sm:$0x33]  }
 0x136   : > { %10474 = vmatmul.mubr.msk.bf16.gmra.mrb[32].mxu0 %vm16335_vm2, %v2235_v61  ;;  %v2606_v61 = vshll.u32 %v12134_v20, 16 }
 0x137   : > { %10479 = vmatprep.mubr.msk.bf16.mxu0 %vm16335_vm2, %v2529_v3  ;;  %v2615_v3 = vshll.u32 %v12138_v7, 16  ;;  %v2987_v7 = vrot.slane %v12158_v30, 2 }
 0x138   : > { %v2608_v33 = vrot.slane %v2606_v61, 2  ;;  %v2668_v61 = vrot.slane %v2666_v51, 1 }
 0x139   : > { %v2617_v4 = vrot.slane %v2615_v3, 2  ;;  %v2675_v3 = vshrl.u32 %v12260_v58, 16 }
 0x13a   : > { %v2609_v18 = vor.u32 %v2608_v33, %v2605_v5  ;;  %v2953_v33 = vld [vmem:[%s11815_s27 + $0x8] sm:$0xc] }
 0x13b   : > { %v2618_v13 = vor.u32 %v2617_v4, %v2614_v16  ;;  %v2677_v16 = vrot.slane %v2675_v3, 1  ;;  %v9553_v19 = vcombine.low %v2953_v33, %v12060_v43  ;;  %v2965_v43 = vrot.slane %v12081_v55, 2 }
 0x13c   : > { %v2969_v55 = vrot.slane %v12095_v63, 2  ;;  %v2975_v63 = vrot.slane %v12122_v12, 2  ;;  %v2983_v12 = vrot.slane %v12146_v24, 2 }
 0x13d   : > { %v2619_v31 = vsel %vm2512_vm4, %v2609_v18, %v2618_v13 }
 0x13e   : > { %10480 = vmatmul.mubr.msk.bf16.vlgmr.msra.gmra.mrb[0].mxu0 %vm16335_vm2, %v2538_v6  ;;  %v2624_v6 = vshll.u32 %v12146_v24, 16  ;;  %v2976_v53 = vsel %vm2959_vm5, %v2973_v34, %v2975_v63  ;;  %v2984_v62 = vsel %vm2959_vm5, %v2981_v10, %v2983_v12  ;;  %v2991_v24 = vrot.slane %v12170_v47, 2 }
 0x13f   : > { %10516 = vmatpush3.bf16.msra.mxu0 %v3052_v22  ;;  %10483 = vmatprep.mubr.msk.bf16.mxu0 %vm16335_vm2, %v2547_v27  ;;  %v2633_v22 = vshll.u32 %v12150_v28, 16  ;;  %v2610_v27 = vsel %vm2512_vm4, %v2600_v1, %v2609_v18  ;;  %v2671_v1 = vrot.slane %v2669_v44, 2  ;;  %v2995_v47 = vrot.slane %v12260_v58, 2 }
 0x140   : > { %11591 = vmatprep.subr.msk.bf16.mxu0 %vm16334_vm0, %v12208_v29  ;;  %v2626_v23 = vrot.slane %v2624_v6, 2 }
 0x141   : > { %v2635_v32 = vrot.slane %v2633_v22, 2  ;;  %v2672_v5 = vor.u32 %v2671_v1, %v2668_v61  ;;  %v12362_v1 = vld [vmem:[%s11815_s27 + $0x30] sm:$0xff]  }
 0x142   : > { %v2627_v0 = vor.u32 %v2626_v23, %v2623_v15  ;;  %v2963_v15 = vrot.slane %v12077_v52, 2  ;;  %v2967_v52 = vrot.slane %v12089_v59, 2  ;;  %v3406_v33 = vrot.slane %v12362_v1, 2 }
 0x143   : > { %v2673_v18 = vsel %vm2512_vm4, %v2663_v2, %v2672_v5 }
 0x144   : > { %v2964_v23 = vsel %vm2959_vm5, %v2961_v21, %v2963_v15  ;;  %v2966_v46 = vsel %vm2959_vm5, %v2963_v15, %v2965_v43  ;;  %v12399_v15 = vld [vmem:[%s11815_s27 + $0x58] sm:$0xff]  }
 0x146   : > { %10484 = vmatmul.mubr.msk.bf16.gmra.mrb[4].mxu0 %vm16335_vm2, %v2556_v50  ;;  %v2636_v50 = vor.u32 %v2635_v32, %v2632_v39  ;;  %v12287_v39 = vld [vmem:[%s16328_s0 + $0xe] sm:$0x3]  ;;  %v2970_v32 = vsel %vm2959_vm5, %v2967_v52, %v2969_v55 }
 0x147   : > { %10487 = vmatprep.mubr.msk.bf16.mxu0 %vm16335_vm2, %v2565_v38  ;;  %v2628_v38 = vsel %vm2512_vm4, %v2618_v13, %v2627_v0  ;;  %v2960_v13 = vrot.slane %v9553_v19, 2  ;;  %v12387_v19 = vld [vmem:[%s11815_s27 + $0x48] sm:$0xff]  }
 0x148   : > { %v2637_v14 = vsel %vm2512_vm4, %v2627_v0, %v2636_v50  ;;  %v2971_v0 = vrot.slane %v12110_v8, 2  ;;  %v2979_v8 = vrot.slane %v12134_v20, 2 }
 0x14a   : > { %v2972_v36 = vsel %vm2959_vm5, %v2969_v55, %v2971_v0  ;;  %v2974_v59 = vsel %vm2959_vm5, %v2971_v0, %v2973_v34  ;;  %v2982_v40 = vsel %vm2959_vm5, %v2979_v8, %v2981_v10  ;;  %v12419_v0 = vld [vmem:[%s11815_s27 + $0x70] sm:$0xff]  }
 0x14e   : > { %10488 = vmatmul.mubr.msk.bf16.gmra.mrb[8].mxu0 %vm16335_vm2, %v2574_v49  ;;  %v2654_v49 = vor.u32 %v2653_v25, %v2650_v42 }
 0x14f   : > { %10491 = vmatprep.mubr.msk.bf16.mxu0 %vm16335_vm2, %v2583_v54  ;;  %v2646_v54 = vsel %vm2512_vm4, %v2636_v50, %v2645_v26  ;;  %v2977_v50 = vrot.slane %v12126_v17, 2  ;;  %v2985_v17 = vrot.slane %v12150_v28, 2  ;;  %v2993_v28 = vrot.slane %v12173_v48, 2 }
 0x150   : > { %v2655_v60 = vsel %vm2512_vm4, %v2645_v26, %v2654_v49  ;;  %v3267_v26 = vld [vmem:[%s11815_s27 + $0x10] sm:$0xc] }
 0x151   : > { %v2978_v37 = vsel %vm2959_vm5, %v2975_v63, %v2977_v50  ;;  %v2986_v20 = vsel %vm2959_vm5, %v2983_v12, %v2985_v17  ;;  %v2988_v42 = vsel %vm2959_vm5, %v2985_v17, %v2987_v7  ;;  %v12338_v45 = vcombine.low %v3267_v26, %v12333_v41  ;;  %v12443_v12 = vld [vmem:[%s11815_s27 + $0x90] sm:$0xff]   ;;  %v12446_v17 = vld [vmem:[%s11815_s27 + $0x98] sm:$0xff]  }
 0x152   : > { %v2996_v44 = vsel %vm2959_vm5, %v2993_v28, %v2995_v47 }
 0x153   : > { %v3399_v48 = vrot.slane %v12338_v45, 2 }
 0x156   : > { %10492 = vmatmul.mubr.msk.bf16.gmra.mrb[12].mxu0 %vm16335_vm2, %v2592_v9  ;;  %v2678_v9 = vshll.u32 %v12260_v58, 16  ;;  %v3404_v58 = vrot.slane %v12354_v57, 2 }
 0x157   : > { %10495 = vmatprep.mubr.msk.bf16.mxu0 %vm16335_vm2, %v2601_v11  ;;  %v2664_v11 = vsel %vm2512_vm4, %v2654_v49, %v2663_v2  ;;  %v12341_v49 = vld [vmem:[%s11815_s27 + $0x18] sm:$0xff]   ;;  %v3938_v2 = vsel %vm16334_vm0, %v12287_v39, 0 }
 0x158   : > { %v2680_v4 = vrot.slane %v2678_v9, 2  ;;  %v3400_v51 = vrot.slane %v12341_v49, 2  ;;  %v12368_v9 = vld [vmem:[%s11815_s27 + $0x38] sm:$0xff]  }
 0x15a   : > { %v2681_v6 = vor.u32 %v2680_v4, %v2677_v16  ;;  %v3401_v56 = vsel %vm2959_vm5, %v3399_v48, %v3400_v51  ;;  %v3407_v16 = vsel %vm2959_vm5, %v3404_v58, %v3406_v33  ;;  %v12383_v4 = vld [vmem:[%s11815_s27 + $0x40] sm:$0xff]  }
 0x15c   : > { %v2682_v22 = vsel %vm2512_vm4, %v2672_v5, %v2681_v6  ;;  %v12373_v5 = vld [vmem:[%s16328_s0 + $0x10] sm:$0x3]  ;;  %v3410_v6 = vrot.slane %v12383_v4, 2 }
 0x15e   : > { %10496 = vmatmul.mubr.msk.bf16.gmra.mrb[16].mxu0 %vm16335_vm2, %v2610_v27  ;;  %v2962_v27 = vsel %vm2959_vm5, %v2960_v13, %v2961_v21  ;;  %v3412_v13 = vrot.slane %v12387_v19, 2 }
 0x15f   : > { %10499 = vmatprep.mubr.msk.bf16.mxu0 %vm16335_vm2, %v2619_v31  ;;  %v3491_v31 = vsel %vm16334_vm0, %v12208_v29, 0  ;;  %v2968_v29 = vsel %vm2959_vm5, %v2965_v43, %v2967_v52  ;;  %v12411_v52 = vld [vmem:[%s11815_s27 + $0x68] sm:$0xff]  }
 0x166   : > { %10500 = vmatmul.mubr.msk.bf16.gmra.mrb[20].mxu0 %vm16335_vm2, %v2628_v38  ;;  %v2980_v38 = vsel %vm2959_vm5, %v2977_v50, %v2979_v8  ;;  %v12435_v8 = vld [vmem:[%s11815_s27 + $0x88] sm:$0xff]  }
 0x167   : > { %10503 = vmatprep.mubr.msk.bf16.mxu0 %vm16335_vm2, %v2637_v14  ;;  %v2989_v14 = vrot.slane %v12162_v35, 2  ;;  %v2994_v35 = vsel %vm2959_vm5, %v2991_v24, %v2993_v28 }
 0x169   : > { %v2990_v25 = vsel %vm2959_vm5, %v2987_v7, %v2989_v14  ;;  %v2992_v30 = vsel %vm2959_vm5, %v2989_v14, %v2991_v24  ;;  %v3432_v7 = vrot.slane %v12446_v17, 2  ;;  %v3714_v14 = vshrl.u32 %v12338_v45, 16 }
 0x16a   : > { %v3725_v24 = vshll.u32 %v12341_v49, 16 }
 0x16e   : > { %10504 = vmatmul.mubr.msk.bf16.gmra.mrb[24].mxu0 %vm16335_vm2, %v2646_v54  ;;  %v12350_v54 = vld [vmem:[%s11815_s27 + $0x20] sm:$0xff]  }
 0x16f   : > { %10507 = vmatprep.mubr.msk.bf16.mxu0 %vm16335_vm2, %v2655_v60  ;;  %v3402_v60 = vrot.slane %v12350_v54, 2 }
 0x171   : > { %v3403_v61 = vsel %vm2959_vm5, %v3400_v51, %v3402_v60  ;;  %v3405_v3 = vsel %vm2959_vm5, %v3402_v60, %v3404_v58  ;;  %v3727_v51 = vrot.slane %v3725_v24, 3 }
 0x176   : > { %10508 = vmatmul.mubr.msk.bf16.gmra.mrb[28].mxu0 %vm16335_vm2, %v2664_v11  ;;  %v3408_v11 = vrot.slane %v12368_v9, 2 }
 0x177   : > { %10511 = vmatprep.mubr.msk.bf16.mxu0 %vm16335_vm2, %v2673_v18 }
 0x178   : > { %v3409_v18 = vsel %vm2959_vm5, %v3406_v33, %v3408_v11  ;;  %v3411_v21 = vsel %vm2959_vm5, %v3408_v11, %v3410_v6 }
 0x17e   : > { %10512 = vmatmul.mubr.msk.bf16.gmra.mrb[32].mxu0 %vm16335_vm2, %v2682_v22  ;;  %v12395_v22 = vld [vmem:[%s11815_s27 + $0x50] sm:$0xff]  }
 0x17f   : > { %10517 = vmatprep.mubr.msk.bf16.mxu0 %vm16335_vm2, %v2962_v27  ;;  %v3413_v27 = vsel %vm2959_vm5, %v3410_v6, %v3412_v13  ;;  %v3414_v43 = vrot.slane %v12395_v22, 2 }
 0x186   : > { %10518 = vmatmul.mubr.msk.bf16.vlgmr.msra.gmra.mrb[0].mxu0 %vm16335_vm2, %v2964_v23  ;;  %v3416_v23 = vrot.slane %v12399_v15, 2 }
 0x187   : > { %10554 = vmatpush3.bf16.msra.mxu0 %v3491_v31  ;;  %10521 = vmatprep.mubr.msk.bf16.mxu0 %vm16335_vm2, %v2966_v46  ;;  %v3415_v31 = vsel %vm2959_vm5, %v3412_v13, %v3414_v43  ;;  %v12407_v46 = vld [vmem:[%s11815_s27 + $0x60] sm:$0xff]  }
 0x188   : > { %11592 = vmatprep.subr.msk.bf16.mxu0 %vm16334_vm0, %v12287_v39  ;;  %v3417_v39 = vsel %vm2959_vm5, %v3414_v43, %v3416_v23  ;;  %v3418_v55 = vrot.slane %v12407_v46, 2 }
 0x18e   : > { %10522 = vmatmul.mubr.msk.bf16.gmra.mrb[4].mxu0 %vm16335_vm2, %v2968_v29  ;;  %v3420_v29 = vrot.slane %v12411_v52, 2 }
 0x18f   : > { %10525 = vmatprep.mubr.msk.bf16.mxu0 %vm16335_vm2, %v2970_v32  ;;  %v3419_v32 = vsel %vm2959_vm5, %v3416_v23, %v3418_v55  ;;  %v3758_v23 = vshrl.u32 %v12368_v9, 16 }
 0x190   : > { %v3421_v34 = vsel %vm2959_vm5, %v3418_v55, %v3420_v29 }
 0x196   : > { %10526 = vmatmul.mubr.msk.bf16.gmra.mrb[8].mxu0 %vm16335_vm2, %v2972_v36  ;;  %v12423_v36 = vld [vmem:[%s11815_s27 + $0x78] sm:$0xff]  }
 0x197   : > { %10529 = vmatprep.mubr.msk.bf16.mxu0 %vm16335_vm2, %v2974_v59  ;;  %v3422_v59 = vrot.slane %v12419_v0, 2  ;;  %v3424_v63 = vrot.slane %v12423_v36, 2 }
 0x199   : > { %v3423_v50 = vsel %vm2959_vm5, %v3420_v29, %v3422_v59 }
 0x19e   : > { %10530 = vmatmul.mubr.msk.bf16.gmra.mrb[12].mxu0 %vm16335_vm2, %v2976_v53  ;;  %v12431_v53 = vld [vmem:[%s11815_s27 + $0x80] sm:$0xff]  }
 0x19f   : > { %10533 = vmatprep.mubr.msk.bf16.mxu0 %vm16335_vm2, %v2978_v37  ;;  %v3425_v37 = vsel %vm2959_vm5, %v3422_v59, %v3424_v63  ;;  %v3426_v10 = vrot.slane %v12431_v53, 2  ;;  %v3760_v59 = vrot.slane %v3758_v23, 2  ;;  %v3821_v23 = vshrl.u32 %v12419_v0, 16 }
 0x1a6   : > { %10534 = vmatmul.mubr.msk.bf16.gmra.mrb[16].mxu0 %vm16335_vm2, %v2980_v38  ;;  %v3428_v38 = vrot.slane %v12435_v8, 2 }
 0x1a7   : > { %10537 = vmatprep.mubr.msk.bf16.mxu0 %vm16335_vm2, %v2982_v40  ;;  %v3427_v40 = vsel %vm2959_vm5, %v3424_v63, %v3426_v10 }
 0x1ae   : > { %10538 = vmatmul.mubr.msk.bf16.gmra.mrb[20].mxu0 %vm16335_vm2, %v2984_v62  ;;  %v3429_v62 = vsel %vm2959_vm5, %v3426_v10, %v3428_v38  ;;  %v3770_v10 = vshll.u32 %v12383_v4, 16 }
 0x1af   : > { %10541 = vmatprep.mubr.msk.bf16.mxu0 %vm16335_vm2, %v2986_v20  ;;  %v3430_v20 = vrot.slane %v12443_v12, 2 }
 0x1b1   : > { %v3431_v28 = vsel %vm2959_vm5, %v3428_v38, %v3430_v20  ;;  %v3433_v26 = vsel %vm2959_vm5, %v3430_v20, %v3432_v7 }
 0x1b6   : > { %10542 = vmatmul.mubr.msk.bf16.gmra.mrb[24].mxu0 %vm16335_vm2, %v2988_v42  ;;  %v3717_v42 = vshll.u32 %v12338_v45, 16  ;;  %v3731_v45 = vshrl.u32 %v12350_v54, 16 }
 0x1b7   : > { %10545 = vmatprep.mubr.msk.bf16.mxu0 %vm16335_vm2, %v2990_v25  ;;  %v3722_v25 = vshrl.u32 %v12341_v49, 16 }
 0x1b8   : > { %v3719_v47 = vrot.slane %v3717_v42, 3  ;;  %v3733_v33 = vrot.slane %v3731_v45, 2 }
 0x1b9   : > { %v3724_v48 = vrot.slane %v3722_v25, 2 }
 0x1bb   : > { %v3728_v58 = vor.u32 %v3727_v51, %v3724_v48 }
 0x1be   : > { %10546 = vmatmul.mubr.msk.bf16.gmra.mrb[28].mxu0 %vm16335_vm2, %v2992_v30  ;;  %v11745_v30 = vld [vmem:[%s11815_s27 + $0xa0] ss:$0 sps:$4 sm:$0x33]  }
 0x1bf   : > { %10549 = vmatprep.mubr.msk.bf16.mxu0 %vm16335_vm2, %v2994_v35  ;;  %v3716_v35 = vrot.slane %v3714_v14, 2 }
 0x1c1   : > { %v3720_v60 = vor.u32 %v3719_v47, %v3716_v35  ;;  %v3794_v35 = vshrl.u32 %v12399_v15, 16  ;;  %v3797_v47 = vshll.u32 %v12399_v15, 16 }
 0x1c6   : > { %10550 = vmatmul.mubr.msk.bf16.gmra.mrb[32].mxu0 %vm16335_vm2, %v2996_v44  ;;  %v3434_v44 = vrot.slane %v11745_v30, 2 }
 0x1c7   : > { %10555 = vmatprep.mubr.msk.bf16.mxu0 %vm16335_vm2, %v3401_v56  ;;  %v3734_v56 = vshll.u32 %v12350_v54, 16 }
 0x1c9   : > { %v3736_v11 = vrot.slane %v3734_v56, 3  ;;  %v3796_v56 = vrot.slane %v3794_v35, 2  ;;  %v3860_v35 = vshll.u32 %v12443_v12, 16 }
 0x1cb   : > { %v3737_v13 = vor.u32 %v3736_v11, %v3733_v33  ;;  %v3812_v33 = vshrl.u32 %v12411_v52, 16  ;;  %v3815_v11 = vshll.u32 %v12411_v52, 16 }
 0x1ce   : > { %10556 = vmatmul.mubr.msk.bf16.vlgmr.msra.gmra.mrb[0].mxu0 %vm16335_vm2, %v3403_v61  ;;  %v3740_v61 = vshrl.u32 %v12354_v57, 16 }
 0x1cf   : > { %10592 = vmatpush3.bf16.msra.mxu0 %v3938_v2  ;;  %10559 = vmatprep.mubr.msk.bf16.mxu0 %vm16335_vm2, %v3405_v3  ;;  %v3743_v2 = vshll.u32 %v12354_v57, 16  ;;  %v3435_v3 = vsel %vm2959_vm5, %v3432_v7, %v3434_v44  ;;  %v3772_v7 = vrot.slane %v3770_v10, 3 }
 0x1d0   : > { %11593 = vmatprep.subr.msk.bf16.mxu0 %vm16334_vm0, %v12373_v5 }
 0x1d1   : > { %v3745_v6 = vrot.slane %v3743_v2, 3  ;;  %v3806_v2 = vshll.u32 %v12407_v46, 16 }
 0x1d6   : > { %10560 = vmatmul.mubr.msk.bf16.gmra.mrb[4].mxu0 %vm16335_vm2, %v3407_v16  ;;  %v3729_v16 = vsel %vm3712_vm6, %v3720_v60, %v3728_v58  ;;  %v3799_v60 = vrot.slane %v3797_v47, 3 }
 0x1d7   : > { %10563 = vmatprep.mubr.msk.bf16.mxu0 %vm16335_vm2, %v3409_v18  ;;  %v3742_v18 = vrot.slane %v3740_v61, 2  ;;  %v3803_v61 = vshrl.u32 %v12407_v46, 16 }
 0x1d9   : > { %v3746_v43 = vor.u32 %v3745_v6, %v3742_v18  ;;  %v3805_v18 = vrot.slane %v3803_v61, 2  ;;  %v3808_v6 = vrot.slane %v3806_v2, 3 }
 0x1de   : > { %10564 = vmatmul.mubr.msk.bf16.gmra.mrb[8].mxu0 %vm16335_vm2, %v3411_v21  ;;  %v3749_v21 = vshrl.u32 %v12362_v1, 16 }
 0x1df   : > { %10567 = vmatprep.mubr.msk.bf16.mxu0 %vm16335_vm2, %v3413_v27  ;;  %v3752_v27 = vshll.u32 %v12362_v1, 16 }
 0x1e0   : > { %v3751_v55 = vrot.slane %v3749_v21, 2  ;;  %v3814_v21 = vrot.slane %v3812_v33, 2 }
 0x1e1   : > { %v3754_v29 = vrot.slane %v3752_v27, 3  ;;  %v3817_v27 = vrot.slane %v3815_v11, 3 }
 0x1e6   : > { %10568 = vmatmul.mubr.msk.bf16.gmra.mrb[12].mxu0 %vm16335_vm2, %v3415_v31  ;;  %v3761_v31 = vshll.u32 %v12368_v9, 16 }
 0x1e7   : > { %10571 = vmatprep.mubr.msk.bf16.mxu0 %vm16335_vm2, %v3417_v39  ;;  %v3738_v39 = vsel %vm3712_vm6, %v3728_v58, %v3737_v13 }
 0x1e8   : > { %v3763_v63 = vrot.slane %v3761_v31, 3  ;;  %v3824_v31 = vshll.u32 %v12419_v0, 16 }
 0x1ea   : > { %v3764_v38 = vor.u32 %v3763_v63, %v3760_v59  ;;  %v3826_v59 = vrot.slane %v3824_v31, 3 }
 0x1ee   : > { %10572 = vmatmul.mubr.msk.bf16.gmra.mrb[16].mxu0 %vm16335_vm2, %v3419_v32  ;;  %v4252_v32 = vsel %vm16334_vm0, %v12373_v5, 0 }
 0x1ef   : > { %10575 = vmatprep.mubr.msk.bf16.mxu0 %vm16335_vm2, %v3421_v34  ;;  %v3747_v34 = vsel %vm3712_vm6, %v3737_v13, %v3746_v43 }
 0x1f6   : > { %10576 = vmatmul.mubr.msk.bf16.gmra.mrb[20].mxu0 %vm16335_vm2, %v3423_v50  ;;  %v3755_v50 = vor.u32 %v3754_v29, %v3751_v55  ;;  %v3830_v55 = vshrl.u32 %v12423_v36, 16  ;;  %v3833_v29 = vshll.u32 %v12423_v36, 16 }
 0x1f7   : > { %10579 = vmatprep.mubr.msk.bf16.mxu0 %vm16335_vm2, %v3425_v37  ;;  %v3767_v37 = vshrl.u32 %v12383_v4, 16 }
 0x1f8   : > { %v3756_v5 = vsel %vm3712_vm6, %v3746_v43, %v3755_v50  ;;  %v3765_v14 = vsel %vm3712_vm6, %v3755_v50, %v3764_v38  ;;  %v3809_v43 = vor.u32 %v3808_v6, %v3805_v18  ;;  %v3832_v50 = vrot.slane %v3830_v55, 2  ;;  %v4153_v18 = vld [vmem:[%s11815_s27 + $0x10] sm:$0x8] }
 0x1f9   : > { %v3769_v20 = vrot.slane %v3767_v37, 2  ;;  %v3835_v37 = vrot.slane %v3833_v29, 3 }
 0x1fb   : > { %v3773_v24 = vor.u32 %v3772_v7, %v3769_v20  ;;  %v3851_v20 = vshll.u32 %v12435_v8, 16 }
 0x1fd   : > { %v3774_v48 = vsel %vm3712_vm6, %v3764_v38, %v3773_v24  ;;  %v3839_v38 = vshrl.u32 %v12431_v53, 16 }
 0x1fe   : > { %10580 = vmatmul.mubr.msk.bf16.gmra.mrb[24].mxu0 %vm16335_vm2, %v3427_v40  ;;  %v3776_v40 = vshrl.u32 %v12387_v19, 16 }
 0x1ff   : > { %10583 = vmatprep.mubr.msk.bf16.mxu0 %vm16335_vm2, %v3429_v62  ;;  %v3779_v62 = vshll.u32 %v12387_v19, 16 }
 0x200   : > { %v3778_v42 = vrot.slane %v3776_v40, 2  ;;  %v3842_v40 = vshll.u32 %v12431_v53, 16 }
 0x201   : > { %v3781_v25 = vrot.slane %v3779_v62, 3  ;;  %v3836_v62 = vor.u32 %v3835_v37, %v3832_v50 }
 0x203   : > { %v3782_v30 = vor.u32 %v3781_v25, %v3778_v42  ;;  %v3844_v42 = vrot.slane %v3842_v40, 3 }
 0x205   : > { %v3783_v45 = vsel %vm3712_vm6, %v3773_v24, %v3782_v30 }
 0x206   : > { %10584 = vmatmul.mubr.msk.bf16.gmra.mrb[28].mxu0 %vm16335_vm2, %v3431_v28  ;;  %v3785_v28 = vshrl.u32 %v12395_v22, 16 }
 0x207   : > { %10587 = vmatprep.mubr.msk.bf16.mxu0 %vm16335_vm2, %v3433_v26  ;;  %v3788_v26 = vshll.u32 %v12395_v22, 16 }
 0x208   : > { %v3787_v51 = vrot.slane %v3785_v28, 2  ;;  %v3853_v28 = vrot.slane %v3851_v20, 3 }
 0x209   : > { %v3790_v44 = vrot.slane %v3788_v26, 3 }
 0x20b   : > { %v3791_v58 = vor.u32 %v3790_v44, %v3787_v51  ;;  %v3869_v51 = vshll.u32 %v12446_v17, 16 }
 0x20d   : > { %v3871_v2 = vrot.slane %v3869_v51, 3 }
 0x20e   : > { %10588 = vmatmul.mubr.msk.bf16.gmra.mrb[32].mxu0 %vm16335_vm2, %v3435_v3  ;;  %v3800_v3 = vor.u32 %v3799_v60, %v3796_v56  ;;  %v3862_v56 = vrot.slane %v3860_v35, 3  ;;  %v12526_v60 = vld [vmem:[%s11815_s27 + $0xa0] ss:$0 sps:$4 sm:$0x77]  }
 0x20f   : > { %10593 = vmatprep.mubr.msk.bf16.mxu0 %vm16335_vm2, %v3729_v16  ;;  %v3792_v16 = vsel %vm3712_vm6, %v3782_v30, %v3791_v58  ;;  %v3857_v30 = vshrl.u32 %v12443_v12, 16  ;;  %v3875_v33 = vshrl.u32 %v12526_v60, 16  ;;  %v3878_v11 = vshll.u32 %v12526_v60, 16 }
 0x210   : > { %v3801_v13 = vsel %vm3712_vm6, %v3791_v58, %v3800_v3 }
 0x216   : > { %10594 = vmatmul.mubr.msk.bf16.vlgmr.msra.gmra.mrb[0].mxu0 %vm16335_vm2, %v3738_v39  ;;  %v3818_v39 = vor.u32 %v3817_v27, %v3814_v21  ;;  %v3880_v21 = vrot.slane %v3878_v11, 3 }
 0x217   : > { %10630 = vmatpush3.bf16.msra.mxu0 %v4252_v32  ;;  %10597 = vmatprep.mubr.msk.bf16.mxu0 %vm16335_vm2, %v3747_v34  ;;  %v3810_v32 = vsel %vm3712_vm6, %v3800_v3, %v3809_v43  ;;  %v3823_v34 = vrot.slane %v3821_v23, 2 }
 0x218   : > { %v3819_v63 = vsel %vm3712_vm6, %v3809_v43, %v3818_v39  ;;  %v9631_v43 = vcombine.low %v4153_v18, %v12333_v41  ;;  %v4165_v41 = vrot.slane %v12354_v57, 3  ;;  %v4173_v57 = vrot.slane %v12387_v19, 3 }
 0x219   : > { %v3827_v10 = vor.u32 %v3826_v59, %v3823_v34  ;;  %v4181_v19 = vrot.slane %v12411_v52, 3  ;;  %v4189_v52 = vrot.slane %v12435_v8, 3 }
 0x21a   : > { %v4160_v31 = vrot.slane %v9631_v43, 3 }
 0x21b   : > { %v3828_v7 = vsel %vm3712_vm6, %v3818_v39, %v3827_v10  ;;  %v3837_v25 = vsel %vm3712_vm6, %v3827_v10, %v3836_v62  ;;  %v4161_v39 = vrot.slane %v12341_v49, 3  ;;  %v4167_v49 = vrot.slane %v12362_v1, 3 }
 0x21c   : > { %v4175_v1 = vrot.slane %v12395_v22, 3  ;;  %v4183_v22 = vrot.slane %v12419_v0, 3  ;;  %v4191_v0 = vrot.slane %v12443_v12, 3 }
 0x21d   : > { %v4162_v29 = vsel %vm4159_vm7, %v4160_v31, %v4161_v39  ;;  %v4168_v50 = vsel %vm4159_vm7, %v4165_v41, %v4167_v49 }
 0x21e   : > { %10598 = vmatmul.mubr.msk.bf16.gmra.mrb[4].mxu0 %vm16335_vm2, %v3756_v5  ;;  %v3848_v5 = vshrl.u32 %v12435_v8, 16  ;;  %v4176_v40 = vsel %vm4159_vm7, %v4173_v57, %v4175_v1 }
 0x21f   : > { %10601 = vmatprep.mubr.msk.bf16.mxu0 %vm16335_vm2, %v3765_v14  ;;  %v3841_v14 = vrot.slane %v3839_v38, 2 }
 0x220   : > { %v3850_v24 = vrot.slane %v3848_v5, 2 }
 0x221   : > { %v3845_v26 = vor.u32 %v3844_v42, %v3841_v14 }
 0x222   : > { %v3854_v47 = vor.u32 %v3853_v28, %v3850_v24  ;;  %v4192_v24 = vsel %vm4159_vm7, %v4189_v52, %v4191_v0 }
 0x223   : > { %v3846_v44 = vsel %vm3712_vm6, %v3836_v62, %v3845_v26 }
 0x224   : > { %v3855_v58 = vsel %vm3712_vm6, %v3845_v26, %v3854_v47  ;;  %v226_v26 = vlaneseq }
 0x226   : > { %10602 = vmatmul.mubr.msk.bf16.gmra.mrb[8].mxu0 %vm16335_vm2, %v3774_v48  ;;  %v3866_v48 = vshrl.u32 %v12446_v17, 16 }
 0x227   : > { %10605 = vmatprep.mubr.msk.bf16.mxu0 %vm16335_vm2, %v3783_v45  ;;  %v3859_v45 = vrot.slane %v3857_v30, 2  ;;  %v12595_v30 = vshrl.u32 %v226_v26, 7 }
 0x228   : > { %v3868_v61 = vrot.slane %v3866_v48, 2 }
 0x229   : > { %v3863_v3 = vor.u32 %v3862_v56, %v3859_v45  ;;  %v229_v12 = vadd.s32 16, %v12595_v30  ;;  %v230_v51 = vadd.s32 24, %v12595_v30  ;;  %v228_v56 = vadd.s32 8, %v12595_v30 }
 0x22a   : > { %v231_v11 = vadd.s32 32, %v12595_v30  ;;  %v12628_v31 = vadd.s32 40, %v12595_v30 }
 0x22b   : > { %v3864_v6 = vsel %vm3712_vm6, %v3854_v47, %v3863_v3  ;;  %v12602_v47 = vmul.u32.u64.low 3817748708, %v12595_v30  ;;  %v12603_v48 = vmul.u32.u64.high 3817748708, %v12595_v30, %v12602_v47 }
 0x22e   : > { %10606 = vmatmul.mubr.msk.bf16.gmra.mrb[12].mxu0 %vm16335_vm2, %v3792_v16  ;;  %v3872_v16 = vor.u32 %v3871_v2, %v3868_v61  ;;  %v233_v61 = vadd.s32 48, %v12595_v30 }
 0x22f   : > { %10609 = vmatprep.mubr.msk.bf16.mxu0 %vm16335_vm2, %v3801_v13  ;;  %v3877_v13 = vrot.slane %v3875_v33, 2 }
 0x230   : > { %v3873_v27 = vsel %vm3712_vm6, %v3863_v3, %v3872_v16  ;;  %v12613_v2 = vmul.u32.u64.low 3817748708, %v228_v56  ;;  %v12614_v3 = vmul.u32.u64.high 3817748708, %v228_v56, %v12613_v2 }
 0x231   : > { %v3881_v23 = vor.u32 %v3880_v21, %v3877_v13  ;;  %v12621_v13 = vadd.s32 56, %v12595_v30 }
 0x233   : > { %v3882_v55 = vsel %vm3712_vm6, %v3872_v16, %v3881_v23  ;;  %v12624_v43 = vmul.u32.u64.low 3817748708, %v231_v11  ;;  %v12625_v23 = vmul.u32.u64.high 3817748708, %v231_v11, %v12624_v43 }
 0x236   : > { %10610 = vmatmul.mubr.msk.bf16.gmra.mrb[16].mxu0 %vm16335_vm2, %v3810_v32  ;;  %v4163_v32 = vrot.slane %v12350_v54, 3  ;;  %v4171_v54 = vrot.slane %v12383_v4, 3  ;;  %v4179_v4 = vrot.slane %v12407_v46, 3  ;;  %v4187_v46 = vrot.slane %v12431_v53, 3 }
 0x237   : > { %10613 = vmatprep.mubr.msk.bf16.mxu0 %vm16335_vm2, %v3819_v63  ;;  %v4169_v63 = vrot.slane %v12368_v9, 3  ;;  %v4177_v9 = vrot.slane %v12399_v15, 3  ;;  %v4185_v15 = vrot.slane %v12423_v36, 3  ;;  %v4193_v36 = vrot.slane %v12446_v17, 3 }
 0x238   : > { %v4164_v34 = vsel %vm4159_vm7, %v4161_v39, %v4163_v32  ;;  %v4166_v59 = vsel %vm4159_vm7, %v4163_v32, %v4165_v41  ;;  %v4174_v38 = vsel %vm4159_vm7, %v4171_v54, %v4173_v57  ;;  %v4182_v20 = vsel %vm4159_vm7, %v4179_v4, %v4181_v19 }
 0x239   : > { %v4170_v37 = vsel %vm4159_vm7, %v4167_v49, %v4169_v63  ;;  %v4172_v10 = vsel %vm4159_vm7, %v4169_v63, %v4171_v54  ;;  %v4178_v62 = vsel %vm4159_vm7, %v4175_v1, %v4177_v9  ;;  %v4180_v5 = vsel %vm4159_vm7, %v4177_v9, %v4179_v4 }
 0x23a   : > { %v4186_v14 = vsel %vm4159_vm7, %v4183_v22, %v4185_v15  ;;  %v4188_v42 = vsel %vm4159_vm7, %v4185_v15, %v4187_v46  ;;  %v4194_v28 = vsel %vm4159_vm7, %v4191_v0, %v4193_v36  ;;  %v4195_v53 = vrot.slane %v12526_v60, 3 }
 0x23b   : > { %v12598_v17 = vmul.u32.u64.low 3817748708, %v229_v12  ;;  %v12599_v35 = vmul.u32.u64.high 3817748708, %v229_v12, %v12598_v17  ;;  %v12631_v39 = vadd.s32 80, %v12595_v30  ;;  %v12659_v4 = vadd.s32 88, %v12595_v30 }
 0x23c   : > { %v4196_v8 = vsel %vm4159_vm7, %v4193_v36, %v4195_v53  ;;  %v12643_v49 = vmul.u32.u64.low 3817748708, %v12628_v31  ;;  %v12644_v63 = vmul.u32.u64.high 3817748708, %v12628_v31, %v12643_v49  ;;  %v12698_v17 = vadd.s32 120, %v12595_v30 }
 0x23d   : > { %v291_v60 = vshrl.u32 %v12599_v35, 4  ;;  %v12682_v0 = vmul.u32.u64.low 3817748708, %v12659_v4  ;;  %v12683_v36 = vmul.u32.u64.high 3817748708, %v12659_v4, %v12682_v0 }
 0x23e   : > { %10614 = vmatmul.mubr.msk.bf16.gmra.mrb[20].mxu0 %vm16335_vm2, %v3828_v7  ;;  %v4184_v7 = vsel %vm4159_vm7, %v4181_v19, %v4183_v22  ;;  %v12665_v22 = vadd.s32 72, %v12595_v30 }
 0x23f   : > { %10617 = vmatprep.mubr.msk.bf16.mxu0 %vm16335_vm2, %v3837_v25  ;;  %v4190_v25 = vsel %vm4159_vm7, %v4187_v46, %v4189_v52  ;;  %v292_v33 = vmul.u32 18, %v291_v60  ;;  %v324_v52 = vshrl.u32 %v12644_v63, 4 }
 0x241   : > { %v325_v35 = vmul.u32 18, %v324_v52 }
 0x246   : > { %10618 = vmatmul.mubr.msk.bf16.gmra.mrb[24].mxu0 %vm16335_vm2, %v3846_v44  ;;  %v12606_v44 = vmul.u32.u64.low 3817748708, %v230_v51  ;;  %v12607_v45 = vmul.u32.u64.high 3817748708, %v230_v51, %v12606_v44 }
 0x247   : > { %10621 = vmatprep.mubr.msk.bf16.mxu0 %vm16335_vm2, %v3855_v58  ;;  %v269_v58 = vshrl.u32 %v12603_v48, 4 }
 0x248   : > { %v302_v21 = vshrl.u32 %v12607_v45, 4 }
 0x249   : > { %v270_v16 = vmul.u32 18, %v269_v58 }
 0x24a   : > { %v303_v41 = vmul.u32 18, %v302_v21 }
 0x24e   : > { %10622 = vmatmul.mubr.msk.bf16.gmra.mrb[28].mxu0 %vm16335_vm2, %v3864_v6  ;;  %v12617_v18 = vmul.u32.u64.low 3817748708, %v233_v61  ;;  %v12618_v6 = vmul.u32.u64.high 3817748708, %v233_v61, %v12617_v18 }
 0x24f   : > { %10625 = vmatprep.mubr.msk.bf16.mxu0 %vm16335_vm2, %v3873_v27  ;;  %v293_v27 = vsub.s32 %v229_v12, %v292_v33  ;;  %v326_v18 = vsub.s32 %v12628_v31, %v325_v35 }
 0x250   : > { %v335_v57 = vshrl.u32 %v12618_v6, 4 }
 0x251   : > { %vm661_vm8 = vcmp.ne.s32.totalorder %v293_v27, 0  ;;  %vm697_vm9 = vcmp.lt.s32.totalorder %v293_v27, 0  ;;  %v769_v54 = vadd.s32 18, %v293_v27 }
 0x252   : > { %vm733_vm12 = vmand %vm697_vm9, %vm661_vm8 }
 0x253   : > { %v12661_v19 = vsel %vm733_vm12, %v769_v54, %v293_v27  ;;  %v390_v27 = vshrl.u32 %v12683_v36, 4 }
 0x254   : > { %16536 = vst [vmem:[#allocation3_spill] sm:$0xff] %v12661_v19 }
 0x256   : > { %10626 = vmatmul.mubr.msk.bf16.gmra.mrb[32].mxu0 %vm16335_vm2, %v3882_v55  ;;  %v271_v55 = vsub.s32 %v12595_v30, %v270_v16 }
 0x257   : > { %10631 = vmatprep.mubr.msk.bf16.mxu0 %vm16335_vm2, %v4162_v29  ;;  %v12635_v29 = vmul.u32.u64.low 3817748708, %v12621_v13  ;;  %v12636_v32 = vmul.u32.u64.high 3817748708, %v12621_v13, %v12635_v29 }
 0x258   : > { %vm659_vm10 = vcmp.ne.s32.totalorder %v271_v55, 0  ;;  %vm695_vm11 = vcmp.lt.s32.totalorder %v271_v55, 0 }
 0x259   : > { %vm731_vm13 = vmand %vm695_vm11, %vm659_vm10 }
 0x25e   : > { %10632 = vmatmul.mubr.msk.bf16.vlgmr.msra.gmra.mrb[0].mxu0 %vm16335_vm2, %v4164_v34  ;;  %v280_v34 = vshrl.u32 %v12614_v3, 4  ;;  %v12718_v3 = vmul.u32.u64.low 3817748708, %v12698_v17  ;;  %v12719_v33 = vmul.u32.u64.high 3817748708, %v12698_v17, %v12718_v3 }
 0x25f   : > { %10635 = vmatprep.mubr.msk.bf16.mxu0 %vm16335_vm2, %v4166_v59  ;;  %v12640_v59 = vadd.s32 64, %v12595_v30 }
 0x261   : > { %v12654_v1 = vmul.u32.u64.low 3817748708, %v12640_v59  ;;  %v12655_v9 = vmul.u32.u64.high 3817748708, %v12640_v59, %v12654_v1 }
 0x263   : > { %v357_v12 = vshrl.u32 %v12655_v9, 4 }
 0x265   : > { %v358_v2 = vmul.u32 18, %v357_v12 }
 0x266   : > { %10636 = vmatmul.mubr.msk.bf16.gmra.mrb[4].mxu0 %vm16335_vm2, %v4168_v50 }
 0x267   : > { %10639 = vmatprep.mubr.msk.bf16.mxu0 %vm16335_vm2, %v4170_v37  ;;  %v12647_v50 = vmul.u32.u64.low 3817748708, %v12631_v39  ;;  %v12648_v37 = vmul.u32.u64.high 3817748708, %v12631_v39, %v12647_v50  ;;  %v359_v29 = vsub.s32 %v12640_v59, %v358_v2 }
 0x268   : > { %v391_v50 = vmul.u32 18, %v390_v27  ;;  %v12888_v27 = vadd.s32 184, %v12595_v30 }
 0x269   : > { %v775_v36 = vadd.s32 18, %v359_v29 }
 0x26e   : > { %10640 = vmatmul.mubr.msk.bf16.gmra.mrb[8].mxu0 %vm16335_vm2, %v4172_v10  ;;  %v12651_v10 = vsub.s32 %v230_v51, %v303_v41  ;;  %v12705_v51 = vadd.s32 104, %v12595_v30 }
 0x26f   : > { %10643 = vmatprep.mubr.msk.bf16.mxu0 %vm16335_vm2, %v4174_v38  ;;  %v281_v38 = vmul.u32 18, %v280_v34 }
 0x270   : > { %vm662_vm14 = vcmp.ne.s32.totalorder %v12651_v10, 0  ;;  %vm698_vm15 = vcmp.lt.s32.totalorder %v12651_v10, 0  ;;  %v12670_v15 = vadd.s32 18, %v12651_v10 }
 0x271   : > { %v12727_v6 = vmul.u32.u64.low 3817748708, %v12705_v51  ;;  %v12728_v21 = vmul.u32.u64.high 3817748708, %v12705_v51, %v12727_v6  ;;  %vm12738_vm8 = vmand %vm698_vm15, %vm662_vm14  ;;  %vm700_vm14 = vcmp.lt.s32.totalorder %v326_v18, 0 }
 0x272   : > { %v12877_v6 = vadd.s32 176, %v12595_v30 }
 0x273   : > { %v412_v52 = vshrl.u32 %v12728_v21, 4 }
 0x276   : > { %10644 = vmatmul.mubr.msk.bf16.gmra.mrb[12].mxu0 %vm16335_vm2, %v4176_v40  ;;  %v767_v40 = vadd.s32 18, %v271_v55 }
 0x277   : > { %10647 = vmatprep.mubr.msk.bf16.mxu0 %vm16335_vm2, %v4178_v62  ;;  %v313_v62 = vshrl.u32 %v12625_v23, 4 }
 0x279   : > { %v314_v46 = vmul.u32 18, %v313_v62 }
 0x27b   : > { %v12707_v44 = vsub.s32 %v231_v11, %v314_v46  ;;  %v12722_v11 = vadd.s32 144, %v12595_v30 }
 0x27d   : > { %vm663_vm6 = vcmp.ne.s32.totalorder %v12707_v44, 0  ;;  %vm699_vm7 = vcmp.lt.s32.totalorder %v12707_v44, 0  ;;  %v771_v23 = vadd.s32 18, %v12707_v44 }
 0x27e   : > { %10648 = vmatmul.mubr.msk.bf16.gmra.mrb[16].mxu0 %vm16335_vm2, %v4180_v5  ;;  %v336_v5 = vmul.u32 18, %v335_v57  ;;  %vm12773_vm15 = vmand %vm699_vm7, %vm663_vm6  ;;  %v772_v57 = vadd.s32 18, %v326_v18  ;;  %vm667_vm6 = vcmp.ne.s32.totalorder %v359_v29, 0  ;;  %vm703_vm7 = vcmp.lt.s32.totalorder %v359_v29, 0 }
 0x27f   : > { %10651 = vmatprep.mubr.msk.bf16.mxu0 %vm16335_vm2, %v4182_v20  ;;  %v346_v20 = vshrl.u32 %v12636_v32, 4  ;;  %v12757_v32 = vmul.u32.u64.low 3817748708, %v12722_v11  ;;  %v12758_v41 = vmul.u32.u64.high 3817748708, %v12722_v11, %v12757_v32 }
 0x281   : > { %v347_v53 = vmul.u32 18, %v346_v20  ;;  %v12797_v20 = vsel %vm12738_vm8, %v12670_v15, %v12651_v10  ;;  %v12820_v15 = vsel %vm12773_vm15, %v771_v23, %v12707_v44  ;;  %vm739_vm8 = vmand %vm703_vm7, %vm667_vm6  ;;  %v467_v35 = vshrl.u32 %v12758_v41, 4 }
 0x282   : > { %16550 = vst [vmem:[#allocation5_spill] sm:$0xff] %v12797_v20  ;;  %16553 = vst [vmem:[#allocation8_spill] sm:$0xff] %v12820_v15 }
 0x286   : > { %10652 = vmatmul.mubr.msk.bf16.gmra.mrb[20].mxu0 %vm16335_vm2, %v4184_v7  ;;  %v12672_v7 = vsub.s32 %v228_v56, %v281_v38 }
 0x287   : > { %10655 = vmatprep.mubr.msk.bf16.mxu0 %vm16335_vm2, %v4186_v14  ;;  %v12674_v14 = vsel %vm731_vm13, %v767_v40, %v271_v55  ;;  %v12745_v55 = vadd.s32 128, %v12595_v30  ;;  %vm664_vm13 = vcmp.ne.s32.totalorder %v326_v18, 0 }
 0x288   : > { %16537 = vst [vmem:[#allocation4_spill] sm:$0xff] %v12674_v14  ;;  %vm660_vm1 = vcmp.ne.s32.totalorder %v12672_v7, 0  ;;  %vm696_vm3 = vcmp.lt.s32.totalorder %v12672_v7, 0  ;;  %v768_v58 = vadd.s32 18, %v12672_v7 }
 0x289   : > { %vm12751_vm10 = vmand %vm696_vm3, %vm660_vm1  ;;  %v12785_v1 = vmul.u32.u64.low 3817748708, %v12745_v55  ;;  %v12786_v9 = vmul.u32.u64.high 3817748708, %v12745_v55, %v12785_v1 }
 0x28a   : > { %v12807_v0 = vsel %vm12751_vm10, %v768_v58, %v12672_v7 }
 0x28b   : > { %16551 = vst [vmem:[#allocation6_spill] sm:$0xff] %v12807_v0  ;;  %v445_v58 = vshrl.u32 %v12786_v9, 4  ;;  %v12948_v9 = vadd.s32 200, %v12595_v30 }
 0x28d   : > { %v446_v21 = vmul.u32 18, %v445_v58 }
 0x28e   : > { %10656 = vmatmul.mubr.msk.bf16.gmra.mrb[24].mxu0 %vm16335_vm2, %v4188_v42  ;;  %v12678_v42 = vadd.s32 112, %v12595_v30 }
 0x28f   : > { %10659 = vmatprep.mubr.msk.bf16.mxu0 %vm16335_vm2, %v4190_v25  ;;  %v379_v25 = vshrl.u32 %v12648_v37, 4  ;;  %v447_v41 = vsub.s32 %v12745_v55, %v446_v21  ;;  %v12933_v55 = vadd.s32 216, %v12595_v30 }
 0x290   : > { %v12701_v47 = vmul.u32.u64.low 3817748708, %v12678_v42  ;;  %v12702_v48 = vmul.u32.u64.high 3817748708, %v12678_v42, %v12701_v47 }
 0x291   : > { %v380_v45 = vmul.u32 18, %v379_v25  ;;  %v12802_v25 = vadd.s32 152, %v12595_v30 }
 0x292   : > { %v423_v63 = vshrl.u32 %v12702_v48, 4  ;;  %v413_v48 = vmul.u32 18, %v412_v52 }
 0x294   : > { %v424_v46 = vmul.u32 18, %v423_v63  ;;  %v12918_v63 = vadd.s32 192, %v12595_v30 }
 0x296   : > { %10660 = vmatmul.mubr.msk.bf16.gmra.mrb[28].mxu0 %vm16335_vm2, %v4192_v24  ;;  %v12686_v24 = vadd.s32 96, %v12595_v30  ;;  %v12839_v47 = vsub.s32 %v12678_v42, %v424_v46 }
 0x297   : > { %10663 = vmatprep.mubr.msk.bf16.mxu0 %vm16335_vm2, %v4194_v28  ;;  %v12688_v28 = vsub.s32 %v233_v61, %v336_v5  ;;  %v348_v61 = vsub.s32 %v12621_v13, %v347_v53  ;;  %v381_v13 = vsub.s32 %v12631_v39, %v380_v45  ;;  %v434_v5 = vshrl.u32 %v12719_v33, 4 }
 0x298   : > { %v12710_v56 = vmul.u32.u64.low 3817748708, %v12686_v24  ;;  %v12711_v60 = vmul.u32.u64.high 3817748708, %v12686_v24, %v12710_v56  ;;  %v12810_v53 = vsub.s32 %v12659_v4, %v391_v50  ;;  %vm709_vm15 = vcmp.lt.s32.totalorder %v12839_v47, 0 }
 0x299   : > { %vm665_vm4 = vcmp.ne.s32.totalorder %v12688_v28, 0  ;;  %vm701_vm5 = vcmp.lt.s32.totalorder %v12688_v28, 0  ;;  %v773_v16 = vadd.s32 18, %v12688_v28  ;;  %vm666_vm9 = vcmp.ne.s32.totalorder %v348_v61, 0 }
 0x29a   : > { %vm702_vm11 = vcmp.lt.s32.totalorder %v348_v61, 0  ;;  %vm12764_vm12 = vmand %vm701_vm5, %vm665_vm4  ;;  %v774_v49 = vadd.s32 18, %v348_v61  ;;  %vm669_vm1 = vcmp.ne.s32.totalorder %v381_v13, 0  ;;  %vm705_vm3 = vcmp.lt.s32.totalorder %v381_v13, 0 }
 0x29b   : > { %v401_v37 = vshrl.u32 %v12711_v60, 4  ;;  %vm12780_vm4 = vmand %vm702_vm11, %vm666_vm9  ;;  %v777_v62 = vadd.s32 18, %v381_v13  ;;  %v12815_v10 = vsel %vm12764_vm12, %v773_v16, %v12688_v28  ;;  %v435_v12 = vmul.u32 18, %v434_v5 }
 0x29c   : > { %vm12788_vm5 = vmand %vm700_vm14, %vm664_vm13  ;;  %16552 = vst [vmem:[#allocation7_spill] sm:$0xff] %v12815_v10  ;;  %v12842_v44 = vmul.u32.u64.low 3817748708, %v12802_v25  ;;  %v12843_v45 = vmul.u32.u64.high 3817748708, %v12802_v25, %v12842_v44  ;;  %v12845_v56 = vsel %vm739_vm8, %v775_v36, %v359_v29  ;;  %vm670_vm10 = vcmp.ne.s32.totalorder %v12810_v53, 0 }
 0x29d   : > { %vm741_vm9 = vmand %vm705_vm3, %vm669_vm1  ;;  %v12833_v7 = vsel %vm12788_vm5, %v772_v57, %v326_v18  ;;  %16557 = vst [vmem:[#allocation12_spill] sm:$0xff] %v12845_v56  ;;  %v12852_v60 = vadd.s32 136, %v12595_v30  ;;  %vm706_vm11 = vcmp.lt.s32.totalorder %v12810_v53, 0  ;;  %v12856_v42 = vadd.s32 18, %v12810_v53 }
 0x29e   : > { %10664 = vmatmul.mubr.msk.bf16.gmra.mrb[32].mxu0 %vm16335_vm2, %v4196_v8  ;;  %v12691_v8 = vmul.u32.u64.low 3817748708, %v12665_v22  ;;  %v12692_v26 = vmul.u32.u64.high 3817748708, %v12665_v22, %v12691_v8  ;;  %16555 = vst [vmem:[#allocation10_spill] sm:$0xff] %v12833_v7  ;;  %v12835_v28 = vsel %vm741_vm9, %v777_v62, %v381_v13  ;;  %v12863_v2 = vsub.s32 %v12698_v17, %v435_v12  ;;  %vm12908_vm9 = vmand %vm706_vm11, %vm670_vm10 }
 0x29f   : > { %v402_v8 = vmul.u32 18, %v401_v37  ;;  %16556 = vst [vmem:[#allocation11_spill] sm:$0xff] %v12835_v28  ;;  %vm673_vm14 = vcmp.ne.s32.totalorder %v12839_v47, 0  ;;  %v781_v3 = vadd.s32 18, %v12839_v47  ;;  %v12869_v33 = vsub.s32 %v12705_v51, %v413_v48 }
 0x2a0   : > { %v368_v31 = vshrl.u32 %v12692_v26, 4  ;;  %v12824_v26 = vsel %vm12780_vm4, %v774_v49, %v348_v61  ;;  %v12873_v16 = vmul.u32.u64.low 3817748708, %v12852_v60  ;;  %v12874_v18 = vmul.u32.u64.high 3817748708, %v12852_v60, %v12873_v16  ;;  %vm12939_vm11 = vmand %vm709_vm15, %vm673_vm14 }
 0x2a1   : > { %16554 = vst [vmem:[#allocation9_spill] sm:$0xff] %v12824_v26  ;;  %v12882_v13 = vadd.s32 160, %v12595_v30  ;;  %vm674_vm4 = vcmp.ne.s32.totalorder %v12863_v2, 0  ;;  %vm710_vm5 = vcmp.lt.s32.totalorder %v12863_v2, 0  ;;  %v782_v43 = vadd.s32 18, %v12863_v2 }
 0x2a2   : > { %v369_v38 = vmul.u32 18, %v368_v31  ;;  %vm672_vm6 = vcmp.ne.s32.totalorder %v12869_v33, 0  ;;  %v478_v23 = vshrl.u32 %v12843_v45, 4  ;;  %v12894_v31 = vadd.s32 168, %v12595_v30  ;;  %vm12967_vm14 = vmand %vm710_vm5, %vm674_vm4 }
 0x2a3   : > { %vm708_vm7 = vcmp.lt.s32.totalorder %v12869_v33, 0  ;;  %v12898_v39 = vmul.u32.u64.low 3817748708, %v12877_v6  ;;  %v12899_v29 = vmul.u32.u64.high 3817748708, %v12877_v6, %v12898_v39  ;;  %v456_v62 = vshrl.u32 %v12874_v18, 4 }
 0x2a4   : > { %v12829_v4 = vsub.s32 %v12665_v22, %v369_v38  ;;  %v12849_v22 = vsub.s32 %v12686_v24, %v402_v8  ;;  %v468_v24 = vmul.u32 18, %v467_v35  ;;  %v479_v57 = vmul.u32 18, %v478_v23 }
 0x2a5   : > { %v12914_v34 = vmul.u32.u64.low 3817748708, %v12882_v13  ;;  %v12915_v49 = vmul.u32.u64.high 3817748708, %v12882_v13, %v12914_v34  ;;  %v12929_v50 = vmul.u32.u64.low 3817748708, %v12888_v27  ;;  %v12930_v37 = vmul.u32.u64.high 3817748708, %v12888_v27, %v12929_v50 }
 0x2a6   : > { %vm668_vm12 = vcmp.ne.s32.totalorder %v12829_v4, 0  ;;  %vm704_vm13 = vcmp.lt.s32.totalorder %v12829_v4, 0  ;;  %v776_v61 = vadd.s32 18, %v12829_v4  ;;  %vm671_vm1 = vcmp.ne.s32.totalorder %v12849_v22, 0 }
 0x2a7   : > { %vm707_vm3 = vcmp.lt.s32.totalorder %v12849_v22, 0  ;;  %v779_v17 = vadd.s32 18, %v12849_v22  ;;  %v469_v51 = vsub.s32 %v12722_v11, %v468_v24  ;;  %v12902_v11 = vadd.s32 208, %v12595_v30  ;;  %vm12924_vm8 = vmand %vm704_vm13, %vm668_vm12 }
 0x2a8   : > { %v12944_v38 = vmul.u32.u64.low 3817748708, %v12894_v31  ;;  %v12945_v1 = vmul.u32.u64.high 3817748708, %v12894_v31, %v12944_v38  ;;  %vm12954_vm12 = vmand %vm707_vm3, %vm671_vm1  ;;  %vm675_vm15 = vcmp.ne.s32.totalorder %v447_v41, 0  ;;  %vm711_vm1 = vcmp.lt.s32.totalorder %v447_v41, 0 }
 0x2a9   : > { %vm677_vm10 = vcmp.ne.s32.totalorder %v469_v51, 0  ;;  %vm713_vm13 = vcmp.lt.s32.totalorder %v469_v51, 0  ;;  %v12960_v5 = vmul.u32.u64.low 3817748708, %v12902_v11  ;;  %v12961_v46 = vmul.u32.u64.high 3817748708, %v12902_v11, %v12960_v5  ;;  %vm12979_vm3 = vmand %vm708_vm7, %vm672_vm6 }
 0x2aa   : > { %v12972_v36 = vmul.u32.u64.low 3817748708, %v12918_v63  ;;  %v12973_v8 = vmul.u32.u64.high 3817748708, %v12918_v63, %v12972_v36  ;;  %v780_v35 = vadd.s32 18, %v12869_v33  ;;  %v785_v48 = vadd.s32 18, %v469_v51  ;;  %vm12989_vm4 = vmand %vm713_vm13, %vm677_vm10 }
 0x2ab   : > { %v12985_v44 = vmul.u32.u64.low 3817748708, %v12933_v55  ;;  %v12986_v45 = vmul.u32.u64.high 3817748708, %v12933_v55, %v12985_v44  ;;  %v783_v24 = vadd.s32 18, %v447_v41  ;;  %v12994_v16 = vsub.s32 %v12802_v25, %v479_v57  ;;  %vm747_vm5 = vmand %vm711_vm1, %vm675_vm15 }
 0x2ac   : > { %v12997_v18 = vmul.u32.u64.low 3817748708, %v12948_v9  ;;  %v12998_v21 = vmul.u32.u64.high 3817748708, %v12948_v9, %v12997_v18  ;;  %v13004_v23 = vsel %vm12908_vm9, %v12856_v42, %v12810_v53  ;;  %v13009_v39 = vsel %vm12924_vm8, %v776_v61, %v12829_v4 }
 0x2ad   : > { %16572 = vst [vmem:[#allocation13_spill] sm:$0xff] %v13004_v23  ;;  %16573 = vst [vmem:[#allocation14_spill] sm:$0xff] %v13009_v39  ;;  %v457_v25 = vmul.u32 18, %v456_v62  ;;  %v511_v34 = vshrl.u32 %v12899_v29, 4  ;;  %v13017_v50 = vsel %vm12939_vm11, %v781_v3, %v12839_v47  ;;  %v13022_v53 = vsel %vm12954_vm12, %v779_v17, %v12849_v22 }
 0x2ae   : > { %16574 = vst [vmem:[#allocation15_spill] sm:$0xff] %v13017_v50  ;;  %16575 = vst [vmem:[#allocation16_spill] sm:$0xff] %v13022_v53  ;;  %v489_v42 = vshrl.u32 %v12915_v49, 4  ;;  %v13026_v4 = vadd.s32 240, %v12595_v30  ;;  %v13031_v61 = vsel %vm12967_vm14, %v782_v43, %v12863_v2  ;;  %v13036_v47 = vsel %vm12979_vm3, %v780_v35, %v12869_v33 }
 0x2af   : > { %16576 = vst [vmem:[#allocation17_spill] sm:$0xff] %v13031_v61  ;;  %16577 = vst [vmem:[#allocation18_spill] sm:$0xff] %v13036_v47  ;;  %v13040_v3 = vsel %vm12989_vm4, %v785_v48, %v469_v51  ;;  %v522_v22 = vshrl.u32 %v12930_v37, 4  ;;  %v13043_v17 = vsel %vm747_vm5, %v783_v24, %v447_v41  ;;  %vm678_vm6 = vcmp.ne.s32.totalorder %v12994_v16, 0 }
 0x2b0   : > { %16578 = vst [vmem:[#allocation19_spill] sm:$0xff] %v13040_v3  ;;  %16579 = vst [vmem:[#allocation20_spill] sm:$0xff] %v13043_v17  ;;  %v500_v29 = vshrl.u32 %v12945_v1, 4  ;;  %v13048_v2 = vadd.s32 224, %v12595_v30  ;;  %v13051_v43 = vsub.s32 %v12852_v60, %v457_v25  ;;  %v512_v33 = vmul.u32 18, %v511_v34 }
 0x2b1   : > { %v555_v32 = vshrl.u32 %v12961_v46, 4  ;;  %v13055_v51 = vadd.s32 248, %v12595_v30  ;;  %v490_v49 = vmul.u32 18, %v489_v42  ;;  %v533_v41 = vshrl.u32 %v12973_v8, 4 }
 0x2b2   : > { %v13059_v59 = vmul.u32.u64.low 3817748708, %v13026_v4  ;;  %v13060_v37 = vmul.u32.u64.high 3817748708, %v13026_v4, %v13059_v59  ;;  %vm714_vm7 = vcmp.lt.s32.totalorder %v12994_v16, 0  ;;  %v523_v54 = vmul.u32 18, %v522_v22 }
 0x2b3   : > { %v566_v57 = vshrl.u32 %v12986_v45, 4  ;;  %v13065_v60 = vadd.s32 232, %v12595_v30  ;;  %v501_v38 = vmul.u32 18, %v500_v29  ;;  %v544_v1 = vshrl.u32 %v12998_v21, 4  ;;  %vm13108_vm12 = vmand %vm714_vm7, %vm678_vm6 }
 0x2b4   : > { %v13069_v40 = vmul.u32.u64.low 3817748708, %v13048_v2  ;;  %v13070_v62 = vmul.u32.u64.high 3817748708, %v13048_v2, %v13069_v40  ;;  %v13073_v5 = vsub.s32 %v12877_v6, %v512_v33  ;;  %v556_v46 = vmul.u32 18, %v555_v32 }
 0x2b5   : > { %v13076_v52 = vmul.u32.u64.low 3817748708, %v13055_v51  ;;  %v13077_v36 = vmul.u32.u64.high 3817748708, %v13055_v51, %v13076_v52  ;;  %v13080_v8 = vadd.s32 18, %v12994_v16  ;;  %vm676_vm9 = vcmp.ne.s32.totalorder %v13051_v43, 0 }
 0x2b6   : > { %v13084_v12 = vsub.s32 %v12882_v13, %v490_v49  ;;  %v534_v35 = vmul.u32 18, %v533_v41  ;;  %v13087_v48 = vsub.s32 %v12888_v27, %v523_v54  ;;  %v567_v44 = vmul.u32 18, %v566_v57 }
 0x2b7   : > { %v13090_v6 = vmul.u32.u64.low 3817748708, %v13065_v60  ;;  %v13091_v45 = vmul.u32.u64.high 3817748708, %v13065_v60, %v13090_v6  ;;  %vm712_vm8 = vcmp.lt.s32.totalorder %v13051_v43, 0  ;;  %v784_v58 = vadd.s32 18, %v13051_v43 }
 0x2b8   : > { %v13096_v24 = vsub.s32 %v12894_v31, %v501_v38  ;;  %v545_v18 = vmul.u32 18, %v544_v1  ;;  %vm681_vm10 = vcmp.ne.s32.totalorder %v13073_v5, 0  ;;  %vm717_vm11 = vcmp.lt.s32.totalorder %v13073_v5, 0  ;;  %vm13124_vm3 = vmand %vm712_vm8, %vm676_vm9 }
 0x2b9   : > { %v789_v13 = vadd.s32 18, %v13073_v5  ;;  %v13102_v27 = vsub.s32 %v12902_v11, %v556_v46  ;;  %vm679_vm13 = vcmp.ne.s32.totalorder %v13084_v12, 0  ;;  %vm715_vm14 = vcmp.lt.s32.totalorder %v13084_v12, 0  ;;  %vm13140_vm9 = vmand %vm717_vm11, %vm681_vm10 }
 0x2ba   : > { %v13115_v31 = vsub.s32 %v12918_v63, %v534_v35  ;;  %v599_v25 = vshrl.u32 %v13060_v37, 4  ;;  %v787_v34 = vadd.s32 18, %v13084_v12  ;;  %vm682_vm4 = vcmp.ne.s32.totalorder %v13087_v48, 0  ;;  %vm13154_vm10 = vmand %vm715_vm14, %vm679_vm13 }
 0x2bb   : > { %vm718_vm5 = vcmp.lt.s32.totalorder %v13087_v48, 0  ;;  %v13132_v63 = vsub.s32 %v12933_v55, %v567_v44  ;;  %vm680_vm8 = vcmp.ne.s32.totalorder %v13096_v24, 0  ;;  %vm716_vm0 = vcmp.lt.s32.totalorder %v13096_v24, 0 }
 0x2bc   : > { %v546_v22 = vsub.s32 %v12948_v9, %v545_v18  ;;  %v577_v55 = vshrl.u32 %v13070_v62, 4  ;;  %v790_v33 = vadd.s32 18, %v13087_v48  ;;  %vm685_vm11 = vcmp.ne.s32.totalorder %v13102_v27, 0  ;;  %vm13168_vm13 = vmand %vm718_vm5, %vm682_vm4 }
 0x2bd   : > { %vm721_vm7 = vcmp.lt.s32.totalorder %v13102_v27, 0  ;;  %v610_v9 = vshrl.u32 %v13077_v36, 4  ;;  %v788_v49 = vadd.s32 18, %v13096_v24  ;;  %vm719_vm15 = vcmp.lt.s32.totalorder %v13115_v31, 0  ;;  %vm13179_vm2 = vmand %vm716_vm0, %vm680_vm8 }
 0x2be   : > { %v600_v41 = vmul.u32 18, %v599_v25  ;;  %v793_v37 = vadd.s32 18, %v13102_v27  ;;  %vm686_vm4 = vcmp.ne.s32.totalorder %v13132_v63, 0  ;;  %vm722_vm5 = vcmp.lt.s32.totalorder %v13132_v63, 0  ;;  %vm13189_vm6 = vmand %vm721_vm7, %vm685_vm11 }
 0x2bf   : > { %v588_v54 = vshrl.u32 %v13091_v45, 4  ;;  %vm684_vm1 = vcmp.ne.s32.totalorder %v546_v22, 0  ;;  %vm720_vm14 = vcmp.lt.s32.totalorder %v546_v22, 0  ;;  %v578_v38 = vmul.u32 18, %v577_v55 }
 0x2c0   : > { %v13194_v1 = vadd.s32 272, %v12595_v30  ;;  %v13200_v40 = vsel %vm13108_vm12, %v13080_v8, %v12994_v16  ;;  %v13205_v62 = vsel %vm13124_vm3, %v784_v58, %v13051_v43  ;;  %vm16596_vm0 = vcmp.ne.s32.totalorder %v13115_v31, 0  ;;  %vm13225_vm12 = vmand %vm722_vm5, %vm686_vm4  ;;  %v13255_v58 = vld [vmem:[%s16329_s1] ss:$0 sm:$0xff] }
 0x2c1   : > { %16594 = vst [vmem:[#allocation21_spill] sm:$0xff] %v13200_v40  ;;  %16595 = vst [vmem:[#allocation22_spill] sm:$0xff] %v13205_v62  ;;  %v791_v52 = vadd.s32 18, %v13115_v31  ;;  %v611_v36 = vmul.u32 18, %v610_v9  ;;  %vm917_vm8 = vcmp.ne.s32.totalorder %v12815_v10, 0  ;;  %vm953_vm11 = vcmp.ne.s32.totalorder %v12815_v10, 17 }
 0x2c2   : > { %vm13209_vm7 = vmand %vm719_vm15, %vm16596_vm0  ;;  %v13219_v16 = vsel %vm13140_vm9, %v789_v13, %v13073_v5  ;;  %v794_v8 = vadd.s32 18, %v13132_v63  ;;  %v792_v35 = vadd.s32 18, %v546_v22  ;;  %v13231_v44 = vsub.s32 %v13026_v4, %v600_v41 }
 0x2c3   : > { %16599 = vst [vmem:[#allocation23_spill] sm:$0xff] %v13219_v16  ;;  %vm915_vm15 = vcmp.ne.s32.totalorder %v12820_v15, 0  ;;  %vm951_vm3 = vcmp.ne.s32.totalorder %v12820_v15, 17  ;;  %v13238_v5 = vsel %vm13154_vm10, %v787_v34, %v13084_v12  ;;  %v13243_v6 = vsel %vm13168_vm13, %v790_v33, %v13087_v48  ;;  %vm756_vm9 = vmand %vm720_vm14, %vm684_vm1 }
 0x2c4   : > { %16602 = vst [vmem:[#allocation24_spill] sm:$0xff] %v13238_v5  ;;  %16603 = vst [vmem:[#allocation25_spill] sm:$0xff] %v13243_v6  ;;  %v13248_v45 = vsel %vm13179_vm2, %v788_v49, %v13096_v24  ;;  %v589_v4 = vmul.u32 18, %v588_v54  ;;  %vm918_vm10 = vcmp.ne.s32.totalorder %v12824_v26, 0  ;;  %vm954_vm4 = vcmp.ne.s32.totalorder %v12824_v26, 17 }
 0x2c5   : > { %16604 = vst [vmem:[#allocation26_spill] sm:$0xff] %v13248_v45  ;;  %v13262_v12 = vsel %vm13189_vm6, %v793_v37, %v13102_v27  ;;  %v13265_v48 = vsub.s32 %v13048_v2, %v578_v38  ;;  %v13268_v24 = vmul.u32.u64.low 3817748708, %v13194_v1  ;;  %v13269_v18 = vmul.u32.u64.high 3817748708, %v13194_v1, %v13268_v24 }
 0x2c6   : > { %16605 = vst [vmem:[#allocation27_spill] sm:$0xff] %v13262_v12  ;;  %v13274_v13 = vsel %vm13209_vm7, %v791_v52, %v13115_v31  ;;  %v13277_v21 = vsub.s32 %v13055_v51, %v611_v36  ;;  %v13280_v25 = vadd.s32 256, %v12595_v30  ;;  %v13283_v27 = vadd.s32 280, %v12595_v30 }
 0x2c7   : > { %16606 = vst [vmem:[#allocation28_spill] sm:$0xff] %v13274_v13  ;;  %vm16607_vm2 = vcmp.ne.s32.totalorder %v12661_v19, 17  ;;  %vm16608_vm1 = vcmp.ne.s32.totalorder %v12661_v19, 0  ;;  %v16609_v2 = vmov 0  ;;  %v13296_v51 = vsel %vm13225_vm12, %v794_v8, %v13132_v63 }
 0x2c8   : > { %vm13289_vm6 = vmand %vm16608_vm1, %vm16607_vm2  ;;  %16612 = vst [vmem:[#allocation30_spill] sm:$0xff] %v13296_v51  ;;  %v13298_v31 = vsel %vm756_vm9, %v792_v35, %v546_v22  ;;  %v13302_v34 = vadd.s32 264, %v12595_v30  ;;  %vm16614_vm14 = vcmp.ne.s32.totalorder %v12674_v14, 17  ;;  %vm16615_vm5 = vcmp.ne.s32.totalorder %v12674_v14, 0 }
 0x2c9   : > { %v16610_v2 = vsel %vm13289_vm6, 4294967295, %v16609_v2  ;;  %16613 = vst [vmem:[#allocation31_spill] sm:$0xff] %v13298_v31  ;;  %vm13311_vm0 = vmand %vm16615_vm5, %vm16614_vm14  ;;  %v16616_v55 = vmov 0  ;;  %v13317_v22 = vadd.s32 18, %v13231_v44  ;;  %v13320_v29 = vsub.s32 %v13065_v60, %v589_v4 }
 0x2ca   : > { %16611 = vst [vmem:[#allocation29_spill] sm:$0xff] %v16610_v2  ;;  %v16617_v55 = vsel %vm13311_vm0, 4294967295, %v16616_v55  ;;  %vm16619_vm12 = vcmp.ne.s32.totalorder %v12797_v20, 17  ;;  %vm16620_vm9 = vcmp.ne.s32.totalorder %v12797_v20, 0  ;;  %v16621_v9 = vmov 0 }
 0x2cb   : > { %16618 = vst [vmem:[#allocation32_spill] sm:$0xff] %v16617_v55  ;;  %vm13329_vm2 = vmand %vm16620_vm9, %vm16619_vm12  ;;  %vm687_vm1 = vcmp.ne.s32.totalorder %v13265_v48, 0  ;;  %v13336_v49 = vadd.s32 18, %v13265_v48  ;;  %vm16625_vm5 = vcmp.ne.s32.totalorder %v12807_v0, 17  ;;  %vm16626_vm7 = vcmp.ne.s32.totalorder %v12807_v0, 0 }
 0x2cc   : > { %v16622_v9 = vsel %vm13329_vm2, 4294967295, %v16621_v9  ;;  %vm13345_vm13 = vmand %vm16626_vm7, %vm16625_vm5  ;;  %v16627_v41 = vmov 0  ;;  %v13353_v37 = vmul.u32.u64.low 3817748708, %v13280_v25  ;;  %v13354_v54 = vmul.u32.u64.high 3817748708, %v13280_v25, %v13353_v37 }
 0x2cd   : > { %16623 = vst [vmem:[#allocation33_spill] sm:$0xff] %v16622_v9  ;;  %v16628_v41 = vsel %vm13345_vm13, 4294967295, %v16627_v41  ;;  %v13370_v43 = vadd.s32 18, %v13277_v21  ;;  %v643_v35 = vshrl.u32 %v13269_v18, 4  ;;  %vm16630_vm7 = vcmask 31744   ;;  %vm13389_vm5 = vmand %vm917_vm8, %vm953_vm11 }
 0x2ce   : > { %16629 = vst [vmem:[#allocation35_spill] sm:$0xff] %v16628_v41  ;;  %v13380_v4 = vmul.u32.u64.low 3817748708, %v13283_v27  ;;  %v13381_v24 = vmul.u32.u64.high 3817748708, %v13283_v27, %v13380_v4  ;;  %vm16631_vm14 = vmmov %vm16630_vm7  ;;  %v16632_v37 = vmov 0  ;;  %vm724_vm9 = vcmp.lt.s32.totalorder %v13320_v29, 0 }
 0x2cf   : > { %v16633_v37 = vsel %vm13389_vm5, 4294967295, %v16632_v37  ;;  %vm16638_vm8 = vmmov %vm16630_vm7  ;;  %v644_v15 = vmul.u32 18, %v643_v35  ;;  %v621_v0 = vshrl.u32 %v13354_v54, 4 }
 0x2d0   : > { %16634 = vst [vmem:[#allocation36_spill] sm:$0xff] %v16633_v37  ;;  %vm16639_vm11 = vmmov %vm16630_vm7 }
 0x2d1   : > { %vm13414_vm12 = vmand %vm918_vm10, %vm954_vm4  ;;  %vm16643_vm10 = vcmp.ne.s32.totalorder %v13231_v44, 0  ;;  %vm16644_vm4 = vcmp.lt.s32.totalorder %v13231_v44, 0 }
 0x331   : > { %v10633_v11 = vpop.f32.mrb[0].mxu0 }
 0x332   : > { %v13305_v42 = vadd.f32 %v10633_v11, %v13255_v58  ;;  %v4288_v63 = vpop.f32.mrb[1].mxu0 }
 0x333   : > { %v13323_v33 = vadd.f32 %v13255_v58, %v4288_v63  ;;  %v10634_v32 = vpop.f32.mrb[2].mxu0 }
 0x334   : > { %v13339_v60 = vadd.f32 %v10634_v32, %v13255_v58  ;;  %v4291_v59 = vpop.f32.mrb[3].mxu0  ;;  %v4584_v57 = vsel %vm13289_vm6, %v13305_v42, 0.0 }
 0x335   : > { %v4582_v38 = vsel %vm13311_vm0, %v13323_v33, 0.0  ;;  %v13363_v46 = vadd.f32 %v13255_v58, %v4291_v59  ;;  %v4697_v11 = vmul.f32 %v4584_v57, %v4584_v57  ;;  %v4621_v55 = vsel %vm16638_vm8, %v4584_v57, 0.0 }
 0x336   : > { %16624 = vst [vmem:[#allocation34_spill] sm:$0xff] %v13339_v60  ;;  %v4695_v52 = vmul.f32 %v4582_v38, %v4582_v38  ;;  %v4585_v36 = vsel %vm13329_vm2, %v13339_v60, 0.0  ;;  %v4618_v63 = vsel %vm16630_vm7, %v4582_v38, 0.0  ;;  %v16635_v38 = vmov 0 }
 0x337   : > { %v4583_v8 = vsel %vm13345_vm13, %v13363_v46, 0.0  ;;  %v4698_v18 = vmul.f32 %v4585_v36, %v4585_v36 }
 0x338   : > { %v4619_v32 = vsel %vm16631_vm14, %v4583_v8, 0.0  ;;  %v4696_v59 = vmul.f32 %v4583_v8, %v4583_v8  ;;  %vm13399_vm14 = vmand %vm915_vm15, %vm951_vm3  ;;  %v13404_v8 = vmul.u32.u64.low 3817748708, %v13302_v34  ;;  %v13405_v9 = vmul.u32.u64.high 3817748708, %v13302_v34, %v13404_v8 }
 0x339   : > { %v4620_v4 = vadd.f32 %v4619_v32, %v4618_v63  ;;  %v10637_v41 = vpop.f32.mrb[4].mxu0  ;;  %v16636_v38 = vsel %vm13399_vm14, 4294967295, %v16635_v38  ;;  %v4731_v2 = vsel %vm16639_vm11, %v4695_v52, 0.0  ;;  %v16640_v32 = vmov 0  ;;  %vm16647_vm15 = vmmov %vm16638_vm8 }
 0x33a   : > { %16637 = vst [vmem:[#allocation37_spill] sm:$0xff] %v16636_v38  ;;  %v4732_v10 = vsel %vm16630_vm7, %v4696_v59, 0.0  ;;  %v4304_v63 = vpop.f32.mrb[5].mxu0  ;;  %v16641_v32 = vsel %vm13414_vm12, 4294967295, %v16640_v32  ;;  %vm13430_vm7 = vmand %vm16644_vm4, %vm16643_vm10  ;;  %vm16648_vm8 = vcmp.lt.s32.totalorder %v13265_v48, 0 }
 0x33b   : > { %16642 = vst [vmem:[#allocation38_spill] sm:$0xff] %v16641_v32  ;;  %v4622_v57 = vadd.f32 %v4621_v55, %v4620_v4  ;;  %v4733_v8 = vadd.f32 %v4732_v10, %v4731_v2  ;;  %v13422_v52 = vadd.f32 %v13255_v58, %v4304_v63  ;;  %v10638_v59 = vpop.f32.mrb[6].mxu0  ;;  %v4734_v55 = vsel %vm16647_vm15, %v4697_v11, 0.0  ;;  %vm13442_vm11 = vmand %vm16648_vm8, %vm687_vm1 }
 0x33c   : > { %v13436_v10 = vadd.f32 %v10637_v41, %v13255_v58  ;;  %v4307_v2 = vpop.f32.mrb[7].mxu0  ;;  %v796_v63 = vadd.s32 18, %v13320_v29  ;;  %vm16651_vm10 = vmmov %vm16647_vm15  ;;  %vm16653_vm15 = vcmp.ne.s32.totalorder %v13277_v21, 0  ;;  %vm16654_vm1 = vcmp.lt.s32.totalorder %v13277_v21, 0 }
 0x33d   : > { %v4623_v35 = vsel %vm16651_vm10, %v4585_v36, 0.0  ;;  %vm16652_vm4 = vmmov %vm16651_vm10  ;;  %v4735_v14 = vadd.f32 %v4734_v55, %v4733_v8  ;;  %v4586_v41 = vsel %vm13399_vm14, %v13422_v52, 0.0  ;;  %v13463_v36 = vadd.f32 %v10638_v59, %v13255_v58 }
 0x33e   : > { %v4736_v11 = vsel %vm16652_vm4, %v4698_v18, 0.0  ;;  %vm13457_vm8 = vmand %vm16654_vm1, %vm16653_vm15  ;;  %v4624_v19 = vadd.f32 %v4623_v35, %v4622_v57  ;;  %v4699_v60 = vmul.f32 %v4586_v41, %v4586_v41  ;;  %vm16658_vm10 = vcmp.ne.s32.totalorder %v13320_v29, 0 }
 0x33f   : > { %vm16657_vm3 = vmmov %vm16652_vm4  ;;  %v4737_v8 = vadd.f32 %v4736_v11, %v4735_v14  ;;  %vm16661_vm15 = vcmp.ne.s32.totalorder %v12833_v7, 17  ;;  %vm16662_vm1 = vcmp.ne.s32.totalorder %v12833_v7, 0  ;;  %v16663_v57 = vmov 0 }
 0x340   : > { %v4625_v54 = vsel %vm16657_vm3, %v4586_v41, 0.0  ;;  %vm13469_vm4 = vmand %vm724_vm9, %vm16658_vm10  ;;  %v13487_v59 = vsel %vm13430_vm7, %v13317_v22, %v13231_v44  ;;  %v13493_v14 = vsel %vm13442_vm11, %v13336_v49, %v13265_v48  ;;  %v13496_v55 = vsub.s32 %v13194_v1, %v644_v15 }
 0x341   : > { %vm13477_vm14 = vmand %vm16662_vm1, %vm16661_vm15  ;;  %16666 = vst [vmem:[#allocation40_spill] sm:$0xff] %v13487_v59  ;;  %v4588_v35 = vsel %vm13389_vm5, %v13436_v10, 0.0  ;;  %v4626_v11 = vadd.f32 %v4625_v54, %v4624_v19  ;;  %v13503_v26 = vadd.f32 %v13255_v58, %v4307_v2  ;;  %v10641_v44 = vpop.f32.mrb[8].mxu0  ;;  %v13511_v15 = vsel %vm13457_vm8, %v13370_v43, %v13277_v21 }
 0x342   : > { %v16664_v57 = vsel %vm13477_vm14, 4294967295, %v16663_v57  ;;  %16667 = vst [vmem:[#allocation41_spill] sm:$0xff] %v13493_v14  ;;  %vm16668_vm9 = vmmov %vm16657_vm3  ;;  %v13516_v19 = vsel %vm13469_vm4, %v796_v63, %v13320_v29  ;;  %v622_v1 = vmul.u32 18, %v621_v0  ;;  %v4589_v49 = vsel %vm13414_vm12, %v13463_v36, 0.0  ;;  %v4320_v21 = vpop.f32.mrb[9].mxu0 }
 0x343   : > { %16665 = vst [vmem:[#allocation39_spill] sm:$0xff] %v16664_v57  ;;  %v4738_v41 = vsel %vm16668_vm9, %v4699_v60, 0.0  ;;  %16669 = vst [vmem:[#allocation42_spill] sm:$0xff] %v13511_v15  ;;  %v4587_v60 = vsel %vm13477_vm14, %v13503_v26, 0.0  ;;  %v13526_v20 = vadd.f32 %v10641_v44, %v13255_v58  ;;  %vm16671_vm11 = vcmp.ne.s32.totalorder %v12845_v56, 17  ;;  %v10642_v54 = vpop.f32.mrb[10].mxu0 }
 0x344   : > { %16670 = vst [vmem:[#allocation43_spill] sm:$0xff] %v13516_v19  ;;  %v4739_v22 = vadd.f32 %v4738_v41, %v4737_v8  ;;  %vm16672_vm8 = vcmp.ne.s32.totalorder %v12845_v56, 0  ;;  %v16673_v0 = vmov 0  ;;  %v4701_v29 = vmul.f32 %v4588_v35, %v4588_v35  ;;  %vm16676_vm9 = vmmov %vm16657_vm3  ;;  %v4323_v41 = vpop.f32.mrb[11].mxu0 }
 0x345   : > { %vm13532_vm4 = vmand %vm16672_vm8, %vm16671_vm11  ;;  %v4627_v43 = vsel %vm16676_vm9, %v4587_v60, 0.0  ;;  %v4700_v2 = vmul.f32 %v4587_v60, %v4587_v60  ;;  %vm16677_vm7 = vcmp.ne.s32.totalorder %v12835_v28, 17  ;;  %vm16678_vm10 = vcmp.ne.s32.totalorder %v12835_v28, 0 }
 0x346   : > { %v16674_v0 = vsel %vm13532_vm4, 4294967295, %v16673_v0  ;;  %vm13543_vm3 = vmand %vm16678_vm10, %vm16677_vm7  ;;  %v16679_v4 = vmov 0  ;;  %v13548_v63 = vadd.f32 %v13255_v58, %v4320_v21  ;;  %v4628_v18 = vadd.f32 %v4627_v43, %v4626_v11 }
 0x347   : > { %16675 = vst [vmem:[#allocation44_spill] sm:$0xff] %v16674_v0  ;;  %v16680_v4 = vsel %vm13543_vm3, 4294967295, %v16679_v4  ;;  %v13553_v8 = vadd.f32 %v10642_v54, %v13255_v58  ;;  %v13556_v44 = vadd.s32 18, %v13496_v55  ;;  %v632_v60 = vshrl.u32 %v13405_v9, 4  ;;  %vm16682_vm7 = vmmov %vm16676_vm9 }
 0x348   : > { %16681 = vst [vmem:[#allocation45_spill] sm:$0xff] %v16680_v4  ;;  %v4629_v48 = vsel %vm16682_vm7, %v4588_v35, 0.0  ;;  %v4702_v57 = vmul.f32 %v4589_v49, %v4589_v49  ;;  %vm16683_vm10 = vmmov %vm16682_vm7  ;;  %v4590_v32 = vsel %vm13532_vm4, %v13548_v63, 0.0  ;;  %vm16684_vm9 = vcmp.ne.s32.totalorder %v13004_v23, 17 }
 0x349   : > { %v4740_v21 = vsel %vm16683_vm10, %v4700_v2, 0.0  ;;  %vm16685_vm11 = vcmp.ne.s32.totalorder %v13004_v23, 0  ;;  %v16686_v11 = vmov 0  ;;  %v4630_v43 = vadd.f32 %v4629_v48, %v4628_v18 }
 0x34a   : > { %vm13568_vm8 = vmand %vm16685_vm11, %vm16684_vm9  ;;  %v4741_v54 = vadd.f32 %v4740_v21, %v4739_v22  ;;  %v4592_v9 = vsel %vm13543_vm3, %v13526_v20, 0.0  ;;  %v4703_v35 = vmul.f32 %v4590_v32, %v4590_v32  ;;  %vm16689_vm7 = vcmp.ne.s32.totalorder %v13009_v39, 17 }
 0x34b   : > { %v16687_v11 = vsel %vm13568_vm8, 4294967295, %v16686_v11  ;;  %vm16690_vm10 = vcmp.ne.s32.totalorder %v13009_v39, 0  ;;  %v16691_v2 = vmov 0  ;;  %vm16694_vm1 = vcmask 31744  }
 0x34c   : > { %16688 = vst [vmem:[#allocation46_spill] sm:$0xff] %v16687_v11  ;;  %vm13579_vm15 = vmand %vm16690_vm10, %vm16689_vm7  ;;  %v4742_v0 = vsel %vm16694_vm1, %v4701_v29, 0.0  ;;  %v13587_v22 = vadd.f32 %v13255_v58, %v4323_v41  ;;  %v4593_v4 = vsel %vm13568_vm8, %v13553_v8, 0.0  ;;  %v4705_v29 = vmul.f32 %v4592_v9, %v4592_v9 }
 0x34d   : > { %v16692_v2 = vsel %vm13579_vm15, 4294967295, %v16691_v2  ;;  %vm16695_vm11 = vmmov %vm16694_vm1  ;;  %v4743_v18 = vadd.f32 %v4742_v0, %v4741_v54  ;;  %v10645_v0 = vpop.f32.mrb[12].mxu0 }
 0x34e   : > { %16693 = vst [vmem:[#allocation47_spill] sm:$0xff] %v16692_v2  ;;  %v4631_v37 = vsel %vm16695_vm11, %v4589_v49, 0.0  ;;  %vm16696_vm9 = vmmov %vm16694_vm1  ;;  %v13597_v49 = vsub.s32 %v13280_v25, %v622_v1  ;;  %v4336_v1 = vpop.f32.mrb[13].mxu0  ;;  %v13628_v23 = vadd.f32 %v10645_v0, %v13255_v58 }
 0x34f   : > { %v4633_v48 = vsel %vm16696_vm9, %v4590_v32, 0.0  ;;  %v4632_v21 = vadd.f32 %v4631_v37, %v4630_v43  ;;  %vm16697_vm10 = vmmov %vm16694_vm1  ;;  %v4591_v37 = vsel %vm13579_vm15, %v13587_v22, 0.0  ;;  %vm16714_vm15 = vcmp.ne.s32.totalorder %v13017_v50, 0 }
 0x350   : > { %v4744_v32 = vsel %vm16697_vm10, %v4702_v57, 0.0  ;;  %vm16698_vm11 = vmmov %vm16694_vm1  ;;  %v4704_v25 = vmul.f32 %v4591_v37, %v4591_v37  ;;  %vm16701_vm10 = vcmp.ne.s32.totalorder %v13022_v53, 0  ;;  %v16702_v57 = vmov 0 }
 0x351   : > { %v4746_v41 = vsel %vm16698_vm11, %v4703_v35, 0.0  ;;  %v4634_v43 = vadd.f32 %v4633_v48, %v4632_v21  ;;  %v4745_v54 = vadd.f32 %v4744_v32, %v4743_v18  ;;  %vm16699_vm7 = vmmov %vm16694_vm1  ;;  %vm16700_vm1 = vcmp.ne.s32.totalorder %v13022_v53, 17  ;;  %v10646_v18 = vpop.f32.mrb[14].mxu0 }
 0x352   : > { %v4635_v11 = vsel %vm16699_vm7, %v4591_v37, 0.0  ;;  %vm13611_vm3 = vmand %vm16701_vm10, %vm16700_vm1  ;;  %v4706_v35 = vmul.f32 %v4593_v4, %v4593_v4  ;;  %v13618_v48 = vadd.f32 %v13255_v58, %v4336_v1  ;;  %v16705_v21 = vshrl.u32 %v13381_v24, 4  ;;  %v4339_v28 = vpop.f32.mrb[15].mxu0 }
 0x353   : > { %v16703_v57 = vsel %vm13611_vm3, 4294967295, %v16702_v57  ;;  %v13624_v37 = vmul.u32 18, %v632_v60  ;;  %v4747_v2 = vadd.f32 %v4746_v41, %v4745_v54  ;;  %v4636_v38 = vadd.f32 %v4635_v11, %v4634_v43  ;;  %vm16706_vm1 = vmmov %vm16699_vm7 }
 0x354   : > { %16704 = vst [vmem:[#allocation48_spill] sm:$0xff] %v16703_v57  ;;  %v655_v32 = vmul.u32 18, %v16705_v21  ;;  %v4748_v53 = vsel %vm16706_vm1, %v4704_v25, 0.0  ;;  %vm16707_vm10 = vcmp.ne.s32.totalorder %v13036_v47, 17  ;;  %vm16708_vm11 = vcmp.ne.s32.totalorder %v13036_v47, 0  ;;  %vm16712_vm13 = vmmov %vm16706_vm1 }
 0x355   : > { %vm13634_vm9 = vmand %vm16708_vm11, %vm16707_vm10  ;;  %v16709_v1 = vmov 0  ;;  %v4637_v24 = vsel %vm16712_vm13, %v4592_v9, 0.0  ;;  %vm16713_vm7 = vcmp.ne.s32.totalorder %v13017_v50, 17  ;;  %v16715_v60 = vmov 0 }
 0x356   : > { %v16710_v1 = vsel %vm13634_vm9, 4294967295, %v16709_v1  ;;  %vm13643_vm8 = vmand %vm16714_vm15, %vm16713_vm7  ;;  %v4594_v11 = vsel %vm13611_vm3, %v13618_v48, 0.0  ;;  %v13651_v41 = vadd.f32 %v10646_v18, %v13255_v58  ;;  %v13654_v0 = vadd.f32 %v13255_v58, %v4339_v28 }
 0x357   : > { %16711 = vst [vmem:[#allocation49_spill] sm:$0xff] %v16710_v1  ;;  %v16716_v60 = vsel %vm13643_vm8, 4294967295, %v16715_v60  ;;  %vm16718_vm11 = vmmov %vm16706_vm1  ;;  %v4638_v43 = vadd.f32 %v4637_v24, %v4636_v38  ;;  %v4749_v54 = vadd.f32 %v4748_v53, %v4747_v2  ;;  %vm16719_vm13 = vcmp.ne.s32.totalorder %v13031_v61, 17 }
 0x358   : > { %16717 = vst [vmem:[#allocation50_spill] sm:$0xff] %v16716_v60  ;;  %v4750_v9 = vsel %vm16718_vm11, %v4705_v29, 0.0  ;;  %vm16720_vm15 = vcmp.ne.s32.totalorder %v13031_v61, 0  ;;  %v16721_v25 = vmov 0  ;;  %vm16724_vm10 = vmmov %vm16706_vm1  ;;  %v4707_v28 = vmul.f32 %v4594_v11, %v4594_v11  ;;  %v10649_v61 = vpop.f32.mrb[16].mxu0 }
 0x359   : > { %vm13661_vm7 = vmand %vm16720_vm15, %vm16719_vm13  ;;  %v4639_v18 = vsel %vm16724_vm10, %v4593_v4, 0.0  ;;  %v4595_v38 = vsel %vm13634_vm9, %v13654_v0, 0.0  ;;  %v4751_v2 = vadd.f32 %v4750_v9, %v4749_v54  ;;  %v4596_v29 = vsel %vm13643_vm8, %v13628_v23, 0.0  ;;  %v4352_v54 = vpop.f32.mrb[17].mxu0 }
 0x35a   : > { %v16722_v25 = vsel %vm13661_vm7, 4294967295, %v16721_v25  ;;  %vm16725_vm3 = vmmov %vm16706_vm1  ;;  %v4640_v24 = vadd.f32 %v4639_v18, %v4638_v43  ;;  %v4708_v57 = vmul.f32 %v4595_v38, %v4595_v38  ;;  %vm16729_vm10 = vcmp.ne.s32.totalorder %v13043_v17, 17 }
 0x35b   : > { %16723 = vst [vmem:[#allocation51_spill] sm:$0xff] %v16722_v25  ;;  %v4641_v21 = vsel %vm16725_vm3, %v4594_v11, 0.0  ;;  %vm16726_vm14 = vmmov %vm16706_vm1  ;;  %v4597_v11 = vsel %vm13661_vm7, %v13651_v41, 0.0  ;;  %vm16730_vm11 = vcmp.ne.s32.totalorder %v13043_v17, 0  ;;  %v16731_v43 = vmov 0 }
 0x35c   : > { %v4752_v53 = vsel %vm16726_vm14, %v4706_v35, 0.0  ;;  %vm16727_vm13 = vmmov %vm16706_vm1  ;;  %v4642_v35 = vadd.f32 %v4641_v21, %v4640_v24  ;;  %v799_v18 = vadd.s32 18, %v13597_v49  ;;  %vm16735_vm14 = vcmp.ne.s32.totalorder %v13040_v3, 17 }
 0x35d   : > { %v4754_v4 = vsel %vm16727_vm13, %v4707_v28, 0.0  ;;  %vm16728_vm3 = vmmov %vm16706_vm1  ;;  %v4753_v9 = vadd.f32 %v4752_v53, %v4751_v2  ;;  %v4709_v28 = vmul.f32 %v4596_v29, %v4596_v29  ;;  %vm16736_vm7 = vcmp.ne.s32.totalorder %v13040_v3, 0  ;;  %v10650_v2 = vpop.f32.mrb[18].mxu0 }
 0x35e   : > { %v4643_v1 = vsel %vm16728_vm3, %v4595_v38, 0.0  ;;  %vm13688_vm4 = vmand %vm16730_vm11, %vm16729_vm10  ;;  %v16737_v38 = vmov 0  ;;  %v13706_v53 = vadd.f32 %v13255_v58, %v4352_v54  ;;  %v13711_v24 = vsub.s32 %v13283_v27, %v655_v32  ;;  %v4355_v17 = vpop.f32.mrb[19].mxu0 }
 0x35f   : > { %v16732_v43 = vsel %vm13688_vm4, 4294967295, %v16731_v43  ;;  %vm16734_vm15 = vmmov %vm16706_vm1  ;;  %v4710_v25 = vmul.f32 %v4597_v11, %v4597_v11  ;;  %v4644_v60 = vadd.f32 %v4643_v1, %v4642_v35  ;;  %v13714_v3 = vadd.f32 %v10649_v61, %v13255_v58 }
 0x360   : > { %16733 = vst [vmem:[#allocation52_spill] sm:$0xff] %v16732_v43  ;;  %v4756_v21 = vsel %vm16734_vm15, %v4708_v57, 0.0  ;;  %vm13701_vm11 = vmand %vm16736_vm7, %vm16735_vm14  ;;  %v4755_v57 = vadd.f32 %v4754_v4, %v4753_v9  ;;  %vm16740_vm7 = vcmp.ne.s32.totalorder %v13205_v62, 17  ;;  %vm16741_vm15 = vcmp.ne.s32.totalorder %v13205_v62, 0  ;;  %v10653_v62 = vpop.f32.mrb[20].mxu0 }
 0x361   : > { %v16738_v38 = vsel %vm13701_vm11, 4294967295, %v16737_v38  ;;  %vm13720_vm14 = vmand %vm16741_vm15, %vm16740_vm7  ;;  %v16742_v54 = vmov 0  ;;  %v4598_v27 = vsel %vm13688_vm4, %v13706_v53, 0.0  ;;  %vm16746_vm13 = vcmp.ne.s32.totalorder %v13200_v40, 17 }
 0x362   : > { %16739 = vst [vmem:[#allocation53_spill] sm:$0xff] %v16738_v38  ;;  %v16743_v54 = vsel %vm13720_vm14, 4294967295, %v16742_v54  ;;  %vm16745_vm10 = vmmov %vm16706_vm1  ;;  %vm16747_vm3 = vcmp.ne.s32.totalorder %v13200_v40, 0  ;;  %v16748_v61 = vmov 0  ;;  %v13737_v32 = vadd.f32 %v10650_v2, %v13255_v58 }
 0x363   : > { %16744 = vst [vmem:[#allocation54_spill] sm:$0xff] %v16743_v54  ;;  %v4645_v50 = vsel %vm16745_vm10, %v4596_v29, 0.0  ;;  %vm13732_vm1 = vmand %vm16747_vm3, %vm16746_vm13  ;;  %v13740_v1 = vadd.f32 %v13255_v58, %v4355_v17  ;;  %v4757_v29 = vadd.f32 %v4756_v21, %v4755_v57  ;;  %v4711_v35 = vmul.f32 %v4598_v27, %v4598_v27 }
 0x364   : > { %v16749_v61 = vsel %vm13732_vm1, 4294967295, %v16748_v61  ;;  %v4646_v4 = vadd.f32 %v4645_v50, %v4644_v60  ;;  %vm16751_vm10 = vcmp.ne.s32.totalorder %v13496_v55, 0  ;;  %vm16752_vm7 = vcmp.lt.s32.totalorder %v13496_v55, 0 }
 0x365   : > { %16750 = vst [vmem:[#allocation55_spill] sm:$0xff] %v16749_v61  ;;  %vm13746_vm15 = vmand %vm16752_vm7, %vm16751_vm10  ;;  %v13752_v43 = vsub.s32 %v13302_v34, %v13624_v37  ;;  %vm16755_vm13 = vcmask 31744   ;;  %v4599_v60 = vsel %vm13720_vm14, %v13740_v1, 0.0  ;;  %vm16758_vm7 = vcmp.ne.s32.totalorder %v13597_v49, 0 }
 0x366   : > { %v4758_v2 = vsel %vm16755_vm13, %v4709_v28, 0.0  ;;  %vm16756_vm3 = vmmov %vm16755_vm13  ;;  %vm16759_vm9 = vcmp.lt.s32.totalorder %v13597_v49, 0  ;;  %v4600_v28 = vsel %vm13701_vm11, %v13714_v3, 0.0  ;;  %v4712_v40 = vmul.f32 %v4599_v60, %v4599_v60 }
 0x367   : > { %v4647_v17 = vsel %vm16756_vm3, %v4597_v11, 0.0  ;;  %vm16757_vm4 = vmmov %vm16756_vm3  ;;  %v4759_v11 = vadd.f32 %v4758_v2, %v4757_v29  ;;  %v4651_v54 = vsel %vm16756_vm3, %v4599_v60, 0.0  ;;  %vm16765_vm8 = vcmp.ne.s32.totalorder %v13238_v5, 0 }
 0x368   : > { %v4649_v50 = vsel %vm16757_vm4, %v4598_v27, 0.0  ;;  %vm13766_vm12 = vmand %vm16759_vm9, %vm16758_vm7  ;;  %v4648_v21 = vadd.f32 %v4647_v17, %v4646_v4  ;;  %v4601_v27 = vsel %vm13732_vm1, %v13737_v32, 0.0  ;;  %v16766_v4 = vmov 0 }
 0x369   : > { %vm16762_vm13 = vmmov %vm16756_vm3  ;;  %v13795_v2 = vsel %vm13746_vm15, %v13556_v44, %v13496_v55  ;;  %v13800_v17 = vsel %vm13766_vm12, %v799_v18, %v13597_v49  ;;  %v4714_v44 = vmul.f32 %v4601_v27, %v4601_v27  ;;  %v13810_v34 = vadd.f32 %v10653_v62, %v13255_v58 }
 0x36a   : > { %v4760_v37 = vsel %vm16762_vm13, %v4710_v25, 0.0  ;;  %vm16763_vm4 = vmmov %vm16756_vm3  ;;  %v4650_v25 = vadd.f32 %v4649_v50, %v4648_v21  ;;  %vm16764_vm13 = vcmp.ne.s32.totalorder %v13238_v5, 17  ;;  %v4713_v50 = vmul.f32 %v4600_v28, %v4600_v28 }
 0x36b   : > { %v4762_v57 = vsel %vm16763_vm4, %v4711_v35, 0.0  ;;  %v4761_v29 = vadd.f32 %v4760_v37, %v4759_v11  ;;  %vm13785_vm10 = vmand %vm16765_vm8, %vm16764_vm13  ;;  %v4368_v35 = vpop.f32.mrb[21].mxu0  ;;  %vm16770_vm12 = vcmp.ne.s32.totalorder %v13248_v45, 17  ;;  %vm16771_vm15 = vcmp.ne.s32.totalorder %v13248_v45, 0 }
 0x36c   : > { %v16767_v4 = vsel %vm13785_vm10, 4294967295, %v16766_v4  ;;  %vm16769_vm8 = vmmov %vm16756_vm3  ;;  %v13804_v37 = vadd.f32 %v13255_v58, %v4368_v35  ;;  %v10654_v11 = vpop.f32.mrb[22].mxu0  ;;  %v4652_v9 = vadd.f32 %v4651_v54, %v4650_v25  ;;  %vm16776_vm9 = vcmp.ne.s32.totalorder %v13219_v16, 17 }
 0x36d   : > { %16768 = vst [vmem:[#allocation56_spill] sm:$0xff] %v16767_v4  ;;  %v4764_v60 = vsel %vm16769_vm8, %v4712_v40, 0.0  ;;  %v4763_v55 = vadd.f32 %v4762_v57, %v4761_v29  ;;  %vm13816_vm8 = vmand %vm16771_vm15, %vm16770_vm12  ;;  %v16772_v40 = vmov 0  ;;  %v4371_v49 = vpop.f32.mrb[23].mxu0  ;;  %vm16777_vm7 = vcmp.ne.s32.totalorder %v13219_v16, 0 }
 0x36e   : > { %v16773_v40 = vsel %vm13816_vm8, 4294967295, %v16772_v40  ;;  %vm16775_vm4 = vmmov %vm16756_vm3  ;;  %v16778_v62 = vmov 0  ;;  %v4602_v54 = vsel %vm13785_vm10, %v13804_v37, 0.0  ;;  %v13834_v21 = vadd.f32 %v10654_v11, %v13255_v58  ;;  %v10657_v38 = vpop.f32.mrb[24].mxu0 }
 0x36f   : > { %16774 = vst [vmem:[#allocation57_spill] sm:$0xff] %v16773_v40  ;;  %v4653_v18 = vsel %vm16775_vm4, %v4600_v28, 0.0  ;;  %vm13826_vm3 = vmand %vm16777_vm7, %vm16776_vm9  ;;  %v13837_v57 = vadd.f32 %v13255_v58, %v4371_v49  ;;  %v4765_v28 = vadd.f32 %v4764_v60, %v4763_v55  ;;  %v4715_v29 = vmul.f32 %v4602_v54, %v4602_v54 }
 0x370   : > { %v16779_v62 = vsel %vm13826_vm3, 4294967295, %v16778_v62  ;;  %v4654_v25 = vadd.f32 %v4653_v18, %v4652_v9  ;;  %vm16781_vm4 = vcmp.ne.s32.totalorder %v13243_v6, 17  ;;  %vm16782_vm9 = vcmp.ne.s32.totalorder %v13243_v6, 0 }
 0x371   : > { %16780 = vst [vmem:[#allocation58_spill] sm:$0xff] %v16779_v62  ;;  %vm13843_vm7 = vmand %vm16782_vm9, %vm16781_vm4  ;;  %v16783_v35 = vmov 0  ;;  %vm16786_vm15 = vcmask 31744   ;;  %v4603_v60 = vsel %vm13816_vm8, %v13837_v57, 0.0  ;;  %v4604_v18 = vsel %vm13826_vm3, %v13810_v34, 0.0 }
 0x372   : > { %v16784_v35 = vsel %vm13843_vm7, 4294967295, %v16783_v35  ;;  %v4766_v4 = vsel %vm16786_vm15, %v4713_v50, 0.0  ;;  %vm16787_vm13 = vmmov %vm16786_vm15  ;;  %v4716_v61 = vmul.f32 %v4603_v60, %v4603_v60  ;;  %vm16793_vm1 = vcmp.ne.s32.totalorder %v13274_v13, 0 }
 0x373   : > { %16785 = vst [vmem:[#allocation59_spill] sm:$0xff] %v16784_v35  ;;  %v4655_v11 = vsel %vm16787_vm13, %v4601_v27, 0.0  ;;  %vm16788_vm10 = vmmov %vm16787_vm13  ;;  %v4767_v9 = vadd.f32 %v4766_v4, %v4765_v28  ;;  %v4384_v28 = vpop.f32.mrb[25].mxu0  ;;  %vm16807_vm12 = vcmask 31744   ;;  %vm16821_vm3 = vcmp.ne.s32.totalorder %v13711_v24, 0 }
 0x374   : > { %v4657_v49 = vsel %vm16788_vm10, %v4602_v54, 0.0  ;;  %vm16789_vm4 = vmmov %vm16788_vm10  ;;  %v4656_v50 = vadd.f32 %v4655_v11, %v4654_v25  ;;  %v4605_v54 = vsel %vm13843_vm7, %v13834_v21, 0.0  ;;  %v16794_v25 = vmov 0 }
 0x375   : > { %v4768_v55 = vsel %vm16789_vm4, %v4714_v44, 0.0  ;;  %vm16790_vm9 = vmmov %vm16789_vm4  ;;  %v4717_v11 = vmul.f32 %v4604_v18, %v4604_v18  ;;  %v4661_v16 = vsel %vm16807_vm12, %v4604_v18, 0.0  ;;  %vm16813_vm12 = vcmp.ne.s32.totalorder %v13296_v51, 17 }
 0x376   : > { %v4770_v27 = vsel %vm16790_vm9, %v4715_v29, 0.0  ;;  %vm16791_vm10 = vmmov %vm16789_vm4  ;;  %v4658_v4 = vadd.f32 %v4657_v49, %v4656_v50  ;;  %v4769_v44 = vadd.f32 %v4768_v55, %v4767_v9  ;;  %vm16792_vm4 = vcmp.ne.s32.totalorder %v13274_v13, 17  ;;  %v10658_v55 = vpop.f32.mrb[26].mxu0 }
 0x377   : > { %v4659_v40 = vsel %vm16791_vm10, %v4603_v60, 0.0  ;;  %vm13871_vm11 = vmand %vm16793_vm1, %vm16792_vm4  ;;  %v800_v29 = vadd.s32 18, %v13752_v43  ;;  %v13881_v60 = vadd.f32 %v13255_v58, %v4384_v28  ;;  %v802_v9 = vadd.s32 18, %v13711_v24  ;;  %v4387_v6 = vpop.f32.mrb[27].mxu0 }
 0x378   : > { %v16795_v25 = vsel %vm13871_vm11, 4294967295, %v16794_v25  ;;  %vm16797_vm13 = vmmov %vm16790_vm9  ;;  %vm16798_vm9 = vcmp.ne.s32.totalorder %v13752_v43, 0  ;;  %vm16799_vm10 = vcmp.lt.s32.totalorder %v13752_v43, 0  ;;  %v4771_v35 = vadd.f32 %v4770_v27, %v4769_v44 }
 0x379   : > { %16796 = vst [vmem:[#allocation60_spill] sm:$0xff] %v16795_v25  ;;  %v4772_v49 = vsel %vm16797_vm13, %v4716_v61, 0.0  ;;  %vm13890_vm15 = vmand %vm16799_vm10, %vm16798_vm9  ;;  %v4718_v61 = vmul.f32 %v4605_v54, %v4605_v54  ;;  %v4660_v62 = vadd.f32 %v4659_v40, %v4658_v4  ;;  %v13895_v28 = vadd.f32 %v10657_v38, %v13255_v58 }
 0x37a   : > { %vm16802_vm13 = vcmp.ne.s32.totalorder %v13298_v31, 17  ;;  %vm16803_vm1 = vcmp.ne.s32.totalorder %v13298_v31, 0  ;;  %v16804_v13 = vmov 0  ;;  %vm16808_vm9 = vcmp.ne.s32.totalorder %v13262_v12, 17 }
 0x37b   : > { %vm13901_vm4 = vmand %vm16803_vm1, %vm16802_vm13  ;;  %vm16809_vm10 = vcmp.ne.s32.totalorder %v13262_v12, 0  ;;  %v16810_v40 = vmov 0  ;;  %v4606_v38 = vsel %vm13871_vm11, %v13881_v60, 0.0  ;;  %v13918_v27 = vadd.f32 %v10658_v55, %v13255_v58 }
 0x37c   : > { %v16805_v13 = vsel %vm13901_vm4, 4294967295, %v16804_v13  ;;  %vm13910_vm7 = vmand %vm16809_vm10, %vm16808_vm9  ;;  %v13921_v4 = vadd.f32 %v13255_v58, %v4387_v6  ;;  %v4662_v44 = vadd.f32 %v4661_v16, %v4660_v62  ;;  %v4773_v18 = vadd.f32 %v4772_v49, %v4771_v35 }
 0x37d   : > { %16806 = vst [vmem:[#allocation61_spill] sm:$0xff] %v16805_v13  ;;  %v16811_v40 = vsel %vm13910_vm7, 4294967295, %v16810_v40  ;;  %v4719_v31 = vmul.f32 %v4606_v38, %v4606_v38  ;;  %vm16814_vm1 = vcmp.ne.s32.totalorder %v13296_v51, 0  ;;  %v16815_v12 = vmov 0  ;;  %v10661_v51 = vpop.f32.mrb[28].mxu0 }
 0x37e   : > { %16812 = vst [vmem:[#allocation62_spill] sm:$0xff] %v16811_v40  ;;  %vm13927_vm13 = vmand %vm16814_vm1, %vm16813_vm12  ;;  %v13934_v25 = vsel %vm13890_vm15, %v800_v29, %v13752_v43  ;;  %vm16818_vm9 = vcmask 31744   ;;  %v4607_v62 = vsel %vm13901_vm4, %v13921_v4, 0.0  ;;  %vm16822_vm8 = vcmp.lt.s32.totalorder %v13711_v24, 0 }
 0x37f   : > { %v16816_v12 = vsel %vm13927_vm13, 4294967295, %v16815_v12  ;;  %v4774_v55 = vsel %vm16818_vm9, %v4717_v11, 0.0  ;;  %vm16819_vm10 = vmmov %vm16818_vm9  ;;  %v4776_v35 = vsel %vm16818_vm9, %v4718_v61, 0.0  ;;  %v4608_v29 = vsel %vm13910_vm7, %v13895_v28, 0.0  ;;  %v9651_v61 = vld [vmem:[%s16330_s2 + $0x2] sm:$0x3] }
 0x380   : > { %16817 = vst [vmem:[#allocation63_spill] sm:$0xff] %v16816_v12  ;;  %v4663_v6 = vsel %vm16819_vm10, %v4605_v54, 0.0  ;;  %vm16820_vm11 = vmmov %vm16818_vm9  ;;  %v4775_v54 = vadd.f32 %v4774_v55, %v4773_v18  ;;  %v4609_v50 = vsel %vm13927_vm13, %v13918_v27, 0.0  ;;  %v4720_v13 = vmul.f32 %v4607_v62, %v4607_v62 }
 0x381   : > { %v4665_v16 = vsel %vm16820_vm11, %v4606_v38, 0.0  ;;  %vm13948_vm15 = vmand %vm16822_vm8, %vm16821_vm3  ;;  %v4664_v11 = vadd.f32 %v4663_v6, %v4662_v44  ;;  %vm16827_vm3 = vcmp.ne.s32.totalorder %v13493_v14, 17  ;;  %vm16828_vm8 = vcmp.ne.s32.totalorder %v13493_v14, 0  ;;  %v4400_v44 = vpop.f32.mrb[29].mxu0 }
 0x382   : > { %vm16825_vm11 = vmmov %vm16818_vm9  ;;  %v4777_v55 = vadd.f32 %v4776_v35, %v4775_v54  ;;  %v13976_v6 = vsel %vm13948_vm15, %v802_v9, %v13711_v24  ;;  %v13982_v54 = vadd.f32 %v13255_v58, %v4400_v44  ;;  %v4722_v40 = vmul.f32 %v4609_v50, %v4609_v50 }
 0x383   : > { %v4778_v49 = vsel %vm16825_vm11, %v4719_v31, 0.0  ;;  %vm16826_vm10 = vmmov %vm16818_vm9  ;;  %v4666_v18 = vadd.f32 %v4665_v16, %v4664_v11  ;;  %v16829_v31 = vmov 0  ;;  %16832 = vst [vmem:[#allocation65_spill] sm:$0xff] %v13976_v6  ;;  %v10662_v11 = vpop.f32.mrb[30].mxu0  ;;  %v13986_v24 = vadd.f32 %v10661_v51, %v13255_v58 }
 0x384   : > { %v4667_v38 = vsel %vm16826_vm10, %v4607_v62, 0.0  ;;  %vm13968_vm9 = vmand %vm16828_vm8, %vm16827_vm3  ;;  %vm16833_vm10 = vcmask 1041408   ;;  %v4721_v62 = vmul.f32 %v4608_v29, %v4608_v29  ;;  %v4779_v12 = vadd.f32 %v4778_v49, %v4777_v55 }
 0x385   : > { %v16830_v31 = vsel %vm13968_vm9, 4294967295, %v16829_v31  ;;  %11594 = vmatprep.subr.msk.bf16.mxu1 %vm16833_vm10, %v9651_v61  ;;  %vm16834_vm12 = vmmov %vm16833_vm10  ;;  %v4668_v14 = vadd.f32 %v4667_v38, %v4666_v18  ;;  %vm16836_vm15 = vcmp.ne.s32.totalorder %v13516_v19, 17  ;;  %v16838_v9 = vmov 0 }
 0x386   : > { %16831 = vst [vmem:[#allocation64_spill] sm:$0xff] %v16830_v31  ;;  %v5502_v16 = vsel %vm16834_vm12, %v9651_v61, 0  ;;  %vm16835_vm1 = vmmov %vm16825_vm11  ;;  %vm16837_vm12 = vcmp.ne.s32.totalorder %v13516_v19, 0  ;;  %vm16841_vm10 = vcmp.ne.s32.totalorder %v13487_v59, 17  ;;  %vm16842_vm11 = vcmp.ne.s32.totalorder %v13487_v59, 0 }
 0x387   : > { %v4780_v35 = vsel %vm16835_vm1, %v4720_v13, 0.0  ;;  %10668 = vmatpush3.bf16.msra.mxu1 %v5502_v16  ;;  %vm13992_vm8 = vmand %vm16837_vm12, %vm16836_vm15  ;;  %v4403_v13 = vpop.f32.mrb[31].mxu0  ;;  %v4669_v43 = vsel %vm16835_vm1, %v4608_v29, 0.0  ;;  %v16843_v49 = vmov 0  ;;  %v4610_v51 = vsel %vm13968_vm9, %v13982_v54, 0.0 }
 0x388   : > { %v16839_v9 = vsel %vm13992_vm8, 4294967295, %v16838_v9  ;;  %vm14001_vm3 = vmand %vm16842_vm11, %vm16841_vm10  ;;  %v14009_v38 = vadd.f32 %v10662_v11, %v13255_v58  ;;  %v14012_v61 = vadd.f32 %v13255_v58, %v4403_v13  ;;  %v4670_v18 = vadd.f32 %v4669_v43, %v4668_v14  ;;  %v10665_v59 = vpop.f32.mrb[32].mxu0 }
 0x389   : > { %16840 = vst [vmem:[#allocation66_spill] sm:$0xff] %v16839_v9  ;;  %v16844_v49 = vsel %vm14001_vm3, 4294967295, %v16843_v49  ;;  %v4781_v29 = vadd.f32 %v4780_v35, %v4779_v12  ;;  %v4723_v55 = vmul.f32 %v4610_v51, %v4610_v51  ;;  %vm16846_vm15 = vcmp.ne.s32.totalorder %v13511_v15, 17  ;;  %vm16851_vm10 = vmmov %vm16835_vm1 }
 0x38a   : > { %16845 = vst [vmem:[#allocation67_spill] sm:$0xff] %v16844_v49  ;;  %vm16847_vm11 = vcmp.ne.s32.totalorder %v13511_v15, 0  ;;  %v16848_v44 = vmov 0  ;;  %v4782_v16 = vsel %vm16851_vm10, %v4721_v62, 0.0  ;;  %vm16852_vm9 = vmmov %vm16835_vm1  ;;  %v4611_v12 = vsel %vm13992_vm8, %v14012_v61, 0.0 }
 0x38b   : > { %vm14018_vm12 = vmand %vm16847_vm11, %vm16846_vm15  ;;  %v4671_v11 = vsel %vm16852_vm9, %v4609_v50, 0.0  ;;  %v4783_v35 = vadd.f32 %v4782_v16, %v4781_v29  ;;  %v4612_v43 = vsel %vm14001_vm3, %v13986_v24, 0.0  ;;  %vm16858_vm11 = vcmp.ne.s32.totalorder %v13800_v17, 0 }
 0x38c   : > { %v16849_v44 = vsel %vm14018_vm12, 4294967295, %v16848_v44  ;;  %vm16853_vm13 = vmmov %vm16835_vm1  ;;  %v4672_v31 = vadd.f32 %v4671_v11, %v4670_v18  ;;  %v4613_v50 = vsel %vm14018_vm12, %v14009_v38, 0.0  ;;  %v4416_v18 = vpop.f32.mrb[33].mxu0  ;;  %v4725_v29 = vmul.f32 %v4612_v43, %v4612_v43 }
 0x38d   : > { %16850 = vst [vmem:[#allocation68_spill] sm:$0xff] %v16849_v44  ;;  %v4673_v13 = vsel %vm16853_vm13, %v4610_v51, 0.0  ;;  %vm16854_vm7 = vmmov %vm16835_vm1  ;;  %v4724_v51 = vmul.f32 %v4611_v12, %v4611_v12  ;;  %vm16857_vm13 = vcmp.ne.s32.totalorder %v13800_v17, 17  ;;  %v14050_v16 = vadd.f32 %v13255_v58, %v4416_v18  ;;  %v5390_v18 = vld [vmem:[%s16330_s2] sm:$0x3] }
 0x38e   : > { %v4784_v14 = vsel %vm16854_vm7, %v4722_v40, 0.0  ;;  %vm16855_vm15 = vmmov %vm16835_vm1  ;;  %v4674_v9 = vadd.f32 %v4673_v13, %v4672_v31  ;;  %vm981_vm7 = vcmp.ne.s32.totalorder %v13795_v2, 17  ;;  %v16859_v40 = vmov 0  ;;  %v10666_v31 = vpop.f32.mrb[34].mxu0 }
 0x38f   : > { %v4786_v15 = vsel %vm16855_vm15, %v4723_v55, 0.0  ;;  %vm16856_vm9 = vmmov %vm16835_vm1  ;;  %v4785_v19 = vadd.f32 %v4784_v14, %v4783_v35  ;;  %v4788_v55 = vsel %vm16835_vm1, %v4724_v51, 0.0  ;;  %v4726_v13 = vmul.f32 %v4613_v50, %v4613_v50  ;;  %v4419_v51 = vpop.f32.mrb[35].mxu0 }
 0x390   : > { %v4675_v62 = vsel %vm16856_vm9, %v4611_v12, 0.0  ;;  %vm14043_vm10 = vmand %vm16858_vm11, %vm16857_vm13  ;;  %v14054_v14 = vadd.f32 %v10665_v59, %v13255_v58  ;;  %vm16862_vm13 = vcmp.ne.s32.totalorder %v13934_v25, 17  ;;  %vm16863_vm11 = vcmp.ne.s32.totalorder %v13934_v25, 0 }
 0x391   : > { %v16860_v40 = vsel %vm14043_vm10, 4294967295, %v16859_v40  ;;  %v4787_v11 = vadd.f32 %v4786_v15, %v4785_v19  ;;  %v4676_v12 = vadd.f32 %v4675_v62, %v4674_v9  ;;  %vm14060_vm15 = vmand %vm16863_vm11, %vm16862_vm13  ;;  %v16864_v35 = vmov 0 }
 0x392   : > { %16861 = vst [vmem:[#allocation69_spill] sm:$0xff] %v16860_v40  ;;  %v16865_v35 = vsel %vm14060_vm15, 4294967295, %v16864_v35  ;;  %v4677_v15 = vsel %vm16835_vm1, %v4612_v43, 0.0  ;;  %vm16867_vm9 = vcmp.ne.s32.totalorder %v13795_v2, 0  ;;  %v16868_v59 = vmov 0  ;;  %vm16872_vm11 = vmmov %vm16835_vm1 }
 0x393   : > { %16866 = vst [vmem:[#allocation70_spill] sm:$0xff] %v16865_v35  ;;  %vm14072_vm12 = vmand %vm16867_vm9, %vm981_vm7  ;;  %v4614_v19 = vsel %vm14043_vm10, %v14050_v16, 0.0  ;;  %v14080_v9 = vadd.f32 %v13255_v58, %v4419_v51  ;;  %vm16871_vm13 = vcmask 1041408   ;;  %v4678_v62 = vadd.f32 %v4677_v15, %v4676_v12 }
 0x394   : > { %v16869_v59 = vsel %vm14072_vm12, 4294967295, %v16868_v59  ;;  %11595 = vmatprep.subr.msk.bf16.mxu1 %vm16871_vm13, %v5390_v18  ;;  %v4789_v44 = vadd.f32 %v4788_v55, %v4787_v11  ;;  %v4727_v43 = vmul.f32 %v4614_v19, %v4614_v19  ;;  %v14084_v49 = vadd.f32 %v10666_v31, %v13255_v58  ;;  %vm16873_vm7 = vmmov %vm16835_vm1 }
 0x395   : > { %16870 = vst [vmem:[#allocation71_spill] sm:$0xff] %v16869_v59  ;;  %v4790_v45 = vsel %vm16872_vm11, %v4725_v29, 0.0  ;;  %v4679_v5 = vsel %vm16873_vm7, %v4613_v50, 0.0  ;;  %vm16874_vm9 = vmmov %vm16835_vm1  ;;  %vm16875_vm1 = vcmp.ne.s32.totalorder %v13976_v6, 17  ;;  %vm16876_vm10 = vcmp.ne.s32.totalorder %v13976_v6, 0 }
 0x396   : > { %v4681_v47 = vsel %vm16874_vm9, %v4614_v19, 0.0  ;;  %vm14093_vm3 = vmand %vm16876_vm10, %vm16875_vm1  ;;  %v16877_v51 = vmov 0  ;;  %v4615_v55 = vsel %vm14060_vm15, %v14080_v9, 0.0  ;;  %v4791_v31 = vadd.f32 %v4790_v45, %v4789_v44 }
 0x397   : > { %v16878_v51 = vsel %vm14093_vm3, 4294967295, %v16877_v51  ;;  %vm16880_vm13 = vmmov %vm16873_vm7  ;;  %v4616_v50 = vsel %vm14072_vm12, %v14054_v14, 0.0  ;;  %v4680_v29 = vadd.f32 %v4679_v5, %v4678_v62  ;;  %v4683_v12 = vsel %vm16873_vm7, %v4615_v55, 0.0 }
 0x398   : > { %16879 = vst [vmem:[#allocation72_spill] sm:$0xff] %v16878_v51  ;;  %v4792_v58 = vsel %vm16880_vm13, %v4726_v13, 0.0  ;;  %vm16881_vm11 = vmmov %vm16873_vm7  ;;  %v4728_v18 = vmul.f32 %v4615_v55, %v4615_v55  ;;  %vm5284_vm10 = vcmask 24576   ;;  %v4617_v35 = vsel %vm14093_vm3, %v14084_v49, 0.0 }
 0x399   : > { %v4794_v11 = vsel %vm16881_vm11, %v4727_v43, 0.0  ;;  %v4682_v15 = vadd.f32 %v4681_v47, %v4680_v29  ;;  %v4793_v19 = vadd.f32 %v4792_v58, %v4791_v31  ;;  %v4729_v40 = vmul.f32 %v4616_v50, %v4616_v50  ;;  %vm16882_vm9 = vmmov %vm16873_vm7 }
 0x39a   : > { %v4796_v45 = vsel %vm16882_vm9, %v4728_v18, 0.0  ;;  %v11761_v44 = vmov 0.0   ;;  %vm16883_vm1 = vmmov %vm16873_vm7  ;;  %v4730_v43 = vmul.f32 %v4617_v35, %v4617_v35  ;;  %vm16466_vm9 = vcmp.lt.s32.totalorder %v12595_v30, 2 }
 0x39b   : > { %5285 = vst.msk [vmem:[#allocation2] sm:$0x1] %vm5284_vm10, %v11761_v44  ;;  %5286 = vst.msk [vmem:[#allocation2 + $0x145] sm:$0x1] %vm5284_vm10, %v11761_v44  ;;  %v4795_v13 = vadd.f32 %v4794_v11, %v4793_v19  ;;  %v4684_v5 = vadd.f32 %v4683_v12, %v4682_v15  ;;  %v4685_v62 = vsel %vm16883_vm1, %v4616_v50, 0.0  ;;  %vm16463_vm10 = vcmp.lt.s32.totalorder %v12595_v30, 6 }
 0x39c   : > { %vm16884_vm13 = vmmov %vm16883_vm1 }
 0x39d   : > { %v4686_v59 = vadd.f32 %v4685_v62, %v4684_v5  ;;  %v4797_v55 = vadd.f32 %v4796_v45, %v4795_v13  ;;  %v4798_v47 = vsel %vm16884_vm13, %v4729_v40, 0.0  ;;  %vm16885_vm11 = vmmov %vm16883_vm1  ;;  %vm872_vm13 = vcmp.eq.s32.totalorder %v13934_v25, 0 }
 0x39e   : > { %v4687_v58 = vsel %vm16885_vm11, %v4617_v35, 0.0  ;;  %vm16886_vm7 = vmmov %vm16883_vm1  ;;  %vm908_vm11 = vcmp.eq.s32.totalorder %v13934_v25, 17  ;;  %vm871_vm1 = vcmp.eq.s32.totalorder %v13800_v17, 0 }
 0x39f   : > { %v4688_v31 = vadd.f32 %v4687_v58, %v4686_v59  ;;  %v4799_v29 = vadd.f32 %v4798_v47, %v4797_v55  ;;  %v4800_v51 = vsel %vm16886_vm7, %v4730_v43, 0.0  ;;  %vm16890_vm7 = vcmp.eq.s32.totalorder %v13800_v17, 17 }
 0x3a1   : > { %v4689_v6 = vrot.slane %v4688_v31, 4  ;;  %v4801_v18 = vadd.f32 %v4800_v51, %v4799_v29 }
 0x3a3   : > { %v4690_v39 = vadd.f32 %v4689_v6, %v4688_v31  ;;  %v4802_v56 = vrot.slane %v4801_v18, 4 }
 0x3a5   : > { %v4691_v44 = vrot.slane %v4690_v39, 2  ;;  %v4803_v11 = vadd.f32 %v4802_v56, %v4801_v18 }
 0x3a7   : > { %v4692_v12 = vadd.f32 %v4691_v44, %v4690_v39  ;;  %v4804_v15 = vrot.slane %v4803_v11, 2 }
 0x3a9   : > { %v4693_v50 = vrot.slane %v4692_v12, 1  ;;  %v4805_v19 = vadd.f32 %v4804_v15, %v4803_v11 }
 0x3ab   : > { %v4694_v5 = vadd.f32 %v4693_v50, %v4692_v12  ;;  %v4806_v45 = vrot.slane %v4805_v19, 1 }
 0x3ad   : > { %v4807_v13 = vadd.f32 %v4806_v45, %v4805_v19  ;;  %v14114_v40 = vmul.f32 0.00390625, %v4694_v5  ;;  %v16887_v5 = vld [vmem:[#allocation34_spill] sm:$0xff] }
 0x3af   : > { %v4809_v35 = vmul.f32 0.00390625, %v4807_v13  ;;  %v4810_v59 = vmul.f32 %v14114_v40, %v14114_v40  ;;  %v4843_v51 = vsub.f32 %v14009_v38, %v14114_v40  ;;  %v4844_v6 = vsub.f32 %v14050_v16, %v14114_v40 }
 0x3b0   : > { %v4845_v56 = vsub.f32 %v14080_v9, %v14114_v40  ;;  %v4846_v39 = vsub.f32 %v14054_v14, %v14114_v40  ;;  %v4847_v62 = vsub.f32 %v14084_v49, %v14114_v40  ;;  %v4829_v47 = vsub.f32 %v13740_v1, %v14114_v40 }
 0x3b1   : > { %v4811_v43 = vsub.f32 %v4809_v35, %v4810_v59  ;;  %v4831_v38 = vsub.f32 %v13737_v32, %v14114_v40  ;;  %v4832_v16 = vsub.f32 %v13804_v37, %v14114_v40  ;;  %v4833_v9 = vsub.f32 %v13837_v57, %v14114_v40 }
 0x3b2   : > { %v4834_v14 = vsub.f32 %v13810_v34, %v14114_v40  ;;  %v4835_v49 = vsub.f32 %v13834_v21, %v14114_v40  ;;  %v4812_v15 = vsub.f32 %v13323_v33, %v14114_v40  ;;  %v4813_v50 = vsub.f32 %v13363_v46, %v14114_v40 }
 0x3b3   : > { %v4848_v55 = vadd.f32 1e-05, %v4811_v43  ;;  %v4814_v19 = vsub.f32 %v13305_v42, %v14114_v40  ;;  %v4815_v45 = vsub.f32 %v16887_v5, %v14114_v40  ;;  %v4816_v13 = vsub.f32 %v13422_v52, %v14114_v40 }
 0x3b4   : > { %v4817_v35 = vsub.f32 %v13503_v26, %v14114_v40  ;;  %v4818_v33 = vsub.f32 %v13436_v10, %v14114_v40  ;;  %v4819_v42 = vsub.f32 %v13463_v36, %v14114_v40  ;;  %v4820_v46 = vsub.f32 %v13548_v63, %v14114_v40 }
 0x3b5   : > { %11748 = vrsqrt.f32 %v4848_v55  ;;  %v4821_v52 = vsub.f32 %v13587_v22, %v14114_v40  ;;  %v4822_v26 = vsub.f32 %v13526_v20, %v14114_v40  ;;  %v4823_v10 = vsub.f32 %v13553_v8, %v14114_v40 }
 0x3b6   : > { %v4824_v36 = vsub.f32 %v13618_v48, %v14114_v40  ;;  %v4825_v63 = vsub.f32 %v13654_v0, %v14114_v40  ;;  %v4826_v22 = vsub.f32 %v13628_v23, %v14114_v40  ;;  %v4827_v43 = vsub.f32 %v13651_v41, %v14114_v40 }
 0x3b7   : > { %v4828_v20 = vsub.f32 %v13706_v53, %v14114_v40  ;;  %v4830_v8 = vsub.f32 %v13714_v3, %v14114_v40  ;;  %v16896_v37 = vsub.f32 %v13881_v60, %v14114_v40  ;;  %v16897_v57 = vsub.f32 %v13921_v4, %v14114_v40 }
 0x3b8   : > { %v16898_v34 = vsub.f32 %v13895_v28, %v14114_v40  ;;  %v16899_v21 = vsub.f32 %v13918_v27, %v14114_v40  ;;  %v16900_v60 = vsub.f32 %v13982_v54, %v14114_v40  ;;  %v16901_v4 = vsub.f32 %v14012_v61, %v14114_v40 }
 0x3b9   : > { %v16902_v28 = vsub.f32 %v13986_v24, %v14114_v40 }
 0x3bf   : > { %v14190_v59 = vpop.eup %11748 }
 0x3c0   : > { %v4881_v55 = vmul.f32 %v14190_v59, %v4843_v51  ;;  %v4882_v48 = vmul.f32 %v14190_v59, %v4844_v6  ;;  %v4883_v0 = vmul.f32 %v14190_v59, %v4845_v56  ;;  %v4884_v5 = vmul.f32 %v14190_v59, %v4846_v39 }
 0x3c1   : > { %v4885_v12 = vmul.f32 %v14190_v59, %v4847_v62  ;;  %v4850_v23 = vmul.f32 %v14190_v59, %v4812_v15  ;;  %v4851_v41 = vmul.f32 %v14190_v59, %v4813_v50  ;;  %v4852_v11 = vmul.f32 %v14190_v59, %v4814_v19 }
 0x3c2   : > { %v14208_v53 = vmax.f32 %v4881_v55, 0.0  ;;  %v14210_v44 = vmax.f32 %v4882_v48, 0.0  ;;  %v4919_v3 = vmax.f32 %v4883_v0, 0.0  ;;  %v14212_v51 = vmax.f32 %v4884_v5, 0.0 }
 0x3c3   : > { %v14214_v6 = vmax.f32 %v4885_v12, 0.0  ;;  %v4853_v56 = vmul.f32 %v14190_v59, %v4815_v45  ;;  %v4854_v39 = vmul.f32 %v14190_v59, %v4816_v13  ;;  %v4855_v62 = vmul.f32 %v14190_v59, %v4817_v35 }
 0x3c4   : > { %16888 = vst [vmem:[#allocation34_spill] sm:$0xff] %v14208_v53  ;;  %16889 = vst [vmem:[#allocation73_spill] sm:$0xff] %v14212_v51  ;;  %v16469_v15 = vrot.slane %v14210_v44, 2  ;;  %v4955_v50 = vrot.slane %v4919_v3, 2  ;;  %v4956_v19 = vrot.slane %v14212_v51, 2  ;;  %v16468_v55 = vrot.slane %v14208_v53, 6 }
 0x3c5   : > { %v16464_v48 = vrot.slane %v14214_v6, 2  ;;  %v5027_v0 = vrot.slane %v14210_v44, 6  ;;  %v5028_v5 = vrot.slane %v4919_v3, 6  ;;  %v16465_v12 = vrot.slane %v14212_v51, 6 }
 0x3c6   : > { %v4960_v45 = vsel %vm16463_vm10, %v4955_v50, %v4956_v19  ;;  %v4961_v13 = vsel %vm16463_vm10, %v16469_v15, %v4955_v50  ;;  %v4860_v17 = vmul.f32 %v14190_v59, %v4822_v26  ;;  %v4861_v25 = vmul.f32 %v14190_v59, %v4823_v10 }
 0x3c7   : > { %v4959_v29 = vsel %vm16463_vm10, %v4956_v19, %v16464_v48  ;;  %v5033_v31 = vsel %vm16466_vm9, %v5028_v5, %v16465_v12  ;;  %v5034_v58 = vsel %vm16466_vm9, %v5027_v0, %v5028_v5  ;;  %v5035_v50 = vsel %vm16466_vm9, %v16468_v55, %v5027_v0 }
 0x3c8   : > { %v5172_v18 = vsel %vm16890_vm7, %v5035_v50, %v14210_v44  ;;  %v5173_v19 = vsel %vm908_vm11, %v5034_v58, %v4919_v3  ;;  %vm16891_vm10 = vcmp.eq.s32.totalorder %v13795_v2, 17  ;;  %v4856_v12 = vmul.f32 %v14190_v59, %v4818_v33 }
 0x3c9   : > { %v5174_v48 = vsel %vm16891_vm10, %v5033_v31, %v14212_v51  ;;  %v5280_v5 = vsel %vm871_vm1, %v4961_v13, %v5172_v18  ;;  %v5281_v35 = vsel %vm872_vm13, %v4960_v45, %v5173_v19  ;;  %vm16892_vm9 = vcmp.eq.s32.totalorder %v13795_v2, 0 }
 0x3ca   : > { %v5282_v0 = vsel %vm16892_vm9, %v4959_v29, %v5174_v48  ;;  %v4857_v50 = vmul.f32 %v14190_v59, %v4819_v42  ;;  %vm16893_vm7 = vcmask 31744   ;;  %v4858_v58 = vmul.f32 %v14190_v59, %v4820_v46 }
 0x3cb   : > { %5319 = vst.msk [vmem:[#allocation2 + $0x113] sm:$0xff] %vm16893_vm7, %v5280_v5  ;;  %vm16894_vm11 = vmmov %vm16893_vm7  ;;  %v4859_v31 = vmul.f32 %v14190_v59, %v4821_v52  ;;  %v4862_v18 = vmul.f32 %v14190_v59, %v4824_v36  ;;  %v4863_v2 = vmul.f32 %v14190_v59, %v4825_v63  ;;  %v4864_v29 = vmul.f32 %v14190_v59, %v4826_v22 }
 0x3cc   : > { %5320 = vst.msk [vmem:[#allocation2 + $0x11b] sm:$0xff] %vm16894_vm11, %v5281_v35  ;;  %vm16895_vm3 = vmmov %vm16893_vm7  ;;  %v4865_v33 = vmul.f32 %v14190_v59, %v4827_v43  ;;  %v4866_v42 = vmul.f32 %v14190_v59, %v4828_v20  ;;  %v4867_v46 = vmul.f32 %v14190_v59, %v4829_v47  ;;  %v4868_v52 = vmul.f32 %v14190_v59, %v4830_v8 }
 0x3cd   : > { %5321 = vst.msk [vmem:[#allocation2 + $0x123] sm:$0xff] %vm16895_vm3, %v5282_v0  ;;  %v4869_v26 = vmul.f32 %v14190_v59, %v4831_v38  ;;  %v4870_v10 = vmul.f32 %v14190_v59, %v4832_v16  ;;  %v4871_v36 = vmul.f32 %v14190_v59, %v4833_v9  ;;  %v4872_v1 = vmul.f32 %v14190_v59, %v4834_v14  ;;  %vm16920_vm10 = vmmov %vm16893_vm7 }
 0x3ce   : > { %v4873_v32 = vmul.f32 %v14190_v59, %v4835_v49  ;;  %vm16485_vm3 = vcmask 25600   ;;  %v4874_v47 = vmul.f32 %v14190_v59, %v16896_v37  ;;  %v4875_v38 = vmul.f32 %v14190_v59, %v16897_v57 }
 0x3cf   : > { %v4876_v16 = vmul.f32 %v14190_v59, %v16898_v34  ;;  %v4877_v9 = vmul.f32 %v14190_v59, %v16899_v21  ;;  %v4878_v14 = vmul.f32 %v14190_v59, %v16900_v60  ;;  %v4879_v49 = vmul.f32 %v14190_v59, %v16901_v4 }
 0x3d0   : > { %v4880_v63 = vmul.f32 %v14190_v59, %v16902_v28  ;;  %v14328_v22 = vmax.f32 %v4850_v23, 0.0  ;;  %v14330_v27 = vmax.f32 %v4851_v41, 0.0  ;;  %v14332_v43 = vmax.f32 %v4852_v11, 0.0 }
 0x3d1   : > { %v14334_v20 = vmax.f32 %v4853_v56, 0.0  ;;  %v14336_v54 = vmax.f32 %v4854_v39, 0.0  ;;  %v14338_v8 = vmax.f32 %v4855_v62, 0.0  ;;  %v14340_v61 = vmax.f32 %v4856_v12, 0.0 }
 0x3d2   : > { %v14342_v3 = vmax.f32 %v4857_v50, 0.0  ;;  %v14344_v48 = vmax.f32 %v4858_v58, 0.0  ;;  %v14346_v24 = vmax.f32 %v4859_v31, 0.0  ;;  %v14348_v40 = vmax.f32 %v4860_v17, 0.0 }
 0x3d3   : > { %v14350_v59 = vmax.f32 %v4861_v25, 0.0  ;;  %v14352_v11 = vmax.f32 %v4862_v18, 0.0  ;;  %v14354_v23 = vmax.f32 %v4863_v2, 0.0  ;;  %v14356_v41 = vmax.f32 %v4864_v29, 0.0  ;;  %v5331_v25 = vld [vmem:[#allocation2 + $0x117] sm:$0xff] }
 0x3d4   : > { %v14358_v56 = vmax.f32 %v4865_v33, 0.0  ;;  %v14360_v39 = vmax.f32 %v4866_v42, 0.0  ;;  %v14362_v62 = vmax.f32 %v4867_v46, 0.0  ;;  %v14364_v12 = vmax.f32 %v4868_v52, 0.0  ;;  %v5332_v42 = vld [vmem:[#allocation2 + $0x11f] sm:$0x3] }
 0x3d5   : > { %16903 = vst [vmem:[#allocation74_spill] sm:$0xff] %v14356_v41  ;;  %v14366_v45 = vmax.f32 %v4869_v26, 0.0  ;;  %v14368_v13 = vmax.f32 %v4870_v10, 0.0  ;;  %v14370_v35 = vmax.f32 %v4871_v36, 0.0  ;;  %v14372_v19 = vmax.f32 %v4872_v1, 0.0  ;;  %5334 = vst.msk [vmem:[#allocation2 + $0x13b] sm:$0xff] %vm16920_vm10, %v5331_v25 }
 0x3d6   : > { %16904 = vst [vmem:[#allocation75_spill] sm:$0xff] %v14358_v56  ;;  %16905 = vst [vmem:[#allocation76_spill] sm:$0xff] %v14360_v39  ;;  %v14374_v5 = vmax.f32 %v4873_v32, 0.0  ;;  %v14376_v0 = vmax.f32 %v4874_v47, 0.0  ;;  %v14378_v50 = vmax.f32 %v4875_v38, 0.0  ;;  %v14380_v58 = vmax.f32 %v4876_v16, 0.0 }
 0x3d7   : > { %16906 = vst [vmem:[#allocation77_spill] sm:$0xff] %v14362_v62  ;;  %16907 = vst [vmem:[#allocation78_spill] sm:$0xff] %v14364_v12  ;;  %v14382_v31 = vmax.f32 %v4877_v9, 0.0  ;;  %v14384_v17 = vmax.f32 %v4878_v14, 0.0  ;;  %v14386_v18 = vmax.f32 %v4879_v49, 0.0  ;;  %v14388_v2 = vmax.f32 %v4880_v63, 0.0 }
 0x3d8   : > { %16908 = vst [vmem:[#allocation79_spill] sm:$0xff] %v14366_v45  ;;  %16909 = vst [vmem:[#allocation80_spill] sm:$0xff] %v14368_v13  ;;  %v4924_v46 = vrot.slane %v14332_v43, 2  ;;  %v4925_v52 = vrot.slane %v14334_v20, 2  ;;  %v4926_v26 = vrot.slane %v14336_v54, 2  ;;  %v4927_v10 = vrot.slane %v14338_v8, 2 }
 0x3d9   : > { %16910 = vst [vmem:[#allocation81_spill] sm:$0xff] %v14370_v35  ;;  %16911 = vst [vmem:[#allocation82_spill] sm:$0xff] %v14372_v19  ;;  %v4928_v36 = vrot.slane %v14340_v61, 2  ;;  %v4929_v1 = vrot.slane %v14342_v3, 2  ;;  %v4930_v32 = vrot.slane %v14344_v48, 2  ;;  %v4931_v37 = vrot.slane %v14346_v24, 2 }
 0x3da   : > { %16912 = vst [vmem:[#allocation83_spill] sm:$0xff] %v14374_v5  ;;  %16913 = vst [vmem:[#allocation84_spill] sm:$0xff] %v14376_v0  ;;  %v4932_v47 = vrot.slane %v14348_v40, 2  ;;  %v4933_v57 = vrot.slane %v14350_v59, 2  ;;  %v4934_v38 = vrot.slane %v14352_v11, 2  ;;  %v4935_v34 = vrot.slane %v14354_v23, 2 }
 0x3db   : > { %16914 = vst [vmem:[#allocation85_spill] sm:$0xff] %v14378_v50  ;;  %16915 = vst [vmem:[#allocation86_spill] sm:$0xff] %v14380_v58  ;;  %v4936_v16 = vrot.slane %v14356_v41, 2  ;;  %v4937_v21 = vrot.slane %v14358_v56, 2  ;;  %v4938_v9 = vrot.slane %v14360_v39, 2  ;;  %v4939_v60 = vrot.slane %v14362_v62, 2 }
 0x3dc   : > { %16916 = vst [vmem:[#allocation87_spill] sm:$0xff] %v14382_v31  ;;  %16917 = vst [vmem:[#allocation88_spill] sm:$0xff] %v14384_v17  ;;  %v4940_v14 = vrot.slane %v14364_v12, 2  ;;  %v4941_v4 = vrot.slane %v14366_v45, 2  ;;  %v4942_v49 = vrot.slane %v14368_v13, 2  ;;  %v4943_v28 = vrot.slane %v14370_v35, 2 }
 0x3dd   : > { %16918 = vst [vmem:[#allocation89_spill] sm:$0xff] %v14386_v18  ;;  %16919 = vst [vmem:[#allocation90_spill] sm:$0xff] %v14388_v2  ;;  %v4944_v63 = vrot.slane %v14372_v19, 2  ;;  %v4945_v25 = vrot.slane %v14374_v5, 2  ;;  %v4947_v55 = vrot.slane %v14378_v50, 2  ;;  %v4948_v29 = vrot.slane %v14380_v58, 2 }
 0x3de   : > { %5335 = vst.msk [vmem:[#allocation2 + $0x143] sm:$0x3] %vm16485_vm3, %v5332_v42  ;;  %v4946_v42 = vrot.slane %v14376_v0, 2  ;;  %v4949_v33 = vrot.slane %v14382_v31, 2  ;;  %v4950_v15 = vrot.slane %v14384_v17, 2  ;;  %v4951_v51 = vrot.slane %v14386_v18, 2 }
 0x3df   : > { %v4952_v7 = vrot.slane %v14388_v2, 2  ;;  %v16921_v35 = vrot.slane %v14210_v44, 2  ;;  %v16922_v19 = vrot.slane %v14208_v53, 2  ;;  %vm16923_vm9 = vcmp.lt.s32.totalorder %v12595_v30, 6 }
 0x3e0   : > { %vm16925_vm1 = vmmov %vm16923_vm9 }
 0x3e1   : > { %v14429_v5 = vsel %vm16923_vm9, %v16922_v19, %v16921_v35  ;;  %v14433_v50 = vsel %vm16925_vm1, %v4946_v42, %v4947_v55  ;;  %vm16927_vm13 = vmmov %vm16925_vm1 }
 0x3e2   : > { %16924 = vst [vmem:[#allocation91_spill] sm:$0xff] %v14429_v5  ;;  %16926 = vst [vmem:[#allocation92_spill] sm:$0xff] %v14433_v50  ;;  %v14437_v31 = vsel %vm16927_vm13, %v4945_v25, %v4946_v42  ;;  %v16937_v5 = vrot.slane %v14208_v53, 2  ;;  %v16991_v50 = vld [vmem:[#allocation5_spill] sm:$0xff] }
 0x3e3   : > { %16928 = vst [vmem:[#allocation93_spill] sm:$0xff] %v14437_v31  ;;  %vm16929_vm7 = vmmov %vm16925_vm1  ;;  %v16996_v31 = vld [vmem:[#allocation10_spill] sm:$0xff] }
 0x3e4   : > { %v14441_v18 = vsel %vm16929_vm7, %v4950_v15, %v4951_v51  ;;  %vm16931_vm11 = vmmov %vm16925_vm1  ;;  %v14459_v42 = vsel %vm16925_vm1, %v4952_v7, %v16937_v5 }
 0x3e5   : > { %16930 = vst [vmem:[#allocation94_spill] sm:$0xff] %v14441_v18  ;;  %v14445_v44 = vsel %vm16931_vm11, %v4949_v33, %v4950_v15  ;;  %vm16933_vm10 = vmmov %vm16925_vm1 }
 0x3e6   : > { %16932 = vst [vmem:[#allocation95_spill] sm:$0xff] %v14445_v44  ;;  %v14449_v35 = vsel %vm16933_vm10, %v4948_v29, %v4949_v33  ;;  %vm16935_vm9 = vmmov %vm16925_vm1  ;;  %v16994_v44 = vld [vmem:[#allocation6_spill] sm:$0xff] }
 0x3e7   : > { %16934 = vst [vmem:[#allocation96_spill] sm:$0xff] %v14449_v35  ;;  %v14453_v19 = vsel %vm16935_vm9, %v4947_v55, %v4948_v29  ;;  %16938 = vst [vmem:[#allocation98_spill] sm:$0xff] %v14459_v42  ;;  %v16987_v42 = vrot.slane %v14214_v6, 2  ;;  %v16995_v35 = vld [vmem:[#allocation8_spill] sm:$0xff] }
 0x3e8   : > { %16936 = vst [vmem:[#allocation97_spill] sm:$0xff] %v14453_v19  ;;  %vm16939_vm13 = vmmov %vm16925_vm1  ;;  %v16990_v19 = vld [vmem:[#allocation3_spill] sm:$0xff] }
 0x3e9   : > { %v14463_v18 = vsel %vm16939_vm13, %v4951_v51, %v4952_v7  ;;  %vm16941_vm7 = vmmov %vm16925_vm1  ;;  %v14483_v7 = vsel %vm16925_vm1, %v4940_v14, %v4941_v4 }
 0x3ea   : > { %16940 = vst [vmem:[#allocation99_spill] sm:$0xff] %v14463_v18  ;;  %v14467_v15 = vsel %vm16941_vm7, %v4944_v63, %v4945_v25  ;;  %vm16943_vm11 = vmmov %vm16925_vm1  ;;  %v16984_v25 = vrot.slane %v14328_v22, 2  ;;  %v5015_v18 = vrot.slane %v14368_v13, 6  ;;  %v17066_v13 = vrot.slane %v14354_v23, 6 }
 0x3eb   : > { %16942 = vst [vmem:[#allocation100_spill] sm:$0xff] %v14467_v15  ;;  %v14471_v33 = vsel %vm16943_vm11, %v4943_v28, %v4944_v63  ;;  %vm16945_vm10 = vmmov %vm16925_vm1  ;;  %v16980_v63 = vrot.slane %v14330_v27, 2  ;;  %v16997_v15 = vld [vmem:[#allocation82_spill] sm:$0xff] }
 0x3ec   : > { %16944 = vst [vmem:[#allocation101_spill] sm:$0xff] %v14471_v33  ;;  %v14475_v55 = vsel %vm16945_vm10, %v4942_v49, %v4943_v28  ;;  %vm16947_vm9 = vmmov %vm16925_vm1  ;;  %v5017_v33 = vrot.slane %v16997_v15, 6  ;;  %v17022_v15 = vld [vmem:[#allocation22_spill] sm:$0xff] }
 0x3ed   : > { %16946 = vst [vmem:[#allocation102_spill] sm:$0xff] %v14475_v55  ;;  %v14479_v5 = vsel %vm16947_vm9, %v4941_v4, %v4942_v49  ;;  %16949 = vst [vmem:[#allocation104_spill] sm:$0xff] %v14483_v7  ;;  %v16998_v55 = vld [vmem:[#allocation83_spill] sm:$0xff]  ;;  %v5019_v7 = vrot.slane %v14376_v0, 6 }
 0x3ee   : > { %16948 = vst [vmem:[#allocation103_spill] sm:$0xff] %v14479_v5  ;;  %vm16950_vm13 = vmmov %vm16925_vm1  ;;  %v5018_v5 = vrot.slane %v16998_v55, 6  ;;  %v17019_v0 = vld [vmem:[#allocation15_spill] sm:$0xff]  ;;  %v17020_v55 = vld [vmem:[#allocation17_spill] sm:$0xff] }
 0x3ef   : > { %v14487_v51 = vsel %vm16950_vm13, %v4939_v60, %v4940_v14  ;;  %vm16952_vm7 = vmmov %vm16925_vm1  ;;  %v14507_v14 = vsel %vm16925_vm1, %v4934_v38, %v4935_v34 }
 0x3f0   : > { %16951 = vst [vmem:[#allocation105_spill] sm:$0xff] %v14487_v51  ;;  %v14491_v29 = vsel %vm16952_vm7, %v4938_v9, %v4939_v60  ;;  %vm16954_vm11 = vmmov %vm16925_vm1  ;;  %v16999_v51 = vld [vmem:[#allocation85_spill] sm:$0xff] }
 0x3f1   : > { %16953 = vst [vmem:[#allocation106_spill] sm:$0xff] %v14491_v29  ;;  %v14495_v28 = vsel %vm16954_vm11, %v4937_v21, %v4938_v9  ;;  %vm16956_vm10 = vmmov %vm16925_vm1  ;;  %v5020_v29 = vrot.slane %v16999_v51, 6  ;;  %v17011_v51 = vld [vmem:[#allocation73_spill] sm:$0xff] }
 0x3f2   : > { %16955 = vst [vmem:[#allocation107_spill] sm:$0xff] %v14495_v28  ;;  %v14499_v49 = vsel %vm16956_vm10, %v4936_v16, %v4937_v21  ;;  %vm16958_vm9 = vmmov %vm16925_vm1  ;;  %v17000_v28 = vld [vmem:[#allocation7_spill] sm:$0xff] }
 0x3f3   : > { %16957 = vst [vmem:[#allocation108_spill] sm:$0xff] %v14499_v49  ;;  %v14503_v4 = vsel %vm16958_vm9, %v4935_v34, %v4936_v16  ;;  %16960 = vst [vmem:[#allocation110_spill] sm:$0xff] %v14507_v14  ;;  %v17001_v49 = vld [vmem:[#allocation9_spill] sm:$0xff]  ;;  %v17003_v14 = vld [vmem:[#allocation14_spill] sm:$0xff] }
 0x3f4   : > { %16959 = vst [vmem:[#allocation109_spill] sm:$0xff] %v14503_v4  ;;  %vm16961_vm13 = vmmov %vm16925_vm1  ;;  %v17002_v4 = vld [vmem:[#allocation12_spill] sm:$0xff] }
 0x3f5   : > { %v14511_v60 = vsel %vm16961_vm13, %v4933_v57, %v4934_v38  ;;  %vm16963_vm7 = vmmov %vm16925_vm1  ;;  %v14531_v38 = vsel %vm16925_vm1, %v4928_v36, %v4929_v1 }
 0x3f6   : > { %16962 = vst [vmem:[#allocation111_spill] sm:$0xff] %v14511_v60  ;;  %v14515_v9 = vsel %vm16963_vm7, %v4932_v47, %v4933_v57  ;;  %vm16965_vm11 = vmmov %vm16925_vm1  ;;  %v5021_v60 = vrot.slane %v14380_v58, 6  ;;  %v17012_v58 = vrot.slane %v17011_v51, 6 }
 0x3f7   : > { %16964 = vst [vmem:[#allocation112_spill] sm:$0xff] %v14515_v9  ;;  %v14519_v21 = vsel %vm16965_vm11, %v4931_v37, %v4932_v47  ;;  %vm16967_vm10 = vmmov %vm16925_vm1  ;;  %v17004_v9 = vld [vmem:[#allocation87_spill] sm:$0xff] }
 0x3f8   : > { %16966 = vst [vmem:[#allocation113_spill] sm:$0xff] %v14519_v21  ;;  %v14523_v16 = vsel %vm16967_vm10, %v4930_v32, %v4931_v37  ;;  %vm16969_vm9 = vmmov %vm16925_vm1  ;;  %v5022_v21 = vrot.slane %v17004_v9, 6 }
 0x3f9   : > { %16968 = vst [vmem:[#allocation114_spill] sm:$0xff] %v14523_v16  ;;  %v14527_v34 = vsel %vm16969_vm9, %v4929_v1, %v4930_v32  ;;  %16971 = vst [vmem:[#allocation116_spill] sm:$0xff] %v14531_v38  ;;  %v5023_v16 = vrot.slane %v14384_v17, 6 }
 0x3fa   : > { %16970 = vst [vmem:[#allocation115_spill] sm:$0xff] %v14527_v34  ;;  %vm16972_vm13 = vmmov %vm16925_vm1  ;;  %v17005_v34 = vld [vmem:[#allocation89_spill] sm:$0xff] }
 0x3fb   : > { %v14535_v57 = vsel %vm16972_vm13, %v4927_v10, %v4928_v36  ;;  %vm16974_vm7 = vmmov %vm16925_vm1  ;;  %v16983_v36 = vmov %v16980_v63  ;;  %v5024_v38 = vrot.slane %v17005_v34, 6 }
 0x3fc   : > { %16973 = vst [vmem:[#allocation117_spill] sm:$0xff] %v14535_v57  ;;  %v14539_v47 = vsel %vm16974_vm7, %v4926_v26, %v4927_v10  ;;  %vm16976_vm11 = vmmov %vm16925_vm1  ;;  %v14561_v10 = vsel %vm16925_vm1, %v16984_v25, %v16983_v36  ;;  %v5011_v36 = vrot.slane %v14360_v39, 6  ;;  %v17006_v57 = vld [vmem:[#allocation11_spill] sm:$0xff]  ;;  %v17090_v39 = vrot.slane %v14338_v8, 6 }
 0x3fd   : > { %16975 = vst [vmem:[#allocation118_spill] sm:$0xff] %v14539_v47  ;;  %v14543_v37 = vsel %vm16976_vm11, %v4925_v52, %v4926_v26  ;;  %vm16978_vm10 = vmmov %vm16925_vm1  ;;  %v16986_v26 = vmov %v16984_v25  ;;  %v5012_v25 = vrot.slane %v14362_v62, 6  ;;  %v17007_v47 = vld [vmem:[#allocation13_spill] sm:$0xff]  ;;  %vm17120_vm3 = vcmp.eq.s32.totalorder %v17006_v57, 17 }
 0x3fe   : > { %16977 = vst [vmem:[#allocation119_spill] sm:$0xff] %v14543_v37  ;;  %v14547_v32 = vsel %vm16978_vm10, %v4924_v46, %v4925_v52  ;;  %vm16981_vm9 = vmmov %vm16925_vm1  ;;  %v17008_v37 = vld [vmem:[#allocation16_spill] sm:$0xff] }
 0x3ff   : > { %16979 = vst [vmem:[#allocation120_spill] sm:$0xff] %v14547_v32  ;;  %v14553_v1 = vsel %vm16981_vm9, %v16980_v63, %v4924_v46  ;;  %16985 = vst [vmem:[#allocation122_spill] sm:$0xff] %v14561_v10  ;;  %v16992_v46 = vld [vmem:[#allocation81_spill] sm:$0xff]  ;;  %v17009_v32 = vld [vmem:[#allocation18_spill] sm:$0xff]  ;;  %v17010_v10 = vrot.slane %v14214_v6, 6  ;;  %vm17013_vm9 = vcmp.lt.s32.totalorder %v12595_v30, 2 }
 0x400   : > { %16982 = vst [vmem:[#allocation121_spill] sm:$0xff] %v14553_v1  ;;  %vm16988_vm13 = vmmov %vm16925_vm1  ;;  %v5016_v63 = vrot.slane %v16992_v46, 6  ;;  %v5025_v1 = vrot.slane %v14388_v2, 6  ;;  %v17021_v2 = vld [vmem:[#allocation20_spill] sm:$0xff]  ;;  %v17033_v46 = vld [vmem:[#allocation26_spill] sm:$0xff] }
 0x401   : > { %v14569_v52 = vsel %vm16988_vm13, %v16987_v42, %v16986_v26  ;;  %v5013_v42 = vrot.slane %v14364_v12, 6  ;;  %v5014_v26 = vrot.slane %v14366_v45, 6  ;;  %v14622_v9 = vsel %vm17013_vm9, %v17012_v58, %v17010_v10  ;;  %vm17015_vm10 = vmmov %vm17013_vm9 }
 0x402   : > { %16989 = vst [vmem:[#allocation123_spill] sm:$0xff] %v14569_v52  ;;  %v16993_v52 = vld [vmem:[#allocation4_spill] sm:$0xff]  ;;  %17014 = vst [vmem:[#allocation3_spill] sm:$0xff] %v14622_v9  ;;  %v14626_v34 = vsel %vm17015_vm10, %v5019_v7, %v5020_v29  ;;  %v17030_v9 = vld [vmem:[#allocation19_spill] sm:$0xff]  ;;  %v17071_v45 = vmov %v17066_v13  ;;  %v17074_v12 = vrot.slane %v14350_v59, 6 }
 0x403   : > { %17016 = vst [vmem:[#allocation5_spill] sm:$0xff] %v14626_v34  ;;  %vm17017_vm1 = vmmov %vm17013_vm9  ;;  %v17031_v34 = vld [vmem:[#allocation21_spill] sm:$0xff]  ;;  %vm17112_vm13 = vcmp.eq.s32.totalorder %v16993_v52, 17 }
 0x404   : > { %v14630_v17 = vsel %vm17017_vm1, %v5018_v5, %v5019_v7  ;;  %vm17023_vm12 = vmmov %vm17017_vm1  ;;  %v14650_v10 = vsel %vm17017_vm1, %v5020_v29, %v5021_v60  ;;  %v14668_v29 = vsel %vm17017_vm1, %v5017_v33, %v5018_v5 }
 0x405   : > { %17018 = vst [vmem:[#allocation4_spill] sm:$0xff] %v14630_v17  ;;  %v14638_v58 = vsel %vm17023_vm12, %v5023_v16, %v5024_v38  ;;  %vm17025_vm9 = vmmov %vm17017_vm1  ;;  %v17032_v17 = vld [vmem:[#allocation24_spill] sm:$0xff] }
 0x406   : > { %17024 = vst [vmem:[#allocation6_spill] sm:$0xff] %v14638_v58  ;;  %v14642_v51 = vsel %vm17025_vm9, %v5022_v21, %v5023_v16  ;;  %vm17027_vm10 = vmmov %vm17017_vm1  ;;  %v17034_v58 = vrot.slane %v14208_v53, 6  ;;  %v17044_v53 = vld [vmem:[#allocation28_spill] sm:$0xff] }
 0x407   : > { %17026 = vst [vmem:[#allocation8_spill] sm:$0xff] %v14642_v51  ;;  %v14646_v7 = vsel %vm17027_vm10, %v5021_v60, %v5022_v21  ;;  %17029 = vst [vmem:[#allocation7_spill] sm:$0xff] %v14650_v10  ;;  %v17042_v51 = vld [vmem:[#allocation23_spill] sm:$0xff]  ;;  %v17102_v10 = vrot.slane %v14330_v27, 6 }
 0x408   : > { %17028 = vst [vmem:[#allocation10_spill] sm:$0xff] %v14646_v7  ;;  %vm17035_vm9 = vmmov %vm17017_vm1  ;;  %v17043_v7 = vld [vmem:[#allocation25_spill] sm:$0xff] }
 0x409   : > { %v14660_v16 = vsel %vm17035_vm9, %v5025_v1, %v17034_v58  ;;  %vm17037_vm10 = vmmov %vm17017_vm1  ;;  %17039 = vst [vmem:[#allocation14_spill] sm:$0xff] %v14668_v29  ;;  %v17059_v29 = vrot.slane %v14358_v56, 6 }
 0x40a   : > { %17036 = vst [vmem:[#allocation9_spill] sm:$0xff] %v14660_v16  ;;  %v14664_v21 = vsel %vm17037_vm10, %v5024_v38, %v5025_v1  ;;  %vm17040_vm7 = vmmov %vm17017_vm1  ;;  %v17053_v16 = vld [vmem:[#allocation27_spill] sm:$0xff] }
 0x40b   : > { %17038 = vst [vmem:[#allocation12_spill] sm:$0xff] %v14664_v21  ;;  %v14672_v60 = vsel %vm17040_vm7, %v5016_v63, %v5017_v33  ;;  %vm17046_vm11 = vmmov %vm17017_vm1  ;;  %v14688_v33 = vsel %vm17017_vm1, %v5013_v42, %v5014_v26  ;;  %v17054_v21 = vld [vmem:[#allocation30_spill] sm:$0xff] }
 0x40c   : > { %17041 = vst [vmem:[#allocation11_spill] sm:$0xff] %v14672_v60  ;;  %v14680_v38 = vsel %vm17046_vm11, %v5015_v18, %v5016_v63  ;;  %vm17048_vm10 = vmmov %vm17017_vm1  ;;  %v17063_v60 = vrot.slane %v14356_v41, 6  ;;  %v17077_v63 = vrot.slane %v14348_v40, 6  ;;  %vm17110_vm11 = vcmp.eq.s32.totalorder %v16990_v19, 17 }
 0x40d   : > { %17047 = vst [vmem:[#allocation13_spill] sm:$0xff] %v14680_v38  ;;  %v14684_v5 = vsel %vm17048_vm10, %v5014_v26, %v5015_v18  ;;  %17050 = vst [vmem:[#allocation18_spill] sm:$0xff] %v14688_v33  ;;  %v17080_v33 = vrot.slane %v14346_v24, 6 }
 0x40e   : > { %17049 = vst [vmem:[#allocation16_spill] sm:$0xff] %v14684_v5  ;;  %vm17051_vm7 = vmmov %vm17017_vm1  ;;  %v17065_v5 = vmov %v17063_v60 }
 0x40f   : > { %v14692_v1 = vsel %vm17051_vm7, %v5012_v25, %v5013_v42  ;;  %vm17057_vm12 = vmmov %vm17017_vm1  ;;  %v17062_v42 = vmov %v17059_v29 }
 0x410   : > { %17052 = vst [vmem:[#allocation73_spill] sm:$0xff] %v14692_v1  ;;  %v14700_v18 = vsel %vm17057_vm12, %v5011_v36, %v5012_v25  ;;  %vm17060_vm10 = vmmov %vm17017_vm1  ;;  %v14714_v38 = vsel %vm17017_vm1, %v17063_v60, %v17062_v42  ;;  %v17072_v60 = vrot.slane %v14352_v11, 6 }
 0x411   : > { %17058 = vst [vmem:[#allocation15_spill] sm:$0xff] %v14700_v18  ;;  %v14706_v26 = vsel %vm17060_vm10, %v17059_v29, %v5011_v36  ;;  %17064 = vst [vmem:[#allocation30_spill] sm:$0xff] %v14714_v38  ;;  %v17079_v36 = vmov %v17077_v63  ;;  %v17087_v18 = vrot.slane %v14340_v61, 6  ;;  %v17099_v38 = vrot.slane %v14332_v43, 6 }
 0x412   : > { %17061 = vst [vmem:[#allocation17_spill] sm:$0xff] %v14706_v26  ;;  %vm17067_vm12 = vmmov %vm17017_vm1  ;;  %v5054_v42 = vsel %vm17017_vm1, %v17072_v60, %v17071_v45  ;;  %v17073_v1 = vmov %v17072_v60  ;;  %v5057_v45 = vsel %vm17017_vm1, %v17080_v33, %v17079_v36 }
 0x413   : > { %v5053_v25 = vsel %vm17067_vm12, %v17066_v13, %v17065_v5  ;;  %vm17075_vm12 = vmmov %vm17017_vm1  ;;  %v17076_v5 = vmov %v17074_v12  ;;  %v17089_v26 = vmov %v17087_v18  ;;  %v17101_v41 = vmov %v17099_v38 }
 0x414   : > { %v5055_v13 = vsel %vm17075_vm12, %v17074_v12, %v17073_v1  ;;  %vm17078_vm7 = vmmov %vm17017_vm1  ;;  %v17081_v12 = vmov %v17080_v33  ;;  %v17082_v1 = vrot.slane %v14344_v48, 6 }
 0x415   : > { %v5056_v29 = vsel %vm17078_vm7, %v17077_v63, %v17076_v5  ;;  %vm17083_vm7 = vmmov %vm17017_vm1  ;;  %v17085_v5 = vrot.slane %v14342_v3, 6 }
 0x416   : > { %v5058_v63 = vsel %vm17083_vm7, %v17082_v1, %v17081_v12  ;;  %v17084_v60 = vmov %v17082_v1  ;;  %vm17088_vm10 = vmmov %vm17017_vm1  ;;  %v17092_v1 = vmov %v17090_v39 }
 0x417   : > { %v5059_v33 = vsel %vm17017_vm1, %v17085_v5, %v17084_v60  ;;  %v17086_v36 = vmov %v17085_v5  ;;  %vm17091_vm7 = vmmov %vm17017_vm1  ;;  %v17093_v60 = vrot.slane %v14336_v54, 6 }
 0x418   : > { %v5060_v62 = vsel %vm17088_vm10, %v17087_v18, %v17086_v36  ;;  %v5061_v12 = vsel %vm17091_vm7, %v17090_v39, %v17089_v26  ;;  %vm17094_vm10 = vmmov %vm17017_vm1  ;;  %v17096_v36 = vrot.slane %v14334_v20, 6 }
 0x419   : > { %v5062_v18 = vsel %vm17094_vm10, %v17093_v60, %v17092_v1  ;;  %v17095_v5 = vmov %v17093_v60  ;;  %vm17097_vm7 = vmmov %vm17017_vm1  ;;  %v17104_v60 = vmov %v17102_v10 }
 0x41a   : > { %v5063_v39 = vsel %vm17097_vm7, %v17096_v36, %v17095_v5  ;;  %v17098_v26 = vmov %v17096_v36  ;;  %vm17100_vm12 = vmmov %vm17017_vm1  ;;  %v17105_v5 = vrot.slane %v14328_v22, 6  ;;  %vm17127_vm7 = vcmp.eq.s32.totalorder %v17019_v0, 17 }
 0x41b   : > { %v5064_v56 = vsel %vm17100_vm12, %v17099_v38, %v17098_v26  ;;  %vm17103_vm10 = vmmov %vm17017_vm1  ;;  %v17108_v26 = vrot.slane %v14214_v6, 6 }
 0x41c   : > { %v5065_v1 = vsel %vm17103_vm10, %v17102_v10, %v17101_v41  ;;  %vm17106_vm12 = vmmov %vm17017_vm1  ;;  %v17107_v36 = vmov %v17105_v5 }
 0x41d   : > { %v5066_v38 = vsel %vm17106_vm12, %v17105_v5, %v17104_v60  ;;  %vm17109_vm10 = vmmov %vm17017_vm1  ;;  %v5142_v10 = vsel %vm17110_vm11, %v5065_v1, %v14332_v43  ;;  %vm17111_vm1 = vcmp.eq.s32.totalorder %v16991_v50, 17  ;;  %vm17114_vm11 = vcmp.eq.s32.totalorder %v16995_v35, 17  ;;  %v17138_v1 = vld [vmem:[#allocation42_spill] sm:$0xff]  ;;  %v17140_v60 = vld [vmem:[#allocation65_spill] sm:$0xff] }
 0x41e   : > { %v5067_v41 = vsel %vm17109_vm10, %v17108_v26, %v17107_v36  ;;  %v5143_v58 = vsel %vm17111_vm1, %v5064_v56, %v14334_v20  ;;  %vm17113_vm10 = vcmp.eq.s32.totalorder %v16994_v44, 17  ;;  %v5144_v20 = vsel %vm17114_vm11, %v5063_v39, %v14336_v54  ;;  %v17137_v39 = vld [vmem:[#allocation40_spill] sm:$0xff]  ;;  %v17141_v5 = vld [vmem:[#allocation78_spill] sm:$0xff]  ;;  %v17144_v26 = vld [vmem:[#allocation79_spill] sm:$0xff] }
 0x41f   : > { %v5140_v30 = vsel %vm17112_vm13, %v5067_v41, %v14328_v22  ;;  %v5141_v43 = vsel %vm17113_vm10, %v5066_v38, %v14330_v27  ;;  %vm17115_vm1 = vcmp.eq.s32.totalorder %v16996_v31, 17  ;;  %vm17116_vm12 = vcmp.eq.s32.totalorder %v17000_v28, 17  ;;  %v17142_v38 = vld [vmem:[#allocation73_spill] sm:$0xff]  ;;  %v17145_v41 = vld [vmem:[#allocation18_spill] sm:$0xff] }
 0x420   : > { %v5145_v56 = vsel %vm17115_vm1, %v5062_v18, %v14338_v8  ;;  %v5146_v22 = vsel %vm17116_vm12, %v5061_v12, %v14340_v61  ;;  %vm17117_vm10 = vcmp.eq.s32.totalorder %v17001_v49, 17  ;;  %vm17118_vm11 = vcmp.eq.s32.totalorder %v17002_v4, 17  ;;  %v17135_v12 = vld [vmem:[#allocation15_spill] sm:$0xff] }
 0x421   : > { %v5147_v27 = vsel %vm17117_vm10, %v5060_v62, %v14342_v3  ;;  %v5148_v54 = vsel %vm17118_vm11, %v5059_v33, %v14344_v48  ;;  %vm17119_vm1 = vcmp.eq.s32.totalorder %v17003_v14, 17  ;;  %v5150_v61 = vsel %vm17120_vm3, %v5057_v45, %v14348_v40  ;;  %v17124_v62 = vld [vmem:[#allocation31_spill] sm:$0xff]  ;;  %v17126_v40 = vld [vmem:[#allocation74_spill] sm:$0xff]  ;;  %v17132_v33 = vld [vmem:[#allocation17_spill] sm:$0xff] }
 0x422   : > { %v5149_v8 = vsel %vm17119_vm1, %v5058_v63, %v14346_v24  ;;  %vm17121_vm10 = vcmp.eq.s32.totalorder %v17007_v47, 17  ;;  %vm17122_vm11 = vcmp.eq.s32.totalorder %v17008_v37, 17  ;;  %vm17123_vm1 = vcmp.eq.s32.totalorder %v17009_v32, 17  ;;  %v17125_v63 = vld [vmem:[#allocation41_spill] sm:$0xff]  ;;  %v17129_v45 = vld [vmem:[#allocation30_spill] sm:$0xff] }
 0x423   : > { %v5151_v3 = vsel %vm17121_vm10, %v5056_v29, %v14350_v59  ;;  %v5152_v48 = vsel %vm17122_vm11, %v5055_v13, %v14352_v11  ;;  %v5153_v24 = vsel %vm17123_vm1, %v5054_v42, %v14354_v23  ;;  %v5154_v59 = vsel %vm17127_vm7, %v5053_v25, %v17126_v40  ;;  %v17128_v29 = vld [vmem:[#allocation75_spill] sm:$0xff]  ;;  %v17131_v13 = vld [vmem:[#allocation76_spill] sm:$0xff]  ;;  %v17134_v42 = vld [vmem:[#allocation77_spill] sm:$0xff] }
 0x424   : > { %vm17130_vm10 = vcmp.eq.s32.totalorder %v17020_v55, 17  ;;  %vm17133_vm11 = vcmp.eq.s32.totalorder %v17021_v2, 17  ;;  %vm17136_vm1 = vcmp.eq.s32.totalorder %v17022_v15, 17  ;;  %v17139_v25 = vld [vmem:[#allocation43_spill] sm:$0xff]  ;;  %vm17152_vm12 = vcmp.eq.s32.totalorder %v17033_v46, 17  ;;  %v17153_v15 = vld [vmem:[#allocation82_spill] sm:$0xff] }
 0x425   : > { %v5155_v11 = vsel %vm17130_vm10, %v17129_v45, %v17128_v29  ;;  %v5156_v23 = vsel %vm17133_vm11, %v17132_v33, %v17131_v13  ;;  %v5157_v18 = vsel %vm17136_vm1, %v17135_v12, %v17134_v42  ;;  %vm17143_vm10 = vcmp.eq.s32.totalorder %v17030_v9, 17  ;;  %v17147_v29 = vld [vmem:[#allocation80_spill] sm:$0xff]  ;;  %v17150_v33 = vld [vmem:[#allocation81_spill] sm:$0xff]  ;;  %v17154_v2 = vld [vmem:[#allocation11_spill] sm:$0xff] }
 0x426   : > { %v5158_v36 = vsel %vm17143_vm10, %v17142_v38, %v17141_v5  ;;  %vm17146_vm11 = vcmp.eq.s32.totalorder %v17031_v34, 17  ;;  %v17148_v45 = vld [vmem:[#allocation16_spill] sm:$0xff]  ;;  %vm17149_vm1 = vcmp.eq.s32.totalorder %v17032_v17, 17  ;;  %v17151_v42 = vld [vmem:[#allocation13_spill] sm:$0xff]  ;;  %vm17155_vm13 = vcmp.eq.s32.totalorder %v17042_v51, 17  ;;  %v17156_v38 = vld [vmem:[#allocation83_spill] sm:$0xff] }
 0x427   : > { %v5159_v40 = vsel %vm17146_vm11, %v17145_v41, %v17144_v26  ;;  %v5160_v13 = vsel %vm17149_vm1, %v17148_v45, %v17147_v29  ;;  %v5161_v12 = vsel %vm17152_vm12, %v17151_v42, %v17150_v33  ;;  %v5162_v5 = vsel %vm17155_vm13, %v17154_v2, %v17153_v15  ;;  %v17157_v9 = vld [vmem:[#allocation14_spill] sm:$0xff]  ;;  %v17159_v41 = vld [vmem:[#allocation84_spill] sm:$0xff]  ;;  %v17162_v45 = vld [vmem:[#allocation85_spill] sm:$0xff] }
 0x428   : > { %vm17158_vm10 = vcmp.eq.s32.totalorder %v17043_v7, 17  ;;  %v17160_v34 = vld [vmem:[#allocation4_spill] sm:$0xff]  ;;  %vm17161_vm11 = vcmp.eq.s32.totalorder %v17044_v53, 17  ;;  %v17163_v17 = vld [vmem:[#allocation5_spill] sm:$0xff]  ;;  %vm17164_vm1 = vcmp.eq.s32.totalorder %v17124_v62, 17  ;;  %v17165_v42 = vld [vmem:[#allocation86_spill] sm:$0xff] }
 0x429   : > { %v5163_v26 = vsel %vm17158_vm10, %v17157_v9, %v17156_v38  ;;  %v5164_v29 = vsel %vm17161_vm11, %v17160_v34, %v17159_v41  ;;  %v5165_v33 = vsel %vm17164_vm1, %v17163_v17, %v17162_v45  ;;  %v17166_v46 = vld [vmem:[#allocation7_spill] sm:$0xff]  ;;  %vm17167_vm12 = vcmp.eq.s32.totalorder %v17053_v16, 17  ;;  %v17169_v51 = vld [vmem:[#allocation10_spill] sm:$0xff]  ;;  %v17171_v38 = vld [vmem:[#allocation88_spill] sm:$0xff] }
 0x42a   : > { %v5166_v2 = vsel %vm17167_vm12, %v17166_v46, %v17165_v42  ;;  %v17168_v15 = vld [vmem:[#allocation87_spill] sm:$0xff]  ;;  %vm17170_vm13 = vcmp.eq.s32.totalorder %v17054_v21, 17  ;;  %v17172_v7 = vld [vmem:[#allocation8_spill] sm:$0xff]  ;;  %vm17173_vm10 = vcmp.eq.s32.totalorder %v17125_v63, 17  ;;  %v17174_v41 = vld [vmem:[#allocation89_spill] sm:$0xff]  ;;  %vm17176_vm11 = vcmp.eq.s32.totalorder %v17139_v25, 17 }
 0x42b   : > { %v5167_v9 = vsel %vm17170_vm13, %v17169_v51, %v17168_v15  ;;  %v5168_v34 = vsel %vm17173_vm10, %v17172_v7, %v17171_v38  ;;  %v17175_v53 = vld [vmem:[#allocation6_spill] sm:$0xff]  ;;  %v17178_v62 = vld [vmem:[#allocation12_spill] sm:$0xff]  ;;  %vm17179_vm1 = vcmp.eq.s32.totalorder %v17137_v39, 17  ;;  %v17181_v16 = vld [vmem:[#allocation9_spill] sm:$0xff]  ;;  %vm17182_vm12 = vcmp.eq.s32.totalorder %v17138_v1, 17 }
 0x42c   : > { %v5169_v17 = vsel %vm17176_vm11, %v17175_v53, %v17174_v41  ;;  %v17177_v45 = vld [vmem:[#allocation90_spill] sm:$0xff]  ;;  %v17183_v15 = vld [vmem:[#allocation3_spill] sm:$0xff]  ;;  %vm17184_vm13 = vcmp.eq.s32.totalorder %v17140_v60, 17  ;;  %vm17186_vm10 = vcmp.eq.s32.totalorder %v16993_v52, 0  ;;  %v17187_v53 = vld [vmem:[#allocation121_spill] sm:$0xff]  ;;  %vm17188_vm11 = vcmp.eq.s32.totalorder %v16994_v44, 0 }
 0x42d   : > { %v5170_v46 = vsel %vm17179_vm1, %v17178_v62, %v17177_v45  ;;  %v17180_v42 = vld [vmem:[#allocation34_spill] sm:$0xff]  ;;  %v5175_v7 = vsel %vm17184_vm13, %v17183_v15, %v14214_v6  ;;  %v5249_v41 = vsel %vm17188_vm11, %v17187_v53, %v5141_v43  ;;  %v17189_v39 = vld [vmem:[#allocation120_spill] sm:$0xff]  ;;  %vm17190_vm1 = vcmp.eq.s32.totalorder %v16990_v19, 0  ;;  %v17191_v45 = vld [vmem:[#allocation119_spill] sm:$0xff] }
 0x42e   : > { %v5171_v51 = vsel %vm17182_vm12, %v17181_v16, %v17180_v42  ;;  %v17185_v38 = vld [vmem:[#allocation122_spill] sm:$0xff]  ;;  %v5250_v62 = vsel %vm17190_vm1, %v17189_v39, %v5142_v10  ;;  %vm17192_vm12 = vcmp.eq.s32.totalorder %v16991_v50, 0  ;;  %vm17194_vm3 = vcmp.eq.s32.totalorder %v16995_v35, 0  ;;  %v17196_v52 = vld [vmem:[#allocation117_spill] sm:$0xff]  ;;  %v17198_v44 = vld [vmem:[#allocation116_spill] sm:$0xff] }
 0x42f   : > { %v5248_v25 = vsel %vm17186_vm10, %v17185_v38, %v5140_v30  ;;  %v5251_v16 = vsel %vm17192_vm12, %v17191_v45, %v5143_v58  ;;  %v17193_v42 = vld [vmem:[#allocation118_spill] sm:$0xff]  ;;  %vm17195_vm13 = vcmask 31744   ;;  %vm17197_vm10 = vcmp.eq.s32.totalorder %v16996_v31, 0  ;;  %v17200_v19 = vld [vmem:[#allocation115_spill] sm:$0xff]  ;;  %v17208_v31 = vld [vmem:[#allocation113_spill] sm:$0xff] }
 0x430   : > { %v5252_v6 = vsel %vm17194_vm3, %v17193_v42, %v5144_v20  ;;  %5287 = vst.msk [vmem:[#allocation2 + $0x13] sm:$0xff] %vm17195_vm13, %v5248_v25  ;;  %v5253_v30 = vsel %vm17197_vm10, %v17196_v52, %v5145_v56  ;;  %vm17199_vm11 = vcmp.eq.s32.totalorder %v17000_v28, 0  ;;  %vm17201_vm1 = vcmp.eq.s32.totalorder %v17001_v49, 0  ;;  %v17202_v50 = vld [vmem:[#allocation114_spill] sm:$0xff]  ;;  %vm17204_vm7 = vmmov %vm17195_vm13  ;;  %v17210_v28 = vld [vmem:[#allocation112_spill] sm:$0xff] }
 0x431   : > { %v5254_v43 = vsel %vm17199_vm11, %v17198_v44, %v5146_v22  ;;  %v5255_v10 = vsel %vm17201_vm1, %v17200_v19, %v5147_v27  ;;  %vm17203_vm12 = vcmp.eq.s32.totalorder %v17002_v4, 0  ;;  %5288 = vst.msk [vmem:[#allocation2 + $0x1b] sm:$0xff] %vm17204_vm7, %v5249_v41  ;;  %vm17205_vm3 = vmmov %vm17204_vm7  ;;  %vm17209_vm10 = vcmp.eq.s32.totalorder %v17003_v14, 0  ;;  %v17212_v20 = vld [vmem:[#allocation111_spill] sm:$0xff]  ;;  %v17214_v56 = vld [vmem:[#allocation110_spill] sm:$0xff] }
 0x432   : > { %v5256_v58 = vsel %vm17203_vm12, %v17202_v50, %v5148_v54  ;;  %5289 = vst.msk [vmem:[#allocation2 + $0x23] sm:$0xff] %vm17205_vm3, %v5250_v62  ;;  %vm17206_vm13 = vmmov %vm17205_vm3  ;;  %v5257_v35 = vsel %vm17209_vm10, %v17208_v31, %v5149_v8  ;;  %vm17211_vm11 = vcmp.eq.s32.totalorder %v17006_v57, 0  ;;  %vm17213_vm1 = vcmp.eq.s32.totalorder %v17007_v47, 0  ;;  %v17219_v14 = vld [vmem:[#allocation109_spill] sm:$0xff]  ;;  %v17221_v27 = vld [vmem:[#allocation108_spill] sm:$0xff] }
 0x433   : > { %5290 = vst.msk [vmem:[#allocation2 + $0x2b] sm:$0xff] %vm17206_vm13, %v5251_v16  ;;  %vm17207_vm9 = vmmov %vm17205_vm3  ;;  %v5258_v49 = vsel %vm17211_vm11, %v17210_v28, %v5150_v61  ;;  %v5259_v4 = vsel %vm17213_vm1, %v17212_v20, %v5151_v3  ;;  %vm17215_vm7 = vcmp.eq.s32.totalorder %v17008_v37, 0  ;;  %vm17220_vm10 = vcmp.eq.s32.totalorder %v17009_v32, 0  ;;  %v17223_v54 = vld [vmem:[#allocation107_spill] sm:$0xff]  ;;  %v17225_v8 = vld [vmem:[#allocation106_spill] sm:$0xff] }
 0x434   : > { %5291 = vst.msk [vmem:[#allocation2 + $0x33] sm:$0xff] %vm17207_vm9, %v5252_v6  ;;  %v5260_v22 = vsel %vm17215_vm7, %v17214_v56, %v5152_v48  ;;  %vm17216_vm12 = vmmov %vm17205_vm3  ;;  %v5261_v57 = vsel %vm17220_vm10, %v17219_v14, %v5153_v24  ;;  %vm17222_vm11 = vcmp.eq.s32.totalorder %v17019_v0, 0  ;;  %vm17224_vm1 = vcmp.eq.s32.totalorder %v17020_v55, 0  ;;  %v17226_v61 = vld [vmem:[#allocation20_spill] sm:$0xff]  ;;  %v17231_v32 = vld [vmem:[#allocation105_spill] sm:$0xff] }
 0x435   : > { %5292 = vst.msk [vmem:[#allocation2 + $0x3b] sm:$0xff] %vm17216_vm12, %v5253_v30  ;;  %vm17217_vm9 = vmmov %vm17205_vm3  ;;  %v5262_v47 = vsel %vm17222_vm11, %v17221_v27, %v5154_v59  ;;  %v5263_v37 = vsel %vm17224_vm1, %v17223_v54, %v5155_v11  ;;  %vm17227_vm7 = vcmp.eq.s32.totalorder %v17226_v61, 0  ;;  %v17232_v48 = vld [vmem:[#allocation22_spill] sm:$0xff]  ;;  %v17234_v24 = vld [vmem:[#allocation104_spill] sm:$0xff] }
 0x436   : > { %5293 = vst.msk [vmem:[#allocation2 + $0x43] sm:$0xff] %vm17205_vm3, %v5254_v43  ;;  %vm17218_vm13 = vmmov %vm17205_vm3  ;;  %v5264_v3 = vsel %vm17227_vm7, %v17225_v8, %v5156_v23  ;;  %vm17233_vm10 = vcmp.eq.s32.totalorder %v17232_v48, 0  ;;  %v17235_v59 = vld [vmem:[#allocation19_spill] sm:$0xff]  ;;  %v17238_v39 = vld [vmem:[#allocation21_spill] sm:$0xff] }
 0x437   : > { %5294 = vst.msk [vmem:[#allocation2 + $0x4b] sm:$0xff] %vm17217_vm9, %v5255_v10  ;;  %vm17228_vm12 = vmmov %vm17205_vm3  ;;  %v5265_v0 = vsel %vm17233_vm10, %v17231_v32, %v5157_v18  ;;  %vm17236_vm11 = vcmp.eq.s32.totalorder %v17235_v59, 0  ;;  %v17237_v11 = vld [vmem:[#allocation103_spill] sm:$0xff]  ;;  %vm17239_vm1 = vcmp.eq.s32.totalorder %v17238_v39, 0  ;;  %v17240_v25 = vld [vmem:[#allocation102_spill] sm:$0xff] }
 0x438   : > { %5295 = vst.msk [vmem:[#allocation2 + $0x53] sm:$0xff] %vm17218_vm13, %v5256_v58  ;;  %vm17229_vm9 = vmmov %vm17205_vm3  ;;  %v5266_v55 = vsel %vm17236_vm11, %v17234_v24, %v5158_v36  ;;  %v5267_v23 = vsel %vm17239_vm1, %v17237_v11, %v5159_v40  ;;  %v17241_v15 = vld [vmem:[#allocation24_spill] sm:$0xff]  ;;  %v17246_v18 = vld [vmem:[#allocation101_spill] sm:$0xff] }
 0x439   : > { %5296 = vst.msk [vmem:[#allocation2 + $0x5b] sm:$0xff] %vm17228_vm12, %v5257_v35  ;;  %vm17230_vm13 = vmmov %vm17205_vm3  ;;  %vm17242_vm7 = vcmp.eq.s32.totalorder %v17241_v15, 0  ;;  %v17247_v53 = vld [vmem:[#allocation26_spill] sm:$0xff]  ;;  %v17249_v41 = vld [vmem:[#allocation100_spill] sm:$0xff] }
 0x43a   : > { %5297 = vst.msk [vmem:[#allocation2 + $0x63] sm:$0xff] %vm17205_vm3, %v5258_v49  ;;  %v5268_v38 = vsel %vm17242_vm7, %v17240_v25, %v5160_v13  ;;  %vm17243_vm12 = vmmov %vm17205_vm3  ;;  %vm17248_vm10 = vcmp.eq.s32.totalorder %v17247_v53, 0  ;;  %v17250_v62 = vld [vmem:[#allocation23_spill] sm:$0xff]  ;;  %v17252_v45 = vld [vmem:[#allocation93_spill] sm:$0xff] }
 0x43b   : > { %5298 = vst.msk [vmem:[#allocation2 + $0x6b] sm:$0xff] %vm17229_vm9, %v5259_v4  ;;  %vm17244_vm9 = vmmov %vm17205_vm3  ;;  %v5269_v36 = vsel %vm17248_vm10, %v17246_v18, %v5161_v12  ;;  %vm17251_vm11 = vcmp.eq.s32.totalorder %v17250_v62, 0  ;;  %v17253_v16 = vld [vmem:[#allocation25_spill] sm:$0xff]  ;;  %v17255_v42 = vld [vmem:[#allocation92_spill] sm:$0xff] }
 0x43c   : > { %5299 = vst.msk [vmem:[#allocation2 + $0x73] sm:$0xff] %vm17230_vm13, %v5260_v22  ;;  %vm17245_vm13 = vmmov %vm17205_vm3  ;;  %v5270_v40 = vsel %vm17251_vm11, %v17249_v41, %v5162_v5  ;;  %vm17254_vm1 = vcmp.eq.s32.totalorder %v17253_v16, 0  ;;  %v17256_v6 = vld [vmem:[#allocation28_spill] sm:$0xff]  ;;  %v17261_v12 = vld [vmem:[#allocation97_spill] sm:$0xff] }
 0x43d   : > { %5300 = vst.msk [vmem:[#allocation2 + $0x7b] sm:$0xff] %vm17243_vm12, %v5261_v57  ;;  %v5271_v13 = vsel %vm17254_vm1, %v17252_v45, %v5163_v26  ;;  %vm17257_vm7 = vcmp.eq.s32.totalorder %v17256_v6, 0  ;;  %vm17258_vm12 = vmmov %vm17205_vm3  ;;  %v17262_v30 = vld [vmem:[#allocation31_spill] sm:$0xff]  ;;  %v17264_v44 = vld [vmem:[#allocation96_spill] sm:$0xff]  ;;  %vm17268_vm1 = vcmp.eq.s32.totalorder %v17054_v21, 0 }
 0x43e   : > { %5301 = vst.msk [vmem:[#allocation2 + $0x83] sm:$0xff] %vm17205_vm3, %v5262_v47  ;;  %v5272_v52 = vsel %vm17257_vm7, %v17255_v42, %v5164_v29  ;;  %5305 = vst.msk [vmem:[#allocation2 + $0xa3] sm:$0xff] %vm17205_vm3, %v5266_v55  ;;  %vm17263_vm10 = vcmp.eq.s32.totalorder %v17262_v30, 0  ;;  %v17265_v43 = vld [vmem:[#allocation27_spill] sm:$0xff]  ;;  %v17269_v10 = vld [vmem:[#allocation94_spill] sm:$0xff]  ;;  %vm17270_vm7 = vcmp.eq.s32.totalorder %v17125_v63, 0 }
 0x43f   : > { %5302 = vst.msk [vmem:[#allocation2 + $0x8b] sm:$0xff] %vm17244_vm9, %v5263_v37  ;;  %vm17259_vm9 = vmmov %vm17205_vm3  ;;  %v5273_v5 = vsel %vm17263_vm10, %v17261_v12, %v5165_v33  ;;  %vm17266_vm11 = vcmp.eq.s32.totalorder %v17265_v43, 0  ;;  %v17267_v19 = vld [vmem:[#allocation95_spill] sm:$0xff]  ;;  %v5276_v50 = vsel %vm17270_vm7, %v17269_v10, %v5168_v34  ;;  %v17277_v31 = vld [vmem:[#allocation98_spill] sm:$0xff]  ;;  %vm17283_vm7 = vcmp.eq.s32.totalorder %v17140_v60, 0 }
 0x440   : > { %5303 = vst.msk [vmem:[#allocation2 + $0x93] sm:$0xff] %vm17245_vm13, %v5264_v3  ;;  %vm17260_vm13 = vmmov %vm17205_vm3  ;;  %v5274_v26 = vsel %vm17266_vm11, %v17264_v44, %v5166_v2  ;;  %v5275_v29 = vsel %vm17268_vm1, %v17267_v19, %v5167_v9  ;;  %v17274_v33 = vld [vmem:[#allocation99_spill] sm:$0xff]  ;;  %v17278_v35 = vld [vmem:[#allocation40_spill] sm:$0xff]  ;;  %vm17281_vm1 = vcmp.eq.s32.totalorder %v17138_v1, 0 }
 0x441   : > { %5304 = vst.msk [vmem:[#allocation2 + $0x9b] sm:$0xff] %vm17258_vm12, %v5265_v0  ;;  %vm17271_vm12 = vmmov %vm17205_vm3  ;;  %v17275_v58 = vld [vmem:[#allocation43_spill] sm:$0xff]  ;;  %vm17279_vm11 = vcmp.eq.s32.totalorder %v17278_v35, 0  ;;  %v5325_v60 = vld [vmem:[#allocation2 + $0x35] sm:$0x3] }
 0x442   : > { %5306 = vst.msk [vmem:[#allocation2 + $0xab] sm:$0xff] %vm17259_vm9, %v5267_v23  ;;  %vm17272_vm9 = vmmov %vm17205_vm3  ;;  %vm17276_vm10 = vcmp.eq.s32.totalorder %v17275_v58, 0  ;;  %v5278_v21 = vsel %vm17279_vm11, %v17277_v31, %v5170_v46  ;;  %v17280_v9 = vld [vmem:[#allocation91_spill] sm:$0xff]  ;;  %v5394_v46 = vld [vmem:[#allocation2 + $0x19] sm:$0xff] }
 0x443   : > { %5307 = vst.msk [vmem:[#allocation2 + $0xb3] sm:$0xff] %vm17260_vm13, %v5268_v38  ;;  %vm17273_vm13 = vmmov %vm17205_vm3  ;;  %v5277_v2 = vsel %vm17276_vm10, %v17274_v33, %v5169_v17  ;;  %v5279_v63 = vsel %vm17281_vm1, %v17280_v9, %v5171_v51  ;;  %v17282_v34 = vld [vmem:[#allocation123_spill] sm:$0xff]  ;;  %v11752_v14 = vld [vmem:[%s16330_s2] sm:$0x3] }
 0x444   : > { %5308 = vst.msk [vmem:[#allocation2 + $0xbb] sm:$0xff] %vm17271_vm12, %v5269_v36  ;;  %v5283_v28 = vsel %vm17283_vm7, %v17282_v34, %v5175_v7  ;;  %vm17284_vm12 = vmmov %vm17205_vm3  ;;  %v5323_v1 = vld [vmem:[#allocation2 + $0x25] sm:$0xff]  ;;  %v5324_v17 = vld [vmem:[#allocation2 + $0x2d] sm:$0xff] }
 0x445   : > { %5309 = vst.msk [vmem:[#allocation2 + $0xc3] sm:$0xff] %vm17205_vm3, %v5270_v40  ;;  %5313 = vst.msk [vmem:[#allocation2 + $0xe3] sm:$0xff] %vm17205_vm3, %v5274_v26  ;;  %v5395_v51 = vld [vmem:[#allocation2 + $0x21] sm:$0xff]  ;;  %v5396_v7 = vld [vmem:[#allocation2 + $0x29] sm:$0xff] }
 0x446   : > { %5310 = vst.msk [vmem:[#allocation2 + $0xcb] sm:$0xff] %vm17272_vm9, %v5271_v13  ;;  %vm17285_vm9 = vmmov %vm17205_vm3  ;;  %v5429_v27 = vpack.c.bf16 %v5396_v7, %v5395_v51  ;;  %v15102_v47 = vld [vmem:[%s16330_s2 + $0x4] sm:$0x3]  ;;  %v5397_v54 = vld [vmem:[#allocation2 + $0x31] sm:$0xff] }
 0x447   : > { %5311 = vst.msk [vmem:[#allocation2 + $0xd3] sm:$0xff] %vm17273_vm13, %v5272_v52  ;;  %vm17286_vm13 = vmmov %vm17205_vm3  ;;  %v5398_v37 = vld [vmem:[#allocation2 + $0x39] sm:$0xff]  ;;  %v5399_v8 = vld [vmem:[#allocation2 + $0x41] sm:$0xff] }
 0x448   : > { %5312 = vst.msk [vmem:[#allocation2 + $0xdb] sm:$0xff] %vm17284_vm12, %v5273_v5  ;;  %vm17287_vm10 = vmmov %vm17205_vm3  ;;  %vm17293_vm12 = vcmask 25600   ;;  %v5400_v61 = vld [vmem:[#allocation2 + $0x49] sm:$0xff]  ;;  %v5430_v3 = vpack.c.bf16 %v5398_v37, %v5397_v54  ;;  %v5401_v48 = vld [vmem:[#allocation2 + $0x51] sm:$0xff] }
 0x449   : > { %5314 = vst.msk [vmem:[#allocation2 + $0xeb] sm:$0xff] %vm17285_vm9, %v5275_v29  ;;  %vm17288_vm15 = vmmov %vm17205_vm3  ;;  %v5431_v32 = vpack.c.bf16 %v5400_v61, %v5399_v8  ;;  %v5402_v0 = vld [vmem:[#allocation2 + $0x59] sm:$0xff]  ;;  %v5403_v24 = vld [vmem:[#allocation2 + $0x61] sm:$0xff] }
 0x44a   : > { %5315 = vst.msk [vmem:[#allocation2 + $0xf3] sm:$0xff] %vm17286_vm13, %v5276_v50  ;;  %vm17289_vm11 = vmmov %vm17205_vm3  ;;  %v5404_v59 = vld [vmem:[#allocation2 + $0x69] sm:$0xff]  ;;  %v5432_v55 = vpack.c.bf16 %v5402_v0, %v5401_v48  ;;  %v5405_v39 = vld [vmem:[#allocation2 + $0x71] sm:$0xff] }
 0x44b   : > { %5316 = vst.msk [vmem:[#allocation2 + $0xfb] sm:$0xff] %vm17287_vm10, %v5277_v2  ;;  %vm17290_vm8 = vmmov %vm17205_vm3  ;;  %v5433_v11 = vpack.c.bf16 %v5404_v59, %v5403_v24  ;;  %v5406_v23 = vld [vmem:[#allocation2 + $0x79] sm:$0xff]  ;;  %v5407_v25 = vld [vmem:[#allocation2 + $0x81] sm:$0xff] }
 0x44c   : > { %5317 = vst.msk [vmem:[#allocation2 + $0x103] sm:$0xff] %vm17288_vm15, %v5278_v21  ;;  %vm17291_vm1 = vmmov %vm17205_vm3  ;;  %v5408_v15 = vld [vmem:[#allocation2 + $0x89] sm:$0xff]  ;;  %v5434_v38 = vpack.c.bf16 %v5406_v23, %v5405_v39  ;;  %v5409_v53 = vld [vmem:[#allocation2 + $0x91] sm:$0xff] }
 0x44d   : > { %5318 = vst.msk [vmem:[#allocation2 + $0x10b] sm:$0xff] %vm17289_vm11, %v5279_v63  ;;  %vm17292_vm7 = vmmov %vm17291_vm1  ;;  %v5435_v18 = vpack.c.bf16 %v5408_v15, %v5407_v25  ;;  %v5410_v36 = vld [vmem:[#allocation2 + $0x99] sm:$0xff]  ;;  %v5411_v41 = vld [vmem:[#allocation2 + $0xa1] sm:$0xff] }
 0x44e   : > { %5322 = vst.msk [vmem:[#allocation2 + $0x12b] sm:$0xff] %vm17290_vm8, %v5283_v28  ;;  %vm17294_vm8 = vcmask 1041408   ;;  %vm17295_vm15 = vmmov %vm17291_vm1  ;;  %v5412_v62 = vld [vmem:[#allocation2 + $0xa9] sm:$0xff]  ;;  %v5436_v40 = vpack.c.bf16 %v5410_v36, %v5409_v53  ;;  %v5413_v16 = vld [vmem:[#allocation2 + $0xb1] sm:$0xff] }
 0x44f   : > { %5326 = vst.msk [vmem:[#allocation2 + $0x1] sm:$0xff] %vm17291_vm1, %v5323_v1  ;;  %v5736_v57 = vsel %vm17294_vm8, %v11752_v14, 0  ;;  %vm17296_vm3 = vmmov %vm17291_vm1  ;;  %v5437_v45 = vpack.c.bf16 %v5412_v62, %v5411_v41  ;;  %v5414_v13 = vld [vmem:[#allocation2 + $0xb9] sm:$0xff]  ;;  %v5415_v42 = vld [vmem:[#allocation2 + $0xc1] sm:$0xff] }
 0x450   : > { %5327 = vst.msk [vmem:[#allocation2 + $0x9] sm:$0xff] %vm17292_vm7, %v5324_v17  ;;  %vm17297_vm9 = vmmov %vm17291_vm1  ;;  %v5416_v6 = vld [vmem:[#allocation2 + $0xc9] sm:$0xff]  ;;  %v5438_v52 = vpack.c.bf16 %v5414_v13, %v5413_v16  ;;  %v5417_v30 = vld [vmem:[#allocation2 + $0xd1] sm:$0xff] }
 0x451   : > { %5329 = vst.msk [vmem:[#allocation2 + $0x11] sm:$0x3] %vm17293_vm12, %v5325_v60  ;;  %vm17298_vm13 = vmmov %vm17294_vm8  ;;  %v5439_v12 = vpack.c.bf16 %v5416_v6, %v5415_v42  ;;  %v5418_v5 = vld [vmem:[#allocation2 + $0xd9] sm:$0xff]  ;;  %v5419_v44 = vld [vmem:[#allocation2 + $0xe1] sm:$0xff] }
 0x452   : > { %vm17299_vm10 = vmmov %vm17291_vm1  ;;  %v5420_v43 = vld [vmem:[#allocation2 + $0xe9] sm:$0xff]  ;;  %v5440_v26 = vpack.c.bf16 %v5418_v5, %v5417_v30  ;;  %v5421_v10 = vld [vmem:[#allocation2 + $0xf1] sm:$0xff] }
 0x453   : > { %vm17300_vm11 = vmmov %vm17291_vm1  ;;  %v5441_v29 = vpack.c.bf16 %v5420_v43, %v5419_v44  ;;  %v5422_v50 = vld [vmem:[#allocation2 + $0xf9] sm:$0xff]  ;;  %v5423_v33 = vld [vmem:[#allocation2 + $0x101] sm:$0xff] }
 0x454   : > { %vm17301_vm7 = vmmov %vm17291_vm1  ;;  %v5330_v19 = vld [vmem:[#allocation2 + $0x10f] sm:$0xff]  ;;  %v5442_v2 = vpack.c.bf16 %v5422_v50, %v5421_v10  ;;  %v5426_v21 = vld [vmem:[#allocation2 + $0x119] sm:$0xff] }
 0x455   : > { %vm17302_vm12 = vmmov %vm17291_vm1  ;;  %v5424_v58 = vld [vmem:[#allocation2 + $0x109] sm:$0xff]  ;;  %v5425_v35 = vld [vmem:[#allocation2 + $0x111] sm:$0xff] }
 0x456   : > { %v5391_v49 = vld [vmem:[#allocation2 + $0x1] sm:$0xff]  ;;  %vm17303_vm8 = vmmov %vm17291_vm1  ;;  %v5443_v31 = vpack.c.bf16 %v5424_v58, %v5423_v33  ;;  %v5444_v34 = vpack.c.bf16 %v5426_v21, %v5425_v35  ;;  %v5347_v54 = vld [vmem:[#allocation2 + $0x58] sm:$0xff] }
 0x457   : > { %v5392_v20 = vld [vmem:[#allocation2 + $0x9] sm:$0xff]  ;;  %v5336_v9 = vld [vmem:[#allocation2] sm:$0xff]  ;;  %v5351_v48 = vld [vmem:[#allocation2 + $0x78] sm:$0xff] }
 0x458   : > { %v5393_v4 = vld [vmem:[#allocation2 + $0x11] sm:$0xff]  ;;  %v5427_v56 = vpack.c.bf16 %v5392_v20, %v5391_v49  ;;  %v5337_v63 = vld [vmem:[#allocation2 + $0x8] sm:$0xff]  ;;  %v5340_v17 = vld [vmem:[#allocation2 + $0x20] sm:$0xff] }
 0x459   : > { %v5428_v22 = vpack.c.bf16 %v5394_v46, %v5393_v4  ;;  %v5372_v28 = vpack.c.bf16 %v5337_v63, %v5336_v9  ;;  %v5338_v1 = vld [vmem:[#allocation2 + $0x10] sm:$0xff]  ;;  %v5341_v60 = vld [vmem:[#allocation2 + $0x28] sm:$0xff]  ;;  %v5339_v46 = vld [vmem:[#allocation2 + $0x18] sm:$0xff] }
 0x45a   : > { %10669 = vmatprep.mubr.msk.bf16.mxu1 %vm17295_vm15, %v5427_v56  ;;  %vm17304_vm15 = vmmov %vm17291_vm1  ;;  %v5373_v51 = vpack.c.bf16 %v5339_v46, %v5338_v1  ;;  %v5374_v49 = vpack.c.bf16 %v5341_v60, %v5340_v17  ;;  %v15130_v20 = vld [vmem:[%s16330_s2 + $0x6] sm:$0x3]  ;;  %v5342_v4 = vld [vmem:[#allocation2 + $0x30] sm:$0xff] }
 0x45b   : > { %10670 = vmatmul.mubr.msk.bf16.vlgmr.msra.gmra.mrb[0].mxu1 %vm17296_vm3, %v5428_v22  ;;  %vm17305_vm3 = vmmov %vm17291_vm1  ;;  %v5343_v56 = vld [vmem:[#allocation2 + $0x38] sm:$0xff]  ;;  %v5344_v22 = vld [vmem:[#allocation2 + $0x40] sm:$0xff] }
 0x45c   : > { %10706 = vmatpush3.bf16.msra.mxu1 %v5736_v57  ;;  %10673 = vmatprep.mubr.msk.bf16.mxu1 %vm17297_vm9, %v5429_v27  ;;  %vm17306_vm9 = vmmov %vm17291_vm1  ;;  %v5345_v14 = vld [vmem:[#allocation2 + $0x48] sm:$0xff]  ;;  %v5375_v57 = vpack.c.bf16 %v5343_v56, %v5342_v4  ;;  %v5348_v37 = vld [vmem:[#allocation2 + $0x60] sm:$0xff] }
 0x45d   : > { %11596 = vmatprep.subr.msk.bf16.mxu1 %vm17298_vm13, %v15102_v47  ;;  %vm17307_vm13 = vmmov %vm17291_vm1  ;;  %v5376_v27 = vpack.c.bf16 %v5345_v14, %v5344_v22  ;;  %v5349_v8 = vld [vmem:[#allocation2 + $0x68] sm:$0xff]  ;;  %v5352_v0 = vld [vmem:[#allocation2 + $0x80] sm:$0xff] }
 0x45e   : > { %v5353_v24 = vld [vmem:[#allocation2 + $0x88] sm:$0xff]  ;;  %v5355_v39 = vld [vmem:[#allocation2 + $0x98] sm:$0xff]  ;;  %v5356_v23 = vld [vmem:[#allocation2 + $0xa0] sm:$0xff] }
 0x45f   : > { %v5357_v25 = vld [vmem:[#allocation2 + $0xa8] sm:$0xff]  ;;  %v5359_v53 = vld [vmem:[#allocation2 + $0xb8] sm:$0xff]  ;;  %v5360_v36 = vld [vmem:[#allocation2 + $0xc0] sm:$0xff] }
 0x460   : > { %v5361_v41 = vld [vmem:[#allocation2 + $0xc8] sm:$0xff]  ;;  %v5363_v16 = vld [vmem:[#allocation2 + $0xd8] sm:$0xff]  ;;  %v5364_v13 = vld [vmem:[#allocation2 + $0xe0] sm:$0xff] }
 0x461   : > { %v5365_v42 = vld [vmem:[#allocation2 + $0xe8] sm:$0xff]  ;;  %v5367_v30 = vld [vmem:[#allocation2 + $0xf8] sm:$0xff]  ;;  %v5368_v5 = vld [vmem:[#allocation2 + $0x100] sm:$0xff] }
 0x462   : > { %v5369_v44 = vld [vmem:[#allocation2 + $0x108] sm:$0xff]  ;;  %v5918_v21 = vld [vmem:[#allocation2 + $0x1a] sm:$0xff]  ;;  %v5921_v1 = vld [vmem:[#allocation2 + $0x32] sm:$0xff] }
 0x463   : > { %10674 = vmatmul.mubr.msk.bf16.gmra.mrb[4].mxu1 %vm17299_vm10, %v5430_v3  ;;  %vm17308_vm10 = vmmov %vm17291_vm1  ;;  %v5378_v3 = vpack.c.bf16 %v5349_v8, %v5348_v37  ;;  %v5915_v10 = vld [vmem:[#allocation2 + $0x2] sm:$0xff]  ;;  %v5916_v50 = vld [vmem:[#allocation2 + $0xa] sm:$0xff] }
 0x464   : > { %10677 = vmatprep.mubr.msk.bf16.mxu1 %vm17300_vm11, %v5431_v32  ;;  %5333 = vst.msk [vmem:[#allocation2 + $0x133] sm:$0xff] %vm17308_vm10, %v5330_v19  ;;  %vm17309_vm11 = vmmov %vm17291_vm1  ;;  %v5350_v32 = vld [vmem:[#allocation2 + $0x70] sm:$0xff]  ;;  %v5951_v58 = vpack.c.bf16 %v5916_v50, %v5915_v10  ;;  %v5922_v17 = vld [vmem:[#allocation2 + $0x3a] sm:$0xff] }
 0x465   : > { %v5379_v59 = vpack.c.bf16 %v5351_v48, %v5350_v32  ;;  %v5370_v19 = vld [vmem:[#allocation2 + $0x110] sm:$0xff]  ;;  %v5923_v60 = vld [vmem:[#allocation2 + $0x42] sm:$0xff]  ;;  %vm17361_vm4 = vmmov %vm17291_vm1 }
 0x466   : > { %v5920_v35 = vld [vmem:[#allocation2 + $0x2a] sm:$0xff]  ;;  %v5927_v4 = vld [vmem:[#allocation2 + $0x62] sm:$0xff] }
 0x467   : > { %v5924_v46 = vld [vmem:[#allocation2 + $0x4a] sm:$0xff]  ;;  %v5935_v32 = vld [vmem:[#allocation2 + $0xa2] sm:$0xff] }
 0x468   : > { %v5928_v56 = vld [vmem:[#allocation2 + $0x6a] sm:$0xff] }
 0x469   : > { %v5957_v14 = vpack.c.bf16 %v5928_v56, %v5927_v4  ;;  %v5936_v48 = vld [vmem:[#allocation2 + $0xaa] sm:$0xff] }
 0x46a   : > { %v6569_v50 = vld [vmem:[#allocation2 + $0x23] sm:$0xff] }
 0x46b   : > { %10678 = vmatmul.mubr.msk.bf16.gmra.mrb[8].mxu1 %vm17291_vm1, %v5432_v55  ;;  %v5380_v55 = vpack.c.bf16 %v5353_v24, %v5352_v0  ;;  %v5961_v24 = vpack.c.bf16 %v5936_v48, %v5935_v32  ;;  %v6581_v56 = vld [vmem:[#allocation2 + $0x83] sm:$0xff] }
 0x46c   : > { %10681 = vmatprep.mubr.msk.bf16.mxu1 %vm17301_vm7, %v5433_v11  ;;  %vm17310_vm7 = vmmov %vm17291_vm1  ;;  %v5354_v11 = vld [vmem:[#allocation2 + $0x90] sm:$0xff]  ;;  %v6589_v48 = vld [vmem:[#allocation2 + $0xc3] sm:$0xff] }
 0x46d   : > { %v5381_v15 = vpack.c.bf16 %v5355_v39, %v5354_v11  ;;  %v5939_v11 = vld [vmem:[#allocation2 + $0xc2] sm:$0xff]  ;;  %v5940_v39 = vld [vmem:[#allocation2 + $0xca] sm:$0xff] }
 0x473   : > { %10682 = vmatmul.mubr.msk.bf16.gmra.mrb[12].mxu1 %vm17302_vm12, %v5434_v38  ;;  %vm17311_vm12 = vmmov %vm17291_vm1  ;;  %v5382_v38 = vpack.c.bf16 %v5357_v25, %v5356_v23  ;;  %v5963_v25 = vpack.c.bf16 %v5940_v39, %v5939_v11  ;;  %v6593_v39 = vld [vmem:[#allocation2 + $0xe3] sm:$0xff] }
 0x474   : > { %10685 = vmatprep.mubr.msk.bf16.mxu1 %vm17303_vm8, %v5435_v18  ;;  %vm17312_vm8 = vmmov %vm17291_vm1  ;;  %v5358_v18 = vld [vmem:[#allocation2 + $0xb0] sm:$0xff] }
 0x475   : > { %v5383_v62 = vpack.c.bf16 %v5359_v53, %v5358_v18  ;;  %v5943_v18 = vld [vmem:[#allocation2 + $0xe2] sm:$0xff]  ;;  %v5944_v53 = vld [vmem:[#allocation2 + $0xea] sm:$0xff] }
 0x47b   : > { %10686 = vmatmul.mubr.msk.bf16.gmra.mrb[16].mxu1 %vm17304_vm15, %v5436_v40  ;;  %vm17313_vm15 = vmmov %vm17291_vm1  ;;  %v5384_v40 = vpack.c.bf16 %v5361_v41, %v5360_v36  ;;  %v5965_v41 = vpack.c.bf16 %v5944_v53, %v5943_v18  ;;  %v6597_v53 = vld [vmem:[#allocation2 + $0x103] sm:$0xff] }
 0x47c   : > { %10689 = vmatprep.mubr.msk.bf16.mxu1 %vm17305_vm3, %v5437_v45  ;;  %vm17314_vm3 = vcmask 1041408   ;;  %v5362_v45 = vld [vmem:[#allocation2 + $0xd0] sm:$0xff] }
 0x47d   : > { %v6026_v7 = vsel %vm17314_vm3, %v15102_v47, 0  ;;  %vm17317_vm10 = vmmov %vm17314_vm3  ;;  %v5346_v47 = vld [vmem:[#allocation2 + $0x50] sm:$0xff]  ;;  %v5385_v6 = vpack.c.bf16 %v5363_v16, %v5362_v45  ;;  %v5947_v45 = vld [vmem:[#allocation2 + $0x102] sm:$0xff] }
 0x47e   : > { %v5377_v61 = vpack.c.bf16 %v5347_v54, %v5346_v47  ;;  %vm17323_vm3 = vmmov %vm17291_vm1  ;;  %v5931_v47 = vld [vmem:[#allocation2 + $0x82] sm:$0xff]  ;;  %v5932_v54 = vld [vmem:[#allocation2 + $0x8a] sm:$0xff] }
 0x47f   : > { %v5959_v8 = vpack.c.bf16 %v5932_v54, %v5931_v47  ;;  %v5948_v16 = vld [vmem:[#allocation2 + $0x10a] sm:$0xff] }
 0x480   : > { %v6585_v54 = vld [vmem:[#allocation2 + $0xa3] sm:$0xff] }
 0x483   : > { %10690 = vmatmul.mubr.msk.bf16.gmra.mrb[20].mxu1 %vm17306_vm9, %v5438_v52  ;;  %vm17315_vm9 = vmmov %vm17291_vm1  ;;  %v5386_v52 = vpack.c.bf16 %v5365_v42, %v5364_v13  ;;  %v5967_v42 = vpack.c.bf16 %v5948_v16, %v5947_v45  ;;  %v6601_v16 = vld [vmem:[#allocation2 + $0x123] sm:$0xff] }
 0x484   : > { %10693 = vmatprep.mubr.msk.bf16.mxu1 %vm17307_vm13, %v5439_v12  ;;  %vm17316_vm13 = vmmov %vm17291_vm1  ;;  %v5366_v12 = vld [vmem:[#allocation2 + $0xf0] sm:$0xff] }
 0x485   : > { %v5387_v43 = vpack.c.bf16 %v5367_v30, %v5366_v12 }
 0x48b   : > { %10694 = vmatmul.mubr.msk.bf16.gmra.mrb[24].mxu1 %vm17309_vm11, %v5440_v26  ;;  %vm17318_vm11 = vmmov %vm17291_vm1  ;;  %v5388_v26 = vpack.c.bf16 %v5369_v44, %v5368_v5  ;;  %v9745_v5 = vld [vmem:[%s16330_s2 + $0xa] sm:$0x3]  ;;  %v6275_v44 = vld [vmem:[#allocation2 + $0x122] sm:$0xff] }
 0x48c   : > { %10697 = vmatprep.mubr.msk.bf16.mxu1 %vm17291_vm1, %v5441_v29  ;;  %v5371_v29 = vld [vmem:[#allocation2 + $0x118] sm:$0xff] }
 0x48d   : > { %v5389_v33 = vpack.c.bf16 %v5371_v29, %v5370_v19  ;;  %v6568_v19 = vld [vmem:[#allocation2 + $0x1b] sm:$0xff] }
 0x493   : > { %10698 = vmatmul.mubr.msk.bf16.gmra.mrb[28].mxu1 %vm17310_vm7, %v5442_v2  ;;  %vm17319_vm7 = vmmov %vm17291_vm1  ;;  %v5917_v2 = vld [vmem:[#allocation2 + $0x12] sm:$0xff] }
 0x494   : > { %10701 = vmatprep.mubr.msk.bf16.mxu1 %vm17311_vm12, %v5443_v31  ;;  %vm17320_vm12 = vmmov %vm17291_vm1  ;;  %v5919_v31 = vld [vmem:[#allocation2 + $0x22] sm:$0xff]  ;;  %v15152_v9 = vpack.c.bf16 %v5918_v21, %v5917_v2 }
 0x495   : > { %v6572_v2 = vld [vmem:[#allocation2 + $0x3b] sm:$0xff] }
 0x49b   : > { %10702 = vmatmul.mubr.msk.bf16.gmra.mrb[32].mxu1 %vm17312_vm8, %v5444_v34  ;;  %vm17321_vm8 = vmmov %vm17291_vm1  ;;  %v15156_v34 = vpack.c.bf16 %v5920_v35, %v5919_v31 }
 0x49c   : > { %10707 = vmatprep.mubr.msk.bf16.mxu1 %vm17313_vm15, %v5372_v28  ;;  %vm17322_vm15 = vmmov %vm17291_vm1  ;;  %v15161_v28 = vld [vmem:[%s16330_s2 + $0x8] sm:$0x3] }
 0x4a3   : > { %10708 = vmatmul.mubr.msk.bf16.vlgmr.msra.gmra.mrb[0].mxu1 %vm17315_vm9, %v5373_v51  ;;  %vm17324_vm9 = vmmov %vm17291_vm1  ;;  %v5954_v51 = vpack.c.bf16 %v5922_v17, %v5921_v1  ;;  %v6576_v1 = vld [vmem:[#allocation2 + $0x5b] sm:$0xff] }
 0x4a4   : > { %10744 = vmatpush3.bf16.msra.mxu1 %v6026_v7  ;;  %10711 = vmatprep.mubr.msk.bf16.mxu1 %vm17316_vm13, %v5374_v49  ;;  %vm17325_vm13 = vmmov %vm17291_vm1  ;;  %v5955_v7 = vpack.c.bf16 %v5924_v46, %v5923_v60  ;;  %v5925_v49 = vld [vmem:[#allocation2 + $0x52] sm:$0xff]  ;;  %v6577_v46 = vld [vmem:[#allocation2 + $0x63] sm:$0xff] }
 0x4a5   : > { %11597 = vmatprep.subr.msk.bf16.mxu1 %vm17317_vm10, %v15130_v20  ;;  %vm17326_vm10 = vmmov %vm17291_vm1 }
 0x4ab   : > { %10712 = vmatmul.mubr.msk.bf16.gmra.mrb[4].mxu1 %vm17318_vm11, %v5375_v57  ;;  %vm17327_vm11 = vmmov %vm17291_vm1  ;;  %v5929_v57 = vld [vmem:[#allocation2 + $0x72] sm:$0xff] }
 0x4ac   : > { %10715 = vmatprep.mubr.msk.bf16.mxu1 %vm17291_vm1, %v5376_v27  ;;  %v5930_v27 = vld [vmem:[#allocation2 + $0x7a] sm:$0xff] }
 0x4ad   : > { %v5958_v37 = vpack.c.bf16 %v5930_v27, %v5929_v57  ;;  %v6584_v57 = vld [vmem:[#allocation2 + $0x9b] sm:$0xff] }
 0x4b3   : > { %10716 = vmatmul.mubr.msk.bf16.gmra.mrb[8].mxu1 %vm17319_vm7, %v5377_v61  ;;  %vm17328_vm7 = vmmov %vm17291_vm1  ;;  %v5933_v61 = vld [vmem:[#allocation2 + $0x92] sm:$0xff] }
 0x4b4   : > { %10719 = vmatprep.mubr.msk.bf16.mxu1 %vm17320_vm12, %v5378_v3  ;;  %vm17329_vm12 = vmmov %vm17291_vm1  ;;  %v5934_v3 = vld [vmem:[#allocation2 + $0x9a] sm:$0xff] }
 0x4b5   : > { %v5960_v0 = vpack.c.bf16 %v5934_v3, %v5933_v61  ;;  %v6588_v61 = vld [vmem:[#allocation2 + $0xbb] sm:$0xff] }
 0x4bb   : > { %10720 = vmatmul.mubr.msk.bf16.gmra.mrb[12].mxu1 %vm17321_vm8, %v5379_v59  ;;  %vm17330_vm8 = vmmov %vm17291_vm1  ;;  %v5937_v59 = vld [vmem:[#allocation2 + $0xb2] sm:$0xff] }
 0x4bc   : > { %10723 = vmatprep.mubr.msk.bf16.mxu1 %vm17322_vm15, %v5380_v55  ;;  %vm17331_vm15 = vmmov %vm17291_vm1  ;;  %v5938_v55 = vld [vmem:[#allocation2 + $0xba] sm:$0xff] }
 0x4bd   : > { %v5962_v23 = vpack.c.bf16 %v5938_v55, %v5937_v59  ;;  %v6592_v59 = vld [vmem:[#allocation2 + $0xdb] sm:$0xff] }
 0x4c3   : > { %10724 = vmatmul.mubr.msk.bf16.gmra.mrb[16].mxu1 %vm17323_vm3, %v5381_v15  ;;  %vm17332_vm3 = vcmask 1041408   ;;  %v5941_v15 = vld [vmem:[#allocation2 + $0xd2] sm:$0xff] }
 0x4c4   : > { %10727 = vmatprep.mubr.msk.bf16.mxu1 %vm17324_vm9, %v5382_v38  ;;  %v6352_v63 = vsel %vm17332_vm3, %v15130_v20, 0  ;;  %vm17333_vm9 = vmmov %vm17291_vm1  ;;  %v5926_v20 = vld [vmem:[#allocation2 + $0x5a] sm:$0xff] }
 0x4c5   : > { %v5956_v22 = vpack.c.bf16 %v5926_v20, %v5925_v49  ;;  %v5942_v38 = vld [vmem:[#allocation2 + $0xda] sm:$0xff] }
 0x4c6   : > { %v5964_v36 = vpack.c.bf16 %v5942_v38, %v5941_v15  ;;  %v6580_v49 = vld [vmem:[#allocation2 + $0x7b] sm:$0xff] }
 0x4c7   : > { %v6596_v15 = vld [vmem:[#allocation2 + $0xfb] sm:$0xff] }
 0x4cb   : > { %10728 = vmatmul.mubr.msk.bf16.gmra.mrb[20].mxu1 %vm17325_vm13, %v5383_v62  ;;  %vm17334_vm13 = vmmov %vm17291_vm1  ;;  %v5945_v62 = vld [vmem:[#allocation2 + $0xf2] sm:$0xff] }
 0x4cc   : > { %10731 = vmatprep.mubr.msk.bf16.mxu1 %vm17326_vm10, %v5384_v40  ;;  %vm17335_vm10 = vmmov %vm17332_vm3  ;;  %v5946_v40 = vld [vmem:[#allocation2 + $0xfa] sm:$0xff] }
 0x4cd   : > { %vm17341_vm3 = vmmov %vm17291_vm1  ;;  %v5966_v13 = vpack.c.bf16 %v5946_v40, %v5945_v62  ;;  %v6600_v62 = vld [vmem:[#allocation2 + $0x11b] sm:$0xff] }
 0x4d3   : > { %10732 = vmatmul.mubr.msk.bf16.gmra.mrb[24].mxu1 %vm17327_vm11, %v5385_v6  ;;  %vm17336_vm11 = vmmov %vm17291_vm1  ;;  %v5949_v6 = vld [vmem:[#allocation2 + $0x112] sm:$0xff] }
 0x4d4   : > { %10735 = vmatprep.mubr.msk.bf16.mxu1 %vm17291_vm1, %v5386_v52  ;;  %v5950_v52 = vld [vmem:[#allocation2 + $0x11a] sm:$0xff] }
 0x4d5   : > { %v5968_v12 = vpack.c.bf16 %v5950_v52, %v5949_v6  ;;  %v6894_v6 = vld [vmem:[#allocation2 + $0x1c] sm:$0xff] }
 0x4db   : > { %10736 = vmatmul.mubr.msk.bf16.gmra.mrb[28].mxu1 %vm17328_vm7, %v5387_v43  ;;  %vm17337_vm7 = vmmov %vm17291_vm1  ;;  %v6276_v43 = vld [vmem:[#allocation2 + $0x12a] sm:$0xff] }
 0x4dc   : > { %10739 = vmatprep.mubr.msk.bf16.mxu1 %vm17329_vm12, %v5388_v26  ;;  %vm17338_vm12 = vmmov %vm17291_vm1  ;;  %v6567_v26 = vld [vmem:[#allocation2 + $0x13] sm:$0xff]  ;;  %v6294_v29 = vpack.c.bf16 %v6276_v43, %v6275_v44  ;;  %v6898_v43 = vld [vmem:[#allocation2 + $0x3c] sm:$0xff] }
 0x4dd   : > { %v6603_v10 = vpack.c.bf16 %v6568_v19, %v6567_v26  ;;  %v6897_v44 = vld [vmem:[#allocation2 + $0x34] sm:$0xff] }
 0x4e3   : > { %10740 = vmatmul.mubr.msk.bf16.gmra.mrb[32].mxu1 %vm17330_vm8, %v5389_v33  ;;  %vm17339_vm8 = vmmov %vm17291_vm1  ;;  %v6570_v33 = vld [vmem:[#allocation2 + $0x2b] sm:$0xff] }
 0x4e4   : > { %10745 = vmatprep.mubr.msk.bf16.mxu1 %vm17331_vm15, %v5951_v58  ;;  %vm17340_vm15 = vmmov %vm17291_vm1  ;;  %v6571_v58 = vld [vmem:[#allocation2 + $0x33] sm:$0xff]  ;;  %v6604_v31 = vpack.c.bf16 %v6570_v33, %v6569_v50  ;;  %v6899_v50 = vld [vmem:[#allocation2 + $0x44] sm:$0xff] }
 0x4e5   : > { %v6605_v21 = vpack.c.bf16 %v6572_v2, %v6571_v58  ;;  %v6900_v33 = vld [vmem:[#allocation2 + $0x4c] sm:$0xff]  ;;  %v6901_v58 = vld [vmem:[#allocation2 + $0x54] sm:$0xff]  ;;  %v6902_v2 = vld [vmem:[#allocation2 + $0x5c] sm:$0xff] }
 0x4eb   : > { %10746 = vmatmul.mubr.msk.bf16.vlgmr.msra.gmra.mrb[0].mxu1 %vm17333_vm9, %v15152_v9  ;;  %vm17342_vm9 = vmmov %vm17291_vm1 }
 0x4ec   : > { %10782 = vmatpush3.bf16.msra.mxu1 %v6352_v63  ;;  %10749 = vmatprep.mubr.msk.bf16.mxu1 %vm17334_vm13, %v15156_v34  ;;  %vm17343_vm13 = vmmov %vm17291_vm1  ;;  %v6573_v63 = vld [vmem:[#allocation2 + $0x43] sm:$0xff] }
 0x4ed   : > { %11598 = vmatprep.subr.msk.bf16.mxu1 %vm17335_vm10, %v15161_v28  ;;  %vm17344_vm10 = vmmov %vm17291_vm1 }
 0x4f3   : > { %10750 = vmatmul.mubr.msk.bf16.gmra.mrb[4].mxu1 %vm17336_vm11, %v5954_v51  ;;  %vm17345_vm11 = vmmov %vm17291_vm1 }
 0x4f4   : > { %10753 = vmatprep.mubr.msk.bf16.mxu1 %vm17291_vm1, %v5955_v7 }
 0x4fb   : > { %10754 = vmatmul.mubr.msk.bf16.gmra.mrb[8].mxu1 %vm17337_vm7, %v5956_v22  ;;  %vm17346_vm7 = vmmov %vm17291_vm1 }
 0x4fc   : > { %10757 = vmatprep.mubr.msk.bf16.mxu1 %vm17338_vm12, %v5957_v14  ;;  %vm17347_vm12 = vmmov %vm17291_vm1 }
 0x503   : > { %10758 = vmatmul.mubr.msk.bf16.gmra.mrb[12].mxu1 %vm17339_vm8, %v5958_v37  ;;  %vm17348_vm8 = vmmov %vm17291_vm1 }
 0x504   : > { %10761 = vmatprep.mubr.msk.bf16.mxu1 %vm17340_vm15, %v5959_v8  ;;  %vm17349_vm15 = vmmov %vm17291_vm1 }
 0x50b   : > { %10762 = vmatmul.mubr.msk.bf16.gmra.mrb[16].mxu1 %vm17341_vm3, %v5960_v0  ;;  %vm17350_vm3 = vcmask 1041408  }
 0x50c   : > { %10765 = vmatprep.mubr.msk.bf16.mxu1 %vm17342_vm9, %v5961_v24  ;;  %v6678_v30 = vsel %vm17350_vm3, %v15161_v28, 0  ;;  %vm17351_vm9 = vmmov %vm17291_vm1  ;;  %v6575_v28 = vld [vmem:[#allocation2 + $0x53] sm:$0xff] }
 0x50d   : > { %v6607_v60 = vpack.c.bf16 %v6576_v1, %v6575_v28 }
 0x513   : > { %10766 = vmatmul.mubr.msk.bf16.gmra.mrb[20].mxu1 %vm17343_vm13, %v5962_v23  ;;  %vm17352_vm13 = vmmov %vm17291_vm1 }
 0x514   : > { %10769 = vmatprep.mubr.msk.bf16.mxu1 %vm17344_vm10, %v5963_v25  ;;  %vm17353_vm10 = vmmov %vm17350_vm3 }
 0x515   : > { %vm17359_vm3 = vmmov %vm17291_vm1 }
 0x51b   : > { %10770 = vmatmul.mubr.msk.bf16.gmra.mrb[24].mxu1 %vm17345_vm11, %v5964_v36  ;;  %vm17354_vm11 = vmmov %vm17291_vm1 }
 0x51c   : > { %10773 = vmatprep.mubr.msk.bf16.mxu1 %vm17291_vm1, %v5965_v41 }
 0x523   : > { %10774 = vmatmul.mubr.msk.bf16.gmra.mrb[28].mxu1 %vm17346_vm7, %v5966_v13  ;;  %vm17355_vm7 = vmmov %vm17291_vm1 }
 0x524   : > { %10777 = vmatprep.mubr.msk.bf16.mxu1 %vm17347_vm12, %v5967_v42  ;;  %vm17356_vm12 = vmmov %vm17291_vm1 }
 0x52b   : > { %10778 = vmatmul.mubr.msk.bf16.gmra.mrb[32].mxu1 %vm17348_vm8, %v5968_v12  ;;  %vm17357_vm8 = vmmov %vm17291_vm1 }
 0x52c   : > { %10783 = vmatprep.mubr.msk.bf16.mxu1 %vm17349_vm15, %v15152_v9  ;;  %vm17358_vm15 = vmmov %vm17291_vm1  ;;  %v15215_v9 = vld [vmem:[%s16330_s2 + $0xc] sm:$0x3] }
 0x533   : > { %10784 = vmatmul.mubr.msk.bf16.vlgmr.msra.gmra.mrb[0].mxu1 %vm17351_vm9, %v15156_v34  ;;  %vm17360_vm9 = vmmov %vm17291_vm1  ;;  %v6574_v34 = vld [vmem:[#allocation2 + $0x4b] sm:$0xff] }
 0x534   : > { %10820 = vmatpush3.bf16.msra.mxu1 %v6678_v30  ;;  %10787 = vmatprep.mubr.msk.bf16.mxu1 %vm17352_vm13, %v5954_v51  ;;  %vm17362_vm13 = vmmov %vm17291_vm1  ;;  %v6606_v17 = vpack.c.bf16 %v6574_v34, %v6573_v63  ;;  %v6578_v51 = vld [vmem:[#allocation2 + $0x6b] sm:$0xff]  ;;  %v6905_v63 = vld [vmem:[#allocation2 + $0x74] sm:$0xff] }
 0x535   : > { %11599 = vmatprep.subr.msk.bf16.mxu1 %vm17353_vm10, %v9745_v5  ;;  %vm17363_vm10 = vmmov %vm17291_vm1  ;;  %v6608_v20 = vpack.c.bf16 %v6578_v51, %v6577_v46  ;;  %v6895_v30 = vld [vmem:[#allocation2 + $0x24] sm:$0xff]  ;;  %v6906_v34 = vld [vmem:[#allocation2 + $0x7c] sm:$0xff] }
 0x536   : > { %v6935_v1 = vpack.c.bf16 %v6906_v34, %v6905_v63  ;;  %v6909_v46 = vld [vmem:[#allocation2 + $0x94] sm:$0xff]  ;;  %v6910_v51 = vld [vmem:[#allocation2 + $0x9c] sm:$0xff] }
 0x537   : > { %v7559_v63 = vld [vmem:[#allocation2 + $0x95] sm:$0xff]  ;;  %v7560_v34 = vld [vmem:[#allocation2 + $0x9d] sm:$0xff] }
 0x53b   : > { %10788 = vmatmul.mubr.msk.bf16.gmra.mrb[4].mxu1 %vm17354_vm11, %v5955_v7  ;;  %vm17364_vm11 = vmmov %vm17291_vm1  ;;  %v6579_v7 = vld [vmem:[#allocation2 + $0x73] sm:$0xff] }
 0x53c   : > { %10791 = vmatprep.mubr.msk.bf16.mxu1 %vm17291_vm1, %v5956_v22  ;;  %v6609_v4 = vpack.c.bf16 %v6580_v49, %v6579_v7  ;;  %v6582_v22 = vld [vmem:[#allocation2 + $0x8b] sm:$0xff]  ;;  %v6937_v49 = vpack.c.bf16 %v6910_v51, %v6909_v46  ;;  %v7563_v46 = vld [vmem:[#allocation2 + $0xb5] sm:$0xff]  ;;  %v7564_v51 = vld [vmem:[#allocation2 + $0xbd] sm:$0xff] }
 0x53d   : > { %v6610_v27 = vpack.c.bf16 %v6582_v22, %v6581_v56  ;;  %v6913_v56 = vld [vmem:[#allocation2 + $0xb4] sm:$0xff]  ;;  %v6914_v22 = vld [vmem:[#allocation2 + $0xbc] sm:$0xff] }
 0x543   : > { %10792 = vmatmul.mubr.msk.bf16.gmra.mrb[8].mxu1 %vm17355_vm7, %v5957_v14  ;;  %vm17365_vm7 = vmmov %vm17291_vm1  ;;  %v6583_v14 = vld [vmem:[#allocation2 + $0x93] sm:$0xff] }
 0x544   : > { %10795 = vmatprep.mubr.msk.bf16.mxu1 %vm17356_vm12, %v5958_v37  ;;  %vm17366_vm12 = vmmov %vm17291_vm1  ;;  %v6611_v47 = vpack.c.bf16 %v6584_v57, %v6583_v14  ;;  %v6586_v37 = vld [vmem:[#allocation2 + $0xab] sm:$0xff]  ;;  %v6939_v57 = vpack.c.bf16 %v6914_v22, %v6913_v56  ;;  %v7567_v56 = vld [vmem:[#allocation2 + $0xd5] sm:$0xff] }
 0x545   : > { %v6612_v3 = vpack.c.bf16 %v6586_v37, %v6585_v54  ;;  %v6917_v54 = vld [vmem:[#allocation2 + $0xd4] sm:$0xff]  ;;  %v6918_v37 = vld [vmem:[#allocation2 + $0xdc] sm:$0xff] }
 0x546   : > { %v7568_v22 = vld [vmem:[#allocation2 + $0xdd] sm:$0xff] }
 0x54b   : > { %10796 = vmatmul.mubr.msk.bf16.gmra.mrb[12].mxu1 %vm17357_vm8, %v5959_v8  ;;  %vm17367_vm8 = vmmov %vm17291_vm1  ;;  %v6587_v8 = vld [vmem:[#allocation2 + $0xb3] sm:$0xff] }
 0x54c   : > { %10799 = vmatprep.mubr.msk.bf16.mxu1 %vm17358_vm15, %v5960_v0  ;;  %vm17369_vm15 = vmmov %vm17291_vm1  ;;  %v6613_v32 = vpack.c.bf16 %v6588_v61, %v6587_v8  ;;  %v6590_v0 = vld [vmem:[#allocation2 + $0xcb] sm:$0xff]  ;;  %v6941_v61 = vpack.c.bf16 %v6918_v37, %v6917_v54  ;;  %v7571_v54 = vld [vmem:[#allocation2 + $0xf5] sm:$0xff] }
 0x54d   : > { %v6614_v55 = vpack.c.bf16 %v6590_v0, %v6589_v48  ;;  %v6921_v48 = vld [vmem:[#allocation2 + $0xf4] sm:$0xff]  ;;  %v6922_v0 = vld [vmem:[#allocation2 + $0xfc] sm:$0xff] }
 0x54e   : > { %v7572_v37 = vld [vmem:[#allocation2 + $0xfd] sm:$0xff] }
 0x553   : > { %10800 = vmatmul.mubr.msk.bf16.gmra.mrb[16].mxu1 %vm17359_vm3, %v5961_v24  ;;  %vm17370_vm3 = vmmov %vm17291_vm1  ;;  %v6591_v24 = vld [vmem:[#allocation2 + $0xd3] sm:$0xff] }
 0x554   : > { %10803 = vmatprep.mubr.msk.bf16.mxu1 %vm17360_vm9, %v5962_v23  ;;  %v6615_v11 = vpack.c.bf16 %v6592_v59, %v6591_v24  ;;  %v6594_v23 = vld [vmem:[#allocation2 + $0xeb] sm:$0xff]  ;;  %v6943_v59 = vpack.c.bf16 %v6922_v0, %v6921_v48  ;;  %v7575_v48 = vld [vmem:[#allocation2 + $0x115] sm:$0xff]  ;;  %v7576_v0 = vld [vmem:[#allocation2 + $0x11d] sm:$0xff] }
 0x555   : > { %v6616_v38 = vpack.c.bf16 %v6594_v23, %v6593_v39  ;;  %v6925_v39 = vld [vmem:[#allocation2 + $0x114] sm:$0xff]  ;;  %v6926_v23 = vld [vmem:[#allocation2 + $0x11c] sm:$0xff] }
 0x55b   : > { %10804 = vmatmul.mubr.msk.bf16.gmra.mrb[20].mxu1 %vm17361_vm4, %v5963_v25  ;;  %vm17368_vm4 = vcmask 1041408   ;;  %v6595_v25 = vld [vmem:[#allocation2 + $0xf3] sm:$0xff] }
 0x55c   : > { %10807 = vmatprep.mubr.msk.bf16.mxu1 %vm17362_vm13, %v5964_v36  ;;  %v7004_v35 = vsel %vm17368_vm4, %v9745_v5, 0  ;;  %vm17371_vm9 = vmmov %vm17368_vm4  ;;  %v6617_v18 = vpack.c.bf16 %v6596_v15, %v6595_v25  ;;  %v6598_v36 = vld [vmem:[#allocation2 + $0x10b] sm:$0xff]  ;;  %v6945_v15 = vpack.c.bf16 %v6926_v23, %v6925_v39  ;;  %v7579_v39 = vld [vmem:[#allocation2 + $0x135] sm:$0xff] }
 0x55d   : > { %vm17372_vm13 = vmmov %vm17291_vm1  ;;  %v6618_v40 = vpack.c.bf16 %v6598_v36, %v6597_v53  ;;  %v6896_v5 = vld [vmem:[#allocation2 + $0x2c] sm:$0xff]  ;;  %v7580_v23 = vld [vmem:[#allocation2 + $0x13d] sm:$0xff] }
 0x55e   : > { %vm17378_vm4 = vmmov %vm17291_vm1  ;;  %v15237_v26 = vpack.c.bf16 %v6896_v5, %v6895_v30  ;;  %v7550_v30 = vld [vmem:[#allocation2 + $0x4d] sm:$0xff] }
 0x563   : > { %10808 = vmatmul.mubr.msk.bf16.gmra.mrb[24].mxu1 %vm17363_vm10, %v5965_v41  ;;  %vm17373_vm10 = vmmov %vm17291_vm1  ;;  %v6599_v41 = vld [vmem:[#allocation2 + $0x113] sm:$0xff] }
 0x564   : > { %10811 = vmatprep.mubr.msk.bf16.mxu1 %vm17364_vm11, %v5966_v13  ;;  %vm17374_vm11 = vmmov %vm17291_vm1  ;;  %v6619_v45 = vpack.c.bf16 %v6600_v62, %v6599_v41  ;;  %v6602_v13 = vld [vmem:[#allocation2 + $0x12b] sm:$0xff]  ;;  %v7253_v62 = vld [vmem:[#allocation2 + $0x134] sm:$0xff] }
 0x565   : > { %v6620_v52 = vpack.c.bf16 %v6602_v13, %v6601_v16  ;;  %v9802_v41 = vld [vmem:[%s16330_s2 + $0x10] sm:$0x3] }
 0x566   : > { %v7546_v16 = vld [vmem:[#allocation2 + $0x2d] sm:$0xff] }
 0x56b   : > { %10812 = vmatmul.mubr.msk.bf16.gmra.mrb[28].mxu1 %vm17291_vm1, %v5967_v42  ;;  %v6893_v42 = vld [vmem:[#allocation2 + $0x14] sm:$0xff] }
 0x56c   : > { %10815 = vmatprep.mubr.msk.bf16.mxu1 %vm17365_vm7, %v5968_v12  ;;  %vm17375_vm7 = vmmov %vm17291_vm1  ;;  %v6929_v12 = vpack.c.bf16 %v6894_v6, %v6893_v42  ;;  %v7547_v6 = vld [vmem:[#allocation2 + $0x35] sm:$0xff] }
 0x573   : > { %10816 = vmatmul.mubr.msk.bf16.gmra.mrb[32].mxu1 %vm17366_vm12, %v6294_v29  ;;  %vm17376_vm12 = vmmov %vm17291_vm1  ;;  %v15241_v29 = vpack.c.bf16 %v6898_v43, %v6897_v44 }
 0x574   : > { %10821 = vmatprep.mubr.msk.bf16.mxu1 %vm17367_vm8, %v6603_v10  ;;  %vm17377_vm8 = vmmov %vm17291_vm1  ;;  %v15246_v10 = vld [vmem:[%s16330_s2 + $0xe] sm:$0x3] }
 0x57b   : > { %10822 = vmatmul.mubr.msk.bf16.vlgmr.msra.gmra.mrb[0].mxu1 %vm17369_vm15, %v6604_v31  ;;  %vm17379_vm15 = vmmov %vm17291_vm1  ;;  %v6932_v31 = vpack.c.bf16 %v6900_v33, %v6899_v50 }
 0x57c   : > { %10858 = vmatpush3.bf16.msra.mxu1 %v7004_v35  ;;  %10825 = vmatprep.mubr.msk.bf16.mxu1 %vm17370_vm3, %v6605_v21  ;;  %vm17380_vm3 = vmmov %vm17291_vm1  ;;  %v6933_v35 = vpack.c.bf16 %v6902_v2, %v6901_v58  ;;  %v6903_v21 = vld [vmem:[#allocation2 + $0x64] sm:$0xff]  ;;  %v7555_v58 = vld [vmem:[#allocation2 + $0x75] sm:$0xff] }
 0x57d   : > { %11600 = vmatprep.subr.msk.bf16.mxu1 %vm17371_vm9, %v15215_v9  ;;  %vm17381_vm9 = vmmov %vm17291_vm1  ;;  %v7556_v2 = vld [vmem:[#allocation2 + $0x7d] sm:$0xff] }
 0x583   : > { %10826 = vmatmul.mubr.msk.bf16.gmra.mrb[4].mxu1 %vm17372_vm13, %v6606_v17  ;;  %vm17382_vm13 = vmmov %vm17291_vm1  ;;  %v6907_v17 = vld [vmem:[#allocation2 + $0x84] sm:$0xff] }
 0x584   : > { %10829 = vmatprep.mubr.msk.bf16.mxu1 %vm17373_vm10, %v6607_v60  ;;  %vm17383_vm10 = vmmov %vm17291_vm1  ;;  %v6908_v60 = vld [vmem:[#allocation2 + $0x8c] sm:$0xff] }
 0x585   : > { %v6936_v7 = vpack.c.bf16 %v6908_v60, %v6907_v17  ;;  %v7588_v17 = vpack.c.bf16 %v7560_v34, %v7559_v63 }
 0x58b   : > { %10830 = vmatmul.mubr.msk.bf16.gmra.mrb[8].mxu1 %vm17374_vm11, %v6608_v20  ;;  %vm17384_vm11 = vmmov %vm17291_vm1  ;;  %v6911_v20 = vld [vmem:[#allocation2 + $0xa4] sm:$0xff] }
 0x58c   : > { %10833 = vmatprep.mubr.msk.bf16.mxu1 %vm17291_vm1, %v6609_v4  ;;  %v6912_v4 = vld [vmem:[#allocation2 + $0xac] sm:$0xff] }
 0x58d   : > { %v6938_v14 = vpack.c.bf16 %v6912_v4, %v6911_v20  ;;  %v7590_v20 = vpack.c.bf16 %v7564_v51, %v7563_v46 }
 0x593   : > { %10834 = vmatmul.mubr.msk.bf16.gmra.mrb[12].mxu1 %vm17375_vm7, %v6610_v27  ;;  %vm17385_vm7 = vmmov %vm17291_vm1  ;;  %v6915_v27 = vld [vmem:[#allocation2 + $0xc4] sm:$0xff] }
 0x594   : > { %10837 = vmatprep.mubr.msk.bf16.mxu1 %vm17376_vm12, %v6611_v47  ;;  %vm17386_vm12 = vcmask 1041408   ;;  %v6916_v47 = vld [vmem:[#allocation2 + $0xcc] sm:$0xff] }
 0x595   : > { %v7330_v19 = vsel %vm17386_vm12, %v15215_v9, 0  ;;  %v6904_v9 = vld [vmem:[#allocation2 + $0x6c] sm:$0xff]  ;;  %v6940_v8 = vpack.c.bf16 %v6916_v47, %v6915_v27  ;;  %v7592_v27 = vpack.c.bf16 %v7568_v22, %v7567_v56 }
 0x596   : > { %v6934_v28 = vpack.c.bf16 %v6904_v9, %v6903_v21  ;;  %v7586_v21 = vpack.c.bf16 %v7556_v2, %v7555_v58 }
 0x59b   : > { %10838 = vmatmul.mubr.msk.bf16.gmra.mrb[16].mxu1 %vm17377_vm8, %v6612_v3  ;;  %vm17387_vm8 = vmmov %vm17291_vm1  ;;  %v6919_v3 = vld [vmem:[#allocation2 + $0xe4] sm:$0xff] }
 0x59c   : > { %10841 = vmatprep.mubr.msk.bf16.mxu1 %vm17378_vm4, %v6613_v32  ;;  %vm17388_vm4 = vmmov %vm17291_vm1  ;;  %v6920_v32 = vld [vmem:[#allocation2 + $0xec] sm:$0xff] }
 0x59d   : > { %v6942_v24 = vpack.c.bf16 %v6920_v32, %v6919_v3  ;;  %v7594_v3 = vpack.c.bf16 %v7572_v37, %v7571_v54  ;;  %v7903_v54 = vld [vmem:[#allocation2 + $0x126] sm:$0xff] }
 0x5a3   : > { %10842 = vmatmul.mubr.msk.bf16.gmra.mrb[20].mxu1 %vm17379_vm15, %v6614_v55  ;;  %vm17389_vm15 = vmmov %vm17386_vm12  ;;  %v6923_v55 = vld [vmem:[#allocation2 + $0x104] sm:$0xff] }
 0x5a4   : > { %10845 = vmatprep.mubr.msk.bf16.mxu1 %vm17380_vm3, %v6615_v11  ;;  %vm17390_vm3 = vmmov %vm17291_vm1  ;;  %v6924_v11 = vld [vmem:[#allocation2 + $0x10c] sm:$0xff] }
 0x5a5   : > { %vm17396_vm12 = vmmov %vm17291_vm1  ;;  %v6944_v25 = vpack.c.bf16 %v6924_v11, %v6923_v55  ;;  %v7577_v55 = vld [vmem:[#allocation2 + $0x125] sm:$0xff] }
 0x5ab   : > { %10846 = vmatmul.mubr.msk.bf16.gmra.mrb[24].mxu1 %vm17381_vm9, %v6616_v38  ;;  %vm17391_vm9 = vmmov %vm17291_vm1  ;;  %v6928_v38 = vld [vmem:[#allocation2 + $0x12c] sm:$0xff] }
 0x5ac   : > { %10849 = vmatprep.mubr.msk.bf16.mxu1 %vm17382_vm13, %v6617_v18  ;;  %vm17392_vm13 = vmmov %vm17291_vm1  ;;  %v6927_v18 = vld [vmem:[#allocation2 + $0x124] sm:$0xff] }
 0x5ad   : > { %v6946_v53 = vpack.c.bf16 %v6928_v38, %v6927_v18  ;;  %v7598_v38 = vpack.c.bf16 %v7580_v23, %v7579_v39 }
 0x5b3   : > { %10850 = vmatmul.mubr.msk.bf16.gmra.mrb[28].mxu1 %vm17383_vm10, %v6618_v40  ;;  %vm17393_vm10 = vmmov %vm17291_vm1  ;;  %v7254_v40 = vld [vmem:[#allocation2 + $0x13c] sm:$0xff] }
 0x5b4   : > { %10853 = vmatprep.mubr.msk.bf16.mxu1 %vm17384_vm11, %v6619_v45  ;;  %vm17394_vm11 = vmmov %vm17291_vm1  ;;  %v7545_v45 = vld [vmem:[#allocation2 + $0x25] sm:$0xff]  ;;  %v7272_v13 = vpack.c.bf16 %v7254_v40, %v7253_v62  ;;  %v7876_v62 = vld [vmem:[#allocation2 + $0x4e] sm:$0xff] }
 0x5b5   : > { %v7581_v42 = vpack.c.bf16 %v7546_v16, %v7545_v45  ;;  %v7877_v16 = vld [vmem:[#allocation2 + $0x56] sm:$0xff] }
 0x5bb   : > { %10854 = vmatmul.mubr.msk.bf16.gmra.mrb[32].mxu1 %vm17291_vm1, %v6620_v52  ;;  %v7548_v52 = vld [vmem:[#allocation2 + $0x3d] sm:$0xff] }
 0x5bc   : > { %10859 = vmatprep.mubr.msk.bf16.mxu1 %vm17385_vm7, %v6929_v12  ;;  %vm17395_vm7 = vmmov %vm17291_vm1  ;;  %v7549_v12 = vld [vmem:[#allocation2 + $0x45] sm:$0xff]  ;;  %v7582_v5 = vpack.c.bf16 %v7548_v52, %v7547_v6  ;;  %v7880_v6 = vld [vmem:[#allocation2 + $0x6e] sm:$0xff] }
 0x5bd   : > { %v7583_v43 = vpack.c.bf16 %v7550_v30, %v7549_v12  ;;  %v7881_v30 = vld [vmem:[#allocation2 + $0x76] sm:$0xff] }
 0x5c3   : > { %10860 = vmatmul.mubr.msk.bf16.vlgmr.msra.gmra.mrb[0].mxu1 %vm17387_vm8, %v15237_v26  ;;  %vm17397_vm8 = vmmov %vm17291_vm1 }
 0x5c4   : > { %10896 = vmatpush3.bf16.msra.mxu1 %v7330_v19  ;;  %10863 = vmatprep.mubr.msk.bf16.mxu1 %vm17388_vm4, %v15241_v29  ;;  %vm17398_vm4 = vmmov %vm17291_vm1  ;;  %v7552_v19 = vld [vmem:[#allocation2 + $0x5d] sm:$0xff] }
 0x5c5   : > { %11601 = vmatprep.subr.msk.bf16.mxu1 %vm17389_vm15, %v15246_v10  ;;  %vm17399_vm15 = vmmov %vm17291_vm1 }
 0x5cb   : > { %10864 = vmatmul.mubr.msk.bf16.gmra.mrb[4].mxu1 %vm17390_vm3, %v6932_v31  ;;  %vm17400_vm3 = vmmov %vm17291_vm1 }
 0x5cc   : > { %10867 = vmatprep.mubr.msk.bf16.mxu1 %vm17391_vm9, %v6933_v35  ;;  %vm17401_vm9 = vmmov %vm17291_vm1 }
 0x5d3   : > { %10868 = vmatmul.mubr.msk.bf16.gmra.mrb[8].mxu1 %vm17392_vm13, %v6934_v28  ;;  %vm17402_vm13 = vmmov %vm17291_vm1 }
 0x5d4   : > { %10871 = vmatprep.mubr.msk.bf16.mxu1 %vm17393_vm10, %v6935_v1  ;;  %vm17403_vm10 = vmmov %vm17291_vm1 }
 0x5db   : > { %10872 = vmatmul.mubr.msk.bf16.gmra.mrb[12].mxu1 %vm17394_vm11, %v6936_v7  ;;  %vm17404_vm11 = vmmov %vm17291_vm1 }
 0x5dc   : > { %10875 = vmatprep.mubr.msk.bf16.mxu1 %vm17291_vm1, %v6937_v49  ;;  %vm17405_vm1 = vcmask 1041408  }
 0x5dd   : > { %v7656_v36 = vsel %vm17405_vm1, %v15246_v10, 0  ;;  %v7554_v10 = vld [vmem:[#allocation2 + $0x6d] sm:$0xff] }
 0x5e3   : > { %10876 = vmatmul.mubr.msk.bf16.gmra.mrb[16].mxu1 %vm17395_vm7, %v6938_v14  ;;  %vm17406_vm7 = vmmov %vm17400_vm3 }
 0x5e4   : > { %10879 = vmatprep.mubr.msk.bf16.mxu1 %vm17396_vm12, %v6939_v57  ;;  %vm17407_vm12 = vmmov %vm17400_vm3 }
 0x5eb   : > { %10880 = vmatmul.mubr.msk.bf16.gmra.mrb[20].mxu1 %vm17397_vm8, %v6940_v8  ;;  %vm17408_vm8 = vmmov %vm17405_vm1 }
 0x5ec   : > { %10883 = vmatprep.mubr.msk.bf16.mxu1 %vm17398_vm4, %v6941_v61  ;;  %vm17409_vm4 = vmmov %vm17400_vm3 }
 0x5ed   : > { %vm17415_vm1 = vmmov %vm17400_vm3 }
 0x5f3   : > { %10884 = vmatmul.mubr.msk.bf16.gmra.mrb[24].mxu1 %vm17399_vm15, %v6942_v24  ;;  %vm17410_vm15 = vmmov %vm17400_vm3 }
 0x5f4   : > { %10887 = vmatprep.mubr.msk.bf16.mxu1 %vm17400_vm3, %v6943_v59 }
 0x5fb   : > { %10888 = vmatmul.mubr.msk.bf16.gmra.mrb[28].mxu1 %vm17401_vm9, %v6944_v25  ;;  %vm17411_vm9 = vmmov %vm17400_vm3 }
 0x5fc   : > { %10891 = vmatprep.mubr.msk.bf16.mxu1 %vm17402_vm13, %v6945_v15  ;;  %vm17412_vm13 = vmmov %vm17400_vm3 }
 0x603   : > { %10892 = vmatmul.mubr.msk.bf16.gmra.mrb[32].mxu1 %vm17403_vm10, %v6946_v53  ;;  %vm17413_vm10 = vmmov %vm17400_vm3 }
 0x604   : > { %10897 = vmatprep.mubr.msk.bf16.mxu1 %vm17404_vm11, %v15237_v26  ;;  %vm17414_vm11 = vmmov %vm17400_vm3  ;;  %v7551_v26 = vld [vmem:[#allocation2 + $0x55] sm:$0xff] }
 0x605   : > { %v7584_v50 = vpack.c.bf16 %v7552_v19, %v7551_v26 }
 0x60b   : > { %10898 = vmatmul.mubr.msk.bf16.vlgmr.msra.gmra.mrb[0].mxu1 %vm17406_vm7, %v15241_v29  ;;  %vm17416_vm7 = vmmov %vm17415_vm1  ;;  %v7553_v29 = vld [vmem:[#allocation2 + $0x65] sm:$0xff] }
 0x60c   : > { %10934 = vmatpush3.bf16.msra.mxu1 %v7656_v36  ;;  %10901 = vmatprep.mubr.msk.bf16.mxu1 %vm17407_vm12, %v6932_v31  ;;  %vm17417_vm12 = vmmov %vm17415_vm1  ;;  %v7585_v33 = vpack.c.bf16 %v7554_v10, %v7553_v29  ;;  %v7557_v31 = vld [vmem:[#allocation2 + $0x85] sm:$0xff]  ;;  %v7885_v29 = vld [vmem:[#allocation2 + $0x96] sm:$0xff] }
 0x60d   : > { %11602 = vmatprep.subr.msk.bf16.mxu1 %vm17408_vm8, %v9802_v41  ;;  %vm17418_vm8 = vmmov %vm17415_vm1  ;;  %v7874_v36 = vld [vmem:[#allocation2 + $0x3e] sm:$0xff] }
 0x60e   : > { %v7886_v10 = vld [vmem:[#allocation2 + $0x9e] sm:$0xff] }
 0x60f   : > { %v7914_v58 = vpack.c.bf16 %v7886_v10, %v7885_v29 }
 0x613   : > { %10902 = vmatmul.mubr.msk.bf16.gmra.mrb[4].mxu1 %vm17409_vm4, %v6933_v35  ;;  %vm17419_vm4 = vmmov %vm17415_vm1  ;;  %v7558_v35 = vld [vmem:[#allocation2 + $0x8d] sm:$0xff] }
 0x614   : > { %10905 = vmatprep.mubr.msk.bf16.mxu1 %vm17410_vm15, %v6934_v28  ;;  %vm17420_vm15 = vmmov %vm17415_vm1  ;;  %v7587_v9 = vpack.c.bf16 %v7558_v35, %v7557_v31  ;;  %v7561_v28 = vld [vmem:[#allocation2 + $0xa5] sm:$0xff]  ;;  %v7889_v31 = vld [vmem:[#allocation2 + $0xb6] sm:$0xff] }
 0x615   : > { %v7890_v35 = vld [vmem:[#allocation2 + $0xbe] sm:$0xff] }
 0x616   : > { %v7916_v63 = vpack.c.bf16 %v7890_v35, %v7889_v31  ;;  %v17468_v35 = vld [vmem:[#allocation37_spill] sm:$0xff] }
 0x61b   : > { %10906 = vmatmul.mubr.msk.bf16.gmra.mrb[8].mxu1 %vm17400_vm3, %v6935_v1  ;;  %vm17421_vm3 = vmmov %vm17415_vm1  ;;  %v7562_v1 = vld [vmem:[#allocation2 + $0xad] sm:$0xff] }
 0x61c   : > { %10909 = vmatprep.mubr.msk.bf16.mxu1 %vm17411_vm9, %v6936_v7  ;;  %vm17422_vm9 = vmmov %vm17415_vm1  ;;  %v7589_v60 = vpack.c.bf16 %v7562_v1, %v7561_v28  ;;  %v7565_v7 = vld [vmem:[#allocation2 + $0xc5] sm:$0xff]  ;;  %v7893_v28 = vld [vmem:[#allocation2 + $0xd6] sm:$0xff] }
 0x61d   : > { %v7894_v1 = vld [vmem:[#allocation2 + $0xde] sm:$0xff] }
 0x61e   : > { %v7918_v46 = vpack.c.bf16 %v7894_v1, %v7893_v28 }
 0x623   : > { %10910 = vmatmul.mubr.msk.bf16.gmra.mrb[12].mxu1 %vm17412_vm13, %v6937_v49  ;;  %vm17423_vm13 = vmmov %vm17415_vm1  ;;  %v7566_v49 = vld [vmem:[#allocation2 + $0xcd] sm:$0xff] }
 0x624   : > { %10913 = vmatprep.mubr.msk.bf16.mxu1 %vm17413_vm10, %v6938_v14  ;;  %vm17424_vm10 = vcmask 1041408   ;;  %v7591_v4 = vpack.c.bf16 %v7566_v49, %v7565_v7  ;;  %v7569_v14 = vld [vmem:[#allocation2 + $0xe5] sm:$0xff]  ;;  %v7897_v7 = vld [vmem:[#allocation2 + $0xf6] sm:$0xff] }
 0x625   : > { %v7982_v44 = vsel %vm17424_vm10, %v9802_v41, 0  ;;  %vm17434_vm10 = vmmov %vm17415_vm1  ;;  %v7875_v41 = vld [vmem:[#allocation2 + $0x46] sm:$0xff]  ;;  %v7898_v49 = vld [vmem:[#allocation2 + $0xfe] sm:$0xff] }
 0x626   : > { %v7909_v45 = vpack.c.bf16 %v7876_v62, %v7875_v41  ;;  %v7920_v56 = vpack.c.bf16 %v7898_v49, %v7897_v7  ;;  %v17459_v62 = vld [vmem:[#allocation35_spill] sm:$0xff] }
 0x62b   : > { %10914 = vmatmul.mubr.msk.bf16.gmra.mrb[16].mxu1 %vm17414_vm11, %v6939_v57  ;;  %vm17425_vm11 = vmmov %vm17415_vm1  ;;  %v7570_v57 = vld [vmem:[#allocation2 + $0xed] sm:$0xff] }
 0x62c   : > { %10917 = vmatprep.mubr.msk.bf16.mxu1 %vm17415_vm1, %v6940_v8  ;;  %v7593_v47 = vpack.c.bf16 %v7570_v57, %v7569_v14  ;;  %v7573_v8 = vld [vmem:[#allocation2 + $0x105] sm:$0xff]  ;;  %v7901_v14 = vld [vmem:[#allocation2 + $0x116] sm:$0xff] }
 0x62d   : > { %v7902_v57 = vld [vmem:[#allocation2 + $0x11e] sm:$0xff] }
 0x633   : > { %10918 = vmatmul.mubr.msk.bf16.gmra.mrb[20].mxu1 %vm17416_vm7, %v6941_v61  ;;  %vm17426_vm7 = vmmov %vm17415_vm1  ;;  %v7574_v61 = vld [vmem:[#allocation2 + $0x10d] sm:$0xff] }
 0x634   : > { %10921 = vmatprep.mubr.msk.bf16.mxu1 %vm17417_vm12, %v6942_v24  ;;  %vm17427_vm12 = vmmov %vm17415_vm1  ;;  %v7595_v32 = vpack.c.bf16 %v7574_v61, %v7573_v8  ;;  %v7578_v24 = vld [vmem:[#allocation2 + $0x12d] sm:$0xff]  ;;  %v7905_v8 = vld [vmem:[#allocation2 + $0x136] sm:$0xff] }
 0x635   : > { %v7597_v11 = vpack.c.bf16 %v7578_v24, %v7577_v55  ;;  %v7906_v61 = vld [vmem:[#allocation2 + $0x13e] sm:$0xff] }
 0x63b   : > { %10922 = vmatmul.mubr.msk.bf16.gmra.mrb[24].mxu1 %vm17418_vm8, %v6943_v59  ;;  %vm17428_vm8 = vmmov %vm17415_vm1  ;;  %v7596_v59 = vpack.c.bf16 %v7576_v0, %v7575_v48 }
 0x63c   : > { %10925 = vmatprep.mubr.msk.bf16.mxu1 %vm17419_vm4, %v6944_v25  ;;  %vm17429_vm4 = vmmov %vm17415_vm1  ;;  %v7871_v25 = vld [vmem:[#allocation2 + $0x26] sm:$0xff] }
 0x643   : > { %10926 = vmatmul.mubr.msk.bf16.gmra.mrb[28].mxu1 %vm17420_vm15, %v6945_v15  ;;  %vm17430_vm15 = vmmov %vm17415_vm1  ;;  %v7872_v15 = vld [vmem:[#allocation2 + $0x2e] sm:$0xff] }
 0x644   : > { %10929 = vmatprep.mubr.msk.bf16.mxu1 %vm17421_vm3, %v6946_v53  ;;  %vm17431_vm3 = vmmov %vm17415_vm1  ;;  %v7907_v18 = vpack.c.bf16 %v7872_v15, %v7871_v25  ;;  %v7873_v53 = vld [vmem:[#allocation2 + $0x36] sm:$0xff] }
 0x645   : > { %v7908_v40 = vpack.c.bf16 %v7874_v36, %v7873_v53 }
 0x64b   : > { %10930 = vmatmul.mubr.msk.bf16.gmra.mrb[32].mxu1 %vm17422_vm9, %v7272_v13  ;;  %vm17432_vm9 = vmmov %vm17415_vm1  ;;  %v7878_v13 = vld [vmem:[#allocation2 + $0x5e] sm:$0xff] }
 0x64c   : > { %10935 = vmatprep.mubr.msk.bf16.mxu1 %vm17423_vm13, %v7581_v42  ;;  %vm17433_vm13 = vmmov %vm17415_vm1  ;;  %v7879_v42 = vld [vmem:[#allocation2 + $0x66] sm:$0xff]  ;;  %v7910_v52 = vpack.c.bf16 %v7878_v13, %v7877_v16 }
 0x64d   : > { %v7911_v12 = vpack.c.bf16 %v7880_v6, %v7879_v42 }
 0x653   : > { %10936 = vmatmul.mubr.msk.bf16.vlgmr.msra.gmra.mrb[0].mxu1 %vm17425_vm11, %v7582_v5  ;;  %vm17435_vm11 = vmmov %vm17415_vm1  ;;  %v7882_v5 = vld [vmem:[#allocation2 + $0x7e] sm:$0xff] }
 0x654   : > { %10972 = vmatpush3.bf16.msra.mxu1 %v7982_v44  ;;  %10939 = vmatprep.mubr.msk.bf16.mxu1 %vm17415_vm1, %v7583_v43  ;;  %v7883_v44 = vld [vmem:[#allocation2 + $0x86] sm:$0xff]  ;;  %v7884_v43 = vld [vmem:[#allocation2 + $0x8e] sm:$0xff]  ;;  %v7912_v26 = vpack.c.bf16 %v7882_v5, %v7881_v30 }
 0x655   : > { %v7913_v19 = vpack.c.bf16 %v7884_v43, %v7883_v44 }
 0x65b   : > { %10940 = vmatmul.mubr.msk.bf16.gmra.mrb[4].mxu1 %vm17426_vm7, %v7584_v50  ;;  %vm17436_vm7 = vmmov %vm17415_vm1  ;;  %v7887_v50 = vld [vmem:[#allocation2 + $0xa6] sm:$0xff] }
 0x65c   : > { %10943 = vmatprep.mubr.msk.bf16.mxu1 %vm17427_vm12, %v7585_v33  ;;  %vm17437_vm12 = vmmov %vm17415_vm1  ;;  %v7888_v33 = vld [vmem:[#allocation2 + $0xae] sm:$0xff] }
 0x65d   : > { %v7915_v2 = vpack.c.bf16 %v7888_v33, %v7887_v50 }
 0x663   : > { %10944 = vmatmul.mubr.msk.bf16.gmra.mrb[8].mxu1 %vm17428_vm8, %v7586_v21  ;;  %vm17438_vm8 = vmmov %vm17415_vm1  ;;  %v7891_v21 = vld [vmem:[#allocation2 + $0xc6] sm:$0xff] }
 0x664   : > { %10947 = vmatprep.mubr.msk.bf16.mxu1 %vm17429_vm4, %v7587_v9  ;;  %vm17439_vm4 = vmmov %vm17415_vm1  ;;  %v7892_v9 = vld [vmem:[#allocation2 + $0xce] sm:$0xff] }
 0x665   : > { %v7917_v34 = vpack.c.bf16 %v7892_v9, %v7891_v21 }
 0x66b   : > { %10948 = vmatmul.mubr.msk.bf16.gmra.mrb[12].mxu1 %vm17430_vm15, %v7588_v17  ;;  %vm17440_vm15 = vmmov %vm17415_vm1  ;;  %v7895_v17 = vld [vmem:[#allocation2 + $0xe6] sm:$0xff] }
 0x66c   : > { %10951 = vmatprep.mubr.msk.bf16.mxu1 %vm17431_vm3, %v7589_v60  ;;  %vm17441_vm3 = vmmov %vm17415_vm1  ;;  %v7896_v60 = vld [vmem:[#allocation2 + $0xee] sm:$0xff] }
 0x66d   : > { %v7919_v51 = vpack.c.bf16 %v7896_v60, %v7895_v17 }
 0x673   : > { %10952 = vmatmul.mubr.msk.bf16.gmra.mrb[16].mxu1 %vm17432_vm9, %v7590_v20  ;;  %vm17442_vm9 = vmmov %vm17415_vm1  ;;  %v7899_v20 = vld [vmem:[#allocation2 + $0x106] sm:$0xff] }
 0x674   : > { %10955 = vmatprep.mubr.msk.bf16.mxu1 %vm17433_vm13, %v7591_v4  ;;  %vm17443_vm13 = vmmov %vm17415_vm1  ;;  %v7900_v4 = vld [vmem:[#allocation2 + $0x10e] sm:$0xff] }
 0x675   : > { %v7921_v22 = vpack.c.bf16 %v7900_v4, %v7899_v20  ;;  %v17474_v20 = vld [vmem:[#allocation38_spill] sm:$0xff] }
 0x67b   : > { %10956 = vmatmul.mubr.msk.bf16.gmra.mrb[20].mxu1 %vm17434_vm10, %v7592_v27  ;;  %vm17444_vm10 = vmmov %vm17415_vm1  ;;  %v7904_v27 = vld [vmem:[#allocation2 + $0x12e] sm:$0xff] }
 0x67c   : > { %10959 = vmatprep.mubr.msk.bf16.mxu1 %vm17435_vm11, %v7593_v47  ;;  %vm17445_vm11 = vmmov %vm17415_vm1  ;;  %v7922_v47 = vpack.c.bf16 %v7902_v57, %v7901_v14  ;;  %v7923_v37 = vpack.c.bf16 %v7904_v27, %v7903_v54  ;;  %v17476_v14 = vld [vmem:[#allocation39_spill] sm:$0xff] }
 0x683   : > { %10960 = vmatmul.mubr.msk.bf16.gmra.mrb[24].mxu1 %vm17415_vm1, %v7594_v3  ;;  %v7924_v3 = vpack.c.bf16 %v7906_v61, %v7905_v8 }
 0x684   : > { %10963 = vmatprep.mubr.msk.bf16.mxu1 %vm17436_vm7, %v7595_v32  ;;  %vm17446_vm7 = vmmov %vm17415_vm1  ;;  %v15335_v32 = vld [vmem:[%s16331_s3] ss:$0 sm:$0xff] }
 0x68b   : > { %10964 = vmatmul.mubr.msk.bf16.gmra.mrb[28].mxu1 %vm17437_vm12, %v7596_v59  ;;  %vm17447_vm12 = vmmov %vm17415_vm1 }
 0x68c   : > { %10967 = vmatprep.mubr.msk.bf16.mxu1 %vm17438_vm8, %v7597_v11  ;;  %vm17448_vm8 = vmmov %vm17415_vm1 }
 0x693   : > { %10968 = vmatmul.mubr.msk.bf16.gmra.mrb[32].mxu1 %vm17439_vm4, %v7598_v38  ;;  %vm17449_vm4 = vmmov %vm17415_vm1 }
 0x694   : > { %10973 = vmatprep.mubr.msk.bf16.mxu1 %vm17440_vm15, %v7907_v18  ;;  %vm17450_vm15 = vmmov %vm17415_vm1 }
 0x69b   : > { %10974 = vmatmul.mubr.msk.bf16.vlgmr.msra.gmra.mrb[0].mxu1 %vm17441_vm3, %v7908_v40  ;;  %vm17451_vm3 = vmmov %vm17415_vm1 }
 0x69c   : > { %10977 = vmatprep.mubr.msk.bf16.mxu1 %vm17442_vm9, %v7909_v45  ;;  %vm17452_vm9 = vmmov %vm17415_vm1 }
 0x6a3   : > { %10978 = vmatmul.mubr.msk.bf16.gmra.mrb[4].mxu1 %vm17443_vm13, %v7910_v52  ;;  %vm17453_vm13 = vmmov %vm17415_vm1 }
 0x6a4   : > { %10981 = vmatprep.mubr.msk.bf16.mxu1 %vm17444_vm10, %v7911_v12  ;;  %vm17454_vm10 = vmmov %vm17415_vm1 }
 0x6ab   : > { %10982 = vmatmul.mubr.msk.bf16.gmra.mrb[8].mxu1 %vm17445_vm11, %v7912_v26  ;;  %vm17455_vm11 = vmmov %vm17415_vm1 }
 0x6ac   : > { %10985 = vmatprep.mubr.msk.bf16.mxu1 %vm17415_vm1, %v7913_v19 }
 0x6b3   : > { %10986 = vmatmul.mubr.msk.bf16.gmra.mrb[12].mxu1 %vm17446_vm7, %v7914_v58  ;;  %vm17460_vm7 = vnez %v17459_v62 }
 0x6b4   : > { %10989 = vmatprep.mubr.msk.bf16.mxu1 %vm17447_vm12, %v7915_v2  ;;  %vm17461_vm12 = vmmov %vm17415_vm1 }
 0x6bb   : > { %10990 = vmatmul.mubr.msk.bf16.gmra.mrb[16].mxu1 %vm17448_vm8, %v7916_v63 }
 0x6bc   : > { %10993 = vmatprep.mubr.msk.bf16.mxu1 %vm17449_vm4, %v7917_v34 }
 0x6c3   : > { %10994 = vmatmul.mubr.msk.bf16.gmra.mrb[20].mxu1 %vm17450_vm15, %v7918_v46 }
 0x6c4   : > { %10997 = vmatprep.mubr.msk.bf16.mxu1 %vm17451_vm3, %v7919_v51  ;;  %vm17469_vm3 = vnez %v17468_v35 }
 0x6cb   : > { %10998 = vmatmul.mubr.msk.bf16.gmra.mrb[24].mxu1 %vm17452_vm9, %v7920_v56 }
 0x6cc   : > { %11001 = vmatprep.mubr.msk.bf16.mxu1 %vm17453_vm13, %v7921_v22 }
 0x6d3   : > { %11002 = vmatmul.mubr.msk.bf16.gmra.mrb[28].mxu1 %vm17454_vm10, %v7922_v47 }
 0x6d4   : > { %11005 = vmatprep.mubr.msk.bf16.mxu1 %vm17455_vm11, %v7923_v37  ;;  %vm17475_vm11 = vnez %v17474_v20 }
 0x6db   : > { %11006 = vmatmul.mubr.msk.bf16.gmra.mrb[32].mxu1 %vm17415_vm1, %v7924_v3 }
 0x76e   : > { %v10975_v48 = vpop.f32.mrb[0].mxu1 }
 0x76f   : > { %v15338_v0 = vadd.f32 %v10975_v48, %v15335_v32  ;;  %v8018_v24 = vpop.f32.mrb[1].mxu1 }
 0x770   : > { %v15341_v59 = vadd.f32 %v15335_v32, %v8018_v24  ;;  %v10976_v55 = vpop.f32.mrb[2].mxu1 }
 0x771   : > { %v15344_v11 = vadd.f32 %v10976_v55, %v15335_v32  ;;  %v8021_v39 = vpop.f32.mrb[3].mxu1  ;;  %v8242_v25 = vsel %vm13289_vm6, %v15338_v0, 0.0  ;;  %vm17462_vm6 = vmmov %vm17415_vm1 }
 0x772   : > { %v8240_v38 = vsel %vm13311_vm0, %v15341_v59, 0.0  ;;  %v15353_v18 = vadd.f32 %v15335_v32, %v8021_v39  ;;  %v8355_v45 = vmul.f32 %v8242_v25, %v8242_v25  ;;  %vm17463_vm0 = vmmov %vm17415_vm1  ;;  %vm17477_vm1 = vnez %v17476_v14 }
 0x773   : > { %v8353_v53 = vmul.f32 %v8240_v38, %v8240_v38  ;;  %v8243_v41 = vsel %vm13329_vm2, %v15344_v11, 0.0  ;;  %v8276_v16 = vsel %vm17461_vm12, %v8240_v38, 0.0  ;;  %v8279_v12 = vsel %vm17463_vm0, %v8242_v25, 0.0  ;;  %vm17464_vm8 = vmmov %vm17463_vm0  ;;  %v17481_v25 = vld [vmem:[#allocation44_spill] sm:$0xff] }
 0x774   : > { %v8241_v40 = vsel %vm17460_vm7, %v15353_v18, 0.0  ;;  %v8356_v5 = vmul.f32 %v8243_v41, %v8243_v41  ;;  %vm17465_vm4 = vmmov %vm17463_vm0 }
 0x775   : > { %v8277_v13 = vsel %vm17462_vm6, %v8241_v40, 0.0  ;;  %v8354_v42 = vmul.f32 %v8241_v40, %v8241_v40  ;;  %v8389_v30 = vsel %vm17464_vm8, %v8353_v53, 0.0  ;;  %vm17466_vm2 = vmmov %vm17463_vm0  ;;  %vm17482_vm6 = vnez %v17481_v25 }
 0x776   : > { %v8278_v6 = vadd.f32 %v8277_v13, %v8276_v16  ;;  %v10979_v52 = vpop.f32.mrb[4].mxu1  ;;  %v8392_v50 = vsel %vm17466_vm2, %v8355_v45, 0.0  ;;  %vm17467_vm15 = vmmov %vm17463_vm0 }
 0x777   : > { %v8390_v44 = vsel %vm17465_vm4, %v8354_v42, 0.0  ;;  %v8034_v43 = vpop.f32.mrb[5].mxu1  ;;  %v15371_v33 = vadd.f32 %v10979_v52, %v15335_v32  ;;  %v8281_v2 = vsel %vm17467_vm15, %v8243_v41, 0.0  ;;  %vm17470_vm9 = vmmov %vm17463_vm0  ;;  %v17483_v41 = vld [vmem:[#allocation45_spill] sm:$0xff] }
 0x778   : > { %v8280_v26 = vadd.f32 %v8279_v12, %v8278_v6  ;;  %v8391_v19 = vadd.f32 %v8390_v44, %v8389_v30  ;;  %v15367_v29 = vadd.f32 %v15335_v32, %v8034_v43  ;;  %v10980_v10 = vpop.f32.mrb[6].mxu1  ;;  %v8394_v63 = vsel %vm17470_vm9, %v8356_v5, 0.0  ;;  %vm17471_vm13 = vmmov %vm17463_vm0  ;;  %v17489_v44 = vld [vmem:[#allocation46_spill] sm:$0xff] }
 0x779   : > { %v8037_v58 = vpop.f32.mrb[7].mxu1  ;;  %v15378_v9 = vadd.f32 %v10980_v10, %v15335_v32  ;;  %v8246_v46 = vsel %vm13389_vm5, %v15371_v33, 0.0  ;;  %vm17473_vm10 = vmmov %vm17463_vm0  ;;  %vm17490_vm9 = vnez %v17489_v44 }
 0x77a   : > { %v8393_v31 = vadd.f32 %v8392_v50, %v8391_v19  ;;  %v8244_v21 = vsel %vm17469_vm3, %v15367_v29, 0.0  ;;  %v8282_v34 = vadd.f32 %v8281_v2, %v8280_v26  ;;  %v15387_v49 = vadd.f32 %v15335_v32, %v8037_v58  ;;  %vm17478_vm5 = vmmov %vm17463_vm0  ;;  %v17491_v26 = vld [vmem:[#allocation47_spill] sm:$0xff] }
 0x77b   : > { %v8283_v28 = vsel %vm17471_vm13, %v8244_v21, 0.0  ;;  %v8357_v1 = vmul.f32 %v8244_v21, %v8244_v21  ;;  %v8247_v4 = vsel %vm17475_vm11, %v15378_v9, 0.0  ;;  %v8359_v54 = vmul.f32 %v8246_v46, %v8246_v46  ;;  %vm17479_vm7 = vmmov %vm17463_vm0 }
 0x77c   : > { %v8395_v17 = vadd.f32 %v8394_v63, %v8393_v31  ;;  %v8284_v51 = vadd.f32 %v8283_v28, %v8282_v34  ;;  %v8245_v57 = vsel %vm17477_vm1, %v15387_v49, 0.0  ;;  %v8360_v48 = vmul.f32 %v8247_v4, %v8247_v4  ;;  %vm17480_vm12 = vmmov %vm17463_vm0 }
 0x77d   : > { %v8396_v7 = vsel %vm17473_vm10, %v8357_v1, 0.0  ;;  %v8285_v37 = vsel %vm17478_vm5, %v8245_v57, 0.0  ;;  %v8358_v8 = vmul.f32 %v8245_v57, %v8245_v57  ;;  %v8287_v39 = vsel %vm17479_vm7, %v8246_v46, 0.0  ;;  %vm17485_vm8 = vmmov %vm17466_vm2 }
 0x77e   : > { %v10983_v56 = vpop.f32.mrb[8].mxu1  ;;  %v8397_v22 = vadd.f32 %v8396_v7, %v8395_v17  ;;  %v8286_v24 = vadd.f32 %v8285_v37, %v8284_v51  ;;  %vm17484_vm0 = vnez %v17483_v41  ;;  %v8400_v45 = vsel %vm17485_vm8, %v8359_v54, 0.0  ;;  %vm17486_vm4 = vmmov %vm17466_vm2  ;;  %v17496_v7 = vld [vmem:[#allocation48_spill] sm:$0xff] }
 0x77f   : > { %v15396_v27 = vadd.f32 %v10983_v56, %v15335_v32  ;;  %v8050_v47 = vpop.f32.mrb[9].mxu1  ;;  %v8398_v23 = vsel %vm17480_vm12, %v8358_v8, 0.0  ;;  %v8289_v16 = vsel %vm17486_vm4, %v8247_v4, 0.0  ;;  %vm17487_vm15 = vmmov %vm17466_vm2  ;;  %vm17492_vm13 = vnez %v17491_v26  ;;  %v17501_v8 = vld [vmem:[#allocation49_spill] sm:$0xff] }
 0x780   : > { %v15400_v61 = vadd.f32 %v15335_v32, %v8050_v47  ;;  %v10984_v3 = vpop.f32.mrb[10].mxu1  ;;  %v8288_v53 = vadd.f32 %v8287_v39, %v8286_v24  ;;  %v8399_v36 = vadd.f32 %v8398_v23, %v8397_v22  ;;  %v8402_v6 = vsel %vm17487_vm15, %v8360_v48, 0.0  ;;  %vm17488_vm3 = vmmov %vm17466_vm2  ;;  %v17503_v24 = vld [vmem:[#allocation50_spill] sm:$0xff] }
 0x781   : > { %v8053_v55 = vpop.f32.mrb[11].mxu1  ;;  %v15408_v38 = vadd.f32 %v10984_v3, %v15335_v32  ;;  %v8250_v62 = vsel %vm17484_vm0, %v15396_v27, 0.0  ;;  %vm17493_vm10 = vmmov %vm17466_vm2  ;;  %vm17497_vm5 = vnez %v17496_v7  ;;  %vm17502_vm0 = vnez %v17501_v8  ;;  %v17517_v7 = vld [vmem:[#allocation53_spill] sm:$0xff] }
 0x782   : > { %v8248_v15 = vsel %vm17482_vm6, %v15400_v61, 0.0  ;;  %v15417_v42 = vadd.f32 %v15335_v32, %v8053_v55  ;;  %v8401_v52 = vadd.f32 %v8400_v45, %v8399_v36  ;;  %v8290_v12 = vadd.f32 %v8289_v16, %v8288_v53  ;;  %vm17494_vm11 = vmmov %vm17466_vm2 }
 0x783   : > { %v8361_v40 = vmul.f32 %v8248_v15, %v8248_v15  ;;  %v8291_v13 = vsel %vm17466_vm2, %v8248_v15, 0.0  ;;  %v8363_v30 = vmul.f32 %v8250_v62, %v8250_v62  ;;  %v8251_v43 = vsel %vm17490_vm9, %v15408_v38, 0.0  ;;  %vm17495_vm1 = vmmov %vm17466_vm2 }
 0x784   : > { %v8249_v19 = vsel %vm17492_vm13, %v15417_v42, 0.0  ;;  %v8292_v50 = vadd.f32 %v8291_v13, %v8290_v12  ;;  %v8403_v58 = vadd.f32 %v8402_v6, %v8401_v52  ;;  %v8295_v46 = vsel %vm17495_vm1, %v8250_v62, 0.0  ;;  %vm17498_vm7 = vmmov %vm17495_vm1 }
 0x785   : > { %v8404_v5 = vsel %vm17488_vm3, %v8361_v40, 0.0  ;;  %v8293_v2 = vsel %vm17493_vm10, %v8249_v19, 0.0  ;;  %v8362_v31 = vmul.f32 %v8249_v19, %v8249_v19  ;;  %v8364_v51 = vmul.f32 %v8251_v43, %v8251_v43  ;;  %vm17499_vm12 = vmmov %vm17495_vm1  ;;  %v17508_v40 = vld [vmem:[#allocation51_spill] sm:$0xff] }
 0x786   : > { %v10987_v10 = vpop.f32.mrb[12].mxu1  ;;  %v8405_v34 = vadd.f32 %v8404_v5, %v8403_v58  ;;  %v8294_v28 = vadd.f32 %v8293_v2, %v8292_v50  ;;  %v8408_v56 = vsel %vm17498_vm7, %v8363_v30, 0.0  ;;  %v8297_v47 = vsel %vm17499_vm12, %v8251_v43, 0.0  ;;  %vm17500_vm6 = vmmov %vm17495_vm1 }
 0x787   : > { %v8066_v35 = vpop.f32.mrb[13].mxu1  ;;  %v8406_v1 = vsel %vm17494_vm11, %v8362_v31, 0.0  ;;  %v15433_v17 = vadd.f32 %v10987_v10, %v15335_v32  ;;  %vm17504_vm8 = vnez %v17503_v24  ;;  %vm17505_vm4 = vmmov %vm17495_vm1  ;;  %vm17509_vm3 = vnez %v17508_v40  ;;  %v17512_v10 = vld [vmem:[#allocation52_spill] sm:$0xff] }
 0x788   : > { %v15429_v21 = vadd.f32 %v15335_v32, %v8066_v35  ;;  %v10988_v63 = vpop.f32.mrb[14].mxu1  ;;  %v8296_v22 = vadd.f32 %v8295_v46, %v8294_v28  ;;  %v8407_v14 = vadd.f32 %v8406_v1, %v8405_v34  ;;  %v8410_v23 = vsel %vm17505_vm4, %v8364_v51, 0.0  ;;  %vm17506_vm2 = vmmov %vm17495_vm1 }
 0x789   : > { %v8069_v60 = vpop.f32.mrb[15].mxu1  ;;  %v15444_v57 = vadd.f32 %v10988_v63, %v15335_v32  ;;  %v8254_v55 = vsel %vm17504_vm8, %v15433_v17, 0.0  ;;  %vm17507_vm15 = vmmov %vm17495_vm1  ;;  %vm17513_vm10 = vnez %v17512_v10  ;;  %vm17518_vm7 = vnez %v17517_v7 }
 0x78a   : > { %v8252_v20 = vsel %vm17497_vm5, %v15429_v21, 0.0  ;;  %v15440_v4 = vadd.f32 %v15335_v32, %v8069_v60  ;;  %v8409_v48 = vadd.f32 %v8408_v56, %v8407_v14  ;;  %v8298_v39 = vadd.f32 %v8297_v47, %v8296_v22  ;;  %vm17510_vm9 = vmmov %vm17495_vm1 }
 0x78b   : > { %v8299_v54 = vsel %vm17500_vm6, %v8252_v20, 0.0  ;;  %v8365_v37 = vmul.f32 %v8252_v20, %v8252_v20  ;;  %v8255_v45 = vsel %vm17509_vm3, %v15444_v57, 0.0  ;;  %v8367_v13 = vmul.f32 %v8254_v55, %v8254_v55  ;;  %vm17511_vm13 = vmmov %vm17495_vm1 }
 0x78c   : > { %v8253_v3 = vsel %vm17502_vm0, %v15440_v4, 0.0  ;;  %v8300_v41 = vadd.f32 %v8299_v54, %v8298_v39  ;;  %v8411_v62 = vadd.f32 %v8410_v23, %v8409_v48  ;;  %v8303_v26 = vsel %vm17511_vm13, %v8254_v55, 0.0  ;;  %vm17514_vm11 = vmmov %vm17495_vm1  ;;  %v17522_v48 = vld [vmem:[#allocation55_spill] sm:$0xff] }
 0x78d   : > { %v8412_v25 = vsel %vm17506_vm2, %v8365_v37, 0.0  ;;  %v8301_v15 = vsel %vm17507_vm15, %v8253_v3, 0.0  ;;  %v8366_v53 = vmul.f32 %v8253_v3, %v8253_v3  ;;  %v8368_v19 = vmul.f32 %v8255_v45, %v8255_v45  ;;  %vm17515_vm5 = vmmov %vm17495_vm1 }
 0x78e   : > { %v10991_v36 = vpop.f32.mrb[16].mxu1  ;;  %v8413_v30 = vadd.f32 %v8412_v25, %v8411_v62  ;;  %v8302_v5 = vadd.f32 %v8301_v15, %v8300_v41  ;;  %v8416_v34 = vsel %vm17514_vm11, %v8367_v13, 0.0  ;;  %v8305_v28 = vsel %vm17495_vm1, %v8255_v45, 0.0  ;;  %vm17519_vm12 = vmmov %vm17495_vm1 }
 0x78f   : > { %v8082_v16 = vpop.f32.mrb[17].mxu1  ;;  %v8414_v6 = vsel %vm17510_vm9, %v8366_v53, 0.0  ;;  %v15465_v44 = vadd.f32 %v10991_v36, %v15335_v32  ;;  %v8418_v22 = vsel %vm17519_vm12, %v8368_v19, 0.0  ;;  %vm17520_vm6 = vmmov %vm17495_vm1  ;;  %vm17523_vm8 = vnez %v17522_v48 }
 0x790   : > { %v15462_v52 = vadd.f32 %v15335_v32, %v8082_v16  ;;  %v10992_v12 = vpop.f32.mrb[18].mxu1  ;;  %v8304_v2 = vadd.f32 %v8303_v26, %v8302_v5  ;;  %v8415_v31 = vadd.f32 %v8414_v6, %v8413_v30  ;;  %vm17521_vm0 = vmmov %vm17495_vm1  ;;  %v17526_v16 = vld [vmem:[#allocation56_spill] sm:$0xff] }
 0x791   : > { %v8085_v43 = vpop.f32.mrb[19].mxu1  ;;  %v15475_v63 = vadd.f32 %v10992_v12, %v15335_v32  ;;  %v8258_v20 = vsel %vm17518_vm7, %v15465_v44, 0.0  ;;  %vm17525_vm4 = vmmov %vm17521_vm0  ;;  %vm17527_vm2 = vnez %v17526_v16 }
 0x792   : > { %v8256_v50 = vsel %vm17513_vm10, %v15462_v52, 0.0  ;;  %v15472_v58 = vadd.f32 %v15335_v32, %v8085_v43  ;;  %v8417_v51 = vadd.f32 %v8416_v34, %v8415_v31  ;;  %v8306_v56 = vadd.f32 %v8305_v28, %v8304_v2  ;;  %vm17528_vm15 = vmmov %vm17521_vm0 }
 0x793   : > { %v8369_v35 = vmul.f32 %v8256_v50, %v8256_v50  ;;  %v8307_v1 = vsel %vm17515_vm5, %v8256_v50, 0.0  ;;  %v8259_v24 = vsel %vm17523_vm8, %v15475_v63, 0.0  ;;  %v8371_v39 = vmul.f32 %v8258_v20, %v8258_v20  ;;  %vm17529_vm3 = vmmov %vm17521_vm0  ;;  %v17531_v50 = vld [vmem:[#allocation57_spill] sm:$0xff] }
 0x794   : > { %v8257_v46 = vsel %vm13720_vm14, %v15472_v58, 0.0  ;;  %v8308_v8 = vadd.f32 %v8307_v1, %v8306_v56  ;;  %v8419_v3 = vadd.f32 %v8418_v22, %v8417_v51  ;;  %vm17524_vm14 = vmmov %vm17521_vm0  ;;  %v8311_v40 = vsel %vm17525_vm4, %v8258_v20, 0.0  ;;  %v17538_v22 = vld [vmem:[#allocation59_spill] sm:$0xff] }
 0x795   : > { %v8420_v14 = vsel %vm17520_vm6, %v8369_v35, 0.0  ;;  %v8309_v47 = vsel %vm17521_vm0, %v8257_v46, 0.0  ;;  %v8370_v54 = vmul.f32 %v8257_v46, %v8257_v46  ;;  %v8372_v45 = vmul.f32 %v8259_v24, %v8259_v24  ;;  %vm17530_vm9 = vmmov %vm17521_vm0  ;;  %v17533_v35 = vld [vmem:[#allocation58_spill] sm:$0xff] }
 0x796   : > { %v10995_v37 = vpop.f32.mrb[20].mxu1  ;;  %v8421_v53 = vadd.f32 %v8420_v14, %v8419_v3  ;;  %v8310_v36 = vadd.f32 %v8309_v47, %v8308_v8  ;;  %v8424_v26 = vsel %vm17528_vm15, %v8371_v39, 0.0  ;;  %v8313_v19 = vsel %vm17529_vm3, %v8259_v24, 0.0  ;;  %vm17535_vm11 = vmmov %vm17521_vm0 }
 0x797   : > { %v8098_v55 = vpop.f32.mrb[21].mxu1  ;;  %v8422_v23 = vsel %vm17524_vm14, %v8370_v54, 0.0  ;;  %v15497_v41 = vadd.f32 %v10995_v37, %v15335_v32  ;;  %vm17532_vm13 = vnez %v17531_v50  ;;  %vm17534_vm10 = vnez %v17533_v35  ;;  %vm17536_vm1 = vmmov %vm17521_vm0  ;;  %v17549_v50 = vld [vmem:[#allocation62_spill] sm:$0xff] }
 0x798   : > { %v15494_v25 = vadd.f32 %v15335_v32, %v8098_v55  ;;  %v10996_v15 = vpop.f32.mrb[22].mxu1  ;;  %v8312_v12 = vadd.f32 %v8311_v40, %v8310_v36  ;;  %v8423_v30 = vadd.f32 %v8422_v23, %v8421_v53  ;;  %v8426_v1 = vsel %vm17535_vm11, %v8372_v45, 0.0  ;;  %vm17537_vm5 = vmmov %vm17521_vm0  ;;  %v17542_v53 = vld [vmem:[#allocation60_spill] sm:$0xff] }
 0x799   : > { %v8101_v62 = vpop.f32.mrb[23].mxu1  ;;  %v15507_v43 = vadd.f32 %v10996_v15, %v15335_v32  ;;  %v8262_v34 = vsel %vm17534_vm10, %v15497_v41, 0.0  ;;  %vm17539_vm7 = vnez %v17538_v22  ;;  %vm17540_vm12 = vmmov %vm17521_vm0  ;;  %vm17550_vm15 = vnez %v17549_v50 }
 0x79a   : > { %v8260_v13 = vsel %vm17527_vm2, %v15494_v25, 0.0  ;;  %v15504_v6 = vadd.f32 %v15335_v32, %v8101_v62  ;;  %v8425_v31 = vadd.f32 %v8424_v26, %v8423_v30  ;;  %v8314_v28 = vadd.f32 %v8313_v19, %v8312_v12  ;;  %vm17541_vm6 = vmmov %vm17521_vm0  ;;  %v17547_v26 = vld [vmem:[#allocation61_spill] sm:$0xff] }
 0x79b   : > { %v8373_v5 = vmul.f32 %v8260_v13, %v8260_v13  ;;  %v8315_v10 = vsel %vm17530_vm9, %v8260_v13, 0.0  ;;  %v8263_v14 = vsel %vm17539_vm7, %v15507_v43, 0.0  ;;  %v8375_v54 = vmul.f32 %v8262_v34, %v8262_v34  ;;  %vm17544_vm8 = vmmov %vm17536_vm1 }
 0x79c   : > { %v8261_v2 = vsel %vm17532_vm13, %v15504_v6, 0.0  ;;  %v8316_v20 = vadd.f32 %v8315_v10, %v8314_v28  ;;  %v8427_v56 = vadd.f32 %v8426_v1, %v8425_v31  ;;  %v8319_v23 = vsel %vm17541_vm6, %v8262_v34, 0.0  ;;  %vm17545_vm14 = vmmov %vm17536_vm1 }
 0x79d   : > { %v8428_v60 = vsel %vm17536_vm1, %v8373_v5, 0.0  ;;  %v8317_v46 = vsel %vm17537_vm5, %v8261_v2, 0.0  ;;  %v8374_v51 = vmul.f32 %v8261_v2, %v8261_v2  ;;  %v8376_v15 = vmul.f32 %v8263_v14, %v8263_v14  ;;  %vm17546_vm4 = vmmov %vm17536_vm1 }
 0x79e   : > { %v10999_v7 = vpop.f32.mrb[24].mxu1  ;;  %v8429_v48 = vadd.f32 %v8428_v60, %v8427_v56  ;;  %v8318_v24 = vadd.f32 %v8317_v46, %v8316_v20  ;;  %vm17543_vm0 = vnez %v17542_v53  ;;  %v8432_v12 = vsel %vm17544_vm8, %v8375_v54, 0.0  ;;  %vm17551_vm3 = vmmov %vm17536_vm1 }
 0x79f   : > { %v8114_v47 = vpop.f32.mrb[25].mxu1  ;;  %v8430_v37 = vsel %vm17540_vm12, %v8374_v51, 0.0  ;;  %v15529_v55 = vadd.f32 %v10999_v7, %v15335_v32  ;;  %v8321_v30 = vsel %vm17545_vm14, %v8263_v14, 0.0  ;;  %vm17548_vm2 = vnez %v17547_v26  ;;  %vm17552_vm9 = vmmov %vm17536_vm1  ;;  %v17554_v7 = vld [vmem:[#allocation63_spill] sm:$0xff] }
 0x7a0   : > { %v15526_v8 = vadd.f32 %v15335_v32, %v8114_v47  ;;  %v11000_v3 = vpop.f32.mrb[26].mxu1  ;;  %v8320_v40 = vadd.f32 %v8319_v23, %v8318_v24  ;;  %v8431_v45 = vadd.f32 %v8430_v37, %v8429_v48  ;;  %v8434_v35 = vsel %vm17551_vm3, %v8376_v15, 0.0  ;;  %vm17553_vm13 = vmmov %vm17536_vm1  ;;  %v17557_v15 = vld [vmem:[#allocation64_spill] sm:$0xff] }
 0x7a1   : > { %v8117_v39 = vpop.f32.mrb[27].mxu1  ;;  %v15539_v13 = vadd.f32 %v11000_v3, %v15335_v32  ;;  %v8266_v2 = vsel %vm17550_vm15, %v15529_v55, 0.0  ;;  %vm17555_vm10 = vnez %v17554_v7  ;;  %vm17556_vm11 = vmmov %vm17536_vm1  ;;  %vm17558_vm5 = vnez %v17557_v15 }
 0x7a2   : > { %v8264_v36 = vsel %vm17543_vm0, %v15526_v8, 0.0  ;;  %v15536_v62 = vadd.f32 %v15335_v32, %v8117_v39  ;;  %v8433_v10 = vadd.f32 %v8432_v12, %v8431_v45  ;;  %v8322_v31 = vadd.f32 %v8321_v30, %v8320_v40  ;;  %vm17559_vm7 = vmmov %vm17536_vm1 }
 0x7a3   : > { %v8377_v16 = vmul.f32 %v8264_v36, %v8264_v36  ;;  %v8323_v5 = vsel %vm17546_vm4, %v8264_v36, 0.0  ;;  %v8267_v20 = vsel %vm17555_vm10, %v15539_v13, 0.0  ;;  %v8379_v22 = vmul.f32 %v8266_v2, %v8266_v2  ;;  %vm17560_vm12 = vmmov %vm17536_vm1 }
 0x7a4   : > { %v8265_v19 = vsel %vm17548_vm2, %v15536_v62, 0.0  ;;  %v8324_v46 = vadd.f32 %v8323_v5, %v8322_v31  ;;  %v8435_v51 = vadd.f32 %v8434_v35, %v8433_v10  ;;  %v8327_v39 = vsel %vm17536_vm1, %v8266_v2, 0.0  ;;  %vm17561_vm6 = vmmov %vm17536_vm1  ;;  %v17564_v2 = vld [vmem:[#allocation67_spill] sm:$0xff] }
 0x7a5   : > { %v8436_v34 = vsel %vm17552_vm9, %v8377_v16, 0.0  ;;  %v8325_v28 = vsel %vm17553_vm13, %v8265_v19, 0.0  ;;  %v8378_v1 = vmul.f32 %v8265_v19, %v8265_v19  ;;  %v8380_v23 = vmul.f32 %v8267_v20, %v8267_v20  ;;  %v17562_v19 = vld [vmem:[#allocation66_spill] sm:$0xff]  ;;  %vm17566_vm14 = vmmov %vm17536_vm1 }
 0x7a6   : > { %v11003_v60 = vpop.f32.mrb[28].mxu1  ;;  %v8437_v37 = vadd.f32 %v8436_v34, %v8435_v51  ;;  %v8326_v3 = vadd.f32 %v8325_v28, %v8324_v46  ;;  %v8440_v30 = vsel %vm17559_vm7, %v8379_v22, 0.0  ;;  %v8329_v5 = vsel %vm17560_vm12, %v8267_v20, 0.0  ;;  %vm17567_vm4 = vmmov %vm17536_vm1  ;;  %v17569_v20 = vld [vmem:[#allocation68_spill] sm:$0xff] }
 0x7a7   : > { %v8130_v56 = vpop.f32.mrb[29].mxu1  ;;  %v8438_v14 = vsel %vm17556_vm11, %v8378_v1, 0.0  ;;  %v15561_v48 = vadd.f32 %v11003_v60, %v15335_v32  ;;  %vm17563_vm0 = vnez %v17562_v19  ;;  %vm17565_vm8 = vnez %v17564_v2  ;;  %vm17568_vm2 = vmmov %vm17536_vm1 }
 0x7a8   : > { %v15558_v47 = vadd.f32 %v15335_v32, %v8130_v56  ;;  %v11004_v54 = vpop.f32.mrb[30].mxu1  ;;  %v8328_v40 = vadd.f32 %v8327_v39, %v8326_v3  ;;  %v8439_v45 = vadd.f32 %v8438_v14, %v8437_v37  ;;  %v8442_v34 = vsel %vm17566_vm14, %v8380_v23, 0.0  ;;  %vm17571_vm3 = vmmov %vm17536_vm1 }
 0x7a9   : > { %v8133_v24 = vpop.f32.mrb[31].mxu1  ;;  %v15571_v12 = vadd.f32 %v11004_v54, %v15335_v32  ;;  %v8270_v31 = vsel %vm17565_vm8, %v15561_v48, 0.0  ;;  %vm17570_vm15 = vnez %v17569_v20  ;;  %vm17572_vm9 = vmmov %vm17536_vm1 }
 0x7aa   : > { %v8268_v53 = vsel %vm17558_vm5, %v15558_v47, 0.0  ;;  %v15568_v36 = vadd.f32 %v15335_v32, %v8133_v24  ;;  %v8441_v50 = vadd.f32 %v8440_v30, %v8439_v45  ;;  %v8330_v35 = vadd.f32 %v8329_v5, %v8328_v40  ;;  %v17573_v45 = vld [vmem:[#allocation69_spill] sm:$0xff]  ;;  %vm17575_vm10 = vmmov %vm17536_vm1 }
 0x7ab   : > { %v8381_v16 = vmul.f32 %v8268_v53, %v8268_v53  ;;  %v8331_v26 = vsel %vm17561_vm6, %v8268_v53, 0.0  ;;  %v8271_v56 = vsel %vm17570_vm15, %v15571_v12, 0.0  ;;  %v8383_v14 = vmul.f32 %v8270_v31, %v8270_v31  ;;  %vm17576_vm11 = vmmov %vm17536_vm1 }
 0x7ac   : > { %v8269_v10 = vsel %vm17563_vm0, %v15568_v36, 0.0  ;;  %v8332_v51 = vadd.f32 %v8331_v26, %v8330_v35  ;;  %v8443_v7 = vadd.f32 %v8442_v34, %v8441_v50  ;;  %v8335_v53 = vsel %vm17572_vm9, %v8270_v31, 0.0  ;;  %v17577_v35 = vld [vmem:[#allocation70_spill] sm:$0xff]  ;;  %vm17581_vm12 = vmmov %vm17536_vm1 }
 0x7ad   : > { %v8444_v28 = vsel %vm17567_vm4, %v8381_v16, 0.0  ;;  %v8333_v1 = vsel %vm17568_vm2, %v8269_v10, 0.0  ;;  %v8382_v60 = vmul.f32 %v8269_v10, %v8269_v10  ;;  %v8384_v40 = vmul.f32 %v8271_v56, %v8271_v56  ;;  %vm17582_vm6 = vmmov %vm17536_vm1 }
 0x7ae   : > { %v11007_v46 = vpop.f32.mrb[32].mxu1  ;;  %v8445_v24 = vadd.f32 %v8444_v28, %v8443_v7  ;;  %v8334_v39 = vadd.f32 %v8333_v1, %v8332_v51  ;;  %vm17574_vm13 = vnez %v17573_v45  ;;  %v8448_v50 = vsel %vm17575_vm10, %v8383_v14, 0.0  ;;  %v17579_v1 = vld [vmem:[#allocation71_spill] sm:$0xff]  ;;  %vm17583_vm0 = vmmov %vm17536_vm1  ;;  %v17584_v14 = vld [vmem:[#allocation72_spill] sm:$0xff] }
 0x7af   : > { %v8146_v22 = vpop.f32.mrb[33].mxu1  ;;  %v8446_v54 = vsel %vm17571_vm3, %v8382_v60, 0.0  ;;  %v15593_v23 = vadd.f32 %v11007_v46, %v15335_v32  ;;  %v8337_v2 = vsel %vm17576_vm11, %v8271_v56, 0.0  ;;  %vm17578_vm5 = vnez %v17577_v35  ;;  %vm17586_vm14 = vmmov %vm17583_vm0 }
 0x7b0   : > { %v15590_v37 = vadd.f32 %v15335_v32, %v8146_v22  ;;  %v11008_v3 = vpop.f32.mrb[34].mxu1  ;;  %v8336_v5 = vadd.f32 %v8335_v53, %v8334_v39  ;;  %v8447_v26 = vadd.f32 %v8446_v54, %v8445_v24  ;;  %vm17580_vm7 = vnez %v17579_v1  ;;  %vm17587_vm4 = vmmov %vm17583_vm0 }
 0x7b1   : > { %v8149_v15 = vpop.f32.mrb[35].mxu1  ;;  %v15603_v10 = vadd.f32 %v11008_v3, %v15335_v32  ;;  %v8274_v60 = vsel %vm17580_vm7, %v15593_v23, 0.0  ;;  %v8450_v51 = vsel %vm17581_vm12, %v8384_v40, 0.0  ;;  %vm17585_vm8 = vnez %v17584_v14  ;;  %vm17588_vm2 = vmmov %vm17583_vm0 }
 0x7b2   : > { %v8272_v16 = vsel %vm17574_vm13, %v15590_v37, 0.0  ;;  %v15600_v30 = vadd.f32 %v15335_v32, %v8149_v15  ;;  %v8449_v28 = vadd.f32 %v8448_v50, %v8447_v26  ;;  %v8338_v46 = vadd.f32 %v8337_v2, %v8336_v5  ;;  %vm17589_vm15 = vmmov %vm17583_vm0 }
 0x7b3   : > { %v8385_v19 = vmul.f32 %v8272_v16, %v8272_v16  ;;  %v8339_v31 = vsel %vm17536_vm1, %v8272_v16, 0.0  ;;  %v8275_v54 = vsel %vm17585_vm8, %v15603_v10, 0.0  ;;  %v8387_v3 = vmul.f32 %v8274_v60, %v8274_v60  ;;  %vm17590_vm3 = vmmov %vm17583_vm0 }
 0x7b4   : > { %v8273_v34 = vsel %vm17578_vm5, %v15600_v30, 0.0  ;;  %v8340_v56 = vadd.f32 %v8339_v31, %v8338_v46  ;;  %v8451_v22 = vadd.f32 %v8450_v51, %v8449_v28  ;;  %v8343_v53 = vsel %vm17587_vm4, %v8274_v60, 0.0 }
 0x7b5   : > { %v8452_v32 = vsel %vm17582_vm6, %v8385_v19, 0.0  ;;  %v8341_v7 = vsel %vm17583_vm0, %v8273_v34, 0.0  ;;  %v8386_v20 = vmul.f32 %v8273_v34, %v8273_v34  ;;  %v8388_v45 = vmul.f32 %v8275_v54, %v8275_v54 }
 0x7b6   : > { %v8453_v39 = vadd.f32 %v8452_v32, %v8451_v22  ;;  %v8342_v15 = vadd.f32 %v8341_v7, %v8340_v56  ;;  %v8456_v5 = vsel %vm17588_vm2, %v8387_v3, 0.0  ;;  %v8345_v26 = vsel %vm17589_vm15, %v8275_v54, 0.0 }
 0x7b7   : > { %v8454_v24 = vsel %vm17586_vm14, %v8386_v20, 0.0  ;;  %v8458_v2 = vsel %vm17590_vm3, %v8388_v45, 0.0  ;;  %vm8654_vm9 = vcmask 1042432   ;;  %vm8912_vm13 = vsmask.f32 2304 }
 0x7b8   : > { %v8344_v40 = vadd.f32 %v8343_v53, %v8342_v15  ;;  %v8455_v16 = vadd.f32 %v8454_v24, %v8453_v39  ;;  %v15630_v24 = vld [vmem:[%s11815_s27 + $0x8] sm:$0xe]  ;;  %v15633_v39 = vld [vmem:[%s11815_s27 + $0x10] sm:$0xff]   ;;  %v15636_v15 = vld [vmem:[%s11815_s27 + $0xc] sm:$0xf]  ;;  %vm9319_vm11 = vcmask 27648  }
 0x7b9   : > { %v15639_v53 = vld [vmem:[%s11815_s27 + $0x18] sm:$0xff]   ;;  %vm8913_vm10 = vsmask.f32 6416 }
 0x7ba   : > { %v8346_v19 = vadd.f32 %v8345_v26, %v8344_v40  ;;  %v8457_v50 = vadd.f32 %v8456_v5, %v8455_v16  ;;  %v15642_v40 = vld [vmem:[%s11815_s27 + $0x20] sm:$0xff]   ;;  %v15690_v16 = vld [vmem:[%s11815_s27 + $0x38] sm:$0xff]   ;;  %v15709_v26 = vld [vmem:[%s11815_s27 + $0x50] sm:$0xff]  }
 0x7bb   : > { %17592 = vst [vmem:[#allocation74_spill] sm:$0xff] %v15709_v26  ;;  %v15751_v5 = vld [vmem:[%s11815_s27 + $0x98] sm:$0x3]  ;;  %vm16108_vm1 = vmor %vm8912_vm13, %vm8913_vm10 }
 0x7bc   : > { %v8347_v31 = vrot.slane %v8346_v19, 4  ;;  %v8459_v35 = vadd.f32 %v8458_v2, %v8457_v50  ;;  %v15702_v50 = vld [vmem:[%s11815_s27 + $0x48] sm:$0xff]   ;;  %17601 = vst [vmem:[#allocation78_spill] sm:$0xff] %v15751_v5 }
 0x7bd   : > { %17591 = vst [vmem:[#allocation41_spill] sm:$0xff] %v15702_v50 }
 0x7be   : > { %v8348_v34 = vadd.f32 %v8347_v31, %v8346_v19  ;;  %v8460_v28 = vrot.slane %v8459_v35, 4  ;;  %v15748_v19 = vld [vmem:[%s11815_s27 + $0x90] sm:$0xff]  }
 0x7bf   : > { %17600 = vst [vmem:[#allocation65_spill] sm:$0xff] %v15748_v19 }
 0x7c0   : > { %v8349_v1 = vrot.slane %v8348_v34, 2  ;;  %v8461_v60 = vadd.f32 %v8460_v28, %v8459_v35  ;;  %v15738_v28 = vld [vmem:[%s11815_s27 + $0x80] sm:$0xff]  }
 0x7c1   : > { %17598 = vst [vmem:[#allocation15_spill] sm:$0xff] %v15738_v28 }
 0x7c2   : > { %v8350_v46 = vadd.f32 %v8349_v1, %v8348_v34  ;;  %v8462_v51 = vrot.slane %v8461_v60, 2 }
 0x7c4   : > { %v8351_v32 = vrot.slane %v8350_v46, 1  ;;  %v8463_v7 = vadd.f32 %v8462_v51, %v8461_v60 }
 0x7c6   : > { %v8352_v20 = vadd.f32 %v8351_v32, %v8350_v46  ;;  %v8464_v56 = vrot.slane %v8463_v7, 1  ;;  %v15718_v32 = vld [vmem:[%s11815_s27 + $0x60] sm:$0xff]   ;;  %v15731_v46 = vld [vmem:[%s11815_s27 + $0x78] sm:$0xff]  }
 0x7c7   : > { %17594 = vst [vmem:[#allocation30_spill] sm:$0xff] %v15718_v32  ;;  %17597 = vst [vmem:[#allocation77_spill] sm:$0xff] %v15731_v46 }
 0x7c8   : > { %v8465_v22 = vadd.f32 %v8464_v56, %v8463_v7  ;;  %v15625_v14 = vmul.f32 0.00390625, %v8352_v20  ;;  %v15712_v7 = vld [vmem:[%s11815_s27 + $0x58] sm:$0xff]   ;;  %v15721_v56 = vld [vmem:[%s11815_s27 + $0x68] sm:$0xff]  }
 0x7c9   : > { %17593 = vst [vmem:[#allocation75_spill] sm:$0xff] %v15712_v7  ;;  %17595 = vst [vmem:[#allocation76_spill] sm:$0xff] %v15721_v56  ;;  %v15741_v20 = vld [vmem:[%s11815_s27 + $0x88] sm:$0xff]  }
 0x7ca   : > { %v8467_v54 = vmul.f32 0.00390625, %v8465_v22  ;;  %v8468_v3 = vmul.f32 %v15625_v14, %v15625_v14  ;;  %v15699_v22 = vld [vmem:[%s11815_s27 + $0x40] sm:$0xff]   ;;  %17599 = vst [vmem:[#allocation42_spill] sm:$0xff] %v15741_v20  ;;  %v8470_v56 = vsub.f32 %v15341_v59, %v15625_v14  ;;  %v8471_v7 = vsub.f32 %v15353_v18, %v15625_v14 }
 0x7cb   : > { %v8473_v34 = vsub.f32 %v15344_v11, %v15625_v14  ;;  %v8474_v35 = vsub.f32 %v15367_v29, %v15625_v14  ;;  %v8475_v59 = vsub.f32 %v15387_v49, %v15625_v14  ;;  %v8476_v60 = vsub.f32 %v15371_v33, %v15625_v14 }
 0x7cc   : > { %v8469_v45 = vsub.f32 %v8467_v54, %v8468_v3  ;;  %v15676_v54 = vld [vmem:[%s11815_s27 + $0x28] sm:$0xff]   ;;  %v15679_v3 = vld [vmem:[%s11815_s27 + $0x30] sm:$0xff]   ;;  %v8477_v31 = vsub.f32 %v15378_v9, %v15625_v14  ;;  %v8478_v18 = vsub.f32 %v15400_v61, %v15625_v14  ;;  %v8480_v11 = vsub.f32 %v15396_v27, %v15625_v14 }
 0x7cd   : > { %v8481_v29 = vsub.f32 %v15408_v38, %v15625_v14  ;;  %v8482_v49 = vsub.f32 %v15429_v21, %v15625_v14  ;;  %v8483_v33 = vsub.f32 %v15440_v4, %v15625_v14  ;;  %v8484_v9 = vsub.f32 %v15433_v17, %v15625_v14 }
 0x7ce   : > { %v8506_v2 = vadd.f32 1e-05, %v8469_v45  ;;  %v15728_v45 = vld [vmem:[%s11815_s27 + $0x70] sm:$0xff]   ;;  %v8485_v61 = vsub.f32 %v15444_v57, %v15625_v14  ;;  %s11604_s27 = smul.u32 144, %s17672_s19 }
 0x7cf   : > { %17596 = vst [vmem:[#allocation17_spill] sm:$0xff] %v15728_v45 }
 0x7d0   : > { %11750 = vrsqrt.f32 %v8506_v2  ;;  %v8472_v2 = vsub.f32 %v15338_v0, %v15625_v14  ;;  %v8479_v0 = vsub.f32 %v15417_v42, %v15625_v14  ;;  %v8488_v42 = vsub.f32 %v15465_v44, %v15625_v14  ;;  %s16117_s22 = scalar_lea.vmem %s16333_s5, %s11604_s27 }
 0x7d1   : > { %v17602_v44 = vsub.f32 %v15462_v52, %v15625_v14 }
 0x7da   : > { %v11751_v32 = vpop.eup %11750 }
 0x7db   : > { %v15798_v27 = vmul.f32 %v11751_v32, %v8470_v56  ;;  %v8509_v51 = vmul.f32 %v11751_v32, %v8471_v7  ;;  %v8510_v38 = vmul.f32 %v11751_v32, %v8472_v2  ;;  %v8511_v1 = vmul.f32 %v11751_v32, %v8473_v34 }
 0x7dc   : > { %v8512_v21 = vmul.f32 %v11751_v32, %v8474_v35  ;;  %v8513_v5 = vmul.f32 %v11751_v32, %v8475_v59  ;;  %v8514_v19 = vmul.f32 %v11751_v32, %v8476_v60  ;;  %v8515_v20 = vmul.f32 %v11751_v32, %v8477_v31 }
 0x7dd   : > { %v8516_v4 = vmul.f32 %v11751_v32, %v8478_v18  ;;  %v8517_v28 = vmul.f32 %v11751_v32, %v8479_v0  ;;  %v8518_v46 = vmul.f32 %v11751_v32, %v8480_v11  ;;  %v8519_v17 = vmul.f32 %v11751_v32, %v8481_v29 }
 0x7de   : > { %v8520_v45 = vmul.f32 %v11751_v32, %v8482_v49  ;;  %v8521_v26 = vmul.f32 %v11751_v32, %v8483_v33  ;;  %v8522_v57 = vmul.f32 %v11751_v32, %v8484_v9  ;;  %v8523_v50 = vmul.f32 %v11751_v32, %v8485_v61 }
 0x7df   : > { %v8524_v56 = vmul.f32 %v11751_v32, %v17602_v44  ;;  %v17603_v34 = vsub.f32 %v15472_v58, %v15625_v14  ;;  %v8526_v35 = vmul.f32 %v11751_v32, %v8488_v42  ;;  %v17604_v31 = vsub.f32 %v15475_v63, %v15625_v14 }
 0x7e0   : > { %v17605_v2 = vsub.f32 %v15494_v25, %v15625_v14  ;;  %v17606_v18 = vsub.f32 %v15504_v6, %v15625_v14  ;;  %v17607_v58 = vsub.f32 %v15497_v41, %v15625_v14  ;;  %v17608_v63 = vsub.f32 %v15507_v43, %v15625_v14 }
 0x7e1   : > { %v8525_v7 = vmul.f32 %v11751_v32, %v17603_v34  ;;  %v15809_v60 = vmul.f32 %v11751_v32, %v17604_v31  ;;  %v17609_v25 = vsub.f32 %v15526_v8, %v15625_v14  ;;  %v17610_v6 = vsub.f32 %v15536_v62, %v15625_v14 }
 0x7e2   : > { %v15814_v59 = vmul.f32 %v11751_v32, %v17605_v2  ;;  %v15819_v52 = vmul.f32 %v11751_v32, %v17606_v18  ;;  %v15824_v0 = vmul.f32 %v11751_v32, %v17607_v58  ;;  %v15829_v11 = vmul.f32 %v11751_v32, %v17608_v63 }
 0x7e3   : > { %v15834_v29 = vmul.f32 %v11751_v32, %v17609_v25  ;;  %v15839_v49 = vmul.f32 %v11751_v32, %v17610_v6  ;;  %v17611_v41 = vsub.f32 %v15529_v55, %v15625_v14  ;;  %v17612_v43 = vsub.f32 %v15539_v13, %v15625_v14 }
 0x7e4   : > { %v17613_v8 = vsub.f32 %v15558_v47, %v15625_v14  ;;  %v17614_v62 = vsub.f32 %v15568_v36, %v15625_v14  ;;  %v17615_v55 = vsub.f32 %v15561_v48, %v15625_v14  ;;  %v17616_v13 = vsub.f32 %v15571_v12, %v15625_v14 }
 0x7e5   : > { %v15844_v33 = vmul.f32 %v11751_v32, %v17611_v41  ;;  %v15849_v9 = vmul.f32 %v11751_v32, %v17612_v43  ;;  %v17617_v47 = vsub.f32 %v15590_v37, %v15625_v14  ;;  %v17618_v36 = vsub.f32 %v15600_v30, %v15625_v14 }
 0x7e6   : > { %v15854_v61 = vmul.f32 %v11751_v32, %v17613_v8  ;;  %v15859_v42 = vmul.f32 %v11751_v32, %v17614_v62  ;;  %v15864_v44 = vmul.f32 %v11751_v32, %v17615_v55  ;;  %v15869_v34 = vmul.f32 %v11751_v32, %v17616_v13 }
 0x7e7   : > { %v15874_v31 = vmul.f32 %v11751_v32, %v17617_v47  ;;  %v15879_v2 = vmul.f32 %v11751_v32, %v17618_v36  ;;  %v17619_v48 = vsub.f32 %v15593_v23, %v15625_v14  ;;  %v17620_v12 = vsub.f32 %v15603_v10, %v15625_v14 }
 0x7e8   : > { %v8655_v63 = vrot.slane %v15798_v27, 5  ;;  %v8656_v37 = vrot.slane %v8509_v51, 5  ;;  %v8658_v25 = vrot.slane %v8510_v38, 5  ;;  %v8660_v6 = vrot.slane %v8511_v1, 5 }
 0x7e9   : > { %v15884_v18 = vmul.f32 %v11751_v32, %v17619_v48  ;;  %v15889_v58 = vmul.f32 %v11751_v32, %v17620_v12  ;;  %v8662_v41 = vrot.slane %v8512_v21, 5  ;;  %v8664_v43 = vrot.slane %v8513_v5, 5 }
 0x7ea   : > { %v8666_v30 = vrot.slane %v8514_v19, 5  ;;  %v8668_v8 = vrot.slane %v8515_v20, 5  ;;  %v8657_v23 = vsel %vm8654_vm9, %v8655_v63, %v8656_v37  ;;  %v8659_v62 = vsel %vm8654_vm9, %v8656_v37, %v8658_v25 }
 0x7eb   : > { %v8661_v55 = vsel %vm8654_vm9, %v8658_v25, %v8660_v6  ;;  %v8670_v10 = vrot.slane %v8516_v4, 5  ;;  %v15898_v14 = vsel %vm8654_vm9, %v8660_v6, %v8662_v41  ;;  %v15901_v51 = vsel %vm8654_vm9, %v8662_v41, %v8664_v43 }
 0x7ec   : > { %v15904_v1 = vsel %vm8654_vm9, %v8664_v43, %v8666_v30  ;;  %v15907_v5 = vsel %vm8654_vm9, %v8666_v30, %v8668_v8  ;;  %v8672_v32 = vrot.slane %v8517_v28, 5  ;;  %v8674_v20 = vrot.slane %v8518_v46, 5 }
 0x7ed   : > { %v15910_v19 = vsel %vm8654_vm9, %v8668_v8, %v8670_v10  ;;  %v8676_v38 = vrot.slane %v8519_v17, 5  ;;  %v8678_v21 = vrot.slane %v8520_v45, 5  ;;  %v8680_v4 = vrot.slane %v8521_v26, 5 }
 0x7ee   : > { %v8682_v13 = vrot.slane %v8522_v57, 5  ;;  %v8684_v47 = vrot.slane %v8523_v50, 5  ;;  %v8673_v36 = vsel %vm8654_vm9, %v8670_v10, %v8672_v32  ;;  %v8675_v48 = vsel %vm8654_vm9, %v8672_v32, %v8674_v20 }
 0x7ef   : > { %v8677_v12 = vsel %vm8654_vm9, %v8674_v20, %v8676_v38  ;;  %v8686_v37 = vrot.slane %v8524_v56, 5  ;;  %v8679_v25 = vsel %vm8654_vm9, %v8676_v38, %v8678_v21  ;;  %v8681_v6 = vsel %vm8654_vm9, %v8678_v21, %v8680_v4 }
 0x7f0   : > { %v8683_v41 = vsel %vm8654_vm9, %v8680_v4, %v8682_v13  ;;  %v8685_v28 = vsel %vm8654_vm9, %v8682_v13, %v8684_v47  ;;  %v8688_v26 = vrot.slane %v8525_v7, 5  ;;  %v8690_v45 = vrot.slane %v8526_v35, 5 }
 0x7f1   : > { %v8687_v46 = vsel %vm8654_vm9, %v8684_v47, %v8686_v37  ;;  %v8692_v50 = vrot.slane %v15809_v60, 5  ;;  %v8694_v17 = vrot.slane %v15814_v59, 5  ;;  %v8696_v57 = vrot.slane %v15819_v52, 5 }
 0x7f2   : > { %v8698_v56 = vrot.slane %v15824_v0, 5  ;;  %v8700_v43 = vrot.slane %v15829_v11, 5  ;;  %v8689_v30 = vsel %vm8654_vm9, %v8686_v37, %v8688_v26  ;;  %v8691_v8 = vsel %vm8654_vm9, %v8688_v26, %v8690_v45 }
 0x7f3   : > { %v8693_v10 = vsel %vm8654_vm9, %v8690_v45, %v8692_v50  ;;  %v8702_v32 = vrot.slane %v15834_v29, 5  ;;  %v8695_v7 = vsel %vm8654_vm9, %v8692_v50, %v8694_v17  ;;  %v8697_v35 = vsel %vm8654_vm9, %v8694_v17, %v8696_v57 }
 0x7f4   : > { %v8699_v60 = vsel %vm8654_vm9, %v8696_v57, %v8698_v56  ;;  %v8701_v59 = vsel %vm8654_vm9, %v8698_v56, %v8700_v43  ;;  %v8704_v0 = vrot.slane %v15839_v49, 5  ;;  %v8706_v11 = vrot.slane %v15844_v33, 5 }
 0x7f5   : > { %v8703_v52 = vsel %vm8654_vm9, %v8700_v43, %v8702_v32  ;;  %v8708_v20 = vrot.slane %v15849_v9, 5  ;;  %v8710_v38 = vrot.slane %v15854_v61, 5  ;;  %v8712_v29 = vrot.slane %v15859_v42, 5 }
 0x7f6   : > { %v8714_v21 = vrot.slane %v15864_v44, 5  ;;  %v8716_v4 = vrot.slane %v15869_v34, 5  ;;  %v8705_v13 = vsel %vm8654_vm9, %v8702_v32, %v8704_v0  ;;  %v8707_v47 = vsel %vm8654_vm9, %v8704_v0, %v8706_v11 }
 0x7f7   : > { %v8709_v37 = vsel %vm8654_vm9, %v8706_v11, %v8708_v20  ;;  %v8718_v49 = vrot.slane %v15874_v31, 5  ;;  %v8711_v33 = vsel %vm8654_vm9, %v8708_v20, %v8710_v38  ;;  %v8713_v9 = vsel %vm8654_vm9, %v8710_v38, %v8712_v29 }
 0x7f8   : > { %v8715_v61 = vsel %vm8654_vm9, %v8712_v29, %v8714_v21  ;;  %v8717_v42 = vsel %vm8654_vm9, %v8714_v21, %v8716_v4  ;;  %v8720_v34 = vrot.slane %v15879_v2, 5  ;;  %v8722_v26 = vrot.slane %v15884_v18, 5 }
 0x7f9   : > { %v8719_v44 = vsel %vm8654_vm9, %v8716_v4, %v8718_v49  ;;  %v8724_v45 = vrot.slane %v15889_v58, 5  ;;  %v17621_v50 = vunpack.c.l.bf16 %v15630_v24  ;;  %v17622_v17 = vunpack.c.l.bf16 %v15636_v15 }
 0x7fa   : > { %v17623_v56 = vunpack.c.l.bf16 %v15633_v39  ;;  %v17624_v32 = vunpack.c.h.bf16 %v15633_v39  ;;  %v8721_v2 = vsel %vm8654_vm9, %v8718_v49, %v8720_v34  ;;  %v8723_v18 = vsel %vm8654_vm9, %v8720_v34, %v8722_v26 }
 0x7fb   : > { %v8763_v31 = vadd.f32 %v8655_v63, %v17621_v50  ;;  %v8764_v57 = vadd.f32 %v8657_v23, %v17622_v17  ;;  %v8725_v58 = vsel %vm8654_vm9, %v8722_v26, %v8724_v45  ;;  %v17625_v24 = vunpack.c.l.bf16 %v15639_v53 }
 0x7fc   : > { %v8765_v43 = vadd.f32 %v17623_v56, %v8659_v62  ;;  %v8766_v0 = vadd.f32 %v17624_v32, %v8661_v55  ;;  %v17626_v15 = vunpack.c.h.bf16 %v15639_v53  ;;  %v17627_v23 = vunpack.c.l.bf16 %v15642_v40 }
 0x7fd   : > { %v8767_v27 = vadd.f32 %v17625_v24, %v15898_v14  ;;  %v17628_v39 = vunpack.c.h.bf16 %v15642_v40  ;;  %v17629_v11 = vunpack.c.l.bf16 %v15676_v54  ;;  %v17630_v38 = vunpack.c.h.bf16 %v15676_v54  ;;  %v17637_v54 = vld [vmem:[#allocation41_spill] sm:$0xff] }
 0x7fe   : > { %v8768_v63 = vadd.f32 %v17626_v15, %v15901_v51  ;;  %v8769_v62 = vadd.f32 %v17627_v23, %v15904_v1  ;;  %v17631_v14 = vunpack.c.l.bf16 %v15679_v3  ;;  %v17632_v53 = vunpack.c.h.bf16 %v15679_v3  ;;  %v17640_v3 = vld [vmem:[#allocation74_spill] sm:$0xff] }
 0x7ff   : > { %v8770_v55 = vadd.f32 %v17628_v39, %v15907_v5  ;;  %v8771_v20 = vadd.f32 %v17629_v11, %v15910_v19  ;;  %v8772_v29 = vadd.f32 %v17630_v38, %v8673_v36  ;;  %v17633_v4 = vunpack.c.l.bf16 %v15690_v16  ;;  %v17649_v11 = vld [vmem:[#allocation76_spill] sm:$0xff] }
 0x800   : > { %v8773_v21 = vadd.f32 %v17631_v14, %v8675_v48  ;;  %v8774_v51 = vadd.f32 %v17632_v53, %v8677_v12  ;;  %v17634_v49 = vunpack.c.h.bf16 %v15690_v16  ;;  %v17635_v5 = vunpack.c.l.bf16 %v15699_v22  ;;  %v17643_v16 = vld [vmem:[#allocation75_spill] sm:$0xff]  ;;  %v17652_v53 = vld [vmem:[#allocation17_spill] sm:$0xff] }
 0x801   : > { %v8775_v1 = vadd.f32 %v17633_v4, %v8679_v25  ;;  %v17636_v19 = vunpack.c.h.bf16 %v15699_v22  ;;  %v17638_v36 = vunpack.c.l.bf16 %v17637_v54  ;;  %v17639_v48 = vunpack.c.h.bf16 %v17637_v54  ;;  %v17646_v22 = vld [vmem:[#allocation30_spill] sm:$0xff] }
 0x802   : > { %v8776_v40 = vadd.f32 %v17634_v49, %v8681_v6  ;;  %v8777_v34 = vadd.f32 %v17635_v5, %v8683_v41  ;;  %v17641_v12 = vunpack.c.l.bf16 %v17640_v3  ;;  %v17642_v25 = vunpack.c.h.bf16 %v17640_v3  ;;  %v17655_v5 = vld [vmem:[#allocation77_spill] sm:$0xff] }
 0x803   : > { %v8778_v26 = vadd.f32 %v17636_v19, %v8685_v28  ;;  %v8779_v50 = vadd.f32 %v17638_v36, %v8687_v46  ;;  %v8780_v17 = vadd.f32 %v17639_v48, %v8689_v30  ;;  %v17644_v6 = vunpack.c.l.bf16 %v17643_v16  ;;  %v17658_v36 = vld [vmem:[#allocation15_spill] sm:$0xff] }
 0x804   : > { %v8781_v56 = vadd.f32 %v17641_v12, %v8691_v8  ;;  %v8782_v32 = vadd.f32 %v17642_v25, %v8693_v10  ;;  %v17645_v41 = vunpack.c.h.bf16 %v17643_v16  ;;  %v17647_v28 = vunpack.c.l.bf16 %v17646_v22  ;;  %v17661_v12 = vld [vmem:[#allocation42_spill] sm:$0xff] }
 0x805   : > { %v8783_v24 = vadd.f32 %v17644_v6, %v8695_v7  ;;  %v17648_v46 = vunpack.c.h.bf16 %v17646_v22  ;;  %v17650_v30 = vunpack.c.l.bf16 %v17649_v11  ;;  %v17651_v8 = vunpack.c.h.bf16 %v17649_v11  ;;  %v17664_v6 = vld [vmem:[#allocation65_spill] sm:$0xff] }
 0x806   : > { %v8784_v15 = vadd.f32 %v17645_v41, %v8697_v35  ;;  %v8785_v23 = vadd.f32 %v17647_v28, %v8699_v60  ;;  %v17653_v10 = vunpack.c.l.bf16 %v17652_v53  ;;  %v17654_v7 = vunpack.c.h.bf16 %v17652_v53  ;;  %v17667_v28 = vld [vmem:[#allocation78_spill] sm:$0xff] }
 0x807   : > { %v8786_v39 = vadd.f32 %v17648_v46, %v8701_v59  ;;  %v8787_v38 = vadd.f32 %v17650_v30, %v8703_v52  ;;  %v8788_v14 = vadd.f32 %v17651_v8, %v8705_v13  ;;  %v17656_v35 = vunpack.c.l.bf16 %v17655_v5 }
 0x808   : > { %v8789_v4 = vadd.f32 %v17653_v10, %v8707_v47  ;;  %v8790_v49 = vadd.f32 %v17654_v7, %v8709_v37  ;;  %v17657_v60 = vunpack.c.h.bf16 %v17655_v5  ;;  %v17659_v59 = vunpack.c.l.bf16 %v17658_v36 }
 0x809   : > { %v8791_v19 = vadd.f32 %v17656_v35, %v8711_v33  ;;  %v17660_v52 = vunpack.c.h.bf16 %v17658_v36  ;;  %v17662_v13 = vunpack.c.l.bf16 %v17661_v12  ;;  %v17663_v47 = vunpack.c.h.bf16 %v17661_v12 }
 0x80a   : > { %v8792_v54 = vadd.f32 %v17657_v60, %v8713_v9  ;;  %v8793_v48 = vadd.f32 %v17659_v59, %v8715_v61  ;;  %v17665_v37 = vunpack.c.l.bf16 %v17664_v6  ;;  %v17666_v33 = vunpack.c.h.bf16 %v17664_v6 }
 0x80b   : > { %v8794_v3 = vadd.f32 %v17660_v52, %v8717_v42  ;;  %v8795_v25 = vadd.f32 %v17662_v13, %v8719_v44  ;;  %v8796_v16 = vadd.f32 %v17663_v47, %v8721_v2  ;;  %v17668_v9 = vunpack.c.l.bf16 %v17667_v28 }
 0x80c   : > { %v8797_v41 = vadd.f32 %v17665_v37, %v8723_v18  ;;  %v8798_v22 = vadd.f32 %v17666_v33, %v8725_v58  ;;  %v9861_v11 = vpack.c.bf16 %v8763_v31, %v8763_v31  ;;  %v9862_v61 = vpack.c.bf16 %v8764_v57, %v8764_v57 }
 0x80d   : > { %v8799_v46 = vadd.f32 %v8724_v45, %v17668_v9  ;;  %v9863_v30 = vpack.c.bf16 %v8765_v43, %v8765_v43  ;;  %v9864_v8 = vpack.c.bf16 %v8766_v0, %v8766_v0  ;;  %v16037_v42 = vpack.c.bf16 %v8767_v27, %v8767_v27 }
 0x80e   : > { %v16039_v53 = vpack.c.bf16 %v8768_v63, %v8768_v63  ;;  %v16041_v44 = vpack.c.bf16 %v8769_v62, %v8769_v62  ;;  %v16043_v2 = vpack.c.bf16 %v8770_v55, %v8770_v55  ;;  %v16045_v10 = vpack.c.bf16 %v8771_v20, %v8771_v20 }
 0x80f   : > { %v16047_v18 = vpack.c.bf16 %v8772_v29, %v8772_v29  ;;  %v16049_v58 = vpack.c.bf16 %v8773_v21, %v8773_v21  ;;  %v16051_v7 = vpack.c.bf16 %v8774_v51, %v8774_v51  ;;  %v16053_v45 = vpack.c.bf16 %v8775_v1, %v8775_v1 }
 0x810   : > { %v16055_v31 = vpack.c.bf16 %v8776_v40, %v8776_v40  ;;  %v16057_v57 = vpack.c.bf16 %v8777_v34, %v8777_v34  ;;  %v16059_v43 = vpack.c.bf16 %v8778_v26, %v8778_v26  ;;  %v16061_v0 = vpack.c.bf16 %v8779_v50, %v8779_v50 }
 0x811   : > { %v16063_v27 = vpack.c.bf16 %v8780_v17, %v8780_v17  ;;  %v16065_v63 = vpack.c.bf16 %v8781_v56, %v8781_v56  ;;  %v16067_v62 = vpack.c.bf16 %v8782_v32, %v8782_v32  ;;  %v16069_v55 = vpack.c.bf16 %v8783_v24, %v8783_v24 }
 0x812   : > { %v16071_v20 = vpack.c.bf16 %v8784_v15, %v8784_v15  ;;  %v16073_v29 = vpack.c.bf16 %v8785_v23, %v8785_v23  ;;  %v16075_v21 = vpack.c.bf16 %v8786_v39, %v8786_v39  ;;  %v16077_v51 = vpack.c.bf16 %v8787_v38, %v8787_v38 }
 0x813   : > { %v16079_v1 = vpack.c.bf16 %v8788_v14, %v8788_v14  ;;  %v16081_v40 = vpack.c.bf16 %v8789_v4, %v8789_v4  ;;  %v16083_v34 = vpack.c.bf16 %v8790_v49, %v8790_v49  ;;  %v16085_v26 = vpack.c.bf16 %v8791_v19, %v8791_v19 }
 0x814   : > { %v16087_v50 = vpack.c.bf16 %v8792_v54, %v8792_v54  ;;  %v16089_v17 = vpack.c.bf16 %v8793_v48, %v8793_v48  ;;  %v16091_v56 = vpack.c.bf16 %v8794_v3, %v8794_v3  ;;  %v16093_v32 = vpack.c.bf16 %v8795_v25, %v8795_v25 }
 0x815   : > { %v16095_v24 = vpack.c.bf16 %v8796_v16, %v8796_v16  ;;  %v16097_v15 = vpack.c.bf16 %v8797_v41, %v8797_v41  ;;  %v16099_v23 = vpack.c.bf16 %v8798_v22, %v8798_v22  ;;  %v16101_v39 = vpack.c.bf16 %v8799_v46, %v8799_v46 }
 0x816   : > { %v8916_v38 = vshrl.u32 %v9861_v11, 16  ;;  %v8919_v14 = vshll.u32 %v9861_v11, 16  ;;  %v8925_v4 = vshrl.u32 %v9862_v61, 16  ;;  %v8928_v49 = vshll.u32 %v9862_v61, 16 }
 0x817   : > { %v8935_v5 = vshrl.u32 %v9863_v30, 16  ;;  %v8938_v35 = vshll.u32 %v9863_v30, 16  ;;  %v8945_v19 = vshrl.u32 %v9864_v8, 16  ;;  %v8948_v59 = vshll.u32 %v9864_v8, 16 }
 0x818   : > { %v8918_v60 = vrot.slane %v8916_v38, 5  ;;  %v8921_v54 = vrot.slane %v8919_v14, 6  ;;  %v8927_v36 = vrot.slane %v8925_v4, 5  ;;  %v8930_v48 = vrot.slane %v8928_v49, 6 }
 0x819   : > { %v8937_v52 = vrot.slane %v8935_v5, 5  ;;  %v8940_v3 = vrot.slane %v8938_v35, 6  ;;  %v8947_v12 = vrot.slane %v8945_v19, 5  ;;  %v8950_v25 = vrot.slane %v8948_v59, 6 }
 0x81a   : > { %v8922_v13 = vor.u32 %v8921_v54, %v8918_v60  ;;  %v8955_v47 = vshrl.u32 %v16037_v42, 16  ;;  %v8958_v16 = vshll.u32 %v16037_v42, 16  ;;  %v8931_v37 = vor.u32 %v8930_v48, %v8927_v36 }
 0x81b   : > { %v8941_v41 = vor.u32 %v8940_v3, %v8937_v52  ;;  %v8965_v33 = vshrl.u32 %v16039_v53, 16  ;;  %v8968_v22 = vshll.u32 %v16039_v53, 16  ;;  %v8951_v9 = vor.u32 %v8950_v25, %v8947_v12 }
 0x81c   : > { %v8923_v28 = vrot.slane %v8922_v13, 4  ;;  %v8957_v46 = vrot.slane %v8955_v47, 5  ;;  %v8960_v11 = vrot.slane %v8958_v16, 6  ;;  %v8933_v61 = vrot.slane %v8931_v37, 4 }
 0x81d   : > { %v8943_v30 = vrot.slane %v8941_v41, 4  ;;  %v8967_v8 = vrot.slane %v8965_v33, 5  ;;  %v8970_v42 = vrot.slane %v8968_v22, 6  ;;  %v8953_v53 = vrot.slane %v8951_v9, 4 }
 0x81e   : > { %v8932_v38 = vsel %vm16108_vm1, %v8923_v28, %v8931_v37  ;;  %v8961_v14 = vor.u32 %v8960_v11, %v8957_v46  ;;  %v8975_v4 = vshrl.u32 %v16041_v44, 16  ;;  %v8942_v49 = vsel %vm16108_vm1, %v8933_v61, %v8941_v41 }
 0x81f   : > { %v8952_v5 = vsel %vm16108_vm1, %v8943_v30, %v8951_v9  ;;  %v8971_v35 = vor.u32 %v8970_v42, %v8967_v8  ;;  %v8978_v19 = vshll.u32 %v16041_v44, 16  ;;  %9320 = vst.msk [vmem:[%s16117_s22] sm:$0xf] %vm9319_vm11, %v8932_v38  ;;  %v8985_v59 = vshrl.u32 %v16043_v2, 16  ;;  %9321 = vst.msk [vmem:[%s16117_s22 + $0x4] sm:$0xf] %vm9319_vm11, %v8942_v49 }
 0x820   : > { %v8962_v60 = vsel %vm16108_vm1, %v8953_v53, %v8961_v14  ;;  %v8963_v54 = vrot.slane %v8961_v14, 4  ;;  %v8977_v36 = vrot.slane %v8975_v4, 5  ;;  %9322 = vst.msk [vmem:[%s16117_s22 + $0x8] sm:$0xf] %vm9319_vm11, %v8952_v5  ;;  %v8988_v3 = vshll.u32 %v16043_v2, 16 }
 0x821   : > { %v8973_v48 = vrot.slane %v8971_v35, 4  ;;  %v8980_v52 = vrot.slane %v8978_v19, 6  ;;  %v8995_v44 = vshrl.u32 %v16045_v10, 16  ;;  %9323 = vst.msk [vmem:[%s16117_s22 + $0xc] sm:$0xf] %vm9319_vm11, %v8962_v60  ;;  %v8987_v13 = vrot.slane %v8985_v59, 5 }
 0x822   : > { %v8972_v12 = vsel %vm16108_vm1, %v8963_v54, %v8971_v35  ;;  %v8998_v25 = vshll.u32 %v16045_v10, 16  ;;  %v9005_v47 = vshrl.u32 %v16047_v18, 16  ;;  %v8990_v37 = vrot.slane %v8988_v3, 6 }
 0x823   : > { %v8981_v16 = vor.u32 %v8980_v52, %v8977_v36  ;;  %v8997_v41 = vrot.slane %v8995_v44, 5  ;;  %v9008_v33 = vshll.u32 %v16047_v18, 16  ;;  %9324 = vst.msk [vmem:[%s16117_s22 + $0x10] sm:$0xf] %vm9319_vm11, %v8972_v12  ;;  %v9015_v28 = vshrl.u32 %v16049_v58, 16 }
 0x824   : > { %v9000_v2 = vrot.slane %v8998_v25, 6  ;;  %v9007_v22 = vrot.slane %v9005_v47, 5  ;;  %v9018_v9 = vshll.u32 %v16049_v58, 16  ;;  %v8991_v11 = vor.u32 %v8990_v37, %v8987_v13 }
 0x825   : > { %v8982_v46 = vsel %vm16108_vm1, %v8973_v48, %v8981_v16  ;;  %v8983_v10 = vrot.slane %v8981_v16, 4  ;;  %v9010_v61 = vrot.slane %v9008_v33, 6  ;;  %v9017_v8 = vrot.slane %v9015_v28, 5 }
 0x826   : > { %v9001_v30 = vor.u32 %v9000_v2, %v8997_v41  ;;  %v9020_v42 = vrot.slane %v9018_v9, 6  ;;  %v9025_v18 = vshrl.u32 %v16051_v7, 16  ;;  %9325 = vst.msk [vmem:[%s16117_s22 + $0x14] sm:$0xf] %vm9319_vm11, %v8982_v46  ;;  %v8993_v53 = vrot.slane %v8991_v11, 4 }
 0x827   : > { %v8992_v38 = vsel %vm16108_vm1, %v8983_v10, %v8991_v11  ;;  %v9011_v58 = vor.u32 %v9010_v61, %v9007_v22  ;;  %v9028_v14 = vshll.u32 %v16051_v7, 16  ;;  %v9035_v35 = vshrl.u32 %v16053_v45, 16 }
 0x828   : > { %v9003_v4 = vrot.slane %v9001_v30, 4  ;;  %v9021_v49 = vor.u32 %v9020_v42, %v9017_v8  ;;  %v9027_v5 = vrot.slane %v9025_v18, 5  ;;  %9326 = vst.msk [vmem:[%s16117_s22 + $0x18] sm:$0xf] %vm9319_vm11, %v8992_v38  ;;  %v9002_v19 = vsel %vm16108_vm1, %v8993_v53, %v9001_v30 }
 0x829   : > { %v9013_v60 = vrot.slane %v9011_v58, 4  ;;  %v9030_v54 = vrot.slane %v9028_v14, 6  ;;  %v9038_v36 = vshll.u32 %v16053_v45, 16  ;;  %v9037_v48 = vrot.slane %v9035_v35, 5  ;;  %9327 = vst.msk [vmem:[%s16117_s22 + $0x1c] sm:$0xf] %vm9319_vm11, %v9002_v19 }
 0x82a   : > { %v9012_v59 = vsel %vm16108_vm1, %v9003_v4, %v9011_v58  ;;  %v9023_v7 = vrot.slane %v9021_v49, 4  ;;  %v9045_v52 = vshrl.u32 %v16055_v31, 16  ;;  %v9048_v13 = vshll.u32 %v16055_v31, 16 }
 0x82b   : > { %v9022_v3 = vsel %vm16108_vm1, %v9013_v60, %v9021_v49  ;;  %v9031_v44 = vor.u32 %v9030_v54, %v9027_v5  ;;  %v9040_v12 = vrot.slane %v9038_v36, 6  ;;  %9328 = vst.msk [vmem:[%s16117_s22 + $0x20] sm:$0xf] %vm9319_vm11, %v9012_v59  ;;  %v9055_v25 = vshrl.u32 %v16057_v57, 16 }
 0x82c   : > { %v9047_v45 = vrot.slane %v9045_v52, 5  ;;  %v9058_v47 = vshll.u32 %v16057_v57, 16  ;;  %v9065_v16 = vshrl.u32 %v16059_v43, 16  ;;  %9329 = vst.msk [vmem:[%s16117_s22 + $0x24] sm:$0xf] %vm9319_vm11, %v9022_v3  ;;  %v9050_v2 = vrot.slane %v9048_v13, 6 }
 0x82d   : > { %v9032_v37 = vsel %vm16108_vm1, %v9023_v7, %v9031_v44  ;;  %v9033_v41 = vrot.slane %v9031_v44, 4  ;;  %v9041_v33 = vor.u32 %v9040_v12, %v9037_v48  ;;  %v9057_v22 = vrot.slane %v9055_v25, 5 }
 0x82e   : > { %v9060_v31 = vrot.slane %v9058_v47, 6  ;;  %v9067_v28 = vrot.slane %v9065_v16, 5  ;;  %v9068_v9 = vshll.u32 %v16059_v43, 16  ;;  %9330 = vst.msk [vmem:[%s16117_s22 + $0x28] sm:$0xf] %vm9319_vm11, %v9032_v37  ;;  %v9051_v10 = vor.u32 %v9050_v2, %v9047_v45 }
 0x82f   : > { %v9042_v57 = vsel %vm16108_vm1, %v9033_v41, %v9041_v33  ;;  %v9043_v46 = vrot.slane %v9041_v33, 4  ;;  %v9075_v11 = vshrl.u32 %v16061_v0, 16  ;;  %v9078_v8 = vshll.u32 %v16061_v0, 16 }
 0x830   : > { %v9061_v61 = vor.u32 %v9060_v31, %v9057_v22  ;;  %v9070_v30 = vrot.slane %v9068_v9, 6  ;;  %v9085_v42 = vshrl.u32 %v16063_v27, 16  ;;  %9331 = vst.msk [vmem:[%s16117_s22 + $0x2c] sm:$0xf] %vm9319_vm11, %v9042_v57  ;;  %v9053_v18 = vrot.slane %v9051_v10, 4 }
 0x831   : > { %v9052_v43 = vsel %vm16108_vm1, %v9043_v46, %v9051_v10  ;;  %v9077_v38 = vrot.slane %v9075_v11, 5  ;;  %v9088_v53 = vshll.u32 %v16063_v27, 16  ;;  %v9080_v4 = vrot.slane %v9078_v8, 6 }
 0x832   : > { %v9063_v58 = vrot.slane %v9061_v61, 4  ;;  %v9071_v14 = vor.u32 %v9070_v30, %v9067_v28  ;;  %v9087_v49 = vrot.slane %v9085_v42, 5  ;;  %9332 = vst.msk [vmem:[%s16117_s22 + $0x30] sm:$0xf] %vm9319_vm11, %v9052_v43  ;;  %v9062_v0 = vsel %vm16108_vm1, %v9053_v18, %v9061_v61 }
 0x833   : > { %v9090_v5 = vrot.slane %v9088_v53, 6  ;;  %v9095_v35 = vshrl.u32 %v16065_v63, 16  ;;  %v9098_v19 = vshll.u32 %v16065_v63, 16  ;;  %v9081_v27 = vor.u32 %v9080_v4, %v9077_v38  ;;  %9333 = vst.msk [vmem:[%s16117_s22 + $0x34] sm:$0xf] %vm9319_vm11, %v9062_v0 }
 0x834   : > { %v9072_v60 = vsel %vm16108_vm1, %v9063_v58, %v9071_v14  ;;  %v9073_v54 = vrot.slane %v9071_v14, 4  ;;  %v9105_v36 = vshrl.u32 %v16067_v62, 16  ;;  %v9108_v52 = vshll.u32 %v16067_v62, 16 }
 0x835   : > { %v9091_v59 = vor.u32 %v9090_v5, %v9087_v49  ;;  %v9097_v7 = vrot.slane %v9095_v35, 5  ;;  %v9100_v48 = vrot.slane %v9098_v19, 6  ;;  %9334 = vst.msk [vmem:[%s16117_s22 + $0x38] sm:$0xf] %vm9319_vm11, %v9072_v60  ;;  %v9083_v3 = vrot.slane %v9081_v27, 4 }
 0x836   : > { %v9082_v63 = vsel %vm16108_vm1, %v9073_v54, %v9081_v27  ;;  %v9107_v44 = vrot.slane %v9105_v36, 5  ;;  %v9115_v12 = vshrl.u32 %v16069_v55, 16  ;;  %v9110_v25 = vrot.slane %v9108_v52, 6 }
 0x837   : > { %v9093_v13 = vrot.slane %v9091_v59, 4  ;;  %v9101_v45 = vor.u32 %v9100_v48, %v9097_v7  ;;  %v9118_v47 = vshll.u32 %v16069_v55, 16  ;;  %9335 = vst.msk [vmem:[%s16117_s22 + $0x3c] sm:$0xf] %vm9319_vm11, %v9082_v63  ;;  %v9092_v62 = vsel %vm16108_vm1, %v9083_v3, %v9091_v59 }
 0x838   : > { %v9117_v16 = vrot.slane %v9115_v12, 5  ;;  %v9125_v37 = vshrl.u32 %v16071_v20, 16  ;;  %v9128_v41 = vshll.u32 %v16071_v20, 16  ;;  %v9111_v22 = vor.u32 %v9110_v25, %v9107_v44  ;;  %9336 = vst.msk [vmem:[%s16117_s22 + $0x40] sm:$0xf] %vm9319_vm11, %v9092_v62 }
 0x839   : > { %v9102_v33 = vsel %vm16108_vm1, %v9093_v13, %v9101_v45  ;;  %v9103_v2 = vrot.slane %v9101_v45, 4  ;;  %v9120_v31 = vrot.slane %v9118_v47, 6  ;;  %v9135_v9 = vshrl.u32 %v16073_v29, 16 }
 0x83a   : > { %v9127_v55 = vrot.slane %v9125_v37, 5  ;;  %v9130_v28 = vrot.slane %v9128_v41, 6  ;;  %v9138_v57 = vshll.u32 %v16073_v29, 16  ;;  %9337 = vst.msk [vmem:[%s16117_s22 + $0x44] sm:$0xf] %vm9319_vm11, %v9102_v33  ;;  %v9113_v46 = vrot.slane %v9111_v22, 4 }
 0x83b   : > { %v9112_v20 = vsel %vm16108_vm1, %v9103_v2, %v9111_v22  ;;  %v9121_v10 = vor.u32 %v9120_v31, %v9117_v16  ;;  %v9145_v11 = vshrl.u32 %v16075_v21, 16  ;;  %v9137_v30 = vrot.slane %v9135_v9, 5 }
 0x83c   : > { %v9131_v61 = vor.u32 %v9130_v28, %v9127_v55  ;;  %v9140_v8 = vrot.slane %v9138_v57, 6  ;;  %v9148_v42 = vshll.u32 %v16075_v21, 16  ;;  %9338 = vst.msk [vmem:[%s16117_s22 + $0x48] sm:$0xf] %vm9319_vm11, %v9112_v20  ;;  %v9155_v38 = vshrl.u32 %v16077_v51, 16 }
 0x83d   : > { %v9122_v29 = vsel %vm16108_vm1, %v9113_v46, %v9121_v10  ;;  %v9123_v43 = vrot.slane %v9121_v10, 4  ;;  %v9147_v18 = vrot.slane %v9145_v11, 5  ;;  %v9158_v4 = vshll.u32 %v16077_v51, 16 }
 0x83e   : > { %v9133_v53 = vrot.slane %v9131_v61, 4  ;;  %v9141_v58 = vor.u32 %v9140_v8, %v9137_v30  ;;  %v9150_v14 = vrot.slane %v9148_v42, 6  ;;  %9339 = vst.msk [vmem:[%s16117_s22 + $0x4c] sm:$0xf] %vm9319_vm11, %v9122_v29  ;;  %v9157_v49 = vrot.slane %v9155_v38, 5 }
 0x83f   : > { %v9132_v21 = vsel %vm16108_vm1, %v9123_v43, %v9131_v61  ;;  %v9165_v0 = vshrl.u32 %v16079_v1, 16  ;;  %v9168_v5 = vshll.u32 %v16079_v1, 16  ;;  %v9160_v54 = vrot.slane %v9158_v4, 6 }
 0x840   : > { %v9142_v35 = vsel %vm16108_vm1, %v9133_v53, %v9141_v58  ;;  %v9143_v19 = vrot.slane %v9141_v58, 4  ;;  %v9151_v60 = vor.u32 %v9150_v14, %v9147_v18  ;;  %9340 = vst.msk [vmem:[%s16117_s22 + $0x50] sm:$0xf] %vm9319_vm11, %v9132_v21  ;;  %v9175_v36 = vshrl.u32 %v16081_v40, 16 }
 0x841   : > { %v9167_v51 = vrot.slane %v9165_v0, 5  ;;  %v9170_v27 = vrot.slane %v9168_v5, 6  ;;  %v9178_v59 = vshll.u32 %v16081_v40, 16  ;;  %9341 = vst.msk [vmem:[%s16117_s22 + $0x54] sm:$0xf] %vm9319_vm11, %v9142_v35  ;;  %v9161_v48 = vor.u32 %v9160_v54, %v9157_v49 }
 0x842   : > { %v9152_v1 = vsel %vm16108_vm1, %v9143_v19, %v9151_v60  ;;  %v9153_v7 = vrot.slane %v9151_v60, 4  ;;  %v9185_v52 = vshrl.u32 %v16083_v34, 16  ;;  %v9177_v3 = vrot.slane %v9175_v36, 5 }
 0x843   : > { %v9171_v63 = vor.u32 %v9170_v27, %v9167_v51  ;;  %v9180_v44 = vrot.slane %v9178_v59, 6  ;;  %v9188_v12 = vshll.u32 %v16083_v34, 16  ;;  %9342 = vst.msk [vmem:[%s16117_s22 + $0x58] sm:$0xf] %vm9319_vm11, %v9152_v1  ;;  %v9163_v13 = vrot.slane %v9161_v48, 4 }
 0x844   : > { %v9162_v40 = vsel %vm16108_vm1, %v9153_v7, %v9161_v48  ;;  %v9187_v45 = vrot.slane %v9185_v52, 5  ;;  %v9195_v25 = vshrl.u32 %v16085_v26, 16  ;;  %v9198_v37 = vshll.u32 %v16085_v26, 16 }
 0x845   : > { %v9173_v47 = vrot.slane %v9171_v63, 4  ;;  %v9181_v62 = vor.u32 %v9180_v44, %v9177_v3  ;;  %v9190_v16 = vrot.slane %v9188_v12, 6  ;;  %9343 = vst.msk [vmem:[%s16117_s22 + $0x5c] sm:$0xf] %vm9319_vm11, %v9162_v40  ;;  %v9172_v34 = vsel %vm16108_vm1, %v9163_v13, %v9171_v63 }
 0x846   : > { %v9197_v41 = vrot.slane %v9195_v25, 5  ;;  %v9205_v33 = vshrl.u32 %v16087_v50, 16  ;;  %v9208_v2 = vshll.u32 %v16087_v50, 16  ;;  %v9200_v28 = vrot.slane %v9198_v37, 6  ;;  %9344 = vst.msk [vmem:[%s16117_s22 + $0x60] sm:$0xf] %vm9319_vm11, %v9172_v34 }
 0x847   : > { %v9182_v22 = vsel %vm16108_vm1, %v9173_v47, %v9181_v62  ;;  %v9183_v31 = vrot.slane %v9181_v62, 4  ;;  %v9191_v55 = vor.u32 %v9190_v16, %v9187_v45  ;;  %v9215_v57 = vshrl.u32 %v16089_v17, 16 }
 0x848   : > { %v9207_v26 = vrot.slane %v9205_v33, 5  ;;  %v9210_v9 = vrot.slane %v9208_v2, 6  ;;  %v9218_v20 = vshll.u32 %v16089_v17, 16  ;;  %9345 = vst.msk [vmem:[%s16117_s22 + $0x64] sm:$0xf] %vm9319_vm11, %v9182_v22  ;;  %v9201_v10 = vor.u32 %v9200_v28, %v9197_v41 }
 0x849   : > { %v9192_v50 = vsel %vm16108_vm1, %v9183_v31, %v9191_v55  ;;  %v9193_v46 = vrot.slane %v9191_v55, 4  ;;  %v9225_v11 = vshrl.u32 %v16091_v56, 16  ;;  %v9217_v30 = vrot.slane %v9215_v57, 5 }
 0x84a   : > { %v9211_v61 = vor.u32 %v9210_v9, %v9207_v26  ;;  %v9220_v8 = vrot.slane %v9218_v20, 6  ;;  %v9228_v42 = vshll.u32 %v16091_v56, 16  ;;  %9346 = vst.msk [vmem:[%s16117_s22 + $0x68] sm:$0xf] %vm9319_vm11, %v9192_v50  ;;  %v9203_v29 = vrot.slane %v9201_v10, 4 }
 0x84b   : > { %v9202_v17 = vsel %vm16108_vm1, %v9193_v46, %v9201_v10  ;;  %v9227_v43 = vrot.slane %v9225_v11, 5  ;;  %v9235_v18 = vshrl.u32 %v16093_v32, 16  ;;  %v9238_v14 = vshll.u32 %v16093_v32, 16 }
 0x84c   : > { %v9213_v38 = vrot.slane %v9211_v61, 4  ;;  %v9221_v53 = vor.u32 %v9220_v8, %v9217_v30  ;;  %v9230_v58 = vrot.slane %v9228_v42, 6  ;;  %9347 = vst.msk [vmem:[%s16117_s22 + $0x6c] sm:$0xf] %vm9319_vm11, %v9202_v17  ;;  %v9212_v56 = vsel %vm16108_vm1, %v9203_v29, %v9211_v61 }
 0x84d   : > { %v9237_v4 = vrot.slane %v9235_v18, 5  ;;  %v9245_v21 = vshrl.u32 %v16095_v24, 16  ;;  %v9248_v49 = vshll.u32 %v16095_v24, 16  ;;  %v9240_v19 = vrot.slane %v9238_v14, 6  ;;  %9348 = vst.msk [vmem:[%s16117_s22 + $0x70] sm:$0xf] %vm9319_vm11, %v9212_v56 }
 0x84e   : > { %v9222_v0 = vsel %vm16108_vm1, %v9213_v38, %v9221_v53  ;;  %v9223_v5 = vrot.slane %v9221_v53, 4  ;;  %v9231_v35 = vor.u32 %v9230_v58, %v9227_v43  ;;  %v9255_v54 = vshrl.u32 %v16097_v15, 16 }
 0x84f   : > { %v9247_v32 = vrot.slane %v9245_v21, 5  ;;  %v9250_v60 = vrot.slane %v9248_v49, 6  ;;  %v9258_v51 = vshll.u32 %v16097_v15, 16  ;;  %9349 = vst.msk [vmem:[%s16117_s22 + $0x74] sm:$0xf] %vm9319_vm11, %v9222_v0  ;;  %v9241_v36 = vor.u32 %v9240_v19, %v9237_v4 }
 0x850   : > { %v9232_v24 = vsel %vm16108_vm1, %v9223_v5, %v9231_v35  ;;  %v9233_v27 = vrot.slane %v9231_v35, 4  ;;  %v9265_v59 = vshrl.u32 %v16099_v23, 16  ;;  %v9257_v7 = vrot.slane %v9255_v54, 5 }
 0x851   : > { %v9251_v1 = vor.u32 %v9250_v60, %v9247_v32  ;;  %v9260_v48 = vrot.slane %v9258_v51, 6  ;;  %v9268_v52 = vshll.u32 %v16099_v23, 16  ;;  %9350 = vst.msk [vmem:[%s16117_s22 + $0x78] sm:$0xf] %vm9319_vm11, %v9232_v24  ;;  %v9243_v63 = vrot.slane %v9241_v36, 4 }
 0x852   : > { %v9242_v15 = vsel %vm16108_vm1, %v9233_v27, %v9241_v36  ;;  %v9267_v3 = vrot.slane %v9265_v59, 5  ;;  %v9275_v44 = vshrl.u32 %v16101_v39, 16  ;;  %v9278_v45 = vshll.u32 %v16101_v39, 16 }
 0x853   : > { %v9253_v12 = vrot.slane %v9251_v1, 4  ;;  %v9261_v40 = vor.u32 %v9260_v48, %v9257_v7  ;;  %v9270_v13 = vrot.slane %v9268_v52, 6  ;;  %9351 = vst.msk [vmem:[%s16117_s22 + $0x7c] sm:$0xf] %vm9319_vm11, %v9242_v15  ;;  %v9252_v23 = vsel %vm16108_vm1, %v9243_v63, %v9251_v1 }
 0x854   : > { %v9277_v25 = vrot.slane %v9275_v44, 5  ;;  %v9280_v37 = vrot.slane %v9278_v45, 6  ;;  %9352 = vst.msk [vmem:[%s16117_s22 + $0x80] sm:$0xf] %vm9319_vm11, %v9252_v23 }
 0x855   : > { %v9262_v47 = vsel %vm16108_vm1, %v9253_v12, %v9261_v40  ;;  %v9263_v62 = vrot.slane %v9261_v40, 4  ;;  %v9271_v16 = vor.u32 %v9270_v13, %v9267_v3 }
 0x856   : > { %9353 = vst.msk [vmem:[%s16117_s22 + $0x84] sm:$0xf] %vm9319_vm11, %v9262_v47  ;;  %v9281_v41 = vor.u32 %v9280_v37, %v9277_v25 }
 0x857   : > { %v9272_v34 = vsel %vm16108_vm1, %v9263_v62, %v9271_v16  ;;  %v9273_v39 = vrot.slane %v9271_v16, 4 }
 0x858   : > { %9354 = vst.msk [vmem:[%s16117_s22 + $0x88] sm:$0xf] %vm9319_vm11, %v9272_v34 }
 0x859   : > { %v9282_v33 = vsel %vm16108_vm1, %v9273_v39, %v9281_v41 }
 0x85a   : > { %9355 = vst.msk [vmem:[%s16117_s22 + $0x8c] sm:$0xf] %vm9319_vm11, %v9282_v33 }
 0x85b PF: > { %s15_s18 = sadd.s32 1, %s11759_s18  }
 0x85c   : > { %p12_p4 = scmp.ge.s32.totalorder %s15_s18, 4  }
 0x85e   :  { %14 = sbr.rel (!%p12_p4) target bundleno = 1 (0x1), region = 86 }

</bundles_post_ra>
